<compile_context>
chip_gen: v7x
topology: tpu7x:2x2x1
jax: 0.10.0
libtpu: 0.0.40
codegen_flags: <defaults>
</compile_context>

<pallas_src>
import numpy as np
import jax
import jax.numpy as jnp
from jax import lax
from jax.experimental import pallas as pl

# ---------------- configuration (small shapes) ----------------
NUM_FEATURES = 32          # num_features / feat_size
HIDDEN_DIM   = 64          # transformer_hidden_dim
NUM_HEADS    = 4
HEAD_DIM     = NUM_FEATURES // NUM_HEADS
NUM_LAYERS   = 6
MAX_DEGREE   = 100
MAX_DIST     = 10
BATCH        = 2           # number of graphs in the batch
MAX_NODES    = 8           # padded node count (max over graphs)
LN_EPS       = 1e-5        # PyTorch nn.LayerNorm default
NEG_BIG      = -1e9        # finite "masked" value folded into the attention bias


def _layernorm(x, g, b):
    mu = jnp.mean(x, axis=-1, keepdims=True)
    var = jnp.mean((x - mu) ** 2, axis=-1, keepdims=True)
    return (x - mu) * lax.rsqrt(var + LN_EPS) * g + b


# ------------------------- Pallas kernel -------------------------
def _graphormer_kernel(feat_ref, bias_ref, nmask_ref,
                       wqkv_ref, bqkv_ref, wo_ref, bo_ref,
                       w1_ref, b1_ref, w2_ref, b2_ref,
                       g1_ref, be1_ref, g2_ref, be2_ref,
                       wc_ref, bc_ref, out_ref):
    B, N, F, H, Hd = BATCH, MAX_NODES, NUM_FEATURES, NUM_HEADS, HEAD_DIM
    scale = jnp.float32(Hd ** -0.5)

    h = feat_ref[...]                                   # (B*N, F) hidden state

    for l in range(NUM_LAYERS):                         # weights resident in VMEM
        wqkv = wqkv_ref[l]; bqkv = bqkv_ref[l]          # (H, F, 3*Hd), (H, 1, 3*Hd)
        wo = wo_ref[l]; bo = bo_ref[l]                  # (H, Hd, F),   (1, F)
        w1 = w1_ref[l]; b1 = b1_ref[l]                  # (F, HID),     (1, HID)
        w2 = w2_ref[l]; b2 = b2_ref[l]                  # (HID, F),     (1, F)
        g1 = g1_ref[l]; be1 = be1_ref[l]
        g2 = g2_ref[l]; be2 = be2_ref[l]

        attn_rows = []
        for b in range(B):                              # tiny static batch loop
            xb = h[b * N:(b + 1) * N, :]                # (N, F) sublane-aligned slice
            xh = jnp.broadcast_to(xb, (H, N, F))        # head-batched view of x
            # fused per-head QKV projection: (H, N, F) @ (H, F, 3*Hd) -> (H, N, 3*Hd)
            qkv = jnp.einsum('hnf,hfe->hne', xh, wqkv,
                             preferred_element_type=jnp.float32) + bqkv
            q = qkv[:, :, :Hd] * scale
            k = qkv[:, :, Hd:2 * Hd]
            v = qkv[:, :, 2 * Hd:]
            # head-batched attention scores; mask already folded into bias (-1e9)
            s = jnp.einsum('hqd,hkd->hqk', q, k,
                           preferred_element_type=jnp.float32) + bias_ref[b]
            smax = jnp.max(s, axis=-1, keepdims=True)
            e = jnp.exp(s - smax)
            p = e * pl.reciprocal(jnp.sum(e, axis=-1, keepdims=True), approx=True)
            o = jnp.einsum('hqk,hkd->hqd', p, v,
                           preferred_element_type=jnp.float32)      # (H, N, Hd)
            # output projection: accumulate per-head o_h @ Wo_h directly into (N, F)
            ab = bo
            for hh in range(H):
                ab = ab + jnp.dot(o[hh], wo[hh], preferred_element_type=jnp.float32)
            attn_rows.append(ab)                                    # (N, F)
        attn = jnp.concatenate(attn_rows, axis=0)                   # (B*N, F)

        # residual + LN, FFN (relu), residual + LN — on the full (B*N, F) slab
        y = _layernorm(h + attn, g1, be1)
        ff = jnp.maximum(jnp.dot(y, w1, preferred_element_type=jnp.float32) + b1, 0.0)
        ff = jnp.dot(ff, w2, preferred_element_type=jnp.float32) + b2
        h = _layernorm(y + ff, g2, be2)

    # epilogue (runs once): masked mean pool (1/n pre-folded into nmask),
    # classifier, sigmoid.
    hw = h * nmask_ref[...]                                         # (B*N, F)
    pooled_rows = [jnp.sum(hw[b * N:(b + 1) * N, :], axis=0, keepdims=True)
                   for b in range(B)]
    pooled = jnp.concatenate(pooled_rows, axis=0)                   # (B, F)
    logits = jnp.dot(pooled, wc_ref[...],
                     preferred_element_type=jnp.float32) + bc_ref[...]
    out_ref[...] = pl.reciprocal(1.0 + jnp.exp(-logits), approx=True)


# ------------------------- wrapper -------------------------
def graphormer_pallas(feat, bias_bhnn, mask, nmask, p):
    """feat: (B,N,F); bias_bhnn: (B,H,N,N); mask: (B,N,N) 1==masked; nmask: (B,N,1)."""
    B, N, F, H, Hd, L = BATCH, MAX_NODES, NUM_FEATURES, NUM_HEADS, HEAD_DIM, NUM_LAYERS

    # ---- host-side layout plumbing (pure repacks / folds, no per-call compute) ----
    feat_flat = feat.reshape(B * N, F)
    bias_masked = jnp.where(mask[:, None, :, :] != 0.0,
                            jnp.float32(NEG_BIG), bias_bhnn)         # (B, H, N, N)
    nmask_scaled = (nmask / jnp.sum(nmask, axis=1, keepdims=True)).reshape(B * N, 1)

    def split_out(w):   # (L, F, F) -> (L, H, F, Hd)  (per-head output columns)
        return w.reshape(L, F, H, Hd).transpose(0, 2, 1, 3)

    def split_bias(b):  # (L, 1, F) -> (L, H, 1, Hd)
        return b.reshape(L, 1, H, Hd).transpose(0, 2, 1, 3)

    wqkv = jnp.concatenate([split_out(p['wq']), split_out(p['wk']),
                            split_out(p['wv'])], axis=-1)            # (L, H, F, 3*Hd)
    bqkv = jnp.concatenate([split_bias(p['bq']), split_bias(p['bk']),
                            split_bias(p['bv'])], axis=-1)           # (L, H, 1, 3*Hd)
    wo_h = p['wo'].reshape(L, H, Hd, F)                              # per-head rows of Wo

    return pl.pallas_call(
        _graphormer_kernel,
        out_shape=jax.ShapeDtypeStruct((B, 1), jnp.float32),
    )(feat_flat, bias_masked, nmask_scaled,
      wqkv, bqkv, wo_h, p['bo'],
      p['w1'], p['b1'], p['w2'], p['b2'],
      p['g1'], p['be1'], p['g2'], p['be2'],
      p['wc'], p['bc'])


# ------------------------- parameters -------------------------
def init_params(key):
    ks = jax.random.split(key, 17)
    rnd = lambda k, s, sc=0.1: sc * jax.random.normal(k, s, jnp.float32)
    L, F, Hd = NUM_LAYERS, NUM_FEATURES, HIDDEN_DIM
    return {
        # per-layer BiasedMHA projections (stored (in, out) so x @ W + b)
        'wq': rnd(ks[0], (L, F, F)), 'bq': rnd(ks[1], (L, 1, F), 0.02),
        'wk': rnd(ks[2], (L, F, F)), 'bk': rnd(ks[3], (L, 1, F), 0.02),
        'wv': rnd(ks[4], (L, F, F)), 'bv': rnd(ks[5], (L, 1, F), 0.02),
        'wo': rnd(ks[6], (L, F, F)), 'bo': rnd(ks[7], (L, 1, F), 0.02),
        # per-layer FFN
        'w1': rnd(ks[8], (L, F, Hd)), 'b1': rnd(ks[9], (L, 1, Hd), 0.02),
        'w2': rnd(ks[10], (L, Hd, F)), 'b2': rnd(ks[11], (L, 1, F), 0.02),
        # per-layer LayerNorms (PyTorch defaults)
        'g1': jnp.ones((L, 1, F), jnp.float32), 'be1': jnp.zeros((L, 1, F), jnp.float32),
        'g2': jnp.ones((L, 1, F), jnp.float32), 'be2': jnp.zeros((L, 1, F), jnp.float32),
        # classifier nn.Linear(F, 1)
        'wc': rnd(ks[12], (F, 1)), 'bc': rnd(ks[13], (1, 1), 0.02),
        # DegreeEncoder(max_degree=100, dim=F), direction="both" -> two tables, padding_idx=0
        'deg_in':  rnd(ks[14], (MAX_DEGREE + 1, F)).at[0].set(0.0),
        'deg_out': rnd(ks[15], (MAX_DEGREE + 1, F)).at[0].set(0.0),
        # SpatialEncoder(max_dist=10, num_heads=H): Embedding(max_dist+2, H, padding_idx=0)
        'spatial': rnd(ks[16], (MAX_DIST + 2, NUM_HEADS)).at[0].set(0.0),
    }


# ------------------- graph preprocessing (host-side glue) -------------------
# TODO(synk): DGL graph ops (unbatch, DegreeEncoder lookup, shortest-path SpatialEncoder,
#             mask construction) have no Pallas equivalent; done host-side here.
def _floyd_warshall(adj):
    n = adj.shape[0]
    INF = 1e9
    d = np.full((n, n), INF, np.float64)
    np.fill_diagonal(d, 0.0)
    d[adj > 0] = 1.0
    for k in range(n):
        d = np.minimum(d, d[:, k:k + 1] + d[k:k + 1, :])
    d[d >= INF] = -1.0          # unreachable -> -1 (dgl.shortest_dist convention)
    return d.astype(np.int64)


def build_inputs(key, params):
    # two small undirected graphs (batched like dgl.batch)
    num_nodes = [MAX_NODES, 6]
    edge_lists = [
        [(i, (i + 1) % MAX_NODES) for i in range(MAX_NODES)],   # 8-cycle
        [(0, 1), (1, 2), (2, 3), (3, 4), (4, 5), (0, 3)],       # path + chord
    ]
    total_nodes = sum(num_nodes)
    nfeats = np.asarray(jax.random.normal(key, (total_nodes, NUM_FEATURES), jnp.float32))

    deg_in = np.asarray(params['deg_in'])
    deg_out = np.asarray(params['deg_out'])
    spatial = np.asarray(params['spatial'])

    feats = np.zeros((BATCH, MAX_NODES, NUM_FEATURES), np.float32)
    attn_mask = np.zeros((BATCH, MAX_NODES, MAX_NODES), np.float32)
    bias = np.zeros((BATCH, MAX_NODES, MAX_NODES, NUM_HEADS), np.float32)
    nmask = np.zeros((BATCH, MAX_NODES, 1), np.float32)

    accum = 0
    for b, (n, edges) in enumerate(zip(num_nodes, edge_lists)):
        adj = np.zeros((n, n), np.float32)
        for i, j in edges:
            adj[i, j] = 1.0
            adj[j, i] = 1.0
        deg = np.clip(adj.sum(1).astype(np.int64), 0, MAX_DEGREE)   # in == out (undirected)
        centrality = deg_in[deg] + deg_out[deg]                     # DegreeEncoder("both")
        feats[b, :n] = nfeats[accum:accum + n] + centrality
        attn_mask[b, :, n:] = 1.0
        attn_mask[b, n:, 1:] = 1.0
        dist = np.clip(_floyd_warshall(adj), -1, MAX_DIST) + 1      # SpatialEncoder indexing
        bias[b, :n, :n, :] = spatial[dist]
        nmask[b, :n, 0] = 1.0
        accum += n

    bias_bhnn = np.transpose(bias, (0, 3, 1, 2))   # (B, H, Nq, Nk)
    return (jnp.asarray(feats), jnp.asarray(bias_bhnn),
            jnp.asarray(attn_mask), jnp.asarray(nmask))


# ------------------------- pure-JAX reference -------------------------
def graphormer_reference(feat, bias_bhnn, mask, nmask, p):
    h = feat
    for li in range(NUM_LAYERS):
        q = h @ p['wq'][li] + p['bq'][li]
        k = h @ p['wk'][li] + p['bk'][li]
        v = h @ p['wv'][li] + p['bv'][li]
        q = q.reshape(BATCH, MAX_NODES, NUM_HEADS, HEAD_DIM) * (HEAD_DIM ** -0.5)
        k = k.reshape(BATCH, MAX_NODES, NUM_HEADS, HEAD_DIM)
        v = v.reshape(BATCH, MAX_NODES, NUM_HEADS, HEAD_DIM)
        s = jnp.einsum('bqhd,bkhd->bhqk', q, k) + bias_bhnn
        s = jnp.where(mask[:, None, :, :] != 0.0, -jnp.inf, s)
        a = jax.nn.softmax(s, axis=-1)
        o = jnp.einsum('bhqk,bkhd->bqhd', a, v).reshape(BATCH, MAX_NODES, NUM_FEATURES)
        o = o @ p['wo'][li] + p['bo'][li]
        h = _layernorm(h + o, p['g1'][li], p['be1'][li])
        f = jax.nn.relu(h @ p['w1'][li] + p['b1'][li])
        f = f @ p['w2'][li] + p['b2'][li]
        h = _layernorm(h + f, p['g2'][li], p['be2'][li])
    pooled = jnp.sum(h * nmask, axis=1) / jnp.sum(nmask, axis=1)
    return jax.nn.sigmoid(pooled @ p['wc'] + p['bc'])


if __name__ == "__main__":
    root = jax.random.PRNGKey(0)
    pkey, dkey = jax.random.split(root)
    params = init_params(pkey)
    feat, bias_bhnn, mask, nmask = build_inputs(dkey, params)

    out = graphormer_pallas(feat, bias_bhnn, mask, nmask, params)
    out = jax.block_until_ready(out)

    ref = jax.block_until_ready(graphormer_reference(feat, bias_bhnn, mask, nmask, params))

    assert out.shape == (BATCH, 1)
    np.testing.assert_allclose(np.asarray(out), np.asarray(ref), rtol=2e-3, atol=2e-3)
    print("KERNEL_OK")
</pallas_src>

<mosaic_0001>
module attributes {stable_mosaic.version = 11 : i64} {
  func.func @_graphormer_kernel(%arg0: memref<16x32xf32, #tpu.memory_space<vmem>>, %arg1: memref<2x4x8x8xf32, #tpu.memory_space<vmem>>, %arg2: memref<16x1xf32, #tpu.memory_space<vmem>>, %arg3: memref<6x4x32x24xf32, #tpu.memory_space<vmem>>, %arg4: memref<6x4x1x24xf32, #tpu.memory_space<vmem>>, %arg5: memref<6x4x8x32xf32, #tpu.memory_space<vmem>>, %arg6: memref<6x1x32xf32, #tpu.memory_space<vmem>>, %arg7: memref<6x32x64xf32, #tpu.memory_space<vmem>>, %arg8: memref<6x1x64xf32, #tpu.memory_space<vmem>>, %arg9: memref<6x64x32xf32, #tpu.memory_space<vmem>>, %arg10: memref<6x1x32xf32, #tpu.memory_space<vmem>>, %arg11: memref<6x1x32xf32, #tpu.memory_space<vmem>>, %arg12: memref<6x1x32xf32, #tpu.memory_space<vmem>>, %arg13: memref<6x1x32xf32, #tpu.memory_space<vmem>>, %arg14: memref<6x1x32xf32, #tpu.memory_space<vmem>>, %arg15: memref<32x1xf32, #tpu.memory_space<vmem>>, %arg16: memref<1x1xf32, #tpu.memory_space<vmem>>, %arg17: memref<2x1xf32, #tpu.memory_space<vmem>>) attributes {dimension_semantics = [], scalar_prefetch = 0 : i64, scratch_operands = 0 : i64, tpu.core_type = #tpu.core_type<tc>} {
    %c0 = arith.constant 0 : index
    %c0_0 = arith.constant 0 : index
    %0 = vector.load %arg0[%c0, %c0_0] : memref<16x32xf32, #tpu.memory_space<vmem>>, vector<16x32xf32>
    %c0_1 = arith.constant 0 : index
    %c0_2 = arith.constant 0 : index
    %c0_3 = arith.constant 0 : index
    %c0_4 = arith.constant 0 : index
    %1 = vector.load %arg3[%c0_1, %c0_2, %c0_3, %c0_4] : memref<6x4x32x24xf32, #tpu.memory_space<vmem>>, vector<1x4x32x24xf32>
    %2 = vector.shape_cast %1 : vector<1x4x32x24xf32> to vector<4x32x24xf32>
    %c0_5 = arith.constant 0 : index
    %c0_6 = arith.constant 0 : index
    %c0_7 = arith.constant 0 : index
    %c0_8 = arith.constant 0 : index
    %3 = vector.load %arg4[%c0_5, %c0_6, %c0_7, %c0_8] : memref<6x4x1x24xf32, #tpu.memory_space<vmem>>, vector<1x4x1x24xf32>
    %4 = vector.shape_cast %3 : vector<1x4x1x24xf32> to vector<4x1x24xf32>
    %c0_9 = arith.constant 0 : index
    %c0_10 = arith.constant 0 : index
    %c0_11 = arith.constant 0 : index
    %c0_12 = arith.constant 0 : index
    %5 = vector.load %arg5[%c0_9, %c0_10, %c0_11, %c0_12] : memref<6x4x8x32xf32, #tpu.memory_space<vmem>>, vector<1x4x8x32xf32>
    %6 = vector.shape_cast %5 : vector<1x4x8x32xf32> to vector<4x8x32xf32>
    %c0_13 = arith.constant 0 : index
    %c0_14 = arith.constant 0 : index
    %c0_15 = arith.constant 0 : index
    %7 = vector.load %arg6[%c0_13, %c0_14, %c0_15] : memref<6x1x32xf32, #tpu.memory_space<vmem>>, vector<1x1x32xf32>
    %8 = vector.shape_cast %7 : vector<1x1x32xf32> to vector<1x32xf32>
    %c0_16 = arith.constant 0 : index
    %c0_17 = arith.constant 0 : index
    %c0_18 = arith.constant 0 : index
    %9 = vector.load %arg7[%c0_16, %c0_17, %c0_18] : memref<6x32x64xf32, #tpu.memory_space<vmem>>, vector<1x32x64xf32>
    %10 = vector.shape_cast %9 : vector<1x32x64xf32> to vector<32x64xf32>
    %c0_19 = arith.constant 0 : index
    %c0_20 = arith.constant 0 : index
    %c0_21 = arith.constant 0 : index
    %11 = vector.load %arg8[%c0_19, %c0_20, %c0_21] : memref<6x1x64xf32, #tpu.memory_space<vmem>>, vector<1x1x64xf32>
    %12 = vector.shape_cast %11 : vector<1x1x64xf32> to vector<1x64xf32>
    %c0_22 = arith.constant 0 : index
    %c0_23 = arith.constant 0 : index
    %c0_24 = arith.constant 0 : index
    %13 = vector.load %arg9[%c0_22, %c0_23, %c0_24] : memref<6x64x32xf32, #tpu.memory_space<vmem>>, vector<1x64x32xf32>
    %14 = vector.shape_cast %13 : vector<1x64x32xf32> to vector<64x32xf32>
    %c0_25 = arith.constant 0 : index
    %c0_26 = arith.constant 0 : index
    %c0_27 = arith.constant 0 : index
    %15 = vector.load %arg10[%c0_25, %c0_26, %c0_27] : memref<6x1x32xf32, #tpu.memory_space<vmem>>, vector<1x1x32xf32>
    %16 = vector.shape_cast %15 : vector<1x1x32xf32> to vector<1x32xf32>
    %c0_28 = arith.constant 0 : index
    %c0_29 = arith.constant 0 : index
    %c0_30 = arith.constant 0 : index
    %17 = vector.load %arg11[%c0_28, %c0_29, %c0_30] : memref<6x1x32xf32, #tpu.memory_space<vmem>>, vector<1x1x32xf32>
    %18 = vector.shape_cast %17 : vector<1x1x32xf32> to vector<1x32xf32>
    %c0_31 = arith.constant 0 : index
    %c0_32 = arith.constant 0 : index
    %c0_33 = arith.constant 0 : index
    %19 = vector.load %arg12[%c0_31, %c0_32, %c0_33] : memref<6x1x32xf32, #tpu.memory_space<vmem>>, vector<1x1x32xf32>
    %20 = vector.shape_cast %19 : vector<1x1x32xf32> to vector<1x32xf32>
    %c0_34 = arith.constant 0 : index
    %c0_35 = arith.constant 0 : index
    %c0_36 = arith.constant 0 : index
    %21 = vector.load %arg13[%c0_34, %c0_35, %c0_36] : memref<6x1x32xf32, #tpu.memory_space<vmem>>, vector<1x1x32xf32>
    %22 = vector.shape_cast %21 : vector<1x1x32xf32> to vector<1x32xf32>
    %c0_37 = arith.constant 0 : index
    %c0_38 = arith.constant 0 : index
    %c0_39 = arith.constant 0 : index
    %23 = vector.load %arg14[%c0_37, %c0_38, %c0_39] : memref<6x1x32xf32, #tpu.memory_space<vmem>>, vector<1x1x32xf32>
    %24 = vector.shape_cast %23 : vector<1x1x32xf32> to vector<1x32xf32>
    %25 = vector.extract_strided_slice %0 {offsets = [0, 0], sizes = [8, 32], strides = [1, 1]} : vector<16x32xf32> to vector<8x32xf32>
    %26 = vector.shape_cast %25 : vector<8x32xf32> to vector<1x8x32xf32>
    %27 = vector.broadcast %26 : vector<1x8x32xf32> to vector<4x8x32xf32>
    "tpu.trace_start"() <{level = 10 : i32, message = "hnf,hfe->hne"}> : () -> ()
    %cst = arith.constant dense<0.000000e+00> : vector<4x8x24xf32>
    %28 = tpu.matmul %27, %2, %cst {dimension_numbers = #tpu.dot_dimension_numbers<[2], [1], [1], [2], [0, 0, 0, 1, 1, 2], [0], [0]>} : vector<4x8x32xf32>, vector<4x32x24xf32>, vector<4x8x24xf32> -> vector<4x8x24xf32>
    "tpu.trace_stop"() : () -> ()
    %29 = vector.broadcast %4 : vector<4x1x24xf32> to vector<4x8x24xf32>
    %30 = arith.addf %28, %29 : vector<4x8x24xf32>
    %31 = vector.extract_strided_slice %30 {offsets = [0, 0, 0], sizes = [4, 8, 8], strides = [1, 1, 1]} : vector<4x8x24xf32> to vector<4x8x8xf32>
    %cst_40 = arith.constant 0.353553385 : f32
    %32 = vector.broadcast %cst_40 : f32 to vector<4x8x8xf32>
    %33 = arith.mulf %31, %32 : vector<4x8x8xf32>
    %34 = vector.extract_strided_slice %30 {offsets = [0, 0, 8], sizes = [4, 8, 8], strides = [1, 1, 1]} : vector<4x8x24xf32> to vector<4x8x8xf32>
    %35 = vector.extract_strided_slice %30 {offsets = [0, 0, 16], sizes = [4, 8, 8], strides = [1, 1, 1]} : vector<4x8x24xf32> to vector<4x8x8xf32>
    "tpu.trace_start"() <{level = 10 : i32, message = "hqd,hkd->hqk"}> : () -> ()
    %cst_41 = arith.constant dense<0.000000e+00> : vector<4x8x8xf32>
    %36 = tpu.matmul %33, %34, %cst_41 {dimension_numbers = #tpu.dot_dimension_numbers<[2], [2], [1], [1], [0, 0, 0, 1, 1, 1], [0], [0]>} : vector<4x8x8xf32>, vector<4x8x8xf32>, vector<4x8x8xf32> -> vector<4x8x8xf32>
    "tpu.trace_stop"() : () -> ()
    %c0_42 = arith.constant 0 : index
    %c0_43 = arith.constant 0 : index
    %c0_44 = arith.constant 0 : index
    %c0_45 = arith.constant 0 : index
    %37 = vector.load %arg1[%c0_42, %c0_43, %c0_44, %c0_45] : memref<2x4x8x8xf32, #tpu.memory_space<vmem>>, vector<1x4x8x8xf32>
    %38 = vector.shape_cast %37 : vector<1x4x8x8xf32> to vector<4x8x8xf32>
    %39 = arith.addf %36, %38 : vector<4x8x8xf32>
    %cst_46 = arith.constant dense<0xFF800000> : vector<4x8xf32>
    %40 = vector.multi_reduction <maximumf>, %39, %cst_46 [2] : vector<4x8x8xf32> to vector<4x8xf32>
    %41 = vector.shape_cast %40 : vector<4x8xf32> to vector<4x8x1xf32>
    %42 = vector.broadcast %41 : vector<4x8x1xf32> to vector<4x8x8xf32>
    %43 = arith.subf %39, %42 : vector<4x8x8xf32>
    %44 = math.exp %43 : vector<4x8x8xf32>
    %cst_47 = arith.constant dense<0.000000e+00> : vector<4x8xf32>
    %45 = vector.multi_reduction <add>, %44, %cst_47 [2] : vector<4x8x8xf32> to vector<4x8xf32>
    %46 = vector.shape_cast %45 : vector<4x8xf32> to vector<4x8x1xf32>
    %47 = tpu.reciprocal %46 {approx = true} : vector<4x8x1xf32> -> vector<4x8x1xf32>
    %48 = vector.broadcast %47 : vector<4x8x1xf32> to vector<4x8x8xf32>
    %49 = arith.mulf %44, %48 : vector<4x8x8xf32>
    "tpu.trace_start"() <{level = 10 : i32, message = "hqk,hkd->hqd"}> : () -> ()
    %cst_48 = arith.constant dense<0.000000e+00> : vector<4x8x8xf32>
    %50 = tpu.matmul %49, %35, %cst_48 {dimension_numbers = #tpu.dot_dimension_numbers<[2], [1], [1], [2], [0, 0, 0, 1, 1, 2], [0], [0]>} : vector<4x8x8xf32>, vector<4x8x8xf32>, vector<4x8x8xf32> -> vector<4x8x8xf32>
    "tpu.trace_stop"() : () -> ()
    %51 = vector.extract_strided_slice %50 {offsets = [0, 0, 0], sizes = [1, 8, 8], strides = [1, 1, 1]} : vector<4x8x8xf32> to vector<1x8x8xf32>
    %52 = vector.shape_cast %51 : vector<1x8x8xf32> to vector<8x8xf32>
    %53 = vector.extract_strided_slice %6 {offsets = [0, 0, 0], sizes = [1, 8, 32], strides = [1, 1, 1]} : vector<4x8x32xf32> to vector<1x8x32xf32>
    %54 = vector.shape_cast %53 : vector<1x8x32xf32> to vector<8x32xf32>
    %cst_49 = arith.constant dense<0.000000e+00> : vector<8x32xf32>
    %55 = tpu.matmul %52, %54, %cst_49 {dimension_numbers = #tpu.dot_dimension_numbers<[1], [0], [0], [1], [0, 0, 1, 1], [], []>} : vector<8x8xf32>, vector<8x32xf32>, vector<8x32xf32> -> vector<8x32xf32>
    %56 = vector.broadcast %8 : vector<1x32xf32> to vector<8x32xf32>
    %57 = arith.addf %56, %55 : vector<8x32xf32>
    %58 = vector.extract_strided_slice %50 {offsets = [1, 0, 0], sizes = [1, 8, 8], strides = [1, 1, 1]} : vector<4x8x8xf32> to vector<1x8x8xf32>
    %59 = vector.shape_cast %58 : vector<1x8x8xf32> to vector<8x8xf32>
    %60 = vector.extract_strided_slice %6 {offsets = [1, 0, 0], sizes = [1, 8, 32], strides = [1, 1, 1]} : vector<4x8x32xf32> to vector<1x8x32xf32>
    %61 = vector.shape_cast %60 : vector<1x8x32xf32> to vector<8x32xf32>
    %cst_50 = arith.constant dense<0.000000e+00> : vector<8x32xf32>
    %62 = tpu.matmul %59, %61, %cst_50 {dimension_numbers = #tpu.dot_dimension_numbers<[1], [0], [0], [1], [0, 0, 1, 1], [], []>} : vector<8x8xf32>, vector<8x32xf32>, vector<8x32xf32> -> vector<8x32xf32>
    %63 = arith.addf %57, %62 : vector<8x32xf32>
    %64 = vector.extract_strided_slice %50 {offsets = [2, 0, 0], sizes = [1, 8, 8], strides = [1, 1, 1]} : vector<4x8x8xf32> to vector<1x8x8xf32>
    %65 = vector.shape_cast %64 : vector<1x8x8xf32> to vector<8x8xf32>
    %66 = vector.extract_strided_slice %6 {offsets = [2, 0, 0], sizes = [1, 8, 32], strides = [1, 1, 1]} : vector<4x8x32xf32> to vector<1x8x32xf32>
    %67 = vector.shape_cast %66 : vector<1x8x32xf32> to vector<8x32xf32>
    %cst_51 = arith.constant dense<0.000000e+00> : vector<8x32xf32>
    %68 = tpu.matmul %65, %67, %cst_51 {dimension_numbers = #tpu.dot_dimension_numbers<[1], [0], [0], [1], [0, 0, 1, 1], [], []>} : vector<8x8xf32>, vector<8x32xf32>, vector<8x32xf32> -> vector<8x32xf32>
    %69 = arith.addf %63, %68 : vector<8x32xf32>
    %70 = vector.extract_strided_slice %50 {offsets = [3, 0, 0], sizes = [1, 8, 8], strides = [1, 1, 1]} : vector<4x8x8xf32> to vector<1x8x8xf32>
    %71 = vector.shape_cast %70 : vector<1x8x8xf32> to vector<8x8xf32>
    %72 = vector.extract_strided_slice %6 {offsets = [3, 0, 0], sizes = [1, 8, 32], strides = [1, 1, 1]} : vector<4x8x32xf32> to vector<1x8x32xf32>
    %73 = vector.shape_cast %72 : vector<1x8x32xf32> to vector<8x32xf32>
    %cst_52 = arith.constant dense<0.000000e+00> : vector<8x32xf32>
    %74 = tpu.matmul %71, %73, %cst_52 {dimension_numbers = #tpu.dot_dimension_numbers<[1], [0], [0], [1], [0, 0, 1, 1], [], []>} : vector<8x8xf32>, vector<8x32xf32>, vector<8x32xf32> -> vector<8x32xf32>
    %75 = arith.addf %69, %74 : vector<8x32xf32>
    %76 = vector.extract_strided_slice %0 {offsets = [8, 0], sizes = [8, 32], strides = [1, 1]} : vector<16x32xf32> to vector<8x32xf32>
    %77 = vector.shape_cast %76 : vector<8x32xf32> to vector<1x8x32xf32>
    %78 = vector.broadcast %77 : vector<1x8x32xf32> to vector<4x8x32xf32>
    "tpu.trace_start"() <{level = 10 : i32, message = "hnf,hfe->hne"}> : () -> ()
    %cst_53 = arith.constant dense<0.000000e+00> : vector<4x8x24xf32>
    %79 = tpu.matmul %78, %2, %cst_53 {dimension_numbers = #tpu.dot_dimension_numbers<[2], [1], [1], [2], [0, 0, 0, 1, 1, 2], [0], [0]>} : vector<4x8x32xf32>, vector<4x32x24xf32>, vector<4x8x24xf32> -> vector<4x8x24xf32>
    "tpu.trace_stop"() : () -> ()
    %80 = vector.broadcast %4 : vector<4x1x24xf32> to vector<4x8x24xf32>
    %81 = arith.addf %79, %80 : vector<4x8x24xf32>
    %82 = vector.extract_strided_slice %81 {offsets = [0, 0, 0], sizes = [4, 8, 8], strides = [1, 1, 1]} : vector<4x8x24xf32> to vector<4x8x8xf32>
    %cst_54 = arith.constant 0.353553385 : f32
    %83 = vector.broadcast %cst_54 : f32 to vector<4x8x8xf32>
    %84 = arith.mulf %82, %83 : vector<4x8x8xf32>
    %85 = vector.extract_strided_slice %81 {offsets = [0, 0, 8], sizes = [4, 8, 8], strides = [1, 1, 1]} : vector<4x8x24xf32> to vector<4x8x8xf32>
    %86 = vector.extract_strided_slice %81 {offsets = [0, 0, 16], sizes = [4, 8, 8], strides = [1, 1, 1]} : vector<4x8x24xf32> to vector<4x8x8xf32>
    "tpu.trace_start"() <{level = 10 : i32, message = "hqd,hkd->hqk"}> : () -> ()
    %cst_55 = arith.constant dense<0.000000e+00> : vector<4x8x8xf32>
    %87 = tpu.matmul %84, %85, %cst_55 {dimension_numbers = #tpu.dot_dimension_numbers<[2], [2], [1], [1], [0, 0, 0, 1, 1, 1], [0], [0]>} : vector<4x8x8xf32>, vector<4x8x8xf32>, vector<4x8x8xf32> -> vector<4x8x8xf32>
    "tpu.trace_stop"() : () -> ()
    %c1 = arith.constant 1 : index
    %c0_56 = arith.constant 0 : index
    %c0_57 = arith.constant 0 : index
    %c0_58 = arith.constant 0 : index
    %88 = vector.load %arg1[%c1, %c0_56, %c0_57, %c0_58] : memref<2x4x8x8xf32, #tpu.memory_space<vmem>>, vector<1x4x8x8xf32>
    %89 = vector.shape_cast %88 : vector<1x4x8x8xf32> to vector<4x8x8xf32>
    %90 = arith.addf %87, %89 : vector<4x8x8xf32>
    %cst_59 = arith.constant dense<0xFF800000> : vector<4x8xf32>
    %91 = vector.multi_reduction <maximumf>, %90, %cst_59 [2] : vector<4x8x8xf32> to vector<4x8xf32>
    %92 = vector.shape_cast %91 : vector<4x8xf32> to vector<4x8x1xf32>
    %93 = vector.broadcast %92 : vector<4x8x1xf32> to vector<4x8x8xf32>
    %94 = arith.subf %90, %93 : vector<4x8x8xf32>
    %95 = math.exp %94 : vector<4x8x8xf32>
    %cst_60 = arith.constant dense<0.000000e+00> : vector<4x8xf32>
    %96 = vector.multi_reduction <add>, %95, %cst_60 [2] : vector<4x8x8xf32> to vector<4x8xf32>
    %97 = vector.shape_cast %96 : vector<4x8xf32> to vector<4x8x1xf32>
    %98 = tpu.reciprocal %97 {approx = true} : vector<4x8x1xf32> -> vector<4x8x1xf32>
    %99 = vector.broadcast %98 : vector<4x8x1xf32> to vector<4x8x8xf32>
    %100 = arith.mulf %95, %99 : vector<4x8x8xf32>
    "tpu.trace_start"() <{level = 10 : i32, message = "hqk,hkd->hqd"}> : () -> ()
    %cst_61 = arith.constant dense<0.000000e+00> : vector<4x8x8xf32>
    %101 = tpu.matmul %100, %86, %cst_61 {dimension_numbers = #tpu.dot_dimension_numbers<[2], [1], [1], [2], [0, 0, 0, 1, 1, 2], [0], [0]>} : vector<4x8x8xf32>, vector<4x8x8xf32>, vector<4x8x8xf32> -> vector<4x8x8xf32>
    "tpu.trace_stop"() : () -> ()
    %102 = vector.extract_strided_slice %101 {offsets = [0, 0, 0], sizes = [1, 8, 8], strides = [1, 1, 1]} : vector<4x8x8xf32> to vector<1x8x8xf32>
    %103 = vector.shape_cast %102 : vector<1x8x8xf32> to vector<8x8xf32>
    %104 = vector.extract_strided_slice %6 {offsets = [0, 0, 0], sizes = [1, 8, 32], strides = [1, 1, 1]} : vector<4x8x32xf32> to vector<1x8x32xf32>
    %105 = vector.shape_cast %104 : vector<1x8x32xf32> to vector<8x32xf32>
    %cst_62 = arith.constant dense<0.000000e+00> : vector<8x32xf32>
    %106 = tpu.matmul %103, %105, %cst_62 {dimension_numbers = #tpu.dot_dimension_numbers<[1], [0], [0], [1], [0, 0, 1, 1], [], []>} : vector<8x8xf32>, vector<8x32xf32>, vector<8x32xf32> -> vector<8x32xf32>
    %107 = vector.broadcast %8 : vector<1x32xf32> to vector<8x32xf32>
    %108 = arith.addf %107, %106 : vector<8x32xf32>
    %109 = vector.extract_strided_slice %101 {offsets = [1, 0, 0], sizes = [1, 8, 8], strides = [1, 1, 1]} : vector<4x8x8xf32> to vector<1x8x8xf32>
    %110 = vector.shape_cast %109 : vector<1x8x8xf32> to vector<8x8xf32>
    %111 = vector.extract_strided_slice %6 {offsets = [1, 0, 0], sizes = [1, 8, 32], strides = [1, 1, 1]} : vector<4x8x32xf32> to vector<1x8x32xf32>
    %112 = vector.shape_cast %111 : vector<1x8x32xf32> to vector<8x32xf32>
    %cst_63 = arith.constant dense<0.000000e+00> : vector<8x32xf32>
    %113 = tpu.matmul %110, %112, %cst_63 {dimension_numbers = #tpu.dot_dimension_numbers<[1], [0], [0], [1], [0, 0, 1, 1], [], []>} : vector<8x8xf32>, vector<8x32xf32>, vector<8x32xf32> -> vector<8x32xf32>
    %114 = arith.addf %108, %113 : vector<8x32xf32>
    %115 = vector.extract_strided_slice %101 {offsets = [2, 0, 0], sizes = [1, 8, 8], strides = [1, 1, 1]} : vector<4x8x8xf32> to vector<1x8x8xf32>
    %116 = vector.shape_cast %115 : vector<1x8x8xf32> to vector<8x8xf32>
    %117 = vector.extract_strided_slice %6 {offsets = [2, 0, 0], sizes = [1, 8, 32], strides = [1, 1, 1]} : vector<4x8x32xf32> to vector<1x8x32xf32>
    %118 = vector.shape_cast %117 : vector<1x8x32xf32> to vector<8x32xf32>
    %cst_64 = arith.constant dense<0.000000e+00> : vector<8x32xf32>
    %119 = tpu.matmul %116, %118, %cst_64 {dimension_numbers = #tpu.dot_dimension_numbers<[1], [0], [0], [1], [0, 0, 1, 1], [], []>} : vector<8x8xf32>, vector<8x32xf32>, vector<8x32xf32> -> vector<8x32xf32>
    %120 = arith.addf %114, %119 : vector<8x32xf32>
    %121 = vector.extract_strided_slice %101 {offsets = [3, 0, 0], sizes = [1, 8, 8], strides = [1, 1, 1]} : vector<4x8x8xf32> to vector<1x8x8xf32>
    %122 = vector.shape_cast %121 : vector<1x8x8xf32> to vector<8x8xf32>
    %123 = vector.extract_strided_slice %6 {offsets = [3, 0, 0], sizes = [1, 8, 32], strides = [1, 1, 1]} : vector<4x8x32xf32> to vector<1x8x32xf32>
    %124 = vector.shape_cast %123 : vector<1x8x32xf32> to vector<8x32xf32>
    %cst_65 = arith.constant dense<0.000000e+00> : vector<8x32xf32>
    %125 = tpu.matmul %122, %124, %cst_65 {dimension_numbers = #tpu.dot_dimension_numbers<[1], [0], [0], [1], [0, 0, 1, 1], [], []>} : vector<8x8xf32>, vector<8x32xf32>, vector<8x32xf32> -> vector<8x32xf32>
    %126 = arith.addf %120, %125 : vector<8x32xf32>
    %127 = tpu.concatenate %75, %126 in 0 : vector<8x32xf32>, vector<8x32xf32> -> vector<16x32xf32>
    %128 = arith.addf %0, %127 : vector<16x32xf32>
    %cst_66 = arith.constant dense<0.000000e+00> : vector<16xf32>
    %129 = vector.multi_reduction <add>, %128, %cst_66 [1] : vector<16x32xf32> to vector<16xf32>
    %130 = vector.shape_cast %129 : vector<16xf32> to vector<16x1xf32>
    %cst_67 = arith.constant 3.200000e+01 : f32
    %131 = vector.broadcast %cst_67 : f32 to vector<16x1xf32>
    %132 = arith.divf %130, %131 : vector<16x1xf32>
    %133 = vector.broadcast %132 : vector<16x1xf32> to vector<16x32xf32>
    %134 = arith.subf %128, %133 : vector<16x32xf32>
    %135 = arith.mulf %134, %134 : vector<16x32xf32>
    %cst_68 = arith.constant dense<0.000000e+00> : vector<16xf32>
    %136 = vector.multi_reduction <add>, %135, %cst_68 [1] : vector<16x32xf32> to vector<16xf32>
    %137 = vector.shape_cast %136 : vector<16xf32> to vector<16x1xf32>
    %cst_69 = arith.constant 3.200000e+01 : f32
    %138 = vector.broadcast %cst_69 : f32 to vector<16x1xf32>
    %139 = arith.divf %137, %138 : vector<16x1xf32>
    %140 = vector.broadcast %132 : vector<16x1xf32> to vector<16x32xf32>
    %141 = arith.subf %128, %140 : vector<16x32xf32>
    %cst_70 = arith.constant 9.99999974E-6 : f32
    %142 = vector.broadcast %cst_70 : f32 to vector<16x1xf32>
    %143 = arith.addf %139, %142 : vector<16x1xf32>
    %144 = math.rsqrt %143 : vector<16x1xf32>
    %145 = vector.broadcast %144 : vector<16x1xf32> to vector<16x32xf32>
    %146 = arith.mulf %141, %145 : vector<16x32xf32>
    %147 = vector.broadcast %18 : vector<1x32xf32> to vector<16x32xf32>
    %148 = arith.mulf %146, %147 : vector<16x32xf32>
    %149 = vector.broadcast %20 : vector<1x32xf32> to vector<16x32xf32>
    %150 = arith.addf %148, %149 : vector<16x32xf32>
    %cst_71 = arith.constant dense<0.000000e+00> : vector<16x64xf32>
    %151 = tpu.matmul %150, %10, %cst_71 {dimension_numbers = #tpu.dot_dimension_numbers<[1], [0], [0], [1], [0, 0, 1, 1], [], []>} : vector<16x32xf32>, vector<32x64xf32>, vector<16x64xf32> -> vector<16x64xf32>
    %152 = vector.broadcast %12 : vector<1x64xf32> to vector<16x64xf32>
    %153 = arith.addf %151, %152 : vector<16x64xf32>
    %cst_72 = arith.constant 0.000000e+00 : f32
    %154 = vector.broadcast %cst_72 : f32 to vector<16x64xf32>
    %155 = arith.maximumf %153, %154 : vector<16x64xf32>
    %cst_73 = arith.constant dense<0.000000e+00> : vector<16x32xf32>
    %156 = tpu.matmul %155, %14, %cst_73 {dimension_numbers = #tpu.dot_dimension_numbers<[1], [0], [0], [1], [0, 0, 1, 1], [], []>} : vector<16x64xf32>, vector<64x32xf32>, vector<16x32xf32> -> vector<16x32xf32>
    %157 = vector.broadcast %16 : vector<1x32xf32> to vector<16x32xf32>
    %158 = arith.addf %156, %157 : vector<16x32xf32>
    %159 = arith.addf %150, %158 : vector<16x32xf32>
    %cst_74 = arith.constant dense<0.000000e+00> : vector<16xf32>
    %160 = vector.multi_reduction <add>, %159, %cst_74 [1] : vector<16x32xf32> to vector<16xf32>
    %161 = vector.shape_cast %160 : vector<16xf32> to vector<16x1xf32>
    %cst_75 = arith.constant 3.200000e+01 : f32
    %162 = vector.broadcast %cst_75 : f32 to vector<16x1xf32>
    %163 = arith.divf %161, %162 : vector<16x1xf32>
    %164 = vector.broadcast %163 : vector<16x1xf32> to vector<16x32xf32>
    %165 = arith.subf %159, %164 : vector<16x32xf32>
    %166 = arith.mulf %165, %165 : vector<16x32xf32>
    %cst_76 = arith.constant dense<0.000000e+00> : vector<16xf32>
    %167 = vector.multi_reduction <add>, %166, %cst_76 [1] : vector<16x32xf32> to vector<16xf32>
    %168 = vector.shape_cast %167 : vector<16xf32> to vector<16x1xf32>
    %cst_77 = arith.constant 3.200000e+01 : f32
    %169 = vector.broadcast %cst_77 : f32 to vector<16x1xf32>
    %170 = arith.divf %168, %169 : vector<16x1xf32>
    %171 = vector.broadcast %163 : vector<16x1xf32> to vector<16x32xf32>
    %172 = arith.subf %159, %171 : vector<16x32xf32>
    %cst_78 = arith.constant 9.99999974E-6 : f32
    %173 = vector.broadcast %cst_78 : f32 to vector<16x1xf32>
    %174 = arith.addf %170, %173 : vector<16x1xf32>
    %175 = math.rsqrt %174 : vector<16x1xf32>
    %176 = vector.broadcast %175 : vector<16x1xf32> to vector<16x32xf32>
    %177 = arith.mulf %172, %176 : vector<16x32xf32>
    %178 = vector.broadcast %22 : vector<1x32xf32> to vector<16x32xf32>
    %179 = arith.mulf %177, %178 : vector<16x32xf32>
    %180 = vector.broadcast %24 : vector<1x32xf32> to vector<16x32xf32>
    %181 = arith.addf %179, %180 : vector<16x32xf32>
    %c1_79 = arith.constant 1 : index
    %c0_80 = arith.constant 0 : index
    %c0_81 = arith.constant 0 : index
    %c0_82 = arith.constant 0 : index
    %182 = vector.load %arg3[%c1_79, %c0_80, %c0_81, %c0_82] : memref<6x4x32x24xf32, #tpu.memory_space<vmem>>, vector<1x4x32x24xf32>
    %183 = vector.shape_cast %182 : vector<1x4x32x24xf32> to vector<4x32x24xf32>
    %c1_83 = arith.constant 1 : index
    %c0_84 = arith.constant 0 : index
    %c0_85 = arith.constant 0 : index
    %c0_86 = arith.constant 0 : index
    %184 = vector.load %arg4[%c1_83, %c0_84, %c0_85, %c0_86] : memref<6x4x1x24xf32, #tpu.memory_space<vmem>>, vector<1x4x1x24xf32>
    %185 = vector.shape_cast %184 : vector<1x4x1x24xf32> to vector<4x1x24xf32>
    %c1_87 = arith.constant 1 : index
    %c0_88 = arith.constant 0 : index
    %c0_89 = arith.constant 0 : index
    %c0_90 = arith.constant 0 : index
    %186 = vector.load %arg5[%c1_87, %c0_88, %c0_89, %c0_90] : memref<6x4x8x32xf32, #tpu.memory_space<vmem>>, vector<1x4x8x32xf32>
    %187 = vector.shape_cast %186 : vector<1x4x8x32xf32> to vector<4x8x32xf32>
    %c1_91 = arith.constant 1 : index
    %c0_92 = arith.constant 0 : index
    %c0_93 = arith.constant 0 : index
    %188 = vector.load %arg6[%c1_91, %c0_92, %c0_93] : memref<6x1x32xf32, #tpu.memory_space<vmem>>, vector<1x1x32xf32>
    %189 = vector.shape_cast %188 : vector<1x1x32xf32> to vector<1x32xf32>
    %c1_94 = arith.constant 1 : index
    %c0_95 = arith.constant 0 : index
    %c0_96 = arith.constant 0 : index
    %190 = vector.load %arg7[%c1_94, %c0_95, %c0_96] : memref<6x32x64xf32, #tpu.memory_space<vmem>>, vector<1x32x64xf32>
    %191 = vector.shape_cast %190 : vector<1x32x64xf32> to vector<32x64xf32>
    %c1_97 = arith.constant 1 : index
    %c0_98 = arith.constant 0 : index
    %c0_99 = arith.constant 0 : index
    %192 = vector.load %arg8[%c1_97, %c0_98, %c0_99] : memref<6x1x64xf32, #tpu.memory_space<vmem>>, vector<1x1x64xf32>
    %193 = vector.shape_cast %192 : vector<1x1x64xf32> to vector<1x64xf32>
    %c1_100 = arith.constant 1 : index
    %c0_101 = arith.constant 0 : index
    %c0_102 = arith.constant 0 : index
    %194 = vector.load %arg9[%c1_100, %c0_101, %c0_102] : memref<6x64x32xf32, #tpu.memory_space<vmem>>, vector<1x64x32xf32>
    %195 = vector.shape_cast %194 : vector<1x64x32xf32> to vector<64x32xf32>
    %c1_103 = arith.constant 1 : index
    %c0_104 = arith.constant 0 : index
    %c0_105 = arith.constant 0 : index
    %196 = vector.load %arg10[%c1_103, %c0_104, %c0_105] : memref<6x1x32xf32, #tpu.memory_space<vmem>>, vector<1x1x32xf32>
    %197 = vector.shape_cast %196 : vector<1x1x32xf32> to vector<1x32xf32>
    %c1_106 = arith.constant 1 : index
    %c0_107 = arith.constant 0 : index
    %c0_108 = arith.constant 0 : index
    %198 = vector.load %arg11[%c1_106, %c0_107, %c0_108] : memref<6x1x32xf32, #tpu.memory_space<vmem>>, vector<1x1x32xf32>
    %199 = vector.shape_cast %198 : vector<1x1x32xf32> to vector<1x32xf32>
    %c1_109 = arith.constant 1 : index
    %c0_110 = arith.constant 0 : index
    %c0_111 = arith.constant 0 : index
    %200 = vector.load %arg12[%c1_109, %c0_110, %c0_111] : memref<6x1x32xf32, #tpu.memory_space<vmem>>, vector<1x1x32xf32>
    %201 = vector.shape_cast %200 : vector<1x1x32xf32> to vector<1x32xf32>
    %c1_112 = arith.constant 1 : index
    %c0_113 = arith.constant 0 : index
    %c0_114 = arith.constant 0 : index
    %202 = vector.load %arg13[%c1_112, %c0_113, %c0_114] : memref<6x1x32xf32, #tpu.memory_space<vmem>>, vector<1x1x32xf32>
    %203 = vector.shape_cast %202 : vector<1x1x32xf32> to vector<1x32xf32>
    %c1_115 = arith.constant 1 : index
    %c0_116 = arith.constant 0 : index
    %c0_117 = arith.constant 0 : index
    %204 = vector.load %arg14[%c1_115, %c0_116, %c0_117] : memref<6x1x32xf32, #tpu.memory_space<vmem>>, vector<1x1x32xf32>
    %205 = vector.shape_cast %204 : vector<1x1x32xf32> to vector<1x32xf32>
    %206 = vector.extract_strided_slice %181 {offsets = [0, 0], sizes = [8, 32], strides = [1, 1]} : vector<16x32xf32> to vector<8x32xf32>
    %207 = vector.shape_cast %206 : vector<8x32xf32> to vector<1x8x32xf32>
    %208 = vector.broadcast %207 : vector<1x8x32xf32> to vector<4x8x32xf32>
    "tpu.trace_start"() <{level = 10 : i32, message = "hnf,hfe->hne"}> : () -> ()
    %cst_118 = arith.constant dense<0.000000e+00> : vector<4x8x24xf32>
    %209 = tpu.matmul %208, %183, %cst_118 {dimension_numbers = #tpu.dot_dimension_numbers<[2], [1], [1], [2], [0, 0, 0, 1, 1, 2], [0], [0]>} : vector<4x8x32xf32>, vector<4x32x24xf32>, vector<4x8x24xf32> -> vector<4x8x24xf32>
    "tpu.trace_stop"() : () -> ()
    %210 = vector.broadcast %185 : vector<4x1x24xf32> to vector<4x8x24xf32>
    %211 = arith.addf %209, %210 : vector<4x8x24xf32>
    %212 = vector.extract_strided_slice %211 {offsets = [0, 0, 0], sizes = [4, 8, 8], strides = [1, 1, 1]} : vector<4x8x24xf32> to vector<4x8x8xf32>
    %cst_119 = arith.constant 0.353553385 : f32
    %213 = vector.broadcast %cst_119 : f32 to vector<4x8x8xf32>
    %214 = arith.mulf %212, %213 : vector<4x8x8xf32>
    %215 = vector.extract_strided_slice %211 {offsets = [0, 0, 8], sizes = [4, 8, 8], strides = [1, 1, 1]} : vector<4x8x24xf32> to vector<4x8x8xf32>
    %216 = vector.extract_strided_slice %211 {offsets = [0, 0, 16], sizes = [4, 8, 8], strides = [1, 1, 1]} : vector<4x8x24xf32> to vector<4x8x8xf32>
    "tpu.trace_start"() <{level = 10 : i32, message = "hqd,hkd->hqk"}> : () -> ()
    %cst_120 = arith.constant dense<0.000000e+00> : vector<4x8x8xf32>
    %217 = tpu.matmul %214, %215, %cst_120 {dimension_numbers = #tpu.dot_dimension_numbers<[2], [2], [1], [1], [0, 0, 0, 1, 1, 1], [0], [0]>} : vector<4x8x8xf32>, vector<4x8x8xf32>, vector<4x8x8xf32> -> vector<4x8x8xf32>
    "tpu.trace_stop"() : () -> ()
    %c0_121 = arith.constant 0 : index
    %c0_122 = arith.constant 0 : index
    %c0_123 = arith.constant 0 : index
    %c0_124 = arith.constant 0 : index
    %218 = vector.load %arg1[%c0_121, %c0_122, %c0_123, %c0_124] : memref<2x4x8x8xf32, #tpu.memory_space<vmem>>, vector<1x4x8x8xf32>
    %219 = vector.shape_cast %218 : vector<1x4x8x8xf32> to vector<4x8x8xf32>
    %220 = arith.addf %217, %219 : vector<4x8x8xf32>
    %cst_125 = arith.constant dense<0xFF800000> : vector<4x8xf32>
    %221 = vector.multi_reduction <maximumf>, %220, %cst_125 [2] : vector<4x8x8xf32> to vector<4x8xf32>
    %222 = vector.shape_cast %221 : vector<4x8xf32> to vector<4x8x1xf32>
    %223 = vector.broadcast %222 : vector<4x8x1xf32> to vector<4x8x8xf32>
    %224 = arith.subf %220, %223 : vector<4x8x8xf32>
    %225 = math.exp %224 : vector<4x8x8xf32>
    %cst_126 = arith.constant dense<0.000000e+00> : vector<4x8xf32>
    %226 = vector.multi_reduction <add>, %225, %cst_126 [2] : vector<4x8x8xf32> to vector<4x8xf32>
    %227 = vector.shape_cast %226 : vector<4x8xf32> to vector<4x8x1xf32>
    %228 = tpu.reciprocal %227 {approx = true} : vector<4x8x1xf32> -> vector<4x8x1xf32>
    %229 = vector.broadcast %228 : vector<4x8x1xf32> to vector<4x8x8xf32>
    %230 = arith.mulf %225, %229 : vector<4x8x8xf32>
    "tpu.trace_start"() <{level = 10 : i32, message = "hqk,hkd->hqd"}> : () -> ()
    %cst_127 = arith.constant dense<0.000000e+00> : vector<4x8x8xf32>
    %231 = tpu.matmul %230, %216, %cst_127 {dimension_numbers = #tpu.dot_dimension_numbers<[2], [1], [1], [2], [0, 0, 0, 1, 1, 2], [0], [0]>} : vector<4x8x8xf32>, vector<4x8x8xf32>, vector<4x8x8xf32> -> vector<4x8x8xf32>
    "tpu.trace_stop"() : () -> ()
    %232 = vector.extract_strided_slice %231 {offsets = [0, 0, 0], sizes = [1, 8, 8], strides = [1, 1, 1]} : vector<4x8x8xf32> to vector<1x8x8xf32>
    %233 = vector.shape_cast %232 : vector<1x8x8xf32> to vector<8x8xf32>
    %234 = vector.extract_strided_slice %187 {offsets = [0, 0, 0], sizes = [1, 8, 32], strides = [1, 1, 1]} : vector<4x8x32xf32> to vector<1x8x32xf32>
    %235 = vector.shape_cast %234 : vector<1x8x32xf32> to vector<8x32xf32>
    %cst_128 = arith.constant dense<0.000000e+00> : vector<8x32xf32>
    %236 = tpu.matmul %233, %235, %cst_128 {dimension_numbers = #tpu.dot_dimension_numbers<[1], [0], [0], [1], [0, 0, 1, 1], [], []>} : vector<8x8xf32>, vector<8x32xf32>, vector<8x32xf32> -> vector<8x32xf32>
    %237 = vector.broadcast %189 : vector<1x32xf32> to vector<8x32xf32>
    %238 = arith.addf %237, %236 : vector<8x32xf32>
    %239 = vector.extract_strided_slice %231 {offsets = [1, 0, 0], sizes = [1, 8, 8], strides = [1, 1, 1]} : vector<4x8x8xf32> to vector<1x8x8xf32>
    %240 = vector.shape_cast %239 : vector<1x8x8xf32> to vector<8x8xf32>
    %241 = vector.extract_strided_slice %187 {offsets = [1, 0, 0], sizes = [1, 8, 32], strides = [1, 1, 1]} : vector<4x8x32xf32> to vector<1x8x32xf32>
    %242 = vector.shape_cast %241 : vector<1x8x32xf32> to vector<8x32xf32>
    %cst_129 = arith.constant dense<0.000000e+00> : vector<8x32xf32>
    %243 = tpu.matmul %240, %242, %cst_129 {dimension_numbers = #tpu.dot_dimension_numbers<[1], [0], [0], [1], [0, 0, 1, 1], [], []>} : vector<8x8xf32>, vector<8x32xf32>, vector<8x32xf32> -> vector<8x32xf32>
    %244 = arith.addf %238, %243 : vector<8x32xf32>
    %245 = vector.extract_strided_slice %231 {offsets = [2, 0, 0], sizes = [1, 8, 8], strides = [1, 1, 1]} : vector<4x8x8xf32> to vector<1x8x8xf32>
    %246 = vector.shape_cast %245 : vector<1x8x8xf32> to vector<8x8xf32>
    %247 = vector.extract_strided_slice %187 {offsets = [2, 0, 0], sizes = [1, 8, 32], strides = [1, 1, 1]} : vector<4x8x32xf32> to vector<1x8x32xf32>
    %248 = vector.shape_cast %247 : vector<1x8x32xf32> to vector<8x32xf32>
    %cst_130 = arith.constant dense<0.000000e+00> : vector<8x32xf32>
    %249 = tpu.matmul %246, %248, %cst_130 {dimension_numbers = #tpu.dot_dimension_numbers<[1], [0], [0], [1], [0, 0, 1, 1], [], []>} : vector<8x8xf32>, vector<8x32xf32>, vector<8x32xf32> -> vector<8x32xf32>
    %250 = arith.addf %244, %249 : vector<8x32xf32>
    %251 = vector.extract_strided_slice %231 {offsets = [3, 0, 0], sizes = [1, 8, 8], strides = [1, 1, 1]} : vector<4x8x8xf32> to vector<1x8x8xf32>
    %252 = vector.shape_cast %251 : vector<1x8x8xf32> to vector<8x8xf32>
    %253 = vector.extract_strided_slice %187 {offsets = [3, 0, 0], sizes = [1, 8, 32], strides = [1, 1, 1]} : vector<4x8x32xf32> to vector<1x8x32xf32>
    %254 = vector.shape_cast %253 : vector<1x8x32xf32> to vector<8x32xf32>
    %cst_131 = arith.constant dense<0.000000e+00> : vector<8x32xf32>
    %255 = tpu.matmul %252, %254, %cst_131 {dimension_numbers = #tpu.dot_dimension_numbers<[1], [0], [0], [1], [0, 0, 1, 1], [], []>} : vector<8x8xf32>, vector<8x32xf32>, vector<8x32xf32> -> vector<8x32xf32>
    %256 = arith.addf %250, %255 : vector<8x32xf32>
    %257 = vector.extract_strided_slice %181 {offsets = [8, 0], sizes = [8, 32], strides = [1, 1]} : vector<16x32xf32> to vector<8x32xf32>
    %258 = vector.shape_cast %257 : vector<8x32xf32> to vector<1x8x32xf32>
    %259 = vector.broadcast %258 : vector<1x8x32xf32> to vector<4x8x32xf32>
    "tpu.trace_start"() <{level = 10 : i32, message = "hnf,hfe->hne"}> : () -> ()
    %cst_132 = arith.constant dense<0.000000e+00> : vector<4x8x24xf32>
    %260 = tpu.matmul %259, %183, %cst_132 {dimension_numbers = #tpu.dot_dimension_numbers<[2], [1], [1], [2], [0, 0, 0, 1, 1, 2], [0], [0]>} : vector<4x8x32xf32>, vector<4x32x24xf32>, vector<4x8x24xf32> -> vector<4x8x24xf32>
    "tpu.trace_stop"() : () -> ()
    %261 = vector.broadcast %185 : vector<4x1x24xf32> to vector<4x8x24xf32>
    %262 = arith.addf %260, %261 : vector<4x8x24xf32>
    %263 = vector.extract_strided_slice %262 {offsets = [0, 0, 0], sizes = [4, 8, 8], strides = [1, 1, 1]} : vector<4x8x24xf32> to vector<4x8x8xf32>
    %cst_133 = arith.constant 0.353553385 : f32
    %264 = vector.broadcast %cst_133 : f32 to vector<4x8x8xf32>
    %265 = arith.mulf %263, %264 : vector<4x8x8xf32>
    %266 = vector.extract_strided_slice %262 {offsets = [0, 0, 8], sizes = [4, 8, 8], strides = [1, 1, 1]} : vector<4x8x24xf32> to vector<4x8x8xf32>
    %267 = vector.extract_strided_slice %262 {offsets = [0, 0, 16], sizes = [4, 8, 8], strides = [1, 1, 1]} : vector<4x8x24xf32> to vector<4x8x8xf32>
    "tpu.trace_start"() <{level = 10 : i32, message = "hqd,hkd->hqk"}> : () -> ()
    %cst_134 = arith.constant dense<0.000000e+00> : vector<4x8x8xf32>
    %268 = tpu.matmul %265, %266, %cst_134 {dimension_numbers = #tpu.dot_dimension_numbers<[2], [2], [1], [1], [0, 0, 0, 1, 1, 1], [0], [0]>} : vector<4x8x8xf32>, vector<4x8x8xf32>, vector<4x8x8xf32> -> vector<4x8x8xf32>
    "tpu.trace_stop"() : () -> ()
    %c1_135 = arith.constant 1 : index
    %c0_136 = arith.constant 0 : index
    %c0_137 = arith.constant 0 : index
    %c0_138 = arith.constant 0 : index
    %269 = vector.load %arg1[%c1_135, %c0_136, %c0_137, %c0_138] : memref<2x4x8x8xf32, #tpu.memory_space<vmem>>, vector<1x4x8x8xf32>
    %270 = vector.shape_cast %269 : vector<1x4x8x8xf32> to vector<4x8x8xf32>
    %271 = arith.addf %268, %270 : vector<4x8x8xf32>
    %cst_139 = arith.constant dense<0xFF800000> : vector<4x8xf32>
    %272 = vector.multi_reduction <maximumf>, %271, %cst_139 [2] : vector<4x8x8xf32> to vector<4x8xf32>
    %273 = vector.shape_cast %272 : vector<4x8xf32> to vector<4x8x1xf32>
    %274 = vector.broadcast %273 : vector<4x8x1xf32> to vector<4x8x8xf32>
    %275 = arith.subf %271, %274 : vector<4x8x8xf32>
    %276 = math.exp %275 : vector<4x8x8xf32>
    %cst_140 = arith.constant dense<0.000000e+00> : vector<4x8xf32>
    %277 = vector.multi_reduction <add>, %276, %cst_140 [2] : vector<4x8x8xf32> to vector<4x8xf32>
    %278 = vector.shape_cast %277 : vector<4x8xf32> to vector<4x8x1xf32>
    %279 = tpu.reciprocal %278 {approx = true} : vector<4x8x1xf32> -> vector<4x8x1xf32>
    %280 = vector.broadcast %279 : vector<4x8x1xf32> to vector<4x8x8xf32>
    %281 = arith.mulf %276, %280 : vector<4x8x8xf32>
    "tpu.trace_start"() <{level = 10 : i32, message = "hqk,hkd->hqd"}> : () -> ()
    %cst_141 = arith.constant dense<0.000000e+00> : vector<4x8x8xf32>
    %282 = tpu.matmul %281, %267, %cst_141 {dimension_numbers = #tpu.dot_dimension_numbers<[2], [1], [1], [2], [0, 0, 0, 1, 1, 2], [0], [0]>} : vector<4x8x8xf32>, vector<4x8x8xf32>, vector<4x8x8xf32> -> vector<4x8x8xf32>
    "tpu.trace_stop"() : () -> ()
    %283 = vector.extract_strided_slice %282 {offsets = [0, 0, 0], sizes = [1, 8, 8], strides = [1, 1, 1]} : vector<4x8x8xf32> to vector<1x8x8xf32>
    %284 = vector.shape_cast %283 : vector<1x8x8xf32> to vector<8x8xf32>
    %285 = vector.extract_strided_slice %187 {offsets = [0, 0, 0], sizes = [1, 8, 32], strides = [1, 1, 1]} : vector<4x8x32xf32> to vector<1x8x32xf32>
    %286 = vector.shape_cast %285 : vector<1x8x32xf32> to vector<8x32xf32>
    %cst_142 = arith.constant dense<0.000000e+00> : vector<8x32xf32>
    %287 = tpu.matmul %284, %286, %cst_142 {dimension_numbers = #tpu.dot_dimension_numbers<[1], [0], [0], [1], [0, 0, 1, 1], [], []>} : vector<8x8xf32>, vector<8x32xf32>, vector<8x32xf32> -> vector<8x32xf32>
    %288 = vector.broadcast %189 : vector<1x32xf32> to vector<8x32xf32>
    %289 = arith.addf %288, %287 : vector<8x32xf32>
    %290 = vector.extract_strided_slice %282 {offsets = [1, 0, 0], sizes = [1, 8, 8], strides = [1, 1, 1]} : vector<4x8x8xf32> to vector<1x8x8xf32>
    %291 = vector.shape_cast %290 : vector<1x8x8xf32> to vector<8x8xf32>
    %292 = vector.extract_strided_slice %187 {offsets = [1, 0, 0], sizes = [1, 8, 32], strides = [1, 1, 1]} : vector<4x8x32xf32> to vector<1x8x32xf32>
    %293 = vector.shape_cast %292 : vector<1x8x32xf32> to vector<8x32xf32>
    %cst_143 = arith.constant dense<0.000000e+00> : vector<8x32xf32>
    %294 = tpu.matmul %291, %293, %cst_143 {dimension_numbers = #tpu.dot_dimension_numbers<[1], [0], [0], [1], [0, 0, 1, 1], [], []>} : vector<8x8xf32>, vector<8x32xf32>, vector<8x32xf32> -> vector<8x32xf32>
    %295 = arith.addf %289, %294 : vector<8x32xf32>
    %296 = vector.extract_strided_slice %282 {offsets = [2, 0, 0], sizes = [1, 8, 8], strides = [1, 1, 1]} : vector<4x8x8xf32> to vector<1x8x8xf32>
    %297 = vector.shape_cast %296 : vector<1x8x8xf32> to vector<8x8xf32>
    %298 = vector.extract_strided_slice %187 {offsets = [2, 0, 0], sizes = [1, 8, 32], strides = [1, 1, 1]} : vector<4x8x32xf32> to vector<1x8x32xf32>
    %299 = vector.shape_cast %298 : vector<1x8x32xf32> to vector<8x32xf32>
    %cst_144 = arith.constant dense<0.000000e+00> : vector<8x32xf32>
    %300 = tpu.matmul %297, %299, %cst_144 {dimension_numbers = #tpu.dot_dimension_numbers<[1], [0], [0], [1], [0, 0, 1, 1], [], []>} : vector<8x8xf32>, vector<8x32xf32>, vector<8x32xf32> -> vector<8x32xf32>
    %301 = arith.addf %295, %300 : vector<8x32xf32>
    %302 = vector.extract_strided_slice %282 {offsets = [3, 0, 0], sizes = [1, 8, 8], strides = [1, 1, 1]} : vector<4x8x8xf32> to vector<1x8x8xf32>
    %303 = vector.shape_cast %302 : vector<1x8x8xf32> to vector<8x8xf32>
    %304 = vector.extract_strided_slice %187 {offsets = [3, 0, 0], sizes = [1, 8, 32], strides = [1, 1, 1]} : vector<4x8x32xf32> to vector<1x8x32xf32>
    %305 = vector.shape_cast %304 : vector<1x8x32xf32> to vector<8x32xf32>
    %cst_145 = arith.constant dense<0.000000e+00> : vector<8x32xf32>
    %306 = tpu.matmul %303, %305, %cst_145 {dimension_numbers = #tpu.dot_dimension_numbers<[1], [0], [0], [1], [0, 0, 1, 1], [], []>} : vector<8x8xf32>, vector<8x32xf32>, vector<8x32xf32> -> vector<8x32xf32>
    %307 = arith.addf %301, %306 : vector<8x32xf32>
    %308 = tpu.concatenate %256, %307 in 0 : vector<8x32xf32>, vector<8x32xf32> -> vector<16x32xf32>
    %309 = arith.addf %181, %308 : vector<16x32xf32>
    %cst_146 = arith.constant dense<0.000000e+00> : vector<16xf32>
    %310 = vector.multi_reduction <add>, %309, %cst_146 [1] : vector<16x32xf32> to vector<16xf32>
    %311 = vector.shape_cast %310 : vector<16xf32> to vector<16x1xf32>
    %cst_147 = arith.constant 3.200000e+01 : f32
    %312 = vector.broadcast %cst_147 : f32 to vector<16x1xf32>
    %313 = arith.divf %311, %312 : vector<16x1xf32>
    %314 = vector.broadcast %313 : vector<16x1xf32> to vector<16x32xf32>
    %315 = arith.subf %309, %314 : vector<16x32xf32>
    %316 = arith.mulf %315, %315 : vector<16x32xf32>
    %cst_148 = arith.constant dense<0.000000e+00> : vector<16xf32>
    %317 = vector.multi_reduction <add>, %316, %cst_148 [1] : vector<16x32xf32> to vector<16xf32>
    %318 = vector.shape_cast %317 : vector<16xf32> to vector<16x1xf32>
    %cst_149 = arith.constant 3.200000e+01 : f32
    %319 = vector.broadcast %cst_149 : f32 to vector<16x1xf32>
    %320 = arith.divf %318, %319 : vector<16x1xf32>
    %321 = vector.broadcast %313 : vector<16x1xf32> to vector<16x32xf32>
    %322 = arith.subf %309, %321 : vector<16x32xf32>
    %cst_150 = arith.constant 9.99999974E-6 : f32
    %323 = vector.broadcast %cst_150 : f32 to vector<16x1xf32>
    %324 = arith.addf %320, %323 : vector<16x1xf32>
    %325 = math.rsqrt %324 : vector<16x1xf32>
    %326 = vector.broadcast %325 : vector<16x1xf32> to vector<16x32xf32>
    %327 = arith.mulf %322, %326 : vector<16x32xf32>
    %328 = vector.broadcast %199 : vector<1x32xf32> to vector<16x32xf32>
    %329 = arith.mulf %327, %328 : vector<16x32xf32>
    %330 = vector.broadcast %201 : vector<1x32xf32> to vector<16x32xf32>
    %331 = arith.addf %329, %330 : vector<16x32xf32>
    %cst_151 = arith.constant dense<0.000000e+00> : vector<16x64xf32>
    %332 = tpu.matmul %331, %191, %cst_151 {dimension_numbers = #tpu.dot_dimension_numbers<[1], [0], [0], [1], [0, 0, 1, 1], [], []>} : vector<16x32xf32>, vector<32x64xf32>, vector<16x64xf32> -> vector<16x64xf32>
    %333 = vector.broadcast %193 : vector<1x64xf32> to vector<16x64xf32>
    %334 = arith.addf %332, %333 : vector<16x64xf32>
    %cst_152 = arith.constant 0.000000e+00 : f32
    %335 = vector.broadcast %cst_152 : f32 to vector<16x64xf32>
    %336 = arith.maximumf %334, %335 : vector<16x64xf32>
    %cst_153 = arith.constant dense<0.000000e+00> : vector<16x32xf32>
    %337 = tpu.matmul %336, %195, %cst_153 {dimension_numbers = #tpu.dot_dimension_numbers<[1], [0], [0], [1], [0, 0, 1, 1], [], []>} : vector<16x64xf32>, vector<64x32xf32>, vector<16x32xf32> -> vector<16x32xf32>
    %338 = vector.broadcast %197 : vector<1x32xf32> to vector<16x32xf32>
    %339 = arith.addf %337, %338 : vector<16x32xf32>
    %340 = arith.addf %331, %339 : vector<16x32xf32>
    %cst_154 = arith.constant dense<0.000000e+00> : vector<16xf32>
    %341 = vector.multi_reduction <add>, %340, %cst_154 [1] : vector<16x32xf32> to vector<16xf32>
    %342 = vector.shape_cast %341 : vector<16xf32> to vector<16x1xf32>
    %cst_155 = arith.constant 3.200000e+01 : f32
    %343 = vector.broadcast %cst_155 : f32 to vector<16x1xf32>
    %344 = arith.divf %342, %343 : vector<16x1xf32>
    %345 = vector.broadcast %344 : vector<16x1xf32> to vector<16x32xf32>
    %346 = arith.subf %340, %345 : vector<16x32xf32>
    %347 = arith.mulf %346, %346 : vector<16x32xf32>
    %cst_156 = arith.constant dense<0.000000e+00> : vector<16xf32>
    %348 = vector.multi_reduction <add>, %347, %cst_156 [1] : vector<16x32xf32> to vector<16xf32>
    %349 = vector.shape_cast %348 : vector<16xf32> to vector<16x1xf32>
    %cst_157 = arith.constant 3.200000e+01 : f32
    %350 = vector.broadcast %cst_157 : f32 to vector<16x1xf32>
    %351 = arith.divf %349, %350 : vector<16x1xf32>
    %352 = vector.broadcast %344 : vector<16x1xf32> to vector<16x32xf32>
    %353 = arith.subf %340, %352 : vector<16x32xf32>
    %cst_158 = arith.constant 9.99999974E-6 : f32
    %354 = vector.broadcast %cst_158 : f32 to vector<16x1xf32>
    %355 = arith.addf %351, %354 : vector<16x1xf32>
    %356 = math.rsqrt %355 : vector<16x1xf32>
    %357 = vector.broadcast %356 : vector<16x1xf32> to vector<16x32xf32>
    %358 = arith.mulf %353, %357 : vector<16x32xf32>
    %359 = vector.broadcast %203 : vector<1x32xf32> to vector<16x32xf32>
    %360 = arith.mulf %358, %359 : vector<16x32xf32>
    %361 = vector.broadcast %205 : vector<1x32xf32> to vector<16x32xf32>
    %362 = arith.addf %360, %361 : vector<16x32xf32>
    %c2 = arith.constant 2 : index
    %c0_159 = arith.constant 0 : index
    %c0_160 = arith.constant 0 : index
    %c0_161 = arith.constant 0 : index
    %363 = vector.load %arg3[%c2, %c0_159, %c0_160, %c0_161] : memref<6x4x32x24xf32, #tpu.memory_space<vmem>>, vector<1x4x32x24xf32>
    %364 = vector.shape_cast %363 : vector<1x4x32x24xf32> to vector<4x32x24xf32>
    %c2_162 = arith.constant 2 : index
    %c0_163 = arith.constant 0 : index
    %c0_164 = arith.constant 0 : index
    %c0_165 = arith.constant 0 : index
    %365 = vector.load %arg4[%c2_162, %c0_163, %c0_164, %c0_165] : memref<6x4x1x24xf32, #tpu.memory_space<vmem>>, vector<1x4x1x24xf32>
    %366 = vector.shape_cast %365 : vector<1x4x1x24xf32> to vector<4x1x24xf32>
    %c2_166 = arith.constant 2 : index
    %c0_167 = arith.constant 0 : index
    %c0_168 = arith.constant 0 : index
    %c0_169 = arith.constant 0 : index
    %367 = vector.load %arg5[%c2_166, %c0_167, %c0_168, %c0_169] : memref<6x4x8x32xf32, #tpu.memory_space<vmem>>, vector<1x4x8x32xf32>
    %368 = vector.shape_cast %367 : vector<1x4x8x32xf32> to vector<4x8x32xf32>
    %c2_170 = arith.constant 2 : index
    %c0_171 = arith.constant 0 : index
    %c0_172 = arith.constant 0 : index
    %369 = vector.load %arg6[%c2_170, %c0_171, %c0_172] : memref<6x1x32xf32, #tpu.memory_space<vmem>>, vector<1x1x32xf32>
    %370 = vector.shape_cast %369 : vector<1x1x32xf32> to vector<1x32xf32>
    %c2_173 = arith.constant 2 : index
    %c0_174 = arith.constant 0 : index
    %c0_175 = arith.constant 0 : index
    %371 = vector.load %arg7[%c2_173, %c0_174, %c0_175] : memref<6x32x64xf32, #tpu.memory_space<vmem>>, vector<1x32x64xf32>
    %372 = vector.shape_cast %371 : vector<1x32x64xf32> to vector<32x64xf32>
    %c2_176 = arith.constant 2 : index
    %c0_177 = arith.constant 0 : index
    %c0_178 = arith.constant 0 : index
    %373 = vector.load %arg8[%c2_176, %c0_177, %c0_178] : memref<6x1x64xf32, #tpu.memory_space<vmem>>, vector<1x1x64xf32>
    %374 = vector.shape_cast %373 : vector<1x1x64xf32> to vector<1x64xf32>
    %c2_179 = arith.constant 2 : index
    %c0_180 = arith.constant 0 : index
    %c0_181 = arith.constant 0 : index
    %375 = vector.load %arg9[%c2_179, %c0_180, %c0_181] : memref<6x64x32xf32, #tpu.memory_space<vmem>>, vector<1x64x32xf32>
    %376 = vector.shape_cast %375 : vector<1x64x32xf32> to vector<64x32xf32>
    %c2_182 = arith.constant 2 : index
    %c0_183 = arith.constant 0 : index
    %c0_184 = arith.constant 0 : index
    %377 = vector.load %arg10[%c2_182, %c0_183, %c0_184] : memref<6x1x32xf32, #tpu.memory_space<vmem>>, vector<1x1x32xf32>
    %378 = vector.shape_cast %377 : vector<1x1x32xf32> to vector<1x32xf32>
    %c2_185 = arith.constant 2 : index
    %c0_186 = arith.constant 0 : index
    %c0_187 = arith.constant 0 : index
    %379 = vector.load %arg11[%c2_185, %c0_186, %c0_187] : memref<6x1x32xf32, #tpu.memory_space<vmem>>, vector<1x1x32xf32>
    %380 = vector.shape_cast %379 : vector<1x1x32xf32> to vector<1x32xf32>
    %c2_188 = arith.constant 2 : index
    %c0_189 = arith.constant 0 : index
    %c0_190 = arith.constant 0 : index
    %381 = vector.load %arg12[%c2_188, %c0_189, %c0_190] : memref<6x1x32xf32, #tpu.memory_space<vmem>>, vector<1x1x32xf32>
    %382 = vector.shape_cast %381 : vector<1x1x32xf32> to vector<1x32xf32>
    %c2_191 = arith.constant 2 : index
    %c0_192 = arith.constant 0 : index
    %c0_193 = arith.constant 0 : index
    %383 = vector.load %arg13[%c2_191, %c0_192, %c0_193] : memref<6x1x32xf32, #tpu.memory_space<vmem>>, vector<1x1x32xf32>
    %384 = vector.shape_cast %383 : vector<1x1x32xf32> to vector<1x32xf32>
    %c2_194 = arith.constant 2 : index
    %c0_195 = arith.constant 0 : index
    %c0_196 = arith.constant 0 : index
    %385 = vector.load %arg14[%c2_194, %c0_195, %c0_196] : memref<6x1x32xf32, #tpu.memory_space<vmem>>, vector<1x1x32xf32>
    %386 = vector.shape_cast %385 : vector<1x1x32xf32> to vector<1x32xf32>
    %387 = vector.extract_strided_slice %362 {offsets = [0, 0], sizes = [8, 32], strides = [1, 1]} : vector<16x32xf32> to vector<8x32xf32>
    %388 = vector.shape_cast %387 : vector<8x32xf32> to vector<1x8x32xf32>
    %389 = vector.broadcast %388 : vector<1x8x32xf32> to vector<4x8x32xf32>
    "tpu.trace_start"() <{level = 10 : i32, message = "hnf,hfe->hne"}> : () -> ()
    %cst_197 = arith.constant dense<0.000000e+00> : vector<4x8x24xf32>
    %390 = tpu.matmul %389, %364, %cst_197 {dimension_numbers = #tpu.dot_dimension_numbers<[2], [1], [1], [2], [0, 0, 0, 1, 1, 2], [0], [0]>} : vector<4x8x32xf32>, vector<4x32x24xf32>, vector<4x8x24xf32> -> vector<4x8x24xf32>
    "tpu.trace_stop"() : () -> ()
    %391 = vector.broadcast %366 : vector<4x1x24xf32> to vector<4x8x24xf32>
    %392 = arith.addf %390, %391 : vector<4x8x24xf32>
    %393 = vector.extract_strided_slice %392 {offsets = [0, 0, 0], sizes = [4, 8, 8], strides = [1, 1, 1]} : vector<4x8x24xf32> to vector<4x8x8xf32>
    %cst_198 = arith.constant 0.353553385 : f32
    %394 = vector.broadcast %cst_198 : f32 to vector<4x8x8xf32>
    %395 = arith.mulf %393, %394 : vector<4x8x8xf32>
    %396 = vector.extract_strided_slice %392 {offsets = [0, 0, 8], sizes = [4, 8, 8], strides = [1, 1, 1]} : vector<4x8x24xf32> to vector<4x8x8xf32>
    %397 = vector.extract_strided_slice %392 {offsets = [0, 0, 16], sizes = [4, 8, 8], strides = [1, 1, 1]} : vector<4x8x24xf32> to vector<4x8x8xf32>
    "tpu.trace_start"() <{level = 10 : i32, message = "hqd,hkd->hqk"}> : () -> ()
    %cst_199 = arith.constant dense<0.000000e+00> : vector<4x8x8xf32>
    %398 = tpu.matmul %395, %396, %cst_199 {dimension_numbers = #tpu.dot_dimension_numbers<[2], [2], [1], [1], [0, 0, 0, 1, 1, 1], [0], [0]>} : vector<4x8x8xf32>, vector<4x8x8xf32>, vector<4x8x8xf32> -> vector<4x8x8xf32>
    "tpu.trace_stop"() : () -> ()
    %c0_200 = arith.constant 0 : index
    %c0_201 = arith.constant 0 : index
    %c0_202 = arith.constant 0 : index
    %c0_203 = arith.constant 0 : index
    %399 = vector.load %arg1[%c0_200, %c0_201, %c0_202, %c0_203] : memref<2x4x8x8xf32, #tpu.memory_space<vmem>>, vector<1x4x8x8xf32>
    %400 = vector.shape_cast %399 : vector<1x4x8x8xf32> to vector<4x8x8xf32>
    %401 = arith.addf %398, %400 : vector<4x8x8xf32>
    %cst_204 = arith.constant dense<0xFF800000> : vector<4x8xf32>
    %402 = vector.multi_reduction <maximumf>, %401, %cst_204 [2] : vector<4x8x8xf32> to vector<4x8xf32>
    %403 = vector.shape_cast %402 : vector<4x8xf32> to vector<4x8x1xf32>
    %404 = vector.broadcast %403 : vector<4x8x1xf32> to vector<4x8x8xf32>
    %405 = arith.subf %401, %404 : vector<4x8x8xf32>
    %406 = math.exp %405 : vector<4x8x8xf32>
    %cst_205 = arith.constant dense<0.000000e+00> : vector<4x8xf32>
    %407 = vector.multi_reduction <add>, %406, %cst_205 [2] : vector<4x8x8xf32> to vector<4x8xf32>
    %408 = vector.shape_cast %407 : vector<4x8xf32> to vector<4x8x1xf32>
    %409 = tpu.reciprocal %408 {approx = true} : vector<4x8x1xf32> -> vector<4x8x1xf32>
    %410 = vector.broadcast %409 : vector<4x8x1xf32> to vector<4x8x8xf32>
    %411 = arith.mulf %406, %410 : vector<4x8x8xf32>
    "tpu.trace_start"() <{level = 10 : i32, message = "hqk,hkd->hqd"}> : () -> ()
    %cst_206 = arith.constant dense<0.000000e+00> : vector<4x8x8xf32>
    %412 = tpu.matmul %411, %397, %cst_206 {dimension_numbers = #tpu.dot_dimension_numbers<[2], [1], [1], [2], [0, 0, 0, 1, 1, 2], [0], [0]>} : vector<4x8x8xf32>, vector<4x8x8xf32>, vector<4x8x8xf32> -> vector<4x8x8xf32>
    "tpu.trace_stop"() : () -> ()
    %413 = vector.extract_strided_slice %412 {offsets = [0, 0, 0], sizes = [1, 8, 8], strides = [1, 1, 1]} : vector<4x8x8xf32> to vector<1x8x8xf32>
    %414 = vector.shape_cast %413 : vector<1x8x8xf32> to vector<8x8xf32>
    %415 = vector.extract_strided_slice %368 {offsets = [0, 0, 0], sizes = [1, 8, 32], strides = [1, 1, 1]} : vector<4x8x32xf32> to vector<1x8x32xf32>
    %416 = vector.shape_cast %415 : vector<1x8x32xf32> to vector<8x32xf32>
    %cst_207 = arith.constant dense<0.000000e+00> : vector<8x32xf32>
    %417 = tpu.matmul %414, %416, %cst_207 {dimension_numbers = #tpu.dot_dimension_numbers<[1], [0], [0], [1], [0, 0, 1, 1], [], []>} : vector<8x8xf32>, vector<8x32xf32>, vector<8x32xf32> -> vector<8x32xf32>
    %418 = vector.broadcast %370 : vector<1x32xf32> to vector<8x32xf32>
    %419 = arith.addf %418, %417 : vector<8x32xf32>
    %420 = vector.extract_strided_slice %412 {offsets = [1, 0, 0], sizes = [1, 8, 8], strides = [1, 1, 1]} : vector<4x8x8xf32> to vector<1x8x8xf32>
    %421 = vector.shape_cast %420 : vector<1x8x8xf32> to vector<8x8xf32>
    %422 = vector.extract_strided_slice %368 {offsets = [1, 0, 0], sizes = [1, 8, 32], strides = [1, 1, 1]} : vector<4x8x32xf32> to vector<1x8x32xf32>
    %423 = vector.shape_cast %422 : vector<1x8x32xf32> to vector<8x32xf32>
    %cst_208 = arith.constant dense<0.000000e+00> : vector<8x32xf32>
    %424 = tpu.matmul %421, %423, %cst_208 {dimension_numbers = #tpu.dot_dimension_numbers<[1], [0], [0], [1], [0, 0, 1, 1], [], []>} : vector<8x8xf32>, vector<8x32xf32>, vector<8x32xf32> -> vector<8x32xf32>
    %425 = arith.addf %419, %424 : vector<8x32xf32>
    %426 = vector.extract_strided_slice %412 {offsets = [2, 0, 0], sizes = [1, 8, 8], strides = [1, 1, 1]} : vector<4x8x8xf32> to vector<1x8x8xf32>
    %427 = vector.shape_cast %426 : vector<1x8x8xf32> to vector<8x8xf32>
    %428 = vector.extract_strided_slice %368 {offsets = [2, 0, 0], sizes = [1, 8, 32], strides = [1, 1, 1]} : vector<4x8x32xf32> to vector<1x8x32xf32>
    %429 = vector.shape_cast %428 : vector<1x8x32xf32> to vector<8x32xf32>
    %cst_209 = arith.constant dense<0.000000e+00> : vector<8x32xf32>
    %430 = tpu.matmul %427, %429, %cst_209 {dimension_numbers = #tpu.dot_dimension_numbers<[1], [0], [0], [1], [0, 0, 1, 1], [], []>} : vector<8x8xf32>, vector<8x32xf32>, vector<8x32xf32> -> vector<8x32xf32>
    %431 = arith.addf %425, %430 : vector<8x32xf32>
    %432 = vector.extract_strided_slice %412 {offsets = [3, 0, 0], sizes = [1, 8, 8], strides = [1, 1, 1]} : vector<4x8x8xf32> to vector<1x8x8xf32>
    %433 = vector.shape_cast %432 : vector<1x8x8xf32> to vector<8x8xf32>
    %434 = vector.extract_strided_slice %368 {offsets = [3, 0, 0], sizes = [1, 8, 32], strides = [1, 1, 1]} : vector<4x8x32xf32> to vector<1x8x32xf32>
    %435 = vector.shape_cast %434 : vector<1x8x32xf32> to vector<8x32xf32>
    %cst_210 = arith.constant dense<0.000000e+00> : vector<8x32xf32>
    %436 = tpu.matmul %433, %435, %cst_210 {dimension_numbers = #tpu.dot_dimension_numbers<[1], [0], [0], [1], [0, 0, 1, 1], [], []>} : vector<8x8xf32>, vector<8x32xf32>, vector<8x32xf32> -> vector<8x32xf32>
    %437 = arith.addf %431, %436 : vector<8x32xf32>
    %438 = vector.extract_strided_slice %362 {offsets = [8, 0], sizes = [8, 32], strides = [1, 1]} : vector<16x32xf32> to vector<8x32xf32>
    %439 = vector.shape_cast %438 : vector<8x32xf32> to vector<1x8x32xf32>
    %440 = vector.broadcast %439 : vector<1x8x32xf32> to vector<4x8x32xf32>
    "tpu.trace_start"() <{level = 10 : i32, message = "hnf,hfe->hne"}> : () -> ()
    %cst_211 = arith.constant dense<0.000000e+00> : vector<4x8x24xf32>
    %441 = tpu.matmul %440, %364, %cst_211 {dimension_numbers = #tpu.dot_dimension_numbers<[2], [1], [1], [2], [0, 0, 0, 1, 1, 2], [0], [0]>} : vector<4x8x32xf32>, vector<4x32x24xf32>, vector<4x8x24xf32> -> vector<4x8x24xf32>
    "tpu.trace_stop"() : () -> ()
    %442 = vector.broadcast %366 : vector<4x1x24xf32> to vector<4x8x24xf32>
    %443 = arith.addf %441, %442 : vector<4x8x24xf32>
    %444 = vector.extract_strided_slice %443 {offsets = [0, 0, 0], sizes = [4, 8, 8], strides = [1, 1, 1]} : vector<4x8x24xf32> to vector<4x8x8xf32>
    %cst_212 = arith.constant 0.353553385 : f32
    %445 = vector.broadcast %cst_212 : f32 to vector<4x8x8xf32>
    %446 = arith.mulf %444, %445 : vector<4x8x8xf32>
    %447 = vector.extract_strided_slice %443 {offsets = [0, 0, 8], sizes = [4, 8, 8], strides = [1, 1, 1]} : vector<4x8x24xf32> to vector<4x8x8xf32>
    %448 = vector.extract_strided_slice %443 {offsets = [0, 0, 16], sizes = [4, 8, 8], strides = [1, 1, 1]} : vector<4x8x24xf32> to vector<4x8x8xf32>
    "tpu.trace_start"() <{level = 10 : i32, message = "hqd,hkd->hqk"}> : () -> ()
    %cst_213 = arith.constant dense<0.000000e+00> : vector<4x8x8xf32>
    %449 = tpu.matmul %446, %447, %cst_213 {dimension_numbers = #tpu.dot_dimension_numbers<[2], [2], [1], [1], [0, 0, 0, 1, 1, 1], [0], [0]>} : vector<4x8x8xf32>, vector<4x8x8xf32>, vector<4x8x8xf32> -> vector<4x8x8xf32>
    "tpu.trace_stop"() : () -> ()
    %c1_214 = arith.constant 1 : index
    %c0_215 = arith.constant 0 : index
    %c0_216 = arith.constant 0 : index
    %c0_217 = arith.constant 0 : index
    %450 = vector.load %arg1[%c1_214, %c0_215, %c0_216, %c0_217] : memref<2x4x8x8xf32, #tpu.memory_space<vmem>>, vector<1x4x8x8xf32>
    %451 = vector.shape_cast %450 : vector<1x4x8x8xf32> to vector<4x8x8xf32>
    %452 = arith.addf %449, %451 : vector<4x8x8xf32>
    %cst_218 = arith.constant dense<0xFF800000> : vector<4x8xf32>
    %453 = vector.multi_reduction <maximumf>, %452, %cst_218 [2] : vector<4x8x8xf32> to vector<4x8xf32>
    %454 = vector.shape_cast %453 : vector<4x8xf32> to vector<4x8x1xf32>
    %455 = vector.broadcast %454 : vector<4x8x1xf32> to vector<4x8x8xf32>
    %456 = arith.subf %452, %455 : vector<4x8x8xf32>
    %457 = math.exp %456 : vector<4x8x8xf32>
    %cst_219 = arith.constant dense<0.000000e+00> : vector<4x8xf32>
    %458 = vector.multi_reduction <add>, %457, %cst_219 [2] : vector<4x8x8xf32> to vector<4x8xf32>
    %459 = vector.shape_cast %458 : vector<4x8xf32> to vector<4x8x1xf32>
    %460 = tpu.reciprocal %459 {approx = true} : vector<4x8x1xf32> -> vector<4x8x1xf32>
    %461 = vector.broadcast %460 : vector<4x8x1xf32> to vector<4x8x8xf32>
    %462 = arith.mulf %457, %461 : vector<4x8x8xf32>
    "tpu.trace_start"() <{level = 10 : i32, message = "hqk,hkd->hqd"}> : () -> ()
    %cst_220 = arith.constant dense<0.000000e+00> : vector<4x8x8xf32>
    %463 = tpu.matmul %462, %448, %cst_220 {dimension_numbers = #tpu.dot_dimension_numbers<[2], [1], [1], [2], [0, 0, 0, 1, 1, 2], [0], [0]>} : vector<4x8x8xf32>, vector<4x8x8xf32>, vector<4x8x8xf32> -> vector<4x8x8xf32>
    "tpu.trace_stop"() : () -> ()
    %464 = vector.extract_strided_slice %463 {offsets = [0, 0, 0], sizes = [1, 8, 8], strides = [1, 1, 1]} : vector<4x8x8xf32> to vector<1x8x8xf32>
    %465 = vector.shape_cast %464 : vector<1x8x8xf32> to vector<8x8xf32>
    %466 = vector.extract_strided_slice %368 {offsets = [0, 0, 0], sizes = [1, 8, 32], strides = [1, 1, 1]} : vector<4x8x32xf32> to vector<1x8x32xf32>
    %467 = vector.shape_cast %466 : vector<1x8x32xf32> to vector<8x32xf32>
    %cst_221 = arith.constant dense<0.000000e+00> : vector<8x32xf32>
    %468 = tpu.matmul %465, %467, %cst_221 {dimension_numbers = #tpu.dot_dimension_numbers<[1], [0], [0], [1], [0, 0, 1, 1], [], []>} : vector<8x8xf32>, vector<8x32xf32>, vector<8x32xf32> -> vector<8x32xf32>
    %469 = vector.broadcast %370 : vector<1x32xf32> to vector<8x32xf32>
    %470 = arith.addf %469, %468 : vector<8x32xf32>
    %471 = vector.extract_strided_slice %463 {offsets = [1, 0, 0], sizes = [1, 8, 8], strides = [1, 1, 1]} : vector<4x8x8xf32> to vector<1x8x8xf32>
    %472 = vector.shape_cast %471 : vector<1x8x8xf32> to vector<8x8xf32>
    %473 = vector.extract_strided_slice %368 {offsets = [1, 0, 0], sizes = [1, 8, 32], strides = [1, 1, 1]} : vector<4x8x32xf32> to vector<1x8x32xf32>
    %474 = vector.shape_cast %473 : vector<1x8x32xf32> to vector<8x32xf32>
    %cst_222 = arith.constant dense<0.000000e+00> : vector<8x32xf32>
    %475 = tpu.matmul %472, %474, %cst_222 {dimension_numbers = #tpu.dot_dimension_numbers<[1], [0], [0], [1], [0, 0, 1, 1], [], []>} : vector<8x8xf32>, vector<8x32xf32>, vector<8x32xf32> -> vector<8x32xf32>
    %476 = arith.addf %470, %475 : vector<8x32xf32>
    %477 = vector.extract_strided_slice %463 {offsets = [2, 0, 0], sizes = [1, 8, 8], strides = [1, 1, 1]} : vector<4x8x8xf32> to vector<1x8x8xf32>
    %478 = vector.shape_cast %477 : vector<1x8x8xf32> to vector<8x8xf32>
    %479 = vector.extract_strided_slice %368 {offsets = [2, 0, 0], sizes = [1, 8, 32], strides = [1, 1, 1]} : vector<4x8x32xf32> to vector<1x8x32xf32>
    %480 = vector.shape_cast %479 : vector<1x8x32xf32> to vector<8x32xf32>
    %cst_223 = arith.constant dense<0.000000e+00> : vector<8x32xf32>
    %481 = tpu.matmul %478, %480, %cst_223 {dimension_numbers = #tpu.dot_dimension_numbers<[1], [0], [0], [1], [0, 0, 1, 1], [], []>} : vector<8x8xf32>, vector<8x32xf32>, vector<8x32xf32> -> vector<8x32xf32>
    %482 = arith.addf %476, %481 : vector<8x32xf32>
    %483 = vector.extract_strided_slice %463 {offsets = [3, 0, 0], sizes = [1, 8, 8], strides = [1, 1, 1]} : vector<4x8x8xf32> to vector<1x8x8xf32>
    %484 = vector.shape_cast %483 : vector<1x8x8xf32> to vector<8x8xf32>
    %485 = vector.extract_strided_slice %368 {offsets = [3, 0, 0], sizes = [1, 8, 32], strides = [1, 1, 1]} : vector<4x8x32xf32> to vector<1x8x32xf32>
    %486 = vector.shape_cast %485 : vector<1x8x32xf32> to vector<8x32xf32>
    %cst_224 = arith.constant dense<0.000000e+00> : vector<8x32xf32>
    %487 = tpu.matmul %484, %486, %cst_224 {dimension_numbers = #tpu.dot_dimension_numbers<[1], [0], [0], [1], [0, 0, 1, 1], [], []>} : vector<8x8xf32>, vector<8x32xf32>, vector<8x32xf32> -> vector<8x32xf32>
    %488 = arith.addf %482, %487 : vector<8x32xf32>
    %489 = tpu.concatenate %437, %488 in 0 : vector<8x32xf32>, vector<8x32xf32> -> vector<16x32xf32>
    %490 = arith.addf %362, %489 : vector<16x32xf32>
    %cst_225 = arith.constant dense<0.000000e+00> : vector<16xf32>
    %491 = vector.multi_reduction <add>, %490, %cst_225 [1] : vector<16x32xf32> to vector<16xf32>
    %492 = vector.shape_cast %491 : vector<16xf32> to vector<16x1xf32>
    %cst_226 = arith.constant 3.200000e+01 : f32
    %493 = vector.broadcast %cst_226 : f32 to vector<16x1xf32>
    %494 = arith.divf %492, %493 : vector<16x1xf32>
    %495 = vector.broadcast %494 : vector<16x1xf32> to vector<16x32xf32>
    %496 = arith.subf %490, %495 : vector<16x32xf32>
    %497 = arith.mulf %496, %496 : vector<16x32xf32>
    %cst_227 = arith.constant dense<0.000000e+00> : vector<16xf32>
    %498 = vector.multi_reduction <add>, %497, %cst_227 [1] : vector<16x32xf32> to vector<16xf32>
    %499 = vector.shape_cast %498 : vector<16xf32> to vector<16x1xf32>
    %cst_228 = arith.constant 3.200000e+01 : f32
    %500 = vector.broadcast %cst_228 : f32 to vector<16x1xf32>
    %501 = arith.divf %499, %500 : vector<16x1xf32>
    %502 = vector.broadcast %494 : vector<16x1xf32> to vector<16x32xf32>
    %503 = arith.subf %490, %502 : vector<16x32xf32>
    %cst_229 = arith.constant 9.99999974E-6 : f32
    %504 = vector.broadcast %cst_229 : f32 to vector<16x1xf32>
    %505 = arith.addf %501, %504 : vector<16x1xf32>
    %506 = math.rsqrt %505 : vector<16x1xf32>
    %507 = vector.broadcast %506 : vector<16x1xf32> to vector<16x32xf32>
    %508 = arith.mulf %503, %507 : vector<16x32xf32>
    %509 = vector.broadcast %380 : vector<1x32xf32> to vector<16x32xf32>
    %510 = arith.mulf %508, %509 : vector<16x32xf32>
    %511 = vector.broadcast %382 : vector<1x32xf32> to vector<16x32xf32>
    %512 = arith.addf %510, %511 : vector<16x32xf32>
    %cst_230 = arith.constant dense<0.000000e+00> : vector<16x64xf32>
    %513 = tpu.matmul %512, %372, %cst_230 {dimension_numbers = #tpu.dot_dimension_numbers<[1], [0], [0], [1], [0, 0, 1, 1], [], []>} : vector<16x32xf32>, vector<32x64xf32>, vector<16x64xf32> -> vector<16x64xf32>
    %514 = vector.broadcast %374 : vector<1x64xf32> to vector<16x64xf32>
    %515 = arith.addf %513, %514 : vector<16x64xf32>
    %cst_231 = arith.constant 0.000000e+00 : f32
    %516 = vector.broadcast %cst_231 : f32 to vector<16x64xf32>
    %517 = arith.maximumf %515, %516 : vector<16x64xf32>
    %cst_232 = arith.constant dense<0.000000e+00> : vector<16x32xf32>
    %518 = tpu.matmul %517, %376, %cst_232 {dimension_numbers = #tpu.dot_dimension_numbers<[1], [0], [0], [1], [0, 0, 1, 1], [], []>} : vector<16x64xf32>, vector<64x32xf32>, vector<16x32xf32> -> vector<16x32xf32>
    %519 = vector.broadcast %378 : vector<1x32xf32> to vector<16x32xf32>
    %520 = arith.addf %518, %519 : vector<16x32xf32>
    %521 = arith.addf %512, %520 : vector<16x32xf32>
    %cst_233 = arith.constant dense<0.000000e+00> : vector<16xf32>
    %522 = vector.multi_reduction <add>, %521, %cst_233 [1] : vector<16x32xf32> to vector<16xf32>
    %523 = vector.shape_cast %522 : vector<16xf32> to vector<16x1xf32>
    %cst_234 = arith.constant 3.200000e+01 : f32
    %524 = vector.broadcast %cst_234 : f32 to vector<16x1xf32>
    %525 = arith.divf %523, %524 : vector<16x1xf32>
    %526 = vector.broadcast %525 : vector<16x1xf32> to vector<16x32xf32>
    %527 = arith.subf %521, %526 : vector<16x32xf32>
    %528 = arith.mulf %527, %527 : vector<16x32xf32>
    %cst_235 = arith.constant dense<0.000000e+00> : vector<16xf32>
    %529 = vector.multi_reduction <add>, %528, %cst_235 [1] : vector<16x32xf32> to vector<16xf32>
    %530 = vector.shape_cast %529 : vector<16xf32> to vector<16x1xf32>
    %cst_236 = arith.constant 3.200000e+01 : f32
    %531 = vector.broadcast %cst_236 : f32 to vector<16x1xf32>
    %532 = arith.divf %530, %531 : vector<16x1xf32>
    %533 = vector.broadcast %525 : vector<16x1xf32> to vector<16x32xf32>
    %534 = arith.subf %521, %533 : vector<16x32xf32>
    %cst_237 = arith.constant 9.99999974E-6 : f32
    %535 = vector.broadcast %cst_237 : f32 to vector<16x1xf32>
    %536 = arith.addf %532, %535 : vector<16x1xf32>
    %537 = math.rsqrt %536 : vector<16x1xf32>
    %538 = vector.broadcast %537 : vector<16x1xf32> to vector<16x32xf32>
    %539 = arith.mulf %534, %538 : vector<16x32xf32>
    %540 = vector.broadcast %384 : vector<1x32xf32> to vector<16x32xf32>
    %541 = arith.mulf %539, %540 : vector<16x32xf32>
    %542 = vector.broadcast %386 : vector<1x32xf32> to vector<16x32xf32>
    %543 = arith.addf %541, %542 : vector<16x32xf32>
    %c3 = arith.constant 3 : index
    %c0_238 = arith.constant 0 : index
    %c0_239 = arith.constant 0 : index
    %c0_240 = arith.constant 0 : index
    %544 = vector.load %arg3[%c3, %c0_238, %c0_239, %c0_240] : memref<6x4x32x24xf32, #tpu.memory_space<vmem>>, vector<1x4x32x24xf32>
    %545 = vector.shape_cast %544 : vector<1x4x32x24xf32> to vector<4x32x24xf32>
    %c3_241 = arith.constant 3 : index
    %c0_242 = arith.constant 0 : index
    %c0_243 = arith.constant 0 : index
    %c0_244 = arith.constant 0 : index
    %546 = vector.load %arg4[%c3_241, %c0_242, %c0_243, %c0_244] : memref<6x4x1x24xf32, #tpu.memory_space<vmem>>, vector<1x4x1x24xf32>
    %547 = vector.shape_cast %546 : vector<1x4x1x24xf32> to vector<4x1x24xf32>
    %c3_245 = arith.constant 3 : index
    %c0_246 = arith.constant 0 : index
    %c0_247 = arith.constant 0 : index
    %c0_248 = arith.constant 0 : index
    %548 = vector.load %arg5[%c3_245, %c0_246, %c0_247, %c0_248] : memref<6x4x8x32xf32, #tpu.memory_space<vmem>>, vector<1x4x8x32xf32>
    %549 = vector.shape_cast %548 : vector<1x4x8x32xf32> to vector<4x8x32xf32>
    %c3_249 = arith.constant 3 : index
    %c0_250 = arith.constant 0 : index
    %c0_251 = arith.constant 0 : index
    %550 = vector.load %arg6[%c3_249, %c0_250, %c0_251] : memref<6x1x32xf32, #tpu.memory_space<vmem>>, vector<1x1x32xf32>
    %551 = vector.shape_cast %550 : vector<1x1x32xf32> to vector<1x32xf32>
    %c3_252 = arith.constant 3 : index
    %c0_253 = arith.constant 0 : index
    %c0_254 = arith.constant 0 : index
    %552 = vector.load %arg7[%c3_252, %c0_253, %c0_254] : memref<6x32x64xf32, #tpu.memory_space<vmem>>, vector<1x32x64xf32>
    %553 = vector.shape_cast %552 : vector<1x32x64xf32> to vector<32x64xf32>
    %c3_255 = arith.constant 3 : index
    %c0_256 = arith.constant 0 : index
    %c0_257 = arith.constant 0 : index
    %554 = vector.load %arg8[%c3_255, %c0_256, %c0_257] : memref<6x1x64xf32, #tpu.memory_space<vmem>>, vector<1x1x64xf32>
    %555 = vector.shape_cast %554 : vector<1x1x64xf32> to vector<1x64xf32>
    %c3_258 = arith.constant 3 : index
    %c0_259 = arith.constant 0 : index
    %c0_260 = arith.constant 0 : index
    %556 = vector.load %arg9[%c3_258, %c0_259, %c0_260] : memref<6x64x32xf32, #tpu.memory_space<vmem>>, vector<1x64x32xf32>
    %557 = vector.shape_cast %556 : vector<1x64x32xf32> to vector<64x32xf32>
    %c3_261 = arith.constant 3 : index
    %c0_262 = arith.constant 0 : index
    %c0_263 = arith.constant 0 : index
    %558 = vector.load %arg10[%c3_261, %c0_262, %c0_263] : memref<6x1x32xf32, #tpu.memory_space<vmem>>, vector<1x1x32xf32>
    %559 = vector.shape_cast %558 : vector<1x1x32xf32> to vector<1x32xf32>
    %c3_264 = arith.constant 3 : index
    %c0_265 = arith.constant 0 : index
    %c0_266 = arith.constant 0 : index
    %560 = vector.load %arg11[%c3_264, %c0_265, %c0_266] : memref<6x1x32xf32, #tpu.memory_space<vmem>>, vector<1x1x32xf32>
    %561 = vector.shape_cast %560 : vector<1x1x32xf32> to vector<1x32xf32>
    %c3_267 = arith.constant 3 : index
    %c0_268 = arith.constant 0 : index
    %c0_269 = arith.constant 0 : index
    %562 = vector.load %arg12[%c3_267, %c0_268, %c0_269] : memref<6x1x32xf32, #tpu.memory_space<vmem>>, vector<1x1x32xf32>
    %563 = vector.shape_cast %562 : vector<1x1x32xf32> to vector<1x32xf32>
    %c3_270 = arith.constant 3 : index
    %c0_271 = arith.constant 0 : index
    %c0_272 = arith.constant 0 : index
    %564 = vector.load %arg13[%c3_270, %c0_271, %c0_272] : memref<6x1x32xf32, #tpu.memory_space<vmem>>, vector<1x1x32xf32>
    %565 = vector.shape_cast %564 : vector<1x1x32xf32> to vector<1x32xf32>
    %c3_273 = arith.constant 3 : index
    %c0_274 = arith.constant 0 : index
    %c0_275 = arith.constant 0 : index
    %566 = vector.load %arg14[%c3_273, %c0_274, %c0_275] : memref<6x1x32xf32, #tpu.memory_space<vmem>>, vector<1x1x32xf32>
    %567 = vector.shape_cast %566 : vector<1x1x32xf32> to vector<1x32xf32>
    %568 = vector.extract_strided_slice %543 {offsets = [0, 0], sizes = [8, 32], strides = [1, 1]} : vector<16x32xf32> to vector<8x32xf32>
    %569 = vector.shape_cast %568 : vector<8x32xf32> to vector<1x8x32xf32>
    %570 = vector.broadcast %569 : vector<1x8x32xf32> to vector<4x8x32xf32>
    "tpu.trace_start"() <{level = 10 : i32, message = "hnf,hfe->hne"}> : () -> ()
    %cst_276 = arith.constant dense<0.000000e+00> : vector<4x8x24xf32>
    %571 = tpu.matmul %570, %545, %cst_276 {dimension_numbers = #tpu.dot_dimension_numbers<[2], [1], [1], [2], [0, 0, 0, 1, 1, 2], [0], [0]>} : vector<4x8x32xf32>, vector<4x32x24xf32>, vector<4x8x24xf32> -> vector<4x8x24xf32>
    "tpu.trace_stop"() : () -> ()
    %572 = vector.broadcast %547 : vector<4x1x24xf32> to vector<4x8x24xf32>
    %573 = arith.addf %571, %572 : vector<4x8x24xf32>
    %574 = vector.extract_strided_slice %573 {offsets = [0, 0, 0], sizes = [4, 8, 8], strides = [1, 1, 1]} : vector<4x8x24xf32> to vector<4x8x8xf32>
    %cst_277 = arith.constant 0.353553385 : f32
    %575 = vector.broadcast %cst_277 : f32 to vector<4x8x8xf32>
    %576 = arith.mulf %574, %575 : vector<4x8x8xf32>
    %577 = vector.extract_strided_slice %573 {offsets = [0, 0, 8], sizes = [4, 8, 8], strides = [1, 1, 1]} : vector<4x8x24xf32> to vector<4x8x8xf32>
    %578 = vector.extract_strided_slice %573 {offsets = [0, 0, 16], sizes = [4, 8, 8], strides = [1, 1, 1]} : vector<4x8x24xf32> to vector<4x8x8xf32>
    "tpu.trace_start"() <{level = 10 : i32, message = "hqd,hkd->hqk"}> : () -> ()
    %cst_278 = arith.constant dense<0.000000e+00> : vector<4x8x8xf32>
    %579 = tpu.matmul %576, %577, %cst_278 {dimension_numbers = #tpu.dot_dimension_numbers<[2], [2], [1], [1], [0, 0, 0, 1, 1, 1], [0], [0]>} : vector<4x8x8xf32>, vector<4x8x8xf32>, vector<4x8x8xf32> -> vector<4x8x8xf32>
    "tpu.trace_stop"() : () -> ()
    %c0_279 = arith.constant 0 : index
    %c0_280 = arith.constant 0 : index
    %c0_281 = arith.constant 0 : index
    %c0_282 = arith.constant 0 : index
    %580 = vector.load %arg1[%c0_279, %c0_280, %c0_281, %c0_282] : memref<2x4x8x8xf32, #tpu.memory_space<vmem>>, vector<1x4x8x8xf32>
    %581 = vector.shape_cast %580 : vector<1x4x8x8xf32> to vector<4x8x8xf32>
    %582 = arith.addf %579, %581 : vector<4x8x8xf32>
    %cst_283 = arith.constant dense<0xFF800000> : vector<4x8xf32>
    %583 = vector.multi_reduction <maximumf>, %582, %cst_283 [2] : vector<4x8x8xf32> to vector<4x8xf32>
    %584 = vector.shape_cast %583 : vector<4x8xf32> to vector<4x8x1xf32>
    %585 = vector.broadcast %584 : vector<4x8x1xf32> to vector<4x8x8xf32>
    %586 = arith.subf %582, %585 : vector<4x8x8xf32>
    %587 = math.exp %586 : vector<4x8x8xf32>
    %cst_284 = arith.constant dense<0.000000e+00> : vector<4x8xf32>
    %588 = vector.multi_reduction <add>, %587, %cst_284 [2] : vector<4x8x8xf32> to vector<4x8xf32>
    %589 = vector.shape_cast %588 : vector<4x8xf32> to vector<4x8x1xf32>
    %590 = tpu.reciprocal %589 {approx = true} : vector<4x8x1xf32> -> vector<4x8x1xf32>
    %591 = vector.broadcast %590 : vector<4x8x1xf32> to vector<4x8x8xf32>
    %592 = arith.mulf %587, %591 : vector<4x8x8xf32>
    "tpu.trace_start"() <{level = 10 : i32, message = "hqk,hkd->hqd"}> : () -> ()
    %cst_285 = arith.constant dense<0.000000e+00> : vector<4x8x8xf32>
    %593 = tpu.matmul %592, %578, %cst_285 {dimension_numbers = #tpu.dot_dimension_numbers<[2], [1], [1], [2], [0, 0, 0, 1, 1, 2], [0], [0]>} : vector<4x8x8xf32>, vector<4x8x8xf32>, vector<4x8x8xf32> -> vector<4x8x8xf32>
    "tpu.trace_stop"() : () -> ()
    %594 = vector.extract_strided_slice %593 {offsets = [0, 0, 0], sizes = [1, 8, 8], strides = [1, 1, 1]} : vector<4x8x8xf32> to vector<1x8x8xf32>
    %595 = vector.shape_cast %594 : vector<1x8x8xf32> to vector<8x8xf32>
    %596 = vector.extract_strided_slice %549 {offsets = [0, 0, 0], sizes = [1, 8, 32], strides = [1, 1, 1]} : vector<4x8x32xf32> to vector<1x8x32xf32>
    %597 = vector.shape_cast %596 : vector<1x8x32xf32> to vector<8x32xf32>
    %cst_286 = arith.constant dense<0.000000e+00> : vector<8x32xf32>
    %598 = tpu.matmul %595, %597, %cst_286 {dimension_numbers = #tpu.dot_dimension_numbers<[1], [0], [0], [1], [0, 0, 1, 1], [], []>} : vector<8x8xf32>, vector<8x32xf32>, vector<8x32xf32> -> vector<8x32xf32>
    %599 = vector.broadcast %551 : vector<1x32xf32> to vector<8x32xf32>
    %600 = arith.addf %599, %598 : vector<8x32xf32>
    %601 = vector.extract_strided_slice %593 {offsets = [1, 0, 0], sizes = [1, 8, 8], strides = [1, 1, 1]} : vector<4x8x8xf32> to vector<1x8x8xf32>
    %602 = vector.shape_cast %601 : vector<1x8x8xf32> to vector<8x8xf32>
    %603 = vector.extract_strided_slice %549 {offsets = [1, 0, 0], sizes = [1, 8, 32], strides = [1, 1, 1]} : vector<4x8x32xf32> to vector<1x8x32xf32>
    %604 = vector.shape_cast %603 : vector<1x8x32xf32> to vector<8x32xf32>
    %cst_287 = arith.constant dense<0.000000e+00> : vector<8x32xf32>
    %605 = tpu.matmul %602, %604, %cst_287 {dimension_numbers = #tpu.dot_dimension_numbers<[1], [0], [0], [1], [0, 0, 1, 1], [], []>} : vector<8x8xf32>, vector<8x32xf32>, vector<8x32xf32> -> vector<8x32xf32>
    %606 = arith.addf %600, %605 : vector<8x32xf32>
    %607 = vector.extract_strided_slice %593 {offsets = [2, 0, 0], sizes = [1, 8, 8], strides = [1, 1, 1]} : vector<4x8x8xf32> to vector<1x8x8xf32>
    %608 = vector.shape_cast %607 : vector<1x8x8xf32> to vector<8x8xf32>
    %609 = vector.extract_strided_slice %549 {offsets = [2, 0, 0], sizes = [1, 8, 32], strides = [1, 1, 1]} : vector<4x8x32xf32> to vector<1x8x32xf32>
    %610 = vector.shape_cast %609 : vector<1x8x32xf32> to vector<8x32xf32>
    %cst_288 = arith.constant dense<0.000000e+00> : vector<8x32xf32>
    %611 = tpu.matmul %608, %610, %cst_288 {dimension_numbers = #tpu.dot_dimension_numbers<[1], [0], [0], [1], [0, 0, 1, 1], [], []>} : vector<8x8xf32>, vector<8x32xf32>, vector<8x32xf32> -> vector<8x32xf32>
    %612 = arith.addf %606, %611 : vector<8x32xf32>
    %613 = vector.extract_strided_slice %593 {offsets = [3, 0, 0], sizes = [1, 8, 8], strides = [1, 1, 1]} : vector<4x8x8xf32> to vector<1x8x8xf32>
    %614 = vector.shape_cast %613 : vector<1x8x8xf32> to vector<8x8xf32>
    %615 = vector.extract_strided_slice %549 {offsets = [3, 0, 0], sizes = [1, 8, 32], strides = [1, 1, 1]} : vector<4x8x32xf32> to vector<1x8x32xf32>
    %616 = vector.shape_cast %615 : vector<1x8x32xf32> to vector<8x32xf32>
    %cst_289 = arith.constant dense<0.000000e+00> : vector<8x32xf32>
    %617 = tpu.matmul %614, %616, %cst_289 {dimension_numbers = #tpu.dot_dimension_numbers<[1], [0], [0], [1], [0, 0, 1, 1], [], []>} : vector<8x8xf32>, vector<8x32xf32>, vector<8x32xf32> -> vector<8x32xf32>
    %618 = arith.addf %612, %617 : vector<8x32xf32>
    %619 = vector.extract_strided_slice %543 {offsets = [8, 0], sizes = [8, 32], strides = [1, 1]} : vector<16x32xf32> to vector<8x32xf32>
    %620 = vector.shape_cast %619 : vector<8x32xf32> to vector<1x8x32xf32>
    %621 = vector.broadcast %620 : vector<1x8x32xf32> to vector<4x8x32xf32>
    "tpu.trace_start"() <{level = 10 : i32, message = "hnf,hfe->hne"}> : () -> ()
    %cst_290 = arith.constant dense<0.000000e+00> : vector<4x8x24xf32>
    %622 = tpu.matmul %621, %545, %cst_290 {dimension_numbers = #tpu.dot_dimension_numbers<[2], [1], [1], [2], [0, 0, 0, 1, 1, 2], [0], [0]>} : vector<4x8x32xf32>, vector<4x32x24xf32>, vector<4x8x24xf32> -> vector<4x8x24xf32>
    "tpu.trace_stop"() : () -> ()
    %623 = vector.broadcast %547 : vector<4x1x24xf32> to vector<4x8x24xf32>
    %624 = arith.addf %622, %623 : vector<4x8x24xf32>
    %625 = vector.extract_strided_slice %624 {offsets = [0, 0, 0], sizes = [4, 8, 8], strides = [1, 1, 1]} : vector<4x8x24xf32> to vector<4x8x8xf32>
    %cst_291 = arith.constant 0.353553385 : f32
    %626 = vector.broadcast %cst_291 : f32 to vector<4x8x8xf32>
    %627 = arith.mulf %625, %626 : vector<4x8x8xf32>
    %628 = vector.extract_strided_slice %624 {offsets = [0, 0, 8], sizes = [4, 8, 8], strides = [1, 1, 1]} : vector<4x8x24xf32> to vector<4x8x8xf32>
    %629 = vector.extract_strided_slice %624 {offsets = [0, 0, 16], sizes = [4, 8, 8], strides = [1, 1, 1]} : vector<4x8x24xf32> to vector<4x8x8xf32>
    "tpu.trace_start"() <{level = 10 : i32, message = "hqd,hkd->hqk"}> : () -> ()
    %cst_292 = arith.constant dense<0.000000e+00> : vector<4x8x8xf32>
    %630 = tpu.matmul %627, %628, %cst_292 {dimension_numbers = #tpu.dot_dimension_numbers<[2], [2], [1], [1], [0, 0, 0, 1, 1, 1], [0], [0]>} : vector<4x8x8xf32>, vector<4x8x8xf32>, vector<4x8x8xf32> -> vector<4x8x8xf32>
    "tpu.trace_stop"() : () -> ()
    %c1_293 = arith.constant 1 : index
    %c0_294 = arith.constant 0 : index
    %c0_295 = arith.constant 0 : index
    %c0_296 = arith.constant 0 : index
    %631 = vector.load %arg1[%c1_293, %c0_294, %c0_295, %c0_296] : memref<2x4x8x8xf32, #tpu.memory_space<vmem>>, vector<1x4x8x8xf32>
    %632 = vector.shape_cast %631 : vector<1x4x8x8xf32> to vector<4x8x8xf32>
    %633 = arith.addf %630, %632 : vector<4x8x8xf32>
    %cst_297 = arith.constant dense<0xFF800000> : vector<4x8xf32>
    %634 = vector.multi_reduction <maximumf>, %633, %cst_297 [2] : vector<4x8x8xf32> to vector<4x8xf32>
    %635 = vector.shape_cast %634 : vector<4x8xf32> to vector<4x8x1xf32>
    %636 = vector.broadcast %635 : vector<4x8x1xf32> to vector<4x8x8xf32>
    %637 = arith.subf %633, %636 : vector<4x8x8xf32>
    %638 = math.exp %637 : vector<4x8x8xf32>
    %cst_298 = arith.constant dense<0.000000e+00> : vector<4x8xf32>
    %639 = vector.multi_reduction <add>, %638, %cst_298 [2] : vector<4x8x8xf32> to vector<4x8xf32>
    %640 = vector.shape_cast %639 : vector<4x8xf32> to vector<4x8x1xf32>
    %641 = tpu.reciprocal %640 {approx = true} : vector<4x8x1xf32> -> vector<4x8x1xf32>
    %642 = vector.broadcast %641 : vector<4x8x1xf32> to vector<4x8x8xf32>
    %643 = arith.mulf %638, %642 : vector<4x8x8xf32>
    "tpu.trace_start"() <{level = 10 : i32, message = "hqk,hkd->hqd"}> : () -> ()
    %cst_299 = arith.constant dense<0.000000e+00> : vector<4x8x8xf32>
    %644 = tpu.matmul %643, %629, %cst_299 {dimension_numbers = #tpu.dot_dimension_numbers<[2], [1], [1], [2], [0, 0, 0, 1, 1, 2], [0], [0]>} : vector<4x8x8xf32>, vector<4x8x8xf32>, vector<4x8x8xf32> -> vector<4x8x8xf32>
    "tpu.trace_stop"() : () -> ()
    %645 = vector.extract_strided_slice %644 {offsets = [0, 0, 0], sizes = [1, 8, 8], strides = [1, 1, 1]} : vector<4x8x8xf32> to vector<1x8x8xf32>
    %646 = vector.shape_cast %645 : vector<1x8x8xf32> to vector<8x8xf32>
    %647 = vector.extract_strided_slice %549 {offsets = [0, 0, 0], sizes = [1, 8, 32], strides = [1, 1, 1]} : vector<4x8x32xf32> to vector<1x8x32xf32>
    %648 = vector.shape_cast %647 : vector<1x8x32xf32> to vector<8x32xf32>
    %cst_300 = arith.constant dense<0.000000e+00> : vector<8x32xf32>
    %649 = tpu.matmul %646, %648, %cst_300 {dimension_numbers = #tpu.dot_dimension_numbers<[1], [0], [0], [1], [0, 0, 1, 1], [], []>} : vector<8x8xf32>, vector<8x32xf32>, vector<8x32xf32> -> vector<8x32xf32>
    %650 = vector.broadcast %551 : vector<1x32xf32> to vector<8x32xf32>
    %651 = arith.addf %650, %649 : vector<8x32xf32>
    %652 = vector.extract_strided_slice %644 {offsets = [1, 0, 0], sizes = [1, 8, 8], strides = [1, 1, 1]} : vector<4x8x8xf32> to vector<1x8x8xf32>
    %653 = vector.shape_cast %652 : vector<1x8x8xf32> to vector<8x8xf32>
    %654 = vector.extract_strided_slice %549 {offsets = [1, 0, 0], sizes = [1, 8, 32], strides = [1, 1, 1]} : vector<4x8x32xf32> to vector<1x8x32xf32>
    %655 = vector.shape_cast %654 : vector<1x8x32xf32> to vector<8x32xf32>
    %cst_301 = arith.constant dense<0.000000e+00> : vector<8x32xf32>
    %656 = tpu.matmul %653, %655, %cst_301 {dimension_numbers = #tpu.dot_dimension_numbers<[1], [0], [0], [1], [0, 0, 1, 1], [], []>} : vector<8x8xf32>, vector<8x32xf32>, vector<8x32xf32> -> vector<8x32xf32>
    %657 = arith.addf %651, %656 : vector<8x32xf32>
    %658 = vector.extract_strided_slice %644 {offsets = [2, 0, 0], sizes = [1, 8, 8], strides = [1, 1, 1]} : vector<4x8x8xf32> to vector<1x8x8xf32>
    %659 = vector.shape_cast %658 : vector<1x8x8xf32> to vector<8x8xf32>
    %660 = vector.extract_strided_slice %549 {offsets = [2, 0, 0], sizes = [1, 8, 32], strides = [1, 1, 1]} : vector<4x8x32xf32> to vector<1x8x32xf32>
    %661 = vector.shape_cast %660 : vector<1x8x32xf32> to vector<8x32xf32>
    %cst_302 = arith.constant dense<0.000000e+00> : vector<8x32xf32>
    %662 = tpu.matmul %659, %661, %cst_302 {dimension_numbers = #tpu.dot_dimension_numbers<[1], [0], [0], [1], [0, 0, 1, 1], [], []>} : vector<8x8xf32>, vector<8x32xf32>, vector<8x32xf32> -> vector<8x32xf32>
    %663 = arith.addf %657, %662 : vector<8x32xf32>
    %664 = vector.extract_strided_slice %644 {offsets = [3, 0, 0], sizes = [1, 8, 8], strides = [1, 1, 1]} : vector<4x8x8xf32> to vector<1x8x8xf32>
    %665 = vector.shape_cast %664 : vector<1x8x8xf32> to vector<8x8xf32>
    %666 = vector.extract_strided_slice %549 {offsets = [3, 0, 0], sizes = [1, 8, 32], strides = [1, 1, 1]} : vector<4x8x32xf32> to vector<1x8x32xf32>
    %667 = vector.shape_cast %666 : vector<1x8x32xf32> to vector<8x32xf32>
    %cst_303 = arith.constant dense<0.000000e+00> : vector<8x32xf32>
    %668 = tpu.matmul %665, %667, %cst_303 {dimension_numbers = #tpu.dot_dimension_numbers<[1], [0], [0], [1], [0, 0, 1, 1], [], []>} : vector<8x8xf32>, vector<8x32xf32>, vector<8x32xf32> -> vector<8x32xf32>
    %669 = arith.addf %663, %668 : vector<8x32xf32>
    %670 = tpu.concatenate %618, %669 in 0 : vector<8x32xf32>, vector<8x32xf32> -> vector<16x32xf32>
    %671 = arith.addf %543, %670 : vector<16x32xf32>
    %cst_304 = arith.constant dense<0.000000e+00> : vector<16xf32>
    %672 = vector.multi_reduction <add>, %671, %cst_304 [1] : vector<16x32xf32> to vector<16xf32>
    %673 = vector.shape_cast %672 : vector<16xf32> to vector<16x1xf32>
    %cst_305 = arith.constant 3.200000e+01 : f32
    %674 = vector.broadcast %cst_305 : f32 to vector<16x1xf32>
    %675 = arith.divf %673, %674 : vector<16x1xf32>
    %676 = vector.broadcast %675 : vector<16x1xf32> to vector<16x32xf32>
    %677 = arith.subf %671, %676 : vector<16x32xf32>
    %678 = arith.mulf %677, %677 : vector<16x32xf32>
    %cst_306 = arith.constant dense<0.000000e+00> : vector<16xf32>
    %679 = vector.multi_reduction <add>, %678, %cst_306 [1] : vector<16x32xf32> to vector<16xf32>
    %680 = vector.shape_cast %679 : vector<16xf32> to vector<16x1xf32>
    %cst_307 = arith.constant 3.200000e+01 : f32
    %681 = vector.broadcast %cst_307 : f32 to vector<16x1xf32>
    %682 = arith.divf %680, %681 : vector<16x1xf32>
    %683 = vector.broadcast %675 : vector<16x1xf32> to vector<16x32xf32>
    %684 = arith.subf %671, %683 : vector<16x32xf32>
    %cst_308 = arith.constant 9.99999974E-6 : f32
    %685 = vector.broadcast %cst_308 : f32 to vector<16x1xf32>
    %686 = arith.addf %682, %685 : vector<16x1xf32>
    %687 = math.rsqrt %686 : vector<16x1xf32>
    %688 = vector.broadcast %687 : vector<16x1xf32> to vector<16x32xf32>
    %689 = arith.mulf %684, %688 : vector<16x32xf32>
    %690 = vector.broadcast %561 : vector<1x32xf32> to vector<16x32xf32>
    %691 = arith.mulf %689, %690 : vector<16x32xf32>
    %692 = vector.broadcast %563 : vector<1x32xf32> to vector<16x32xf32>
    %693 = arith.addf %691, %692 : vector<16x32xf32>
    %cst_309 = arith.constant dense<0.000000e+00> : vector<16x64xf32>
    %694 = tpu.matmul %693, %553, %cst_309 {dimension_numbers = #tpu.dot_dimension_numbers<[1], [0], [0], [1], [0, 0, 1, 1], [], []>} : vector<16x32xf32>, vector<32x64xf32>, vector<16x64xf32> -> vector<16x64xf32>
    %695 = vector.broadcast %555 : vector<1x64xf32> to vector<16x64xf32>
    %696 = arith.addf %694, %695 : vector<16x64xf32>
    %cst_310 = arith.constant 0.000000e+00 : f32
    %697 = vector.broadcast %cst_310 : f32 to vector<16x64xf32>
    %698 = arith.maximumf %696, %697 : vector<16x64xf32>
    %cst_311 = arith.constant dense<0.000000e+00> : vector<16x32xf32>
    %699 = tpu.matmul %698, %557, %cst_311 {dimension_numbers = #tpu.dot_dimension_numbers<[1], [0], [0], [1], [0, 0, 1, 1], [], []>} : vector<16x64xf32>, vector<64x32xf32>, vector<16x32xf32> -> vector<16x32xf32>
    %700 = vector.broadcast %559 : vector<1x32xf32> to vector<16x32xf32>
    %701 = arith.addf %699, %700 : vector<16x32xf32>
    %702 = arith.addf %693, %701 : vector<16x32xf32>
    %cst_312 = arith.constant dense<0.000000e+00> : vector<16xf32>
    %703 = vector.multi_reduction <add>, %702, %cst_312 [1] : vector<16x32xf32> to vector<16xf32>
    %704 = vector.shape_cast %703 : vector<16xf32> to vector<16x1xf32>
    %cst_313 = arith.constant 3.200000e+01 : f32
    %705 = vector.broadcast %cst_313 : f32 to vector<16x1xf32>
    %706 = arith.divf %704, %705 : vector<16x1xf32>
    %707 = vector.broadcast %706 : vector<16x1xf32> to vector<16x32xf32>
    %708 = arith.subf %702, %707 : vector<16x32xf32>
    %709 = arith.mulf %708, %708 : vector<16x32xf32>
    %cst_314 = arith.constant dense<0.000000e+00> : vector<16xf32>
    %710 = vector.multi_reduction <add>, %709, %cst_314 [1] : vector<16x32xf32> to vector<16xf32>
    %711 = vector.shape_cast %710 : vector<16xf32> to vector<16x1xf32>
    %cst_315 = arith.constant 3.200000e+01 : f32
    %712 = vector.broadcast %cst_315 : f32 to vector<16x1xf32>
    %713 = arith.divf %711, %712 : vector<16x1xf32>
    %714 = vector.broadcast %706 : vector<16x1xf32> to vector<16x32xf32>
    %715 = arith.subf %702, %714 : vector<16x32xf32>
    %cst_316 = arith.constant 9.99999974E-6 : f32
    %716 = vector.broadcast %cst_316 : f32 to vector<16x1xf32>
    %717 = arith.addf %713, %716 : vector<16x1xf32>
    %718 = math.rsqrt %717 : vector<16x1xf32>
    %719 = vector.broadcast %718 : vector<16x1xf32> to vector<16x32xf32>
    %720 = arith.mulf %715, %719 : vector<16x32xf32>
    %721 = vector.broadcast %565 : vector<1x32xf32> to vector<16x32xf32>
    %722 = arith.mulf %720, %721 : vector<16x32xf32>
    %723 = vector.broadcast %567 : vector<1x32xf32> to vector<16x32xf32>
    %724 = arith.addf %722, %723 : vector<16x32xf32>
    %c4 = arith.constant 4 : index
    %c0_317 = arith.constant 0 : index
    %c0_318 = arith.constant 0 : index
    %c0_319 = arith.constant 0 : index
    %725 = vector.load %arg3[%c4, %c0_317, %c0_318, %c0_319] : memref<6x4x32x24xf32, #tpu.memory_space<vmem>>, vector<1x4x32x24xf32>
    %726 = vector.shape_cast %725 : vector<1x4x32x24xf32> to vector<4x32x24xf32>
    %c4_320 = arith.constant 4 : index
    %c0_321 = arith.constant 0 : index
    %c0_322 = arith.constant 0 : index
    %c0_323 = arith.constant 0 : index
    %727 = vector.load %arg4[%c4_320, %c0_321, %c0_322, %c0_323] : memref<6x4x1x24xf32, #tpu.memory_space<vmem>>, vector<1x4x1x24xf32>
    %728 = vector.shape_cast %727 : vector<1x4x1x24xf32> to vector<4x1x24xf32>
    %c4_324 = arith.constant 4 : index
    %c0_325 = arith.constant 0 : index
    %c0_326 = arith.constant 0 : index
    %c0_327 = arith.constant 0 : index
    %729 = vector.load %arg5[%c4_324, %c0_325, %c0_326, %c0_327] : memref<6x4x8x32xf32, #tpu.memory_space<vmem>>, vector<1x4x8x32xf32>
    %730 = vector.shape_cast %729 : vector<1x4x8x32xf32> to vector<4x8x32xf32>
    %c4_328 = arith.constant 4 : index
    %c0_329 = arith.constant 0 : index
    %c0_330 = arith.constant 0 : index
    %731 = vector.load %arg6[%c4_328, %c0_329, %c0_330] : memref<6x1x32xf32, #tpu.memory_space<vmem>>, vector<1x1x32xf32>
    %732 = vector.shape_cast %731 : vector<1x1x32xf32> to vector<1x32xf32>
    %c4_331 = arith.constant 4 : index
    %c0_332 = arith.constant 0 : index
    %c0_333 = arith.constant 0 : index
    %733 = vector.load %arg7[%c4_331, %c0_332, %c0_333] : memref<6x32x64xf32, #tpu.memory_space<vmem>>, vector<1x32x64xf32>
    %734 = vector.shape_cast %733 : vector<1x32x64xf32> to vector<32x64xf32>
    %c4_334 = arith.constant 4 : index
    %c0_335 = arith.constant 0 : index
    %c0_336 = arith.constant 0 : index
    %735 = vector.load %arg8[%c4_334, %c0_335, %c0_336] : memref<6x1x64xf32, #tpu.memory_space<vmem>>, vector<1x1x64xf32>
    %736 = vector.shape_cast %735 : vector<1x1x64xf32> to vector<1x64xf32>
    %c4_337 = arith.constant 4 : index
    %c0_338 = arith.constant 0 : index
    %c0_339 = arith.constant 0 : index
    %737 = vector.load %arg9[%c4_337, %c0_338, %c0_339] : memref<6x64x32xf32, #tpu.memory_space<vmem>>, vector<1x64x32xf32>
    %738 = vector.shape_cast %737 : vector<1x64x32xf32> to vector<64x32xf32>
    %c4_340 = arith.constant 4 : index
    %c0_341 = arith.constant 0 : index
    %c0_342 = arith.constant 0 : index
    %739 = vector.load %arg10[%c4_340, %c0_341, %c0_342] : memref<6x1x32xf32, #tpu.memory_space<vmem>>, vector<1x1x32xf32>
    %740 = vector.shape_cast %739 : vector<1x1x32xf32> to vector<1x32xf32>
    %c4_343 = arith.constant 4 : index
    %c0_344 = arith.constant 0 : index
    %c0_345 = arith.constant 0 : index
    %741 = vector.load %arg11[%c4_343, %c0_344, %c0_345] : memref<6x1x32xf32, #tpu.memory_space<vmem>>, vector<1x1x32xf32>
    %742 = vector.shape_cast %741 : vector<1x1x32xf32> to vector<1x32xf32>
    %c4_346 = arith.constant 4 : index
    %c0_347 = arith.constant 0 : index
    %c0_348 = arith.constant 0 : index
    %743 = vector.load %arg12[%c4_346, %c0_347, %c0_348] : memref<6x1x32xf32, #tpu.memory_space<vmem>>, vector<1x1x32xf32>
    %744 = vector.shape_cast %743 : vector<1x1x32xf32> to vector<1x32xf32>
    %c4_349 = arith.constant 4 : index
    %c0_350 = arith.constant 0 : index
    %c0_351 = arith.constant 0 : index
    %745 = vector.load %arg13[%c4_349, %c0_350, %c0_351] : memref<6x1x32xf32, #tpu.memory_space<vmem>>, vector<1x1x32xf32>
    %746 = vector.shape_cast %745 : vector<1x1x32xf32> to vector<1x32xf32>
    %c4_352 = arith.constant 4 : index
    %c0_353 = arith.constant 0 : index
    %c0_354 = arith.constant 0 : index
    %747 = vector.load %arg14[%c4_352, %c0_353, %c0_354] : memref<6x1x32xf32, #tpu.memory_space<vmem>>, vector<1x1x32xf32>
    %748 = vector.shape_cast %747 : vector<1x1x32xf32> to vector<1x32xf32>
    %749 = vector.extract_strided_slice %724 {offsets = [0, 0], sizes = [8, 32], strides = [1, 1]} : vector<16x32xf32> to vector<8x32xf32>
    %750 = vector.shape_cast %749 : vector<8x32xf32> to vector<1x8x32xf32>
    %751 = vector.broadcast %750 : vector<1x8x32xf32> to vector<4x8x32xf32>
    "tpu.trace_start"() <{level = 10 : i32, message = "hnf,hfe->hne"}> : () -> ()
    %cst_355 = arith.constant dense<0.000000e+00> : vector<4x8x24xf32>
    %752 = tpu.matmul %751, %726, %cst_355 {dimension_numbers = #tpu.dot_dimension_numbers<[2], [1], [1], [2], [0, 0, 0, 1, 1, 2], [0], [0]>} : vector<4x8x32xf32>, vector<4x32x24xf32>, vector<4x8x24xf32> -> vector<4x8x24xf32>
    "tpu.trace_stop"() : () -> ()
    %753 = vector.broadcast %728 : vector<4x1x24xf32> to vector<4x8x24xf32>
    %754 = arith.addf %752, %753 : vector<4x8x24xf32>
    %755 = vector.extract_strided_slice %754 {offsets = [0, 0, 0], sizes = [4, 8, 8], strides = [1, 1, 1]} : vector<4x8x24xf32> to vector<4x8x8xf32>
    %cst_356 = arith.constant 0.353553385 : f32
    %756 = vector.broadcast %cst_356 : f32 to vector<4x8x8xf32>
    %757 = arith.mulf %755, %756 : vector<4x8x8xf32>
    %758 = vector.extract_strided_slice %754 {offsets = [0, 0, 8], sizes = [4, 8, 8], strides = [1, 1, 1]} : vector<4x8x24xf32> to vector<4x8x8xf32>
    %759 = vector.extract_strided_slice %754 {offsets = [0, 0, 16], sizes = [4, 8, 8], strides = [1, 1, 1]} : vector<4x8x24xf32> to vector<4x8x8xf32>
    "tpu.trace_start"() <{level = 10 : i32, message = "hqd,hkd->hqk"}> : () -> ()
    %cst_357 = arith.constant dense<0.000000e+00> : vector<4x8x8xf32>
    %760 = tpu.matmul %757, %758, %cst_357 {dimension_numbers = #tpu.dot_dimension_numbers<[2], [2], [1], [1], [0, 0, 0, 1, 1, 1], [0], [0]>} : vector<4x8x8xf32>, vector<4x8x8xf32>, vector<4x8x8xf32> -> vector<4x8x8xf32>
    "tpu.trace_stop"() : () -> ()
    %c0_358 = arith.constant 0 : index
    %c0_359 = arith.constant 0 : index
    %c0_360 = arith.constant 0 : index
    %c0_361 = arith.constant 0 : index
    %761 = vector.load %arg1[%c0_358, %c0_359, %c0_360, %c0_361] : memref<2x4x8x8xf32, #tpu.memory_space<vmem>>, vector<1x4x8x8xf32>
    %762 = vector.shape_cast %761 : vector<1x4x8x8xf32> to vector<4x8x8xf32>
    %763 = arith.addf %760, %762 : vector<4x8x8xf32>
    %cst_362 = arith.constant dense<0xFF800000> : vector<4x8xf32>
    %764 = vector.multi_reduction <maximumf>, %763, %cst_362 [2] : vector<4x8x8xf32> to vector<4x8xf32>
    %765 = vector.shape_cast %764 : vector<4x8xf32> to vector<4x8x1xf32>
    %766 = vector.broadcast %765 : vector<4x8x1xf32> to vector<4x8x8xf32>
    %767 = arith.subf %763, %766 : vector<4x8x8xf32>
    %768 = math.exp %767 : vector<4x8x8xf32>
    %cst_363 = arith.constant dense<0.000000e+00> : vector<4x8xf32>
    %769 = vector.multi_reduction <add>, %768, %cst_363 [2] : vector<4x8x8xf32> to vector<4x8xf32>
    %770 = vector.shape_cast %769 : vector<4x8xf32> to vector<4x8x1xf32>
    %771 = tpu.reciprocal %770 {approx = true} : vector<4x8x1xf32> -> vector<4x8x1xf32>
    %772 = vector.broadcast %771 : vector<4x8x1xf32> to vector<4x8x8xf32>
    %773 = arith.mulf %768, %772 : vector<4x8x8xf32>
    "tpu.trace_start"() <{level = 10 : i32, message = "hqk,hkd->hqd"}> : () -> ()
    %cst_364 = arith.constant dense<0.000000e+00> : vector<4x8x8xf32>
    %774 = tpu.matmul %773, %759, %cst_364 {dimension_numbers = #tpu.dot_dimension_numbers<[2], [1], [1], [2], [0, 0, 0, 1, 1, 2], [0], [0]>} : vector<4x8x8xf32>, vector<4x8x8xf32>, vector<4x8x8xf32> -> vector<4x8x8xf32>
    "tpu.trace_stop"() : () -> ()
    %775 = vector.extract_strided_slice %774 {offsets = [0, 0, 0], sizes = [1, 8, 8], strides = [1, 1, 1]} : vector<4x8x8xf32> to vector<1x8x8xf32>
    %776 = vector.shape_cast %775 : vector<1x8x8xf32> to vector<8x8xf32>
    %777 = vector.extract_strided_slice %730 {offsets = [0, 0, 0], sizes = [1, 8, 32], strides = [1, 1, 1]} : vector<4x8x32xf32> to vector<1x8x32xf32>
    %778 = vector.shape_cast %777 : vector<1x8x32xf32> to vector<8x32xf32>
    %cst_365 = arith.constant dense<0.000000e+00> : vector<8x32xf32>
    %779 = tpu.matmul %776, %778, %cst_365 {dimension_numbers = #tpu.dot_dimension_numbers<[1], [0], [0], [1], [0, 0, 1, 1], [], []>} : vector<8x8xf32>, vector<8x32xf32>, vector<8x32xf32> -> vector<8x32xf32>
    %780 = vector.broadcast %732 : vector<1x32xf32> to vector<8x32xf32>
    %781 = arith.addf %780, %779 : vector<8x32xf32>
    %782 = vector.extract_strided_slice %774 {offsets = [1, 0, 0], sizes = [1, 8, 8], strides = [1, 1, 1]} : vector<4x8x8xf32> to vector<1x8x8xf32>
    %783 = vector.shape_cast %782 : vector<1x8x8xf32> to vector<8x8xf32>
    %784 = vector.extract_strided_slice %730 {offsets = [1, 0, 0], sizes = [1, 8, 32], strides = [1, 1, 1]} : vector<4x8x32xf32> to vector<1x8x32xf32>
    %785 = vector.shape_cast %784 : vector<1x8x32xf32> to vector<8x32xf32>
    %cst_366 = arith.constant dense<0.000000e+00> : vector<8x32xf32>
    %786 = tpu.matmul %783, %785, %cst_366 {dimension_numbers = #tpu.dot_dimension_numbers<[1], [0], [0], [1], [0, 0, 1, 1], [], []>} : vector<8x8xf32>, vector<8x32xf32>, vector<8x32xf32> -> vector<8x32xf32>
    %787 = arith.addf %781, %786 : vector<8x32xf32>
    %788 = vector.extract_strided_slice %774 {offsets = [2, 0, 0], sizes = [1, 8, 8], strides = [1, 1, 1]} : vector<4x8x8xf32> to vector<1x8x8xf32>
    %789 = vector.shape_cast %788 : vector<1x8x8xf32> to vector<8x8xf32>
    %790 = vector.extract_strided_slice %730 {offsets = [2, 0, 0], sizes = [1, 8, 32], strides = [1, 1, 1]} : vector<4x8x32xf32> to vector<1x8x32xf32>
    %791 = vector.shape_cast %790 : vector<1x8x32xf32> to vector<8x32xf32>
    %cst_367 = arith.constant dense<0.000000e+00> : vector<8x32xf32>
    %792 = tpu.matmul %789, %791, %cst_367 {dimension_numbers = #tpu.dot_dimension_numbers<[1], [0], [0], [1], [0, 0, 1, 1], [], []>} : vector<8x8xf32>, vector<8x32xf32>, vector<8x32xf32> -> vector<8x32xf32>
    %793 = arith.addf %787, %792 : vector<8x32xf32>
    %794 = vector.extract_strided_slice %774 {offsets = [3, 0, 0], sizes = [1, 8, 8], strides = [1, 1, 1]} : vector<4x8x8xf32> to vector<1x8x8xf32>
    %795 = vector.shape_cast %794 : vector<1x8x8xf32> to vector<8x8xf32>
    %796 = vector.extract_strided_slice %730 {offsets = [3, 0, 0], sizes = [1, 8, 32], strides = [1, 1, 1]} : vector<4x8x32xf32> to vector<1x8x32xf32>
    %797 = vector.shape_cast %796 : vector<1x8x32xf32> to vector<8x32xf32>
    %cst_368 = arith.constant dense<0.000000e+00> : vector<8x32xf32>
    %798 = tpu.matmul %795, %797, %cst_368 {dimension_numbers = #tpu.dot_dimension_numbers<[1], [0], [0], [1], [0, 0, 1, 1], [], []>} : vector<8x8xf32>, vector<8x32xf32>, vector<8x32xf32> -> vector<8x32xf32>
    %799 = arith.addf %793, %798 : vector<8x32xf32>
    %800 = vector.extract_strided_slice %724 {offsets = [8, 0], sizes = [8, 32], strides = [1, 1]} : vector<16x32xf32> to vector<8x32xf32>
    %801 = vector.shape_cast %800 : vector<8x32xf32> to vector<1x8x32xf32>
    %802 = vector.broadcast %801 : vector<1x8x32xf32> to vector<4x8x32xf32>
    "tpu.trace_start"() <{level = 10 : i32, message = "hnf,hfe->hne"}> : () -> ()
    %cst_369 = arith.constant dense<0.000000e+00> : vector<4x8x24xf32>
    %803 = tpu.matmul %802, %726, %cst_369 {dimension_numbers = #tpu.dot_dimension_numbers<[2], [1], [1], [2], [0, 0, 0, 1, 1, 2], [0], [0]>} : vector<4x8x32xf32>, vector<4x32x24xf32>, vector<4x8x24xf32> -> vector<4x8x24xf32>
    "tpu.trace_stop"() : () -> ()
    %804 = vector.broadcast %728 : vector<4x1x24xf32> to vector<4x8x24xf32>
    %805 = arith.addf %803, %804 : vector<4x8x24xf32>
    %806 = vector.extract_strided_slice %805 {offsets = [0, 0, 0], sizes = [4, 8, 8], strides = [1, 1, 1]} : vector<4x8x24xf32> to vector<4x8x8xf32>
    %cst_370 = arith.constant 0.353553385 : f32
    %807 = vector.broadcast %cst_370 : f32 to vector<4x8x8xf32>
    %808 = arith.mulf %806, %807 : vector<4x8x8xf32>
    %809 = vector.extract_strided_slice %805 {offsets = [0, 0, 8], sizes = [4, 8, 8], strides = [1, 1, 1]} : vector<4x8x24xf32> to vector<4x8x8xf32>
    %810 = vector.extract_strided_slice %805 {offsets = [0, 0, 16], sizes = [4, 8, 8], strides = [1, 1, 1]} : vector<4x8x24xf32> to vector<4x8x8xf32>
    "tpu.trace_start"() <{level = 10 : i32, message = "hqd,hkd->hqk"}> : () -> ()
    %cst_371 = arith.constant dense<0.000000e+00> : vector<4x8x8xf32>
    %811 = tpu.matmul %808, %809, %cst_371 {dimension_numbers = #tpu.dot_dimension_numbers<[2], [2], [1], [1], [0, 0, 0, 1, 1, 1], [0], [0]>} : vector<4x8x8xf32>, vector<4x8x8xf32>, vector<4x8x8xf32> -> vector<4x8x8xf32>
    "tpu.trace_stop"() : () -> ()
    %c1_372 = arith.constant 1 : index
    %c0_373 = arith.constant 0 : index
    %c0_374 = arith.constant 0 : index
    %c0_375 = arith.constant 0 : index
    %812 = vector.load %arg1[%c1_372, %c0_373, %c0_374, %c0_375] : memref<2x4x8x8xf32, #tpu.memory_space<vmem>>, vector<1x4x8x8xf32>
    %813 = vector.shape_cast %812 : vector<1x4x8x8xf32> to vector<4x8x8xf32>
    %814 = arith.addf %811, %813 : vector<4x8x8xf32>
    %cst_376 = arith.constant dense<0xFF800000> : vector<4x8xf32>
    %815 = vector.multi_reduction <maximumf>, %814, %cst_376 [2] : vector<4x8x8xf32> to vector<4x8xf32>
    %816 = vector.shape_cast %815 : vector<4x8xf32> to vector<4x8x1xf32>
    %817 = vector.broadcast %816 : vector<4x8x1xf32> to vector<4x8x8xf32>
    %818 = arith.subf %814, %817 : vector<4x8x8xf32>
    %819 = math.exp %818 : vector<4x8x8xf32>
    %cst_377 = arith.constant dense<0.000000e+00> : vector<4x8xf32>
    %820 = vector.multi_reduction <add>, %819, %cst_377 [2] : vector<4x8x8xf32> to vector<4x8xf32>
    %821 = vector.shape_cast %820 : vector<4x8xf32> to vector<4x8x1xf32>
    %822 = tpu.reciprocal %821 {approx = true} : vector<4x8x1xf32> -> vector<4x8x1xf32>
    %823 = vector.broadcast %822 : vector<4x8x1xf32> to vector<4x8x8xf32>
    %824 = arith.mulf %819, %823 : vector<4x8x8xf32>
    "tpu.trace_start"() <{level = 10 : i32, message = "hqk,hkd->hqd"}> : () -> ()
    %cst_378 = arith.constant dense<0.000000e+00> : vector<4x8x8xf32>
    %825 = tpu.matmul %824, %810, %cst_378 {dimension_numbers = #tpu.dot_dimension_numbers<[2], [1], [1], [2], [0, 0, 0, 1, 1, 2], [0], [0]>} : vector<4x8x8xf32>, vector<4x8x8xf32>, vector<4x8x8xf32> -> vector<4x8x8xf32>
    "tpu.trace_stop"() : () -> ()
    %826 = vector.extract_strided_slice %825 {offsets = [0, 0, 0], sizes = [1, 8, 8], strides = [1, 1, 1]} : vector<4x8x8xf32> to vector<1x8x8xf32>
    %827 = vector.shape_cast %826 : vector<1x8x8xf32> to vector<8x8xf32>
    %828 = vector.extract_strided_slice %730 {offsets = [0, 0, 0], sizes = [1, 8, 32], strides = [1, 1, 1]} : vector<4x8x32xf32> to vector<1x8x32xf32>
    %829 = vector.shape_cast %828 : vector<1x8x32xf32> to vector<8x32xf32>
    %cst_379 = arith.constant dense<0.000000e+00> : vector<8x32xf32>
    %830 = tpu.matmul %827, %829, %cst_379 {dimension_numbers = #tpu.dot_dimension_numbers<[1], [0], [0], [1], [0, 0, 1, 1], [], []>} : vector<8x8xf32>, vector<8x32xf32>, vector<8x32xf32> -> vector<8x32xf32>
    %831 = vector.broadcast %732 : vector<1x32xf32> to vector<8x32xf32>
    %832 = arith.addf %831, %830 : vector<8x32xf32>
    %833 = vector.extract_strided_slice %825 {offsets = [1, 0, 0], sizes = [1, 8, 8], strides = [1, 1, 1]} : vector<4x8x8xf32> to vector<1x8x8xf32>
    %834 = vector.shape_cast %833 : vector<1x8x8xf32> to vector<8x8xf32>
    %835 = vector.extract_strided_slice %730 {offsets = [1, 0, 0], sizes = [1, 8, 32], strides = [1, 1, 1]} : vector<4x8x32xf32> to vector<1x8x32xf32>
    %836 = vector.shape_cast %835 : vector<1x8x32xf32> to vector<8x32xf32>
    %cst_380 = arith.constant dense<0.000000e+00> : vector<8x32xf32>
    %837 = tpu.matmul %834, %836, %cst_380 {dimension_numbers = #tpu.dot_dimension_numbers<[1], [0], [0], [1], [0, 0, 1, 1], [], []>} : vector<8x8xf32>, vector<8x32xf32>, vector<8x32xf32> -> vector<8x32xf32>
    %838 = arith.addf %832, %837 : vector<8x32xf32>
    %839 = vector.extract_strided_slice %825 {offsets = [2, 0, 0], sizes = [1, 8, 8], strides = [1, 1, 1]} : vector<4x8x8xf32> to vector<1x8x8xf32>
    %840 = vector.shape_cast %839 : vector<1x8x8xf32> to vector<8x8xf32>
    %841 = vector.extract_strided_slice %730 {offsets = [2, 0, 0], sizes = [1, 8, 32], strides = [1, 1, 1]} : vector<4x8x32xf32> to vector<1x8x32xf32>
    %842 = vector.shape_cast %841 : vector<1x8x32xf32> to vector<8x32xf32>
    %cst_381 = arith.constant dense<0.000000e+00> : vector<8x32xf32>
    %843 = tpu.matmul %840, %842, %cst_381 {dimension_numbers = #tpu.dot_dimension_numbers<[1], [0], [0], [1], [0, 0, 1, 1], [], []>} : vector<8x8xf32>, vector<8x32xf32>, vector<8x32xf32> -> vector<8x32xf32>
    %844 = arith.addf %838, %843 : vector<8x32xf32>
    %845 = vector.extract_strided_slice %825 {offsets = [3, 0, 0], sizes = [1, 8, 8], strides = [1, 1, 1]} : vector<4x8x8xf32> to vector<1x8x8xf32>
    %846 = vector.shape_cast %845 : vector<1x8x8xf32> to vector<8x8xf32>
    %847 = vector.extract_strided_slice %730 {offsets = [3, 0, 0], sizes = [1, 8, 32], strides = [1, 1, 1]} : vector<4x8x32xf32> to vector<1x8x32xf32>
    %848 = vector.shape_cast %847 : vector<1x8x32xf32> to vector<8x32xf32>
    %cst_382 = arith.constant dense<0.000000e+00> : vector<8x32xf32>
    %849 = tpu.matmul %846, %848, %cst_382 {dimension_numbers = #tpu.dot_dimension_numbers<[1], [0], [0], [1], [0, 0, 1, 1], [], []>} : vector<8x8xf32>, vector<8x32xf32>, vector<8x32xf32> -> vector<8x32xf32>
    %850 = arith.addf %844, %849 : vector<8x32xf32>
    %851 = tpu.concatenate %799, %850 in 0 : vector<8x32xf32>, vector<8x32xf32> -> vector<16x32xf32>
    %852 = arith.addf %724, %851 : vector<16x32xf32>
    %cst_383 = arith.constant dense<0.000000e+00> : vector<16xf32>
    %853 = vector.multi_reduction <add>, %852, %cst_383 [1] : vector<16x32xf32> to vector<16xf32>
    %854 = vector.shape_cast %853 : vector<16xf32> to vector<16x1xf32>
    %cst_384 = arith.constant 3.200000e+01 : f32
    %855 = vector.broadcast %cst_384 : f32 to vector<16x1xf32>
    %856 = arith.divf %854, %855 : vector<16x1xf32>
    %857 = vector.broadcast %856 : vector<16x1xf32> to vector<16x32xf32>
    %858 = arith.subf %852, %857 : vector<16x32xf32>
    %859 = arith.mulf %858, %858 : vector<16x32xf32>
    %cst_385 = arith.constant dense<0.000000e+00> : vector<16xf32>
    %860 = vector.multi_reduction <add>, %859, %cst_385 [1] : vector<16x32xf32> to vector<16xf32>
    %861 = vector.shape_cast %860 : vector<16xf32> to vector<16x1xf32>
    %cst_386 = arith.constant 3.200000e+01 : f32
    %862 = vector.broadcast %cst_386 : f32 to vector<16x1xf32>
    %863 = arith.divf %861, %862 : vector<16x1xf32>
    %864 = vector.broadcast %856 : vector<16x1xf32> to vector<16x32xf32>
    %865 = arith.subf %852, %864 : vector<16x32xf32>
    %cst_387 = arith.constant 9.99999974E-6 : f32
    %866 = vector.broadcast %cst_387 : f32 to vector<16x1xf32>
    %867 = arith.addf %863, %866 : vector<16x1xf32>
    %868 = math.rsqrt %867 : vector<16x1xf32>
    %869 = vector.broadcast %868 : vector<16x1xf32> to vector<16x32xf32>
    %870 = arith.mulf %865, %869 : vector<16x32xf32>
    %871 = vector.broadcast %742 : vector<1x32xf32> to vector<16x32xf32>
    %872 = arith.mulf %870, %871 : vector<16x32xf32>
    %873 = vector.broadcast %744 : vector<1x32xf32> to vector<16x32xf32>
    %874 = arith.addf %872, %873 : vector<16x32xf32>
    %cst_388 = arith.constant dense<0.000000e+00> : vector<16x64xf32>
    %875 = tpu.matmul %874, %734, %cst_388 {dimension_numbers = #tpu.dot_dimension_numbers<[1], [0], [0], [1], [0, 0, 1, 1], [], []>} : vector<16x32xf32>, vector<32x64xf32>, vector<16x64xf32> -> vector<16x64xf32>
    %876 = vector.broadcast %736 : vector<1x64xf32> to vector<16x64xf32>
    %877 = arith.addf %875, %876 : vector<16x64xf32>
    %cst_389 = arith.constant 0.000000e+00 : f32
    %878 = vector.broadcast %cst_389 : f32 to vector<16x64xf32>
    %879 = arith.maximumf %877, %878 : vector<16x64xf32>
    %cst_390 = arith.constant dense<0.000000e+00> : vector<16x32xf32>
    %880 = tpu.matmul %879, %738, %cst_390 {dimension_numbers = #tpu.dot_dimension_numbers<[1], [0], [0], [1], [0, 0, 1, 1], [], []>} : vector<16x64xf32>, vector<64x32xf32>, vector<16x32xf32> -> vector<16x32xf32>
    %881 = vector.broadcast %740 : vector<1x32xf32> to vector<16x32xf32>
    %882 = arith.addf %880, %881 : vector<16x32xf32>
    %883 = arith.addf %874, %882 : vector<16x32xf32>
    %cst_391 = arith.constant dense<0.000000e+00> : vector<16xf32>
    %884 = vector.multi_reduction <add>, %883, %cst_391 [1] : vector<16x32xf32> to vector<16xf32>
    %885 = vector.shape_cast %884 : vector<16xf32> to vector<16x1xf32>
    %cst_392 = arith.constant 3.200000e+01 : f32
    %886 = vector.broadcast %cst_392 : f32 to vector<16x1xf32>
    %887 = arith.divf %885, %886 : vector<16x1xf32>
    %888 = vector.broadcast %887 : vector<16x1xf32> to vector<16x32xf32>
    %889 = arith.subf %883, %888 : vector<16x32xf32>
    %890 = arith.mulf %889, %889 : vector<16x32xf32>
    %cst_393 = arith.constant dense<0.000000e+00> : vector<16xf32>
    %891 = vector.multi_reduction <add>, %890, %cst_393 [1] : vector<16x32xf32> to vector<16xf32>
    %892 = vector.shape_cast %891 : vector<16xf32> to vector<16x1xf32>
    %cst_394 = arith.constant 3.200000e+01 : f32
    %893 = vector.broadcast %cst_394 : f32 to vector<16x1xf32>
    %894 = arith.divf %892, %893 : vector<16x1xf32>
    %895 = vector.broadcast %887 : vector<16x1xf32> to vector<16x32xf32>
    %896 = arith.subf %883, %895 : vector<16x32xf32>
    %cst_395 = arith.constant 9.99999974E-6 : f32
    %897 = vector.broadcast %cst_395 : f32 to vector<16x1xf32>
    %898 = arith.addf %894, %897 : vector<16x1xf32>
    %899 = math.rsqrt %898 : vector<16x1xf32>
    %900 = vector.broadcast %899 : vector<16x1xf32> to vector<16x32xf32>
    %901 = arith.mulf %896, %900 : vector<16x32xf32>
    %902 = vector.broadcast %746 : vector<1x32xf32> to vector<16x32xf32>
    %903 = arith.mulf %901, %902 : vector<16x32xf32>
    %904 = vector.broadcast %748 : vector<1x32xf32> to vector<16x32xf32>
    %905 = arith.addf %903, %904 : vector<16x32xf32>
    %c5 = arith.constant 5 : index
    %c0_396 = arith.constant 0 : index
    %c0_397 = arith.constant 0 : index
    %c0_398 = arith.constant 0 : index
    %906 = vector.load %arg3[%c5, %c0_396, %c0_397, %c0_398] : memref<6x4x32x24xf32, #tpu.memory_space<vmem>>, vector<1x4x32x24xf32>
    %907 = vector.shape_cast %906 : vector<1x4x32x24xf32> to vector<4x32x24xf32>
    %c5_399 = arith.constant 5 : index
    %c0_400 = arith.constant 0 : index
    %c0_401 = arith.constant 0 : index
    %c0_402 = arith.constant 0 : index
    %908 = vector.load %arg4[%c5_399, %c0_400, %c0_401, %c0_402] : memref<6x4x1x24xf32, #tpu.memory_space<vmem>>, vector<1x4x1x24xf32>
    %909 = vector.shape_cast %908 : vector<1x4x1x24xf32> to vector<4x1x24xf32>
    %c5_403 = arith.constant 5 : index
    %c0_404 = arith.constant 0 : index
    %c0_405 = arith.constant 0 : index
    %c0_406 = arith.constant 0 : index
    %910 = vector.load %arg5[%c5_403, %c0_404, %c0_405, %c0_406] : memref<6x4x8x32xf32, #tpu.memory_space<vmem>>, vector<1x4x8x32xf32>
    %911 = vector.shape_cast %910 : vector<1x4x8x32xf32> to vector<4x8x32xf32>
    %c5_407 = arith.constant 5 : index
    %c0_408 = arith.constant 0 : index
    %c0_409 = arith.constant 0 : index
    %912 = vector.load %arg6[%c5_407, %c0_408, %c0_409] : memref<6x1x32xf32, #tpu.memory_space<vmem>>, vector<1x1x32xf32>
    %913 = vector.shape_cast %912 : vector<1x1x32xf32> to vector<1x32xf32>
    %c5_410 = arith.constant 5 : index
    %c0_411 = arith.constant 0 : index
    %c0_412 = arith.constant 0 : index
    %914 = vector.load %arg7[%c5_410, %c0_411, %c0_412] : memref<6x32x64xf32, #tpu.memory_space<vmem>>, vector<1x32x64xf32>
    %915 = vector.shape_cast %914 : vector<1x32x64xf32> to vector<32x64xf32>
    %c5_413 = arith.constant 5 : index
    %c0_414 = arith.constant 0 : index
    %c0_415 = arith.constant 0 : index
    %916 = vector.load %arg8[%c5_413, %c0_414, %c0_415] : memref<6x1x64xf32, #tpu.memory_space<vmem>>, vector<1x1x64xf32>
    %917 = vector.shape_cast %916 : vector<1x1x64xf32> to vector<1x64xf32>
    %c5_416 = arith.constant 5 : index
    %c0_417 = arith.constant 0 : index
    %c0_418 = arith.constant 0 : index
    %918 = vector.load %arg9[%c5_416, %c0_417, %c0_418] : memref<6x64x32xf32, #tpu.memory_space<vmem>>, vector<1x64x32xf32>
    %919 = vector.shape_cast %918 : vector<1x64x32xf32> to vector<64x32xf32>
    %c5_419 = arith.constant 5 : index
    %c0_420 = arith.constant 0 : index
    %c0_421 = arith.constant 0 : index
    %920 = vector.load %arg10[%c5_419, %c0_420, %c0_421] : memref<6x1x32xf32, #tpu.memory_space<vmem>>, vector<1x1x32xf32>
    %921 = vector.shape_cast %920 : vector<1x1x32xf32> to vector<1x32xf32>
    %c5_422 = arith.constant 5 : index
    %c0_423 = arith.constant 0 : index
    %c0_424 = arith.constant 0 : index
    %922 = vector.load %arg11[%c5_422, %c0_423, %c0_424] : memref<6x1x32xf32, #tpu.memory_space<vmem>>, vector<1x1x32xf32>
    %923 = vector.shape_cast %922 : vector<1x1x32xf32> to vector<1x32xf32>
    %c5_425 = arith.constant 5 : index
    %c0_426 = arith.constant 0 : index
    %c0_427 = arith.constant 0 : index
    %924 = vector.load %arg12[%c5_425, %c0_426, %c0_427] : memref<6x1x32xf32, #tpu.memory_space<vmem>>, vector<1x1x32xf32>
    %925 = vector.shape_cast %924 : vector<1x1x32xf32> to vector<1x32xf32>
    %c5_428 = arith.constant 5 : index
    %c0_429 = arith.constant 0 : index
    %c0_430 = arith.constant 0 : index
    %926 = vector.load %arg13[%c5_428, %c0_429, %c0_430] : memref<6x1x32xf32, #tpu.memory_space<vmem>>, vector<1x1x32xf32>
    %927 = vector.shape_cast %926 : vector<1x1x32xf32> to vector<1x32xf32>
    %c5_431 = arith.constant 5 : index
    %c0_432 = arith.constant 0 : index
    %c0_433 = arith.constant 0 : index
    %928 = vector.load %arg14[%c5_431, %c0_432, %c0_433] : memref<6x1x32xf32, #tpu.memory_space<vmem>>, vector<1x1x32xf32>
    %929 = vector.shape_cast %928 : vector<1x1x32xf32> to vector<1x32xf32>
    %930 = vector.extract_strided_slice %905 {offsets = [0, 0], sizes = [8, 32], strides = [1, 1]} : vector<16x32xf32> to vector<8x32xf32>
    %931 = vector.shape_cast %930 : vector<8x32xf32> to vector<1x8x32xf32>
    %932 = vector.broadcast %931 : vector<1x8x32xf32> to vector<4x8x32xf32>
    "tpu.trace_start"() <{level = 10 : i32, message = "hnf,hfe->hne"}> : () -> ()
    %cst_434 = arith.constant dense<0.000000e+00> : vector<4x8x24xf32>
    %933 = tpu.matmul %932, %907, %cst_434 {dimension_numbers = #tpu.dot_dimension_numbers<[2], [1], [1], [2], [0, 0, 0, 1, 1, 2], [0], [0]>} : vector<4x8x32xf32>, vector<4x32x24xf32>, vector<4x8x24xf32> -> vector<4x8x24xf32>
    "tpu.trace_stop"() : () -> ()
    %934 = vector.broadcast %909 : vector<4x1x24xf32> to vector<4x8x24xf32>
    %935 = arith.addf %933, %934 : vector<4x8x24xf32>
    %936 = vector.extract_strided_slice %935 {offsets = [0, 0, 0], sizes = [4, 8, 8], strides = [1, 1, 1]} : vector<4x8x24xf32> to vector<4x8x8xf32>
    %cst_435 = arith.constant 0.353553385 : f32
    %937 = vector.broadcast %cst_435 : f32 to vector<4x8x8xf32>
    %938 = arith.mulf %936, %937 : vector<4x8x8xf32>
    %939 = vector.extract_strided_slice %935 {offsets = [0, 0, 8], sizes = [4, 8, 8], strides = [1, 1, 1]} : vector<4x8x24xf32> to vector<4x8x8xf32>
    %940 = vector.extract_strided_slice %935 {offsets = [0, 0, 16], sizes = [4, 8, 8], strides = [1, 1, 1]} : vector<4x8x24xf32> to vector<4x8x8xf32>
    "tpu.trace_start"() <{level = 10 : i32, message = "hqd,hkd->hqk"}> : () -> ()
    %cst_436 = arith.constant dense<0.000000e+00> : vector<4x8x8xf32>
    %941 = tpu.matmul %938, %939, %cst_436 {dimension_numbers = #tpu.dot_dimension_numbers<[2], [2], [1], [1], [0, 0, 0, 1, 1, 1], [0], [0]>} : vector<4x8x8xf32>, vector<4x8x8xf32>, vector<4x8x8xf32> -> vector<4x8x8xf32>
    "tpu.trace_stop"() : () -> ()
    %c0_437 = arith.constant 0 : index
    %c0_438 = arith.constant 0 : index
    %c0_439 = arith.constant 0 : index
    %c0_440 = arith.constant 0 : index
    %942 = vector.load %arg1[%c0_437, %c0_438, %c0_439, %c0_440] : memref<2x4x8x8xf32, #tpu.memory_space<vmem>>, vector<1x4x8x8xf32>
    %943 = vector.shape_cast %942 : vector<1x4x8x8xf32> to vector<4x8x8xf32>
    %944 = arith.addf %941, %943 : vector<4x8x8xf32>
    %cst_441 = arith.constant dense<0xFF800000> : vector<4x8xf32>
    %945 = vector.multi_reduction <maximumf>, %944, %cst_441 [2] : vector<4x8x8xf32> to vector<4x8xf32>
    %946 = vector.shape_cast %945 : vector<4x8xf32> to vector<4x8x1xf32>
    %947 = vector.broadcast %946 : vector<4x8x1xf32> to vector<4x8x8xf32>
    %948 = arith.subf %944, %947 : vector<4x8x8xf32>
    %949 = math.exp %948 : vector<4x8x8xf32>
    %cst_442 = arith.constant dense<0.000000e+00> : vector<4x8xf32>
    %950 = vector.multi_reduction <add>, %949, %cst_442 [2] : vector<4x8x8xf32> to vector<4x8xf32>
    %951 = vector.shape_cast %950 : vector<4x8xf32> to vector<4x8x1xf32>
    %952 = tpu.reciprocal %951 {approx = true} : vector<4x8x1xf32> -> vector<4x8x1xf32>
    %953 = vector.broadcast %952 : vector<4x8x1xf32> to vector<4x8x8xf32>
    %954 = arith.mulf %949, %953 : vector<4x8x8xf32>
    "tpu.trace_start"() <{level = 10 : i32, message = "hqk,hkd->hqd"}> : () -> ()
    %cst_443 = arith.constant dense<0.000000e+00> : vector<4x8x8xf32>
    %955 = tpu.matmul %954, %940, %cst_443 {dimension_numbers = #tpu.dot_dimension_numbers<[2], [1], [1], [2], [0, 0, 0, 1, 1, 2], [0], [0]>} : vector<4x8x8xf32>, vector<4x8x8xf32>, vector<4x8x8xf32> -> vector<4x8x8xf32>
    "tpu.trace_stop"() : () -> ()
    %956 = vector.extract_strided_slice %955 {offsets = [0, 0, 0], sizes = [1, 8, 8], strides = [1, 1, 1]} : vector<4x8x8xf32> to vector<1x8x8xf32>
    %957 = vector.shape_cast %956 : vector<1x8x8xf32> to vector<8x8xf32>
    %958 = vector.extract_strided_slice %911 {offsets = [0, 0, 0], sizes = [1, 8, 32], strides = [1, 1, 1]} : vector<4x8x32xf32> to vector<1x8x32xf32>
    %959 = vector.shape_cast %958 : vector<1x8x32xf32> to vector<8x32xf32>
    %cst_444 = arith.constant dense<0.000000e+00> : vector<8x32xf32>
    %960 = tpu.matmul %957, %959, %cst_444 {dimension_numbers = #tpu.dot_dimension_numbers<[1], [0], [0], [1], [0, 0, 1, 1], [], []>} : vector<8x8xf32>, vector<8x32xf32>, vector<8x32xf32> -> vector<8x32xf32>
    %961 = vector.broadcast %913 : vector<1x32xf32> to vector<8x32xf32>
    %962 = arith.addf %961, %960 : vector<8x32xf32>
    %963 = vector.extract_strided_slice %955 {offsets = [1, 0, 0], sizes = [1, 8, 8], strides = [1, 1, 1]} : vector<4x8x8xf32> to vector<1x8x8xf32>
    %964 = vector.shape_cast %963 : vector<1x8x8xf32> to vector<8x8xf32>
    %965 = vector.extract_strided_slice %911 {offsets = [1, 0, 0], sizes = [1, 8, 32], strides = [1, 1, 1]} : vector<4x8x32xf32> to vector<1x8x32xf32>
    %966 = vector.shape_cast %965 : vector<1x8x32xf32> to vector<8x32xf32>
    %cst_445 = arith.constant dense<0.000000e+00> : vector<8x32xf32>
    %967 = tpu.matmul %964, %966, %cst_445 {dimension_numbers = #tpu.dot_dimension_numbers<[1], [0], [0], [1], [0, 0, 1, 1], [], []>} : vector<8x8xf32>, vector<8x32xf32>, vector<8x32xf32> -> vector<8x32xf32>
    %968 = arith.addf %962, %967 : vector<8x32xf32>
    %969 = vector.extract_strided_slice %955 {offsets = [2, 0, 0], sizes = [1, 8, 8], strides = [1, 1, 1]} : vector<4x8x8xf32> to vector<1x8x8xf32>
    %970 = vector.shape_cast %969 : vector<1x8x8xf32> to vector<8x8xf32>
    %971 = vector.extract_strided_slice %911 {offsets = [2, 0, 0], sizes = [1, 8, 32], strides = [1, 1, 1]} : vector<4x8x32xf32> to vector<1x8x32xf32>
    %972 = vector.shape_cast %971 : vector<1x8x32xf32> to vector<8x32xf32>
    %cst_446 = arith.constant dense<0.000000e+00> : vector<8x32xf32>
    %973 = tpu.matmul %970, %972, %cst_446 {dimension_numbers = #tpu.dot_dimension_numbers<[1], [0], [0], [1], [0, 0, 1, 1], [], []>} : vector<8x8xf32>, vector<8x32xf32>, vector<8x32xf32> -> vector<8x32xf32>
    %974 = arith.addf %968, %973 : vector<8x32xf32>
    %975 = vector.extract_strided_slice %955 {offsets = [3, 0, 0], sizes = [1, 8, 8], strides = [1, 1, 1]} : vector<4x8x8xf32> to vector<1x8x8xf32>
    %976 = vector.shape_cast %975 : vector<1x8x8xf32> to vector<8x8xf32>
    %977 = vector.extract_strided_slice %911 {offsets = [3, 0, 0], sizes = [1, 8, 32], strides = [1, 1, 1]} : vector<4x8x32xf32> to vector<1x8x32xf32>
    %978 = vector.shape_cast %977 : vector<1x8x32xf32> to vector<8x32xf32>
    %cst_447 = arith.constant dense<0.000000e+00> : vector<8x32xf32>
    %979 = tpu.matmul %976, %978, %cst_447 {dimension_numbers = #tpu.dot_dimension_numbers<[1], [0], [0], [1], [0, 0, 1, 1], [], []>} : vector<8x8xf32>, vector<8x32xf32>, vector<8x32xf32> -> vector<8x32xf32>
    %980 = arith.addf %974, %979 : vector<8x32xf32>
    %981 = vector.extract_strided_slice %905 {offsets = [8, 0], sizes = [8, 32], strides = [1, 1]} : vector<16x32xf32> to vector<8x32xf32>
    %982 = vector.shape_cast %981 : vector<8x32xf32> to vector<1x8x32xf32>
    %983 = vector.broadcast %982 : vector<1x8x32xf32> to vector<4x8x32xf32>
    "tpu.trace_start"() <{level = 10 : i32, message = "hnf,hfe->hne"}> : () -> ()
    %cst_448 = arith.constant dense<0.000000e+00> : vector<4x8x24xf32>
    %984 = tpu.matmul %983, %907, %cst_448 {dimension_numbers = #tpu.dot_dimension_numbers<[2], [1], [1], [2], [0, 0, 0, 1, 1, 2], [0], [0]>} : vector<4x8x32xf32>, vector<4x32x24xf32>, vector<4x8x24xf32> -> vector<4x8x24xf32>
    "tpu.trace_stop"() : () -> ()
    %985 = vector.broadcast %909 : vector<4x1x24xf32> to vector<4x8x24xf32>
    %986 = arith.addf %984, %985 : vector<4x8x24xf32>
    %987 = vector.extract_strided_slice %986 {offsets = [0, 0, 0], sizes = [4, 8, 8], strides = [1, 1, 1]} : vector<4x8x24xf32> to vector<4x8x8xf32>
    %cst_449 = arith.constant 0.353553385 : f32
    %988 = vector.broadcast %cst_449 : f32 to vector<4x8x8xf32>
    %989 = arith.mulf %987, %988 : vector<4x8x8xf32>
    %990 = vector.extract_strided_slice %986 {offsets = [0, 0, 8], sizes = [4, 8, 8], strides = [1, 1, 1]} : vector<4x8x24xf32> to vector<4x8x8xf32>
    %991 = vector.extract_strided_slice %986 {offsets = [0, 0, 16], sizes = [4, 8, 8], strides = [1, 1, 1]} : vector<4x8x24xf32> to vector<4x8x8xf32>
    "tpu.trace_start"() <{level = 10 : i32, message = "hqd,hkd->hqk"}> : () -> ()
    %cst_450 = arith.constant dense<0.000000e+00> : vector<4x8x8xf32>
    %992 = tpu.matmul %989, %990, %cst_450 {dimension_numbers = #tpu.dot_dimension_numbers<[2], [2], [1], [1], [0, 0, 0, 1, 1, 1], [0], [0]>} : vector<4x8x8xf32>, vector<4x8x8xf32>, vector<4x8x8xf32> -> vector<4x8x8xf32>
    "tpu.trace_stop"() : () -> ()
    %c1_451 = arith.constant 1 : index
    %c0_452 = arith.constant 0 : index
    %c0_453 = arith.constant 0 : index
    %c0_454 = arith.constant 0 : index
    %993 = vector.load %arg1[%c1_451, %c0_452, %c0_453, %c0_454] : memref<2x4x8x8xf32, #tpu.memory_space<vmem>>, vector<1x4x8x8xf32>
    %994 = vector.shape_cast %993 : vector<1x4x8x8xf32> to vector<4x8x8xf32>
    %995 = arith.addf %992, %994 : vector<4x8x8xf32>
    %cst_455 = arith.constant dense<0xFF800000> : vector<4x8xf32>
    %996 = vector.multi_reduction <maximumf>, %995, %cst_455 [2] : vector<4x8x8xf32> to vector<4x8xf32>
    %997 = vector.shape_cast %996 : vector<4x8xf32> to vector<4x8x1xf32>
    %998 = vector.broadcast %997 : vector<4x8x1xf32> to vector<4x8x8xf32>
    %999 = arith.subf %995, %998 : vector<4x8x8xf32>
    %1000 = math.exp %999 : vector<4x8x8xf32>
    %cst_456 = arith.constant dense<0.000000e+00> : vector<4x8xf32>
    %1001 = vector.multi_reduction <add>, %1000, %cst_456 [2] : vector<4x8x8xf32> to vector<4x8xf32>
    %1002 = vector.shape_cast %1001 : vector<4x8xf32> to vector<4x8x1xf32>
    %1003 = tpu.reciprocal %1002 {approx = true} : vector<4x8x1xf32> -> vector<4x8x1xf32>
    %1004 = vector.broadcast %1003 : vector<4x8x1xf32> to vector<4x8x8xf32>
    %1005 = arith.mulf %1000, %1004 : vector<4x8x8xf32>
    "tpu.trace_start"() <{level = 10 : i32, message = "hqk,hkd->hqd"}> : () -> ()
    %cst_457 = arith.constant dense<0.000000e+00> : vector<4x8x8xf32>
    %1006 = tpu.matmul %1005, %991, %cst_457 {dimension_numbers = #tpu.dot_dimension_numbers<[2], [1], [1], [2], [0, 0, 0, 1, 1, 2], [0], [0]>} : vector<4x8x8xf32>, vector<4x8x8xf32>, vector<4x8x8xf32> -> vector<4x8x8xf32>
    "tpu.trace_stop"() : () -> ()
    %1007 = vector.extract_strided_slice %1006 {offsets = [0, 0, 0], sizes = [1, 8, 8], strides = [1, 1, 1]} : vector<4x8x8xf32> to vector<1x8x8xf32>
    %1008 = vector.shape_cast %1007 : vector<1x8x8xf32> to vector<8x8xf32>
    %1009 = vector.extract_strided_slice %911 {offsets = [0, 0, 0], sizes = [1, 8, 32], strides = [1, 1, 1]} : vector<4x8x32xf32> to vector<1x8x32xf32>
    %1010 = vector.shape_cast %1009 : vector<1x8x32xf32> to vector<8x32xf32>
    %cst_458 = arith.constant dense<0.000000e+00> : vector<8x32xf32>
    %1011 = tpu.matmul %1008, %1010, %cst_458 {dimension_numbers = #tpu.dot_dimension_numbers<[1], [0], [0], [1], [0, 0, 1, 1], [], []>} : vector<8x8xf32>, vector<8x32xf32>, vector<8x32xf32> -> vector<8x32xf32>
    %1012 = vector.broadcast %913 : vector<1x32xf32> to vector<8x32xf32>
    %1013 = arith.addf %1012, %1011 : vector<8x32xf32>
    %1014 = vector.extract_strided_slice %1006 {offsets = [1, 0, 0], sizes = [1, 8, 8], strides = [1, 1, 1]} : vector<4x8x8xf32> to vector<1x8x8xf32>
    %1015 = vector.shape_cast %1014 : vector<1x8x8xf32> to vector<8x8xf32>
    %1016 = vector.extract_strided_slice %911 {offsets = [1, 0, 0], sizes = [1, 8, 32], strides = [1, 1, 1]} : vector<4x8x32xf32> to vector<1x8x32xf32>
    %1017 = vector.shape_cast %1016 : vector<1x8x32xf32> to vector<8x32xf32>
    %cst_459 = arith.constant dense<0.000000e+00> : vector<8x32xf32>
    %1018 = tpu.matmul %1015, %1017, %cst_459 {dimension_numbers = #tpu.dot_dimension_numbers<[1], [0], [0], [1], [0, 0, 1, 1], [], []>} : vector<8x8xf32>, vector<8x32xf32>, vector<8x32xf32> -> vector<8x32xf32>
    %1019 = arith.addf %1013, %1018 : vector<8x32xf32>
    %1020 = vector.extract_strided_slice %1006 {offsets = [2, 0, 0], sizes = [1, 8, 8], strides = [1, 1, 1]} : vector<4x8x8xf32> to vector<1x8x8xf32>
    %1021 = vector.shape_cast %1020 : vector<1x8x8xf32> to vector<8x8xf32>
    %1022 = vector.extract_strided_slice %911 {offsets = [2, 0, 0], sizes = [1, 8, 32], strides = [1, 1, 1]} : vector<4x8x32xf32> to vector<1x8x32xf32>
    %1023 = vector.shape_cast %1022 : vector<1x8x32xf32> to vector<8x32xf32>
    %cst_460 = arith.constant dense<0.000000e+00> : vector<8x32xf32>
    %1024 = tpu.matmul %1021, %1023, %cst_460 {dimension_numbers = #tpu.dot_dimension_numbers<[1], [0], [0], [1], [0, 0, 1, 1], [], []>} : vector<8x8xf32>, vector<8x32xf32>, vector<8x32xf32> -> vector<8x32xf32>
    %1025 = arith.addf %1019, %1024 : vector<8x32xf32>
    %1026 = vector.extract_strided_slice %1006 {offsets = [3, 0, 0], sizes = [1, 8, 8], strides = [1, 1, 1]} : vector<4x8x8xf32> to vector<1x8x8xf32>
    %1027 = vector.shape_cast %1026 : vector<1x8x8xf32> to vector<8x8xf32>
    %1028 = vector.extract_strided_slice %911 {offsets = [3, 0, 0], sizes = [1, 8, 32], strides = [1, 1, 1]} : vector<4x8x32xf32> to vector<1x8x32xf32>
    %1029 = vector.shape_cast %1028 : vector<1x8x32xf32> to vector<8x32xf32>
    %cst_461 = arith.constant dense<0.000000e+00> : vector<8x32xf32>
    %1030 = tpu.matmul %1027, %1029, %cst_461 {dimension_numbers = #tpu.dot_dimension_numbers<[1], [0], [0], [1], [0, 0, 1, 1], [], []>} : vector<8x8xf32>, vector<8x32xf32>, vector<8x32xf32> -> vector<8x32xf32>
    %1031 = arith.addf %1025, %1030 : vector<8x32xf32>
    %1032 = tpu.concatenate %980, %1031 in 0 : vector<8x32xf32>, vector<8x32xf32> -> vector<16x32xf32>
    %1033 = arith.addf %905, %1032 : vector<16x32xf32>
    %cst_462 = arith.constant dense<0.000000e+00> : vector<16xf32>
    %1034 = vector.multi_reduction <add>, %1033, %cst_462 [1] : vector<16x32xf32> to vector<16xf32>
    %1035 = vector.shape_cast %1034 : vector<16xf32> to vector<16x1xf32>
    %cst_463 = arith.constant 3.200000e+01 : f32
    %1036 = vector.broadcast %cst_463 : f32 to vector<16x1xf32>
    %1037 = arith.divf %1035, %1036 : vector<16x1xf32>
    %1038 = vector.broadcast %1037 : vector<16x1xf32> to vector<16x32xf32>
    %1039 = arith.subf %1033, %1038 : vector<16x32xf32>
    %1040 = arith.mulf %1039, %1039 : vector<16x32xf32>
    %cst_464 = arith.constant dense<0.000000e+00> : vector<16xf32>
    %1041 = vector.multi_reduction <add>, %1040, %cst_464 [1] : vector<16x32xf32> to vector<16xf32>
    %1042 = vector.shape_cast %1041 : vector<16xf32> to vector<16x1xf32>
    %cst_465 = arith.constant 3.200000e+01 : f32
    %1043 = vector.broadcast %cst_465 : f32 to vector<16x1xf32>
    %1044 = arith.divf %1042, %1043 : vector<16x1xf32>
    %1045 = vector.broadcast %1037 : vector<16x1xf32> to vector<16x32xf32>
    %1046 = arith.subf %1033, %1045 : vector<16x32xf32>
    %cst_466 = arith.constant 9.99999974E-6 : f32
    %1047 = vector.broadcast %cst_466 : f32 to vector<16x1xf32>
    %1048 = arith.addf %1044, %1047 : vector<16x1xf32>
    %1049 = math.rsqrt %1048 : vector<16x1xf32>
    %1050 = vector.broadcast %1049 : vector<16x1xf32> to vector<16x32xf32>
    %1051 = arith.mulf %1046, %1050 : vector<16x32xf32>
    %1052 = vector.broadcast %923 : vector<1x32xf32> to vector<16x32xf32>
    %1053 = arith.mulf %1051, %1052 : vector<16x32xf32>
    %1054 = vector.broadcast %925 : vector<1x32xf32> to vector<16x32xf32>
    %1055 = arith.addf %1053, %1054 : vector<16x32xf32>
    %cst_467 = arith.constant dense<0.000000e+00> : vector<16x64xf32>
    %1056 = tpu.matmul %1055, %915, %cst_467 {dimension_numbers = #tpu.dot_dimension_numbers<[1], [0], [0], [1], [0, 0, 1, 1], [], []>} : vector<16x32xf32>, vector<32x64xf32>, vector<16x64xf32> -> vector<16x64xf32>
    %1057 = vector.broadcast %917 : vector<1x64xf32> to vector<16x64xf32>
    %1058 = arith.addf %1056, %1057 : vector<16x64xf32>
    %cst_468 = arith.constant 0.000000e+00 : f32
    %1059 = vector.broadcast %cst_468 : f32 to vector<16x64xf32>
    %1060 = arith.maximumf %1058, %1059 : vector<16x64xf32>
    %cst_469 = arith.constant dense<0.000000e+00> : vector<16x32xf32>
    %1061 = tpu.matmul %1060, %919, %cst_469 {dimension_numbers = #tpu.dot_dimension_numbers<[1], [0], [0], [1], [0, 0, 1, 1], [], []>} : vector<16x64xf32>, vector<64x32xf32>, vector<16x32xf32> -> vector<16x32xf32>
    %1062 = vector.broadcast %921 : vector<1x32xf32> to vector<16x32xf32>
    %1063 = arith.addf %1061, %1062 : vector<16x32xf32>
    %1064 = arith.addf %1055, %1063 : vector<16x32xf32>
    %cst_470 = arith.constant dense<0.000000e+00> : vector<16xf32>
    %1065 = vector.multi_reduction <add>, %1064, %cst_470 [1] : vector<16x32xf32> to vector<16xf32>
    %1066 = vector.shape_cast %1065 : vector<16xf32> to vector<16x1xf32>
    %cst_471 = arith.constant 3.200000e+01 : f32
    %1067 = vector.broadcast %cst_471 : f32 to vector<16x1xf32>
    %1068 = arith.divf %1066, %1067 : vector<16x1xf32>
    %1069 = vector.broadcast %1068 : vector<16x1xf32> to vector<16x32xf32>
    %1070 = arith.subf %1064, %1069 : vector<16x32xf32>
    %1071 = arith.mulf %1070, %1070 : vector<16x32xf32>
    %cst_472 = arith.constant dense<0.000000e+00> : vector<16xf32>
    %1072 = vector.multi_reduction <add>, %1071, %cst_472 [1] : vector<16x32xf32> to vector<16xf32>
    %1073 = vector.shape_cast %1072 : vector<16xf32> to vector<16x1xf32>
    %cst_473 = arith.constant 3.200000e+01 : f32
    %1074 = vector.broadcast %cst_473 : f32 to vector<16x1xf32>
    %1075 = arith.divf %1073, %1074 : vector<16x1xf32>
    %1076 = vector.broadcast %1068 : vector<16x1xf32> to vector<16x32xf32>
    %1077 = arith.subf %1064, %1076 : vector<16x32xf32>
    %cst_474 = arith.constant 9.99999974E-6 : f32
    %1078 = vector.broadcast %cst_474 : f32 to vector<16x1xf32>
    %1079 = arith.addf %1075, %1078 : vector<16x1xf32>
    %1080 = math.rsqrt %1079 : vector<16x1xf32>
    %1081 = vector.broadcast %1080 : vector<16x1xf32> to vector<16x32xf32>
    %1082 = arith.mulf %1077, %1081 : vector<16x32xf32>
    %1083 = vector.broadcast %927 : vector<1x32xf32> to vector<16x32xf32>
    %1084 = arith.mulf %1082, %1083 : vector<16x32xf32>
    %1085 = vector.broadcast %929 : vector<1x32xf32> to vector<16x32xf32>
    %1086 = arith.addf %1084, %1085 : vector<16x32xf32>
    %c0_475 = arith.constant 0 : index
    %c0_476 = arith.constant 0 : index
    %1087 = vector.load %arg2[%c0_475, %c0_476] : memref<16x1xf32, #tpu.memory_space<vmem>>, vector<16x1xf32>
    %1088 = vector.broadcast %1087 : vector<16x1xf32> to vector<16x32xf32>
    %1089 = arith.mulf %1086, %1088 : vector<16x32xf32>
    %1090 = vector.extract_strided_slice %1089 {offsets = [0, 0], sizes = [8, 32], strides = [1, 1]} : vector<16x32xf32> to vector<8x32xf32>
    %cst_477 = arith.constant dense<0.000000e+00> : vector<32xf32>
    %1091 = vector.multi_reduction <add>, %1090, %cst_477 [0] : vector<8x32xf32> to vector<32xf32>
    %1092 = vector.shape_cast %1091 : vector<32xf32> to vector<1x32xf32>
    %1093 = vector.extract_strided_slice %1089 {offsets = [8, 0], sizes = [8, 32], strides = [1, 1]} : vector<16x32xf32> to vector<8x32xf32>
    %cst_478 = arith.constant dense<0.000000e+00> : vector<32xf32>
    %1094 = vector.multi_reduction <add>, %1093, %cst_478 [0] : vector<8x32xf32> to vector<32xf32>
    %1095 = vector.shape_cast %1094 : vector<32xf32> to vector<1x32xf32>
    %1096 = tpu.concatenate %1092, %1095 in 0 : vector<1x32xf32>, vector<1x32xf32> -> vector<2x32xf32>
    %c0_479 = arith.constant 0 : index
    %c0_480 = arith.constant 0 : index
    %1097 = vector.load %arg15[%c0_479, %c0_480] : memref<32x1xf32, #tpu.memory_space<vmem>>, vector<32x1xf32>
    %cst_481 = arith.constant dense<0.000000e+00> : vector<2x1xf32>
    %1098 = tpu.matmul %1096, %1097, %cst_481 {dimension_numbers = #tpu.dot_dimension_numbers<[1], [0], [0], [1], [0, 0, 1, 1], [], []>} : vector<2x32xf32>, vector<32x1xf32>, vector<2x1xf32> -> vector<2x1xf32>
    %c0_482 = arith.constant 0 : index
    %c0_483 = arith.constant 0 : index
    %1099 = vector.load %arg16[%c0_482, %c0_483] : memref<1x1xf32, #tpu.memory_space<vmem>>, vector<1x1xf32>
    %1100 = vector.broadcast %1099 : vector<1x1xf32> to vector<2x1xf32>
    %1101 = arith.addf %1098, %1100 : vector<2x1xf32>
    %cst_484 = arith.constant 0.000000e+00 : f32
    %1102 = vector.broadcast %cst_484 : f32 to vector<2x1xf32>
    %1103 = arith.subf %1102, %1101 : vector<2x1xf32>
    %1104 = math.exp %1103 : vector<2x1xf32>
    %cst_485 = arith.constant 1.000000e+00 : f32
    %1105 = vector.broadcast %cst_485 : f32 to vector<2x1xf32>
    %1106 = arith.addf %1105, %1104 : vector<2x1xf32>
    %1107 = tpu.reciprocal %1106 {approx = true} : vector<2x1xf32> -> vector<2x1xf32>
    %c0_486 = arith.constant 0 : index
    %c0_487 = arith.constant 0 : index
    %1108 = vector.load %arg17[%c0_486, %c0_487] : memref<2x1xf32, #tpu.memory_space<vmem>>, vector<2x1xf32>
    tpu.vector_store %arg17[%c0_486, %c0_487], %1107 {strides = array<i32>} : memref<2x1xf32, #tpu.memory_space<vmem>>, vector<2x1xf32>,
    return
  }
}

</mosaic_0001>

<bundles_post_ra>
// kernel: tpu_custom_call.1
= control target key start
LH: loop header
LB: loop body
LE: loop exit
PB: predicated region body
PF: predicated region fallthrough
CT: control target
= control target key end

     0   :  { %v20567_v0 = vmov 0.0|0.0   ;;  %vm20568_vm0 = vmmov 0   ;;  %v20569_v8 = vmov 0.0   ;;  %vm127_vm1 = vcmask 261120   ;;  %s20570_s21 = smov 120   ;;  %s20571_s23 = smov 112   ;;  %s23618_s3 = inlined_call_operand.vmem [shape: f32[6,4,32,24], index: 3, kind: input, shape index: {}]   ;;  %s23619_s0 = inlined_call_operand.vmem [shape: f32[16,32], index: 0, kind: input, shape index: {}]   ;;  %s23620_s4 = inlined_call_operand.vmem [shape: f32[6,4,1,24], index: 4, kind: input, shape index: {}]   ;;  %s23621_s1 = inlined_call_operand.vmem [shape: f32[2,4,8,8], index: 1, kind: input, shape index: {}]   ;;  %s23622_s5 = inlined_call_operand.vmem [shape: f32[6,4,8,32], index: 5, kind: input, shape index: {}]   ;;  %s23623_s6 = inlined_call_operand.vmem [shape: f32[6,1,32], index: 6, kind: input, shape index: {}]   ;;  %s23624_s11 = inlined_call_operand.vmem [shape: f32[6,1,32], index: 11, kind: input, shape index: {}]   ;;  %s23625_s12 = inlined_call_operand.vmem [shape: f32[6,1,32], index: 12, kind: input, shape index: {}]   ;;  %s23626_s7 = inlined_call_operand.vmem [shape: f32[6,32,64], index: 7, kind: input, shape index: {}]   ;;  %s23627_s9 = inlined_call_operand.vmem [shape: f32[6,64,32], index: 9, kind: input, shape index: {}]   ;;  %s23628_s8 = inlined_call_operand.vmem [shape: f32[6,1,64], index: 8, kind: input, shape index: {}]   ;;  %s23629_s10 = inlined_call_operand.vmem [shape: f32[6,1,32], index: 10, kind: input, shape index: {}]   ;;  %s23630_s13 = inlined_call_operand.vmem [shape: f32[6,1,32], index: 13, kind: input, shape index: {}]   ;;  %s23631_s14 = inlined_call_operand.vmem [shape: f32[6,1,32], index: 14, kind: input, shape index: {}]   ;;  %s23632_s2 = inlined_call_operand.vmem [shape: f32[16,1], index: 2, kind: input, shape index: {}]   ;;  %s23633_s15 = inlined_call_operand.vmem [shape: f32[32,1], index: 15, kind: input, shape index: {}]   ;;  %s23634_s16 = inlined_call_operand.<no memory space> [shape: f32[1,1], index: 16, kind: input, shape index: {}]   ;;  %s23635_s17 = inlined_call_operand.vmem [shape: f32[2,1], index: 17, kind: output, shape index: {}]  }
   0x1   :  { %23638 = sst [smem:[#allocation3_spill]] %s23618_s3  ;;  %19875 = vmatprep.subr.bf16.mxu0 %v20567_v0  ;;  %19881 = vmatprep.subr.bf16.mxu1 %v20567_v0  ;;  %v20773_v27 = vld [vmem:[%s23620_s4] ss:$0 sm:$0xff]  ;;  %v20778_v29 = vld [vmem:[%s23620_s4 + $0x1] ss:$0 sm:$0xff]  ;;  %vm422_vm2 = vcmask 64512  }
   0x2   :  { %23639 = sst [smem:[#allocation4_spill]] %s23619_s0  ;;  %s23640_s26 = sld [smem:[#allocation3_spill]]  ;;  %18444 = vmatprep.mubr.msk.f32.mxu0 %vm20568_vm0, %v20569_v8  ;;  %18455 = vmatprep.mubr.msk.f32.mxu1 %vm20568_vm0, %v20569_v8  ;;  %v20791_v35 = vld [vmem:[%s23620_s4 + $0x2] ss:$0 sm:$0xff]  ;;  %v20798_v37 = vld [vmem:[%s23620_s4 + $0x3] ss:$0 sm:$0xff] }
   0x3   :  { %s23641_s22 = sld [smem:[#allocation4_spill]]  ;;  %v415_v51 = vld [vmem:[%s23621_s1] sm:$0xff]  ;;  %v416_v55 = vld [vmem:[%s23621_s1 + $0x8] sm:$0xff]  ;;  %v417_v60 = vld [vmem:[%s23621_s1 + $0x10] sm:$0xff]  ;;  %vm2770_vm3 = vcmask 523264   ;;  %vm17139_vm4 = vcmask 1040384  }
   0x4   :  { %vm17230_vm5 = vcmask 1024  }
   0x8   :  { %v60_v1 = vld [vmem:[%s23640_s26] sm:$0xff]  ;;  %v61_v2 = vld [vmem:[%s23640_s26 + $0x8] sm:$0xff]  ;;  %v62_v6 = vld [vmem:[%s23640_s26 + $0x10] sm:$0xff] }
   0x9   :  { %v64_v3 = vld [vmem:[%s23640_s26 + $0x20] sm:$0xff]  ;;  %v20674_v4 = vpack.c.bf16 %v61_v2, %v60_v1  ;;  %v65_v5 = vld [vmem:[%s23640_s26 + $0x28] sm:$0xff]  ;;  %v63_v7 = vld [vmem:[%s23640_s26 + $0x18] sm:$0xff] }
   0xa   :  { %v20689_v9 = vpack.c.bf16 %v65_v5, %v64_v3  ;;  %v66_v10 = vld [vmem:[%s23640_s26 + $0x30] sm:$0xff]  ;;  %v67_v11 = vld [vmem:[%s23640_s26 + $0x38] sm:$0xff]  ;;  %v20698_v12 = vpack.c.bf16 %v63_v7, %v62_v6  ;;  %v68_v14 = vld [vmem:[%s23640_s26 + $0x40] sm:$0xff] }
   0xb   :  { %19877 = vmatpush3.bf16.msra.mxu0 %v20674_v4  ;;  %v20702_v13 = vpack.c.bf16 %v67_v11, %v66_v10  ;;  %v69_v15 = vld [vmem:[%s23640_s26 + $0x48] sm:$0xff]  ;;  %v72_v16 = vld [vmem:[%s23640_s26 + $0x60] sm:$0xff]  ;;  %v70_v21 = vld [vmem:[%s23640_s26 + $0x50] sm:$0xff] }
   0xc   :  { %19878 = vmatprep.subr.bf16.mxu0 %v20567_v0  ;;  %19883 = vmatpush3.bf16.msra.mxu1 %v20689_v9  ;;  %v73_v17 = vld [vmem:[%s23640_s26 + $0x68] sm:$0xff]  ;;  %v20721_v18 = vld [vmem:[%s23641_s22] sm:$0xff]  ;;  %v20723_v19 = vpack.c.bf16 %v69_v15, %v68_v14  ;;  %v71_v22 = vld [vmem:[%s23640_s26 + $0x58] sm:$0xff] }
   0xd   :  { %19884 = vmatprep.subr.bf16.mxu1 %v20567_v0  ;;  %v20727_v20 = vpack.c.bf16 %v73_v17, %v72_v16  ;;  %v74_v23 = vld [vmem:[%s23640_s26 + $0x70] sm:$0xff]  ;;  %v75_v24 = vld [vmem:[%s23640_s26 + $0x78] sm:$0xff]  ;;  %v20747_v25 = vpack.c.bf16 %v71_v22, %v70_v21 }
   0xe   :  { %v20751_v26 = vpack.c.bf16 %v75_v24, %v74_v23  ;;  %v418_v2 = vld [vmem:[%s23621_s1 + $0x18] sm:$0xff] }
   0xf   :  { %19880 = vmatpush3.bf16.msra.mxu0 %v20698_v12 }
  0x10   :  { %19886 = vmatpush3.bf16.msra.mxu1 %v20702_v13  ;;  %19887 = vmatprep.subr.bf16.mxu0 %v20567_v0 }
  0x11   :  { %19893 = vmatprep.subr.bf16.mxu1 %v20567_v0 }
  0x12   :  { %18445 = vmatmul.mubr.msk.f32.vlgmr.msra.gmra.mrb[0].mxu0 %vm127_vm1, %v20721_v18 }
  0x13   :  { %19889 = vmatpush3.bf16.msra.mxu0 %v20723_v19  ;;  %18456 = vmatmul.mubr.msk.f32.vlgmr.msra.gmra.mrb[0].mxu1 %vm127_vm1, %v20721_v18 }
  0x14   :  { %19890 = vmatprep.subr.bf16.mxu0 %v20567_v0  ;;  %19895 = vmatpush3.bf16.msra.mxu1 %v20727_v20 }
  0x15   :  { %18466 = vmatprep.mubr.msk.f32.mxu0 %vm20568_vm0, %v20569_v8  ;;  %19896 = vmatprep.subr.bf16.mxu1 %v20567_v0 }
  0x16   :  { %18477 = vmatprep.mubr.msk.f32.mxu1 %vm20568_vm0, %v20569_v8 }
  0x17   :  { %19892 = vmatpush3.bf16.msra.mxu0 %v20747_v25 }
  0x18   :  { %19898 = vmatpush3.bf16.msra.mxu1 %v20751_v26  ;;  %18480 = vmatprep.subr.mxu0 %v20569_v8 }
  0x19   :  { %18485 = vmatprep.subr.mxu1 %v20569_v8 }
  0x1a   :  { %18467 = vmatmul.mubr.msk.f32.vlgmr.msra.gmra.mrb[2].mxu0 %vm127_vm1, %v20721_v18 }
  0x1b   :  { %18478 = vmatmul.mubr.msk.f32.vlgmr.msra.gmra.mrb[2].mxu1 %vm127_vm1, %v20721_v18  ;;  %18482 = vmatprep.mubr.msk.f32.mxu0 %vm20568_vm0, %v20569_v8 }
  0x1c   :  { %18487 = vmatprep.mubr.msk.f32.mxu1 %vm20568_vm0, %v20569_v8 }
  0xe5   :  { %v197_v28 = vpop.f32.mrb[0].mxu0 }
  0xe6   :  { %v20781_v30 = vadd.f32 %v20773_v27, %v197_v28  ;;  %v18446_v31 = vpop.f32.mrb[1].mxu0  ;;  %v267_v32 = vpop.f32.mrb[0].mxu1 }
  0xe7   :  { %v18457_v33 = vpop.f32.mrb[1].mxu1  ;;  %v20786_v34 = vadd.f32 %v20778_v29, %v267_v32 }
  0xe8   :  { %420 = vrot.lane.b32.xlu0 %v20781_v30, %s20570_s21  ;;  %v411_v44 = vmul.f32 0.35355338, %v20781_v30 }
  0xe9   :  { %v412_v46 = vmul.f32 0.35355338, %v20786_v34 }
  0xec   :  { %499 = vrot.lane.b32.xlu0 %v20786_v34, %s20570_s21 }
  0xed   :  { %v337_v36 = vpop.f32.mrb[2].mxu0 }
  0xee   :  { %v20801_v38 = vadd.f32 %v20791_v35, %v337_v36  ;;  %v18468_v39 = vpop.f32.mrb[3].mxu0  ;;  %v407_v40 = vpop.f32.mrb[2].mxu1 }
  0xef   :  { %v18479_v41 = vpop.f32.mrb[3].mxu1  ;;  %v20804_v42 = vadd.f32 %v20798_v37, %v407_v40 }
  0xf0   :  { %577 = vrot.lane.b32.xlu1 %v20801_v38, %s20570_s21  ;;  %v413_v48 = vmul.f32 0.35355338, %v20801_v38 }
  0xf1   :  { %v414_v50 = vmul.f32 0.35355338, %v20804_v42 }
  0xf4   :  { %655 = vrot.lane.b32.xlu1 %v20804_v42, %s20570_s21 }
 0x15a   :  { %v421_v43 = vpop.permute.xlu0 %420 }
 0x15b   :  { %18481 = vmatpush3.xpose.msk.msra.mxu0 %vm422_vm2, %v421_v43 }
 0x15c   :  { %18490 = vmatprep.subr.mxu0 %v20569_v8 }
 0x15e   :  { %v500_v45 = vpop.permute.xlu0 %499  ;;  %18483 = vmatmul.mubr.msk.f32.vlgmr.msra.gmra.mrb[4].mxu0 %vm422_vm2, %v411_v44 }
 0x15f   :  { %18486 = vmatpush3.xpose.msk.msra.mxu1 %vm422_vm2, %v500_v45  ;;  %18492 = vmatprep.mubr.msk.f32.mxu0 %vm20568_vm0, %v20569_v8 }
 0x160   :  { %18495 = vmatprep.subr.mxu1 %v20569_v8 }
 0x162   :  { %18488 = vmatmul.mubr.msk.f32.vlgmr.msra.gmra.mrb[4].mxu1 %vm422_vm2, %v412_v46  ;;  %v578_v47 = vpop.permute.xlu1 %577 }
 0x163   :  { %18491 = vmatpush3.xpose.msk.msra.mxu0 %vm422_vm2, %v578_v47  ;;  %18497 = vmatprep.mubr.msk.f32.mxu1 %vm20568_vm0, %v20569_v8 }
 0x164   :  { %18500 = vmatprep.subr.mxu0 %v20569_v8 }
 0x166   :  { %v656_v49 = vpop.permute.xlu1 %655  ;;  %18493 = vmatmul.mubr.msk.f32.vlgmr.msra.gmra.mrb[6].mxu0 %vm422_vm2, %v413_v48 }
 0x167   :  { %18496 = vmatpush3.xpose.msk.msra.mxu1 %vm422_vm2, %v656_v49  ;;  %18502 = vmatprep.mubr.msk.f32.mxu0 %vm20568_vm0, %v20569_v8 }
 0x168   :  { %18505 = vmatprep.subr.mxu1 %v20569_v8 }
 0x16a   :  { %18498 = vmatmul.mubr.msk.f32.vlgmr.msra.gmra.mrb[6].mxu1 %vm422_vm2, %v414_v50 }
 0x16b   :  { %18507 = vmatprep.mubr.msk.f32.mxu1 %vm20568_vm0, %v20569_v8 }
 0x231   :  { %v494_v52 = vpop.f32.mrb[4].mxu0 }
 0x232   :  { %v495_v53 = vadd.f32 %v494_v52, %v415_v51  ;;  %v18484_v54 = vpop.f32.mrb[5].mxu0 }
 0x234   :  { %v732_v56 = vsel %vm422_vm2, %v495_v53, -inf }
 0x235   :  { %v572_v57 = vpop.f32.mrb[4].mxu1  ;;  %733 = vmax.xlane.f32.xlu0 %v732_v56 }
 0x236   :  { %v573_v58 = vadd.f32 %v572_v57, %v416_v55  ;;  %v18489_v59 = vpop.f32.mrb[5].mxu1 }
 0x237   :  { %v20888_v59 = vld [vmem:[%s23622_s5 + $0x8] sm:$0xff] }
 0x238   :  { %v735_v61 = vsel %vm422_vm2, %v573_v58, -inf }
 0x239   :  { %736 = vmax.xlane.f32.xlu1 %v735_v61  ;;  %v650_v62 = vpop.f32.mrb[6].mxu0 }
 0x23a   :  { %v651_v63 = vadd.f32 %v650_v62, %v417_v60  ;;  %v18494_v1 = vpop.f32.mrb[7].mxu0  ;;  %v20895_v60 = vld [vmem:[%s23622_s5 + $0x10] sm:$0xff] }
 0x23c   :  { %v738_v3 = vsel %vm422_vm2, %v651_v63, -inf }
 0x23d   :  { %v728_v5 = vpop.f32.mrb[6].mxu1  ;;  %739 = vmax.xlane.f32.xlu0 %v738_v3 }
 0x23e   :  { %v729_v6 = vadd.f32 %v728_v5, %v418_v2  ;;  %v18499_v7 = vpop.f32.mrb[7].mxu1 }
 0x240   :  { %v741_v10 = vsel %vm422_vm2, %v729_v6, -inf }
 0x241   :  { %742 = vmax.xlane.f32.xlu0 %v741_v10  ;;  %v20923_v10 = vld [vmem:[%s23641_s22 + $0x8] sm:$0xff] }
 0x24a   :  { %776 = vrot.lane.b32.xlu1 %v20781_v30, %s20571_s23 }
 0x2c2   :  { %v734_v11 = vpop.xlane.xlu0 %733 }
 0x2c3   :  { %v744_v14 = vsub.f32 %v495_v53, %v734_v11 }
 0x2c5   :  { %v748_v15 = vmul.f32 1.442695, %v744_v14 }
 0x2c6   :  { %v737_v16 = vpop.xlane.xlu1 %736 }
 0x2c7   :  { %20321 = vpow2.f32 %v748_v15  ;;  %v745_v17 = vsub.f32 %v573_v58, %v737_v16  ;;  %v20881_v58 = vld [vmem:[%s23622_s5] sm:$0xff] }
 0x2c9   :  { %v750_v21 = vmul.f32 1.442695, %v745_v17 }
 0x2ca   :  { %v777_v22 = vpop.permute.xlu1 %776  ;;  %v740_v23 = vpop.xlane.xlu0 %739 }
 0x2cb   :  { %20323 = vpow2.f32 %v750_v21  ;;  %v746_v24 = vsub.f32 %v651_v63, %v740_v23  ;;  %18501 = vmatpush3.msra.mxu0 %v777_v22  ;;  %v20905_v63 = vld [vmem:[%s23622_s5 + $0x18] sm:$0xff] }
 0x2cc   :  { %18510 = vmatprep.subr.mxu0 %v20569_v8 }
 0x2cd   :  { %v752_v28 = vmul.f32 1.442695, %v746_v24 }
 0x2ce   :  { %v743_v31 = vpop.xlane.xlu0 %742 }
 0x2cf   :  { %20325 = vpow2.f32 %v752_v28  ;;  %v747_v32 = vsub.f32 %v729_v6, %v743_v31 }
 0x2d1   :  { %v20322_v33 = vpop.eup %20321  ;;  %v754_v30 = vmul.f32 1.442695, %v747_v32 }
 0x2d2   :  { %v756_v36 = vsel %vm422_vm2, %v20322_v33, 0.0 }
 0x2d3   :  { %20327 = vpow2.f32 %v754_v30  ;;  %757 = vadd.xlane.f32.xlu1 %v756_v36 }
 0x2d5   :  { %v20324_v39 = vpop.eup %20323 }
 0x2d6   :  { %v759_v40 = vsel %vm422_vm2, %v20324_v39, 0.0 }
 0x2d7   :  { %760 = vadd.xlane.f32.xlu0 %v759_v40 }
 0x2d9   :  { %v20326_v41 = vpop.eup %20325 }
 0x2da   :  { %v762_v43 = vsel %vm422_vm2, %v20326_v41, 0.0 }
 0x2db   :  { %763 = vadd.xlane.f32.xlu1 %v762_v43 }
 0x2dd   :  { %v20328_v44 = vpop.eup %20327 }
 0x2de   :  { %v765_v45 = vsel %vm422_vm2, %v20328_v44, 0.0 }
 0x2df   :  { %766 = vadd.xlane.f32.xlu0 %v765_v45 }
 0x2ec   :  { %928 = vrot.lane.b32.xlu1 %v20801_v38, %s20571_s23 }
 0x2f0   :  { %1004 = vrot.lane.b32.xlu1 %v20804_v42, %s20571_s23 }
 0x2f5   :  { %852 = vrot.lane.b32.xlu0 %v20786_v34, %s20571_s23 }
 0x360   :  { %v758_v46 = vpop.xlane.xlu1 %757 }
 0x361   :  { %20329 = vrcp.f32 %v758_v46  ;;  %v17265_v46 = vld [vmem:[%s23621_s1 + $0x20] sm:$0xff] }
 0x364   :  { %v761_v47 = vpop.xlane.xlu0 %760 }
 0x365   :  { %20331 = vrcp.f32 %v761_v47 }
 0x368   :  { %v764_v48 = vpop.xlane.xlu1 %763 }
 0x369   :  { %20333 = vrcp.f32 %v764_v48 }
 0x36b   :  { %v20330_v49 = vpop.eup %20329 }
 0x36c   :  { %v929_v50 = vpop.permute.xlu1 %928  ;;  %v767_v51 = vpop.xlane.xlu0 %766  ;;  %v772_v52 = vmul.f32 %v20330_v49, %v20322_v33 }
 0x36d   :  { %20335 = vrcp.f32 %v767_v51 }
 0x36e   :  { %18503 = vmatmul.mubr.msk.f32.vlgmr.msra.gmra.mrb[8].mxu0 %vm422_vm2, %v772_v52 }
 0x36f   :  { %v20332_v38 = vpop.eup %20331  ;;  %18511 = vmatpush3.msra.mxu0 %v929_v50  ;;  %18512 = vmatprep.mubr.msk.f32.mxu0 %vm20568_vm0, %v20569_v8  ;;  %v17266_v50 = vld [vmem:[%s23621_s1 + $0x28] sm:$0xff] }
 0x370   :  { %v853_v42 = vpop.permute.xlu0 %852  ;;  %v773_v34 = vmul.f32 %v20332_v38, %v20324_v39  ;;  %18520 = vmatprep.subr.mxu0 %v20569_v8  ;;  %v1005_v53 = vpop.permute.xlu1 %1004 }
 0x371   :  { %18506 = vmatpush3.msra.mxu1 %v853_v42 }
 0x372   :  { %18508 = vmatmul.mubr.msk.f32.vlgmr.msra.gmra.mrb[8].mxu1 %vm422_vm2, %v773_v34  ;;  %18515 = vmatprep.subr.mxu1 %v20569_v8  ;;  %v17267_v34 = vld [vmem:[%s23621_s1 + $0x30] sm:$0xff] }
 0x373   :  { %v20334_v54 = vpop.eup %20333  ;;  %18516 = vmatpush3.msra.mxu1 %v1005_v53  ;;  %18517 = vmatprep.mubr.msk.f32.mxu1 %vm20568_vm0, %v20569_v8 }
 0x374   :  { %v774_v55 = vmul.f32 %v20334_v54, %v20326_v41  ;;  %18525 = vmatprep.subr.mxu1 %v20569_v8 }
 0x376   :  { %18513 = vmatmul.mubr.msk.f32.vlgmr.msra.gmra.mrb[10].mxu0 %vm422_vm2, %v774_v55 }
 0x377   :  { %v20336_v56 = vpop.eup %20335  ;;  %18522 = vmatprep.mubr.msk.f32.mxu0 %vm20568_vm0, %v20569_v8  ;;  %18521 = vmatpush3.msra.mxu0 %v20881_v58 }
 0x378   :  { %v775_v57 = vmul.f32 %v20336_v56, %v20328_v44  ;;  %18530 = vmatprep.subr.mxu0 %v20569_v8 }
 0x37a   :  { %18518 = vmatmul.mubr.msk.f32.vlgmr.msra.gmra.mrb[10].mxu1 %vm422_vm2, %v775_v57  ;;  %v17268_v57 = vld [vmem:[%s23621_s1 + $0x38] sm:$0xff] }
 0x37b   :  { %18527 = vmatprep.mubr.msk.f32.mxu1 %vm20568_vm0, %v20569_v8  ;;  %18526 = vmatpush3.msra.mxu1 %v20888_v59 }
 0x37c   :  { %18535 = vmatprep.subr.mxu1 %v20569_v8 }
 0x441   :  { %v848_v61 = vpop.f32.mrb[8].mxu0 }
 0x442   :  { %v18504_v62 = vpop.f32.mrb[9].mxu0  ;;  %18523 = vmatmul.mubr.msk.f32.vlgmr.msra.gmra.mrb[12].mxu0 %vm422_vm2, %v848_v61 }
 0x443   :  { %18531 = vmatpush3.msra.mxu0 %v20895_v60  ;;  %18532 = vmatprep.mubr.msk.f32.mxu0 %vm20568_vm0, %v20569_v8 }
 0x444   :  { %19899 = vmatprep.subr.bf16.mxu0 %v20567_v0 }
 0x445   :  { %v924_v1 = vpop.f32.mrb[8].mxu1 }
 0x446   :  { %v18509_v2 = vpop.f32.mrb[9].mxu1  ;;  %18528 = vmatmul.mubr.msk.f32.vlgmr.msra.gmra.mrb[12].mxu1 %vm422_vm2, %v924_v1 }
 0x447   :  { %18536 = vmatpush3.msra.mxu1 %v20905_v63  ;;  %18537 = vmatprep.mubr.msk.f32.mxu1 %vm20568_vm0, %v20569_v8 }
 0x448   :  { %19905 = vmatprep.subr.bf16.mxu1 %v20567_v0 }
 0x449   :  { %v1000_v3 = vpop.f32.mrb[10].mxu0 }
 0x44a   :  { %v18514_v5 = vpop.f32.mrb[11].mxu0  ;;  %18533 = vmatmul.mubr.msk.f32.vlgmr.msra.gmra.mrb[14].mxu0 %vm422_vm2, %v1000_v3 }
 0x44b   :  { %19901 = vmatpush3.bf16.msra.mxu0 %v20674_v4  ;;  %18548 = vmatprep.mubr.msk.f32.mxu0 %vm20568_vm0, %v20569_v8  ;;  %v20958_v4 = vld [vmem:[%s23623_s6] ss:$0 sm:$0xff] }
 0x44c   :  { %19902 = vmatprep.subr.bf16.mxu0 %v20567_v0 }
 0x44d   :  { %v1076_v6 = vpop.f32.mrb[10].mxu1 }
 0x44e   :  { %v18519_v7 = vpop.f32.mrb[11].mxu1  ;;  %18538 = vmatmul.mubr.msk.f32.vlgmr.msra.gmra.mrb[14].mxu1 %vm422_vm2, %v1076_v6 }
 0x44f   :  { %19904 = vmatpush3.bf16.msra.mxu0 %v20698_v12  ;;  %19907 = vmatpush3.bf16.msra.mxu1 %v20689_v9 }
 0x450   :  { %19908 = vmatprep.subr.bf16.mxu1 %v20567_v0  ;;  %19911 = vmatprep.subr.bf16.mxu0 %v20567_v0 }
 0x451   :  { %18559 = vmatprep.mubr.msk.f32.mxu1 %vm20568_vm0, %v20569_v8 }
 0x452   :  { %18549 = vmatmul.mubr.msk.f32.vlgmr.msra.gmra.mrb[16].mxu0 %vm127_vm1, %v20923_v10 }
 0x453   :  { %19910 = vmatpush3.bf16.msra.mxu1 %v20702_v13  ;;  %19913 = vmatpush3.bf16.msra.mxu0 %v20723_v19 }
 0x454   :  { %19914 = vmatprep.subr.bf16.mxu0 %v20567_v0  ;;  %19917 = vmatprep.subr.bf16.mxu1 %v20567_v0 }
 0x455   :  { %18570 = vmatprep.mubr.msk.f32.mxu0 %vm20568_vm0, %v20569_v8 }
 0x456   :  { %18560 = vmatmul.mubr.msk.f32.vlgmr.msra.gmra.mrb[16].mxu1 %vm127_vm1, %v20923_v10 }
 0x457   :  { %19916 = vmatpush3.bf16.msra.mxu0 %v20747_v25  ;;  %19919 = vmatpush3.bf16.msra.mxu1 %v20727_v20 }
 0x458   :  { %19920 = vmatprep.subr.bf16.mxu1 %v20567_v0  ;;  %18581 = vmatprep.mubr.msk.f32.mxu1 %vm20568_vm0, %v20569_v8 }
 0x459   :  { %18584 = vmatprep.subr.mxu0 %v20569_v8 }
 0x45a   :  { %18571 = vmatmul.mubr.msk.f32.vlgmr.msra.gmra.mrb[18].mxu0 %vm127_vm1, %v20923_v10 }
 0x45b   :  { %19922 = vmatpush3.bf16.msra.mxu1 %v20751_v26  ;;  %18586 = vmatprep.mubr.msk.f32.mxu0 %vm20568_vm0, %v20569_v8 }
 0x45c   :  { %18589 = vmatprep.subr.mxu1 %v20569_v8 }
 0x45e   :  { %18582 = vmatmul.mubr.msk.f32.vlgmr.msra.gmra.mrb[18].mxu1 %vm127_vm1, %v20923_v10 }
 0x45f   :  { %18591 = vmatprep.mubr.msk.f32.mxu1 %vm20568_vm0, %v20569_v8 }
 0x515   :  { %v1149_v9 = vpop.f32.mrb[12].mxu0 }
 0x516   :  { %v18524_v12 = vpop.f32.mrb[13].mxu0  ;;  %v1159_v13 = vadd.f32 %v20958_v4, %v1149_v9 }
 0x519   :  { %v1229_v19 = vpop.f32.mrb[12].mxu1 }
 0x51a   :  { %v1233_v20 = vadd.f32 %v1229_v19, %v1159_v13  ;;  %v18529_v25 = vpop.f32.mrb[13].mxu1 }
 0x51d   :  { %v1303_v26 = vpop.f32.mrb[14].mxu0 }
 0x51e   :  { %v1307_v11 = vadd.f32 %v1303_v26, %v1233_v20  ;;  %v18534_v14 = vpop.f32.mrb[15].mxu0 }
 0x521   :  { %v1377_v15 = vpop.f32.mrb[14].mxu1 }
 0x522   :  { %v20961_v16 = vadd.f32 %v1377_v15, %v1307_v11  ;;  %v18539_v17 = vpop.f32.mrb[15].mxu1 }
 0x525   :  { %v1451_v21 = vpop.f32.mrb[16].mxu0 }
 0x526   :  { %v1452_v22 = vadd.f32 %v20773_v27, %v1451_v21  ;;  %v18550_v23 = vpop.f32.mrb[17].mxu0 }
 0x528   :  { %1675 = vrot.lane.b32.xlu0 %v1452_v22, %s20570_s21  ;;  %v1665_v40 = vmul.f32 0.35355338, %v1452_v22 }
 0x529   :  { %v1521_v24 = vpop.f32.mrb[16].mxu1 }
 0x52a   :  { %v20966_v28 = vadd.f32 %v20778_v29, %v1521_v24  ;;  %v18561_v31 = vpop.f32.mrb[17].mxu1 }
 0x52c   :  { %1753 = vrot.lane.b32.xlu1 %v20966_v28, %s20570_s21 }
 0x52d   :  { %v1591_v32 = vpop.f32.mrb[18].mxu0 }
 0x52e   :  { %v20971_v33 = vadd.f32 %v20791_v35, %v1591_v32  ;;  %v18572_v30 = vpop.f32.mrb[19].mxu0 }
 0x530   :  { %1831 = vrot.lane.b32.xlu0 %v20971_v33, %s20570_s21  ;;  %v1667_v43 = vmul.f32 0.35355338, %v20971_v33 }
 0x531   :  { %v1661_v27 = vpop.f32.mrb[18].mxu1 }
 0x532   :  { %v20976_v36 = vadd.f32 %v20798_v37, %v1661_v27  ;;  %v18583_v39 = vpop.f32.mrb[19].mxu1  ;;  %v1666_v37 = vmul.f32 0.35355338, %v20966_v28  ;;  %v2630_v27 = vadd.f32 %v20961_v16, %v20721_v18 }
 0x534   :  { %1909 = vrot.lane.b32.xlu1 %v20976_v36, %s20570_s21  ;;  %v1668_v45 = vmul.f32 0.35355338, %v20976_v36  ;;  %v2632_v39 = vsel %vm127_vm1, %v2630_v27, 0.0 }
 0x59a   :  { %v1676_v29 = vpop.permute.xlu0 %1675 }
 0x59b   :  { %18585 = vmatpush3.xpose.msk.msra.mxu0 %vm422_vm2, %v1676_v29 }
 0x59c   :  { %18594 = vmatprep.subr.mxu0 %v20569_v8 }
 0x59e   :  { %v1754_v35 = vpop.permute.xlu1 %1753  ;;  %18587 = vmatmul.mubr.msk.f32.vlgmr.msra.gmra.mrb[20].mxu0 %vm422_vm2, %v1665_v40 }
 0x59f   :  { %18590 = vmatpush3.xpose.msk.msra.mxu1 %vm422_vm2, %v1754_v35  ;;  %18596 = vmatprep.mubr.msk.f32.mxu0 %vm20568_vm0, %v20569_v8 }
 0x5a0   :  { %18599 = vmatprep.subr.mxu1 %v20569_v8 }
 0x5a2   :  { %18592 = vmatmul.mubr.msk.f32.vlgmr.msra.gmra.mrb[20].mxu1 %vm422_vm2, %v1666_v37  ;;  %v1832_v41 = vpop.permute.xlu0 %1831 }
 0x5a3   :  { %18595 = vmatpush3.xpose.msk.msra.mxu0 %vm422_vm2, %v1832_v41  ;;  %18601 = vmatprep.mubr.msk.f32.mxu1 %vm20568_vm0, %v20569_v8 }
 0x5a4   :  { %18604 = vmatprep.subr.mxu0 %v20569_v8 }
 0x5a6   :  { %v1910_v44 = vpop.permute.xlu1 %1909  ;;  %18597 = vmatmul.mubr.msk.f32.vlgmr.msra.gmra.mrb[22].mxu0 %vm422_vm2, %v1667_v43 }
 0x5a7   :  { %18600 = vmatpush3.xpose.msk.msra.mxu1 %vm422_vm2, %v1910_v44  ;;  %18606 = vmatprep.mubr.msk.f32.mxu0 %vm20568_vm0, %v20569_v8 }
 0x5a8   :  { %18609 = vmatprep.subr.mxu1 %v20569_v8 }
 0x5aa   :  { %18602 = vmatmul.mubr.msk.f32.vlgmr.msra.gmra.mrb[22].mxu1 %vm422_vm2, %v1668_v45 }
 0x5ab   :  { %18611 = vmatprep.mubr.msk.f32.mxu1 %vm20568_vm0, %v20569_v8 }
 0x671   :  { %v1748_v47 = vpop.f32.mrb[20].mxu0 }
 0x672   :  { %v1749_v48 = vadd.f32 %v17265_v46, %v1748_v47  ;;  %v18588_v49 = vpop.f32.mrb[21].mxu0 }
 0x674   :  { %v1986_v51 = vsel %vm422_vm2, %v1749_v48, -inf }
 0x675   :  { %v1826_v52 = vpop.f32.mrb[20].mxu1  ;;  %1987 = vmax.xlane.f32.xlu0 %v1986_v51 }
 0x676   :  { %v1827_v38 = vadd.f32 %v17266_v50, %v1826_v52  ;;  %v18593_v42 = vpop.f32.mrb[21].mxu1 }
 0x678   :  { %v1989_v53 = vsel %vm422_vm2, %v1827_v38, -inf }
 0x679   :  { %1990 = vmax.xlane.f32.xlu1 %v1989_v53  ;;  %v1904_v54 = vpop.f32.mrb[22].mxu0 }
 0x67a   :  { %v1905_v55 = vadd.f32 %v17267_v34, %v1904_v54  ;;  %v18598_v56 = vpop.f32.mrb[23].mxu0 }
 0x67c   :  { %v1992_v61 = vsel %vm422_vm2, %v1905_v55, -inf }
 0x67d   :  { %v1982_v62 = vpop.f32.mrb[22].mxu1  ;;  %1993 = vmax.xlane.f32.xlu0 %v1992_v61 }
 0x67e   :  { %v1983_v1 = vadd.f32 %v17268_v57, %v1982_v62  ;;  %v18603_v2 = vpop.f32.mrb[23].mxu1 }
 0x680   :  { %v1995_v3 = vsel %vm422_vm2, %v1983_v1, -inf }
 0x681   :  { %1996 = vmax.xlane.f32.xlu0 %v1995_v3 }
 0x68a   :  { %2030 = vrot.lane.b32.xlu1 %v1452_v22, %s20571_s23 }
 0x702   :  { %v1988_v5 = vpop.xlane.xlu0 %1987 }
 0x703   :  { %v1998_v6 = vsub.f32 %v1749_v48, %v1988_v5 }
 0x705   :  { %v2002_v7 = vmul.f32 1.442695, %v1998_v6 }
 0x706   :  { %v1991_v9 = vpop.xlane.xlu1 %1990 }
 0x707   :  { %20337 = vpow2.f32 %v2002_v7  ;;  %v1999_v12 = vsub.f32 %v1827_v38, %v1991_v9 }
 0x709   :  { %v2004_v13 = vmul.f32 1.442695, %v1999_v12 }
 0x70a   :  { %v2031_v19 = vpop.permute.xlu1 %2030  ;;  %v1994_v20 = vpop.xlane.xlu0 %1993 }
 0x70b   :  { %20339 = vpow2.f32 %v2004_v13  ;;  %v2000_v25 = vsub.f32 %v1905_v55, %v1994_v20  ;;  %18605 = vmatpush3.msra.mxu0 %v2031_v19  ;;  %v21061_v55 = vld [vmem:[%s23624_s11] ss:$0 sm:$0xff] }
 0x70c   :  { %18614 = vmatprep.subr.mxu0 %v20569_v8 }
 0x70d   :  { %v2006_v26 = vmul.f32 1.442695, %v2000_v25 }
 0x70e   :  { %v1997_v11 = vpop.xlane.xlu0 %1996 }
 0x70f   :  { %20341 = vpow2.f32 %v2006_v26  ;;  %v2001_v14 = vsub.f32 %v1983_v1, %v1997_v11 }
 0x711   :  { %v20338_v15 = vpop.eup %20337  ;;  %v2008_v17 = vmul.f32 1.442695, %v2001_v14 }
 0x712   :  { %v2010_v21 = vsel %vm422_vm2, %v20338_v15, 0.0 }
 0x713   :  { %20343 = vpow2.f32 %v2008_v17  ;;  %2011 = vadd.xlane.f32.xlu1 %v2010_v21 }
 0x715   :  { %v20340_v22 = vpop.eup %20339 }
 0x716   :  { %v2013_v23 = vsel %vm422_vm2, %v20340_v22, 0.0 }
 0x717   :  { %2014 = vadd.xlane.f32.xlu0 %v2013_v23 }
 0x719   :  { %v20342_v24 = vpop.eup %20341 }
 0x71a   :  { %v2016_v31 = vsel %vm422_vm2, %v20342_v24, 0.0 }
 0x71b   :  { %2017 = vadd.xlane.f32.xlu1 %v2016_v31  ;;  %v85_v31 = vld [vmem:[%s23626_s7] sm:$0xff] }
 0x71d   :  { %v20344_v32 = vpop.eup %20343 }
 0x71e   :  { %v2019_v30 = vsel %vm422_vm2, %v20344_v32, 0.0 }
 0x71f   :  { %2020 = vadd.xlane.f32.xlu0 %v2019_v30 }
 0x72c   :  { %2182 = vrot.lane.b32.xlu1 %v20971_v33, %s20571_s23 }
 0x730   :  { %2258 = vrot.lane.b32.xlu1 %v20976_v36, %s20571_s23 }
 0x735   :  { %2106 = vrot.lane.b32.xlu0 %v20966_v28, %s20571_s23 }
 0x754   :  { %2633 = vadd.xlane.f32.xlu0 %v2632_v39 }
 0x7a0   :  { %v2012_v29 = vpop.xlane.xlu1 %2011 }
 0x7a1   :  { %20345 = vrcp.f32 %v2012_v29  ;;  %v90_v29 = vld [vmem:[%s23627_s9] sm:$0xff] }
 0x7a4   :  { %v2015_v40 = vpop.xlane.xlu0 %2014 }
 0x7a5   :  { %20347 = vrcp.f32 %v2015_v40  ;;  %v91_v40 = vld [vmem:[%s23627_s9 + $0x8] sm:$0xff] }
 0x7a8   :  { %v2018_v35 = vpop.xlane.xlu1 %2017 }
 0x7a9   :  { %20349 = vrcp.f32 %v2018_v35  ;;  %v92_v35 = vld [vmem:[%s23627_s9 + $0x10] sm:$0xff] }
 0x7ab   :  { %v20346_v37 = vpop.eup %20345 }
 0x7ac   :  { %v2183_v33 = vpop.permute.xlu1 %2182  ;;  %v2021_v41 = vpop.xlane.xlu0 %2020  ;;  %v2026_v43 = vmul.f32 %v20346_v37, %v20338_v15  ;;  %v19931_v37 = vpack.c.bf16 %v91_v40, %v90_v29  ;;  %v17301_v29 = vld [vmem:[%s23640_s26 + $0xb0] sm:$0xff]  ;;  %v17302_v40 = vld [vmem:[%s23640_s26 + $0xb8] sm:$0xff] }
 0x7ad   :  { %20351 = vrcp.f32 %v2021_v41 }
 0x7ae   :  { %18607 = vmatmul.mubr.msk.f32.vlgmr.msra.gmra.mrb[24].mxu0 %vm422_vm2, %v2026_v43  ;;  %v94_v43 = vld [vmem:[%s23627_s9 + $0x20] sm:$0xff] }
 0x7af   :  { %v20348_v28 = vpop.eup %20347  ;;  %18615 = vmatpush3.msra.mxu0 %v2183_v33  ;;  %18616 = vmatprep.mubr.msk.f32.mxu0 %vm20568_vm0, %v20569_v8  ;;  %v93_v33 = vld [vmem:[%s23627_s9 + $0x18] sm:$0xff] }
 0x7b0   :  { %v2107_v18 = vpop.permute.xlu0 %2106  ;;  %v2027_v16 = vmul.f32 %v20348_v28, %v20340_v22  ;;  %18624 = vmatprep.subr.mxu0 %v20569_v8  ;;  %v2259_v36 = vpop.permute.xlu1 %2258  ;;  %v19935_v41 = vpack.c.bf16 %v93_v33, %v92_v35  ;;  %v95_v28 = vld [vmem:[%s23627_s9 + $0x28] sm:$0xff]  ;;  %v21218_v35 = vpack.c.bf16 %v17302_v40, %v17301_v29 }
 0x7b1   :  { %18610 = vmatpush3.msra.mxu1 %v2107_v18  ;;  %v19939_v18 = vpack.c.bf16 %v95_v28, %v94_v43  ;;  %v17308_v33 = vld [vmem:[%s23640_s26 + $0xe8] sm:$0xff]  ;;  %v17309_v43 = vld [vmem:[%s23640_s26 + $0xf0] sm:$0xff]  ;;  %v17310_v28 = vld [vmem:[%s23640_s26 + $0xf8] sm:$0xff] }
 0x7b2   :  { %18612 = vmatmul.mubr.msk.f32.vlgmr.msra.gmra.mrb[24].mxu1 %vm422_vm2, %v2027_v16  ;;  %18619 = vmatprep.subr.mxu1 %v20569_v8 }
 0x7b3   :  { %v20350_v44 = vpop.eup %20349  ;;  %18620 = vmatpush3.msra.mxu1 %v2259_v36  ;;  %18621 = vmatprep.mubr.msk.f32.mxu1 %vm20568_vm0, %v20569_v8 }
 0x7b4   :  { %v2028_v45 = vmul.f32 %v20350_v44, %v20342_v24  ;;  %18629 = vmatprep.subr.mxu1 %v20569_v8 }
 0x7b6   :  { %18617 = vmatmul.mubr.msk.f32.vlgmr.msra.gmra.mrb[26].mxu0 %vm422_vm2, %v2028_v45 }
 0x7b7   :  { %v20352_v46 = vpop.eup %20351  ;;  %18625 = vmatpush3.msra.mxu0 %v20881_v58  ;;  %18626 = vmatprep.mubr.msk.f32.mxu0 %vm20568_vm0, %v20569_v8 }
 0x7b8   :  { %v2029_v47 = vmul.f32 %v20352_v46, %v20344_v32  ;;  %18634 = vmatprep.subr.mxu0 %v20569_v8  ;;  %v86_v32 = vld [vmem:[%s23626_s7 + $0x8] sm:$0xff] }
 0x7b9   :  { %v19923_v30 = vpack.c.bf16 %v86_v32, %v85_v31  ;;  %v17299_v31 = vld [vmem:[%s23640_s26 + $0xa0] sm:$0xff]  ;;  %v17300_v32 = vld [vmem:[%s23640_s26 + $0xa8] sm:$0xff] }
 0x7ba   :  { %18622 = vmatmul.mubr.msk.f32.vlgmr.msra.gmra.mrb[26].mxu1 %vm422_vm2, %v2029_v47 }
 0x7bb   :  { %18630 = vmatpush3.msra.mxu1 %v20888_v59  ;;  %18631 = vmatprep.mubr.msk.f32.mxu1 %vm20568_vm0, %v20569_v8 }
 0x7bc   :  { %18639 = vmatprep.subr.mxu1 %v20569_v8 }
 0x7e1   :  { %v2634_v48 = vpop.xlane.xlu0 %2633 }
 0x7e2   :  { %v2639_v49 = vmul.f32 0.03125, %v2634_v48 }
 0x7e4   :  { %v2641_v50 = vsub.f32 %v2630_v27, %v2639_v49  ;;  %v88_v27 = vld [vmem:[%s23626_s7 + $0x18] sm:$0xff]  ;;  %v96_v49 = vld [vmem:[%s23627_s9 + $0x30] sm:$0xff] }
 0x7e6   :  { %v2643_v51 = vmul.f32 %v2641_v50, %v2641_v50 }
 0x7e8   :  { %v2645_v58 = vsel %vm127_vm1, %v2643_v51, 0.0 }
 0x7e9   :  { %2646 = vadd.xlane.f32.xlu0 %v2645_v58  ;;  %v17287_v58 = vld [vmem:[%s23628_s8] ss:$0 sm:$0xff] }
 0x876   :  { %v2647_v52 = vpop.xlane.xlu0 %2646 }
 0x877   :  { %v2651_v38 = vmul.f32 0.03125, %v2647_v52 }
 0x879   :  { %v2653_v42 = vadd.f32 1e-05, %v2651_v38 }
 0x87b   :  { %20353 = vrsqrt.f32 %v2653_v42 }
 0x881   :  { %v2102_v34 = vpop.f32.mrb[24].mxu0 }
 0x882   :  { %v18608_v53 = vpop.f32.mrb[25].mxu0  ;;  %18627 = vmatmul.mubr.msk.f32.vlgmr.msra.gmra.mrb[28].mxu0 %vm422_vm2, %v2102_v34 }
 0x883   :  { %18635 = vmatpush3.msra.mxu0 %v20895_v60  ;;  %18636 = vmatprep.mubr.msk.f32.mxu0 %vm20568_vm0, %v20569_v8  ;;  %v21068_v60 = vld [vmem:[%s23625_s12] ss:$0 sm:$0xff] }
 0x884   :  { %19924 = vmatprep.subr.bf16.mxu0 %v19923_v30 }
 0x885   :  { %v20354_v59 = vpop.eup %20353  ;;  %v2178_v54 = vpop.f32.mrb[24].mxu1 }
 0x886   :  { %v18613_v56 = vpop.f32.mrb[25].mxu1  ;;  %18632 = vmatmul.mubr.msk.f32.vlgmr.msra.gmra.mrb[28].mxu1 %vm422_vm2, %v2178_v54  ;;  %v2657_v57 = vmul.f32 %v20354_v59, %v2641_v50  ;;  %v97_v50 = vld [vmem:[%s23627_s9 + $0x38] sm:$0xff]  ;;  %v17290_v54 = vld [vmem:[%s23629_s10] ss:$0 sm:$0xff] }
 0x887   :  { %18640 = vmatpush3.msra.mxu1 %v20905_v63  ;;  %18641 = vmatprep.mubr.msk.f32.mxu1 %vm20568_vm0, %v20569_v8  ;;  %v19943_v51 = vpack.c.bf16 %v97_v50, %v96_v49  ;;  %v21266_v49 = vld [vmem:[%s23620_s4 + $0x6] ss:$0 sm:$0xff] }
 0x888   :  { %v2665_v61 = vmul.f32 %v21061_v55, %v2657_v57  ;;  %19932 = vmatprep.subr.bf16.mxu1 %v19931_v37 }
 0x889   :  { %v2254_v62 = vpop.f32.mrb[26].mxu0 }
 0x88a   :  { %v18618_v1 = vpop.f32.mrb[27].mxu0  ;;  %18637 = vmatmul.mubr.msk.f32.vlgmr.msra.gmra.mrb[30].mxu0 %vm422_vm2, %v2254_v62  ;;  %v21075_v2 = vadd.f32 %v21068_v60, %v2665_v61 }
 0x88b   :  { %19926 = vmatpush3.bf16.msra.mxu0 %v19923_v30  ;;  %v21199_v30 = vld [vmem:[%s23631_s14] ss:$0 sm:$0xff] }
 0x88c   :  { %18652 = vmatprep.mubr.msk.f32.mxu0 %vm127_vm1, %v21075_v2 }
 0x88d   :  { %v2330_v63 = vpop.f32.mrb[26].mxu1 }
 0x88e   :  { %v18623_v3 = vpop.f32.mrb[27].mxu1  ;;  %18642 = vmatmul.mubr.msk.f32.vlgmr.msra.gmra.mrb[30].mxu1 %vm422_vm2, %v2330_v63 }
 0x88f   :  { %19934 = vmatpush3.bf16.msra.mxu1 %v19931_v37  ;;  %v17307_v37 = vld [vmem:[%s23640_s26 + $0xe0] sm:$0xff] }
 0x890   :  { %19936 = vmatprep.subr.bf16.mxu1 %v19935_v41 }
 0x893   :  { %19938 = vmatpush3.bf16.msra.mxu1 %v19935_v41  ;;  %v21232_v41 = vpack.c.bf16 %v17308_v33, %v17307_v37 }
 0x894   :  { %19940 = vmatprep.subr.bf16.mxu1 %v19939_v18 }
 0x897   :  { %19942 = vmatpush3.bf16.msra.mxu1 %v19939_v18  ;;  %v21244_v18 = vpack.c.bf16 %v17310_v28, %v17309_v43 }
 0x898   :  { %19944 = vmatprep.subr.bf16.mxu1 %v19943_v51 }
 0x89b   :  { %19946 = vmatpush3.bf16.msra.mxu1 %v19943_v51  ;;  %v21276_v51 = vld [vmem:[%s23620_s4 + $0x5] ss:$0 sm:$0xff] }
 0x89c   :  { %19959 = vmatprep.subr.bf16.mxu1 %v20567_v0 }
 0x955   :  { %v2403_v5 = vpop.f32.mrb[28].mxu0 }
 0x956   :  { %v18628_v6 = vpop.f32.mrb[29].mxu0  ;;  %v2407_v7 = vadd.f32 %v20958_v4, %v2403_v5 }
 0x959   :  { %v2477_v9 = vpop.f32.mrb[28].mxu1 }
 0x95a   :  { %v2481_v12 = vadd.f32 %v2477_v9, %v2407_v7  ;;  %v18633_v13 = vpop.f32.mrb[29].mxu1  ;;  %v17295_v7 = vld [vmem:[%s23640_s26 + $0x80] sm:$0xff]  ;;  %v17296_v9 = vld [vmem:[%s23640_s26 + $0x88] sm:$0xff] }
 0x95b   :  { %v17304_v13 = vld [vmem:[%s23640_s26 + $0xc8] sm:$0xff] }
 0x95d   :  { %v2551_v19 = vpop.f32.mrb[30].mxu0 }
 0x95e   :  { %v2555_v20 = vadd.f32 %v2551_v19, %v2481_v12  ;;  %v18638_v25 = vpop.f32.mrb[31].mxu0  ;;  %v21151_v12 = vpack.c.bf16 %v17296_v9, %v17295_v7 }
 0x95f   :  { %v17298_v25 = vld [vmem:[%s23640_s26 + $0x98] sm:$0xff] }
 0x961   :  { %v2625_v26 = vpop.f32.mrb[30].mxu1 }
 0x962   :  { %v2629_v11 = vadd.f32 %v2625_v26, %v2555_v20  ;;  %v18643_v14 = vpop.f32.mrb[31].mxu1  ;;  %v17297_v20 = vld [vmem:[%s23640_s26 + $0x90] sm:$0xff] }
 0x963   :  { %v17305_v26 = vld [vmem:[%s23640_s26 + $0xd0] sm:$0xff]  ;;  %v17306_v14 = vld [vmem:[%s23640_s26 + $0xd8] sm:$0xff] }
 0x964   :  { %v2631_v15 = vadd.f32 %v2629_v11, %v20923_v10  ;;  %v87_v10 = vld [vmem:[%s23626_s7 + $0x10] sm:$0xff]  ;;  %v21173_v11 = vpack.c.bf16 %v17298_v25, %v17297_v20 }
 0x965   :  { %v19927_v39 = vpack.c.bf16 %v88_v27, %v87_v10  ;;  %v21202_v27 = vpack.c.bf16 %v17300_v32, %v17299_v31 }
 0x966   :  { %v2635_v17 = vsel %vm127_vm1, %v2631_v15, 0.0 }
 0x967   :  { %2636 = vadd.xlane.f32.xlu1 %v2635_v17  ;;  %19928 = vmatprep.subr.bf16.mxu0 %v19927_v39 }
 0x968   :  { %19930 = vmatpush3.bf16.msra.mxu0 %v19927_v39 }
 0x969   :  { %19947 = vmatprep.subr.bf16.mxu0 %v20567_v0 }
 0x9f4   :  { %v2637_v21 = vpop.xlane.xlu1 %2636 }
 0x9f5   :  { %v2640_v22 = vmul.f32 0.03125, %v2637_v21 }
 0x9f7   :  { %v2642_v23 = vsub.f32 %v2631_v15, %v2640_v22  ;;  %v21179_v15 = vpack.c.bf16 %v17306_v14, %v17305_v26  ;;  %v3263_v26 = vld [vmem:[%s23621_s1 + $0x8] sm:$0xff] }
 0x9f9   :  { %v2644_v24 = vmul.f32 %v2642_v23, %v2642_v23 }
 0x9fb   :  { %v2648_v4 = vsel %vm127_vm1, %v2644_v24, 0.0  ;;  %v21188_v24 = vld [vmem:[%s23630_s13] ss:$0 sm:$0xff] }
 0x9fc   :  { %2649 = vadd.xlane.f32.xlu0 %v2648_v4 }
 0xa89   :  { %v2650_v16 = vpop.xlane.xlu0 %2649 }
 0xa8a   :  { %v2652_v36 = vmul.f32 0.03125, %v2650_v16  ;;  %v21258_v16 = vld [vmem:[%s23620_s4 + $0x4] ss:$0 sm:$0xff] }
 0xa8c   :  { %v2654_v44 = vadd.f32 1e-05, %v2652_v36 }
 0xa8e   :  { %20355 = vrsqrt.f32 %v2654_v44 }
 0xa98   :  { %v20356_v45 = vpop.eup %20355 }
 0xa99   :  { %v2658_v46 = vmul.f32 %v20356_v45, %v2642_v23 }
 0xa9b   :  { %v2666_v47 = vmul.f32 %v21061_v55, %v2658_v46 }
 0xa9d   :  { %v21117_v48 = vadd.f32 %v21068_v60, %v2666_v47 }
 0xa9f   :  { %18653 = vmatmul.mubr.msk.f32.vlgmr.msra.gmra.mrb[32].mxu0 %vm127_vm1, %v21117_v48 }
 0xaa0   :  { %18682 = vmatprep.mubr.msk.f32.mxu0 %vm20568_vm0, %v20569_v8  ;;  %19949 = vmatpush3.bf16.msra.mxu0 %v21151_v12 }
 0xaa1   :  { %19950 = vmatprep.subr.bf16.mxu0 %v20567_v0 }
 0xaa4   :  { %19952 = vmatpush3.bf16.msra.mxu0 %v21173_v11 }
 0xaa5   :  { %19953 = vmatprep.subr.bf16.mxu0 %v20567_v0 }
 0xb72   :  { %v18654_v52 = vpop.f32.mrb[32].mxu0 }
 0xb73   :  { %v2759_v38 = vadd.f32 %v18654_v52, %v17287_v58  ;;  %v2753_v42 = vpop.f32.mrb[33].mxu0 }
 0xb74   :  { %v2754_v34 = vadd.f32 %v17287_v58, %v2753_v42  ;;  %v21288_v42 = vld [vmem:[%s23620_s4 + $0x7] ss:$0 sm:$0xff] }
 0xb75   :  { %v2763_v59 = vmax.f32 %v2759_v38, 0.0 }
 0xb76   :  { %v2762_v53 = vmax.f32 %v2754_v34, 0.0 }
 0xb78   :  { %18671 = vmatprep.mubr.msk.f32.mxu1 %vm2770_vm3, %v2762_v53 }
 0xb79   :  { %18672 = vmatmul.mubr.msk.f32.vlgmr.msra.gmra.mrb[32].mxu1 %vm2770_vm3, %v2763_v59 }
 0xb7a   :  { %18704 = vmatprep.mubr.msk.f32.mxu1 %vm20568_vm0, %v20569_v8 }
 0xc4c   :  { %v18673_v55 = vpop.f32.mrb[32].mxu1 }
 0xc4d   :  { %v21140_v56 = vadd.f32 %v18673_v55, %v17290_v54  ;;  %v2843_v57 = vpop.f32.mrb[33].mxu1 }
 0xc4e   :  { %v2844_v60 = vadd.f32 %v17290_v54, %v2843_v57 }
 0xc50   :  { %v2852_v61 = vadd.f32 %v2844_v60, %v21075_v2  ;;  %v17303_v2 = vld [vmem:[%s23640_s26 + $0xc0] sm:$0xff] }
 0xc51   :  { %v21159_v19 = vpack.c.bf16 %v17304_v13, %v17303_v2  ;;  %v20566_v13 = vld [vmem:[%s23621_s1 + $0x10] sm:$0xff] }
 0xc52   :  { %v2854_v62 = vsel %vm127_vm1, %v2852_v61, 0.0 }
 0xc53   :  { %2855 = vadd.xlane.f32.xlu1 %v2854_v62  ;;  %19961 = vmatpush3.bf16.msra.mxu1 %v21159_v19 }
 0xc54   :  { %19962 = vmatprep.subr.bf16.mxu1 %v20567_v0 }
 0xc57   :  { %19964 = vmatpush3.bf16.msra.mxu1 %v21179_v15 }
 0xc58   :  { %18718 = vmatprep.subr.mxu1 %v20569_v8 }
 0xce0   :  { %v2856_v1 = vpop.xlane.xlu1 %2855 }
 0xce1   :  { %v2860_v63 = vmul.f32 0.03125, %v2856_v1 }
 0xce3   :  { %v2862_v3 = vsub.f32 %v2852_v61, %v2860_v63 }
 0xce5   :  { %v2864_v5 = vmul.f32 %v2862_v3, %v2862_v3 }
 0xce7   :  { %v2866_v6 = vsel %vm127_vm1, %v2864_v5, 0.0  ;;  %v20565_v5 = vld [vmem:[%s23621_s1] sm:$0xff] }
 0xce8   :  { %2867 = vadd.xlane.f32.xlu0 %v2866_v6 }
 0xd75   :  { %v2868_v17 = vpop.xlane.xlu0 %2867 }
 0xd76   :  { %v2872_v21 = vmul.f32 0.03125, %v2868_v17 }
 0xd78   :  { %v2874_v22 = vadd.f32 1e-05, %v2872_v21 }
 0xd7a   :  { %20357 = vrsqrt.f32 %v2874_v22 }
 0xd84   :  { %v20358_v23 = vpop.eup %20357 }
 0xd85   :  { %v2878_v4 = vmul.f32 %v20358_v23, %v2862_v3 }
 0xd87   :  { %v2886_v10 = vmul.f32 %v21188_v24, %v2878_v4  ;;  %v3265_v4 = vld [vmem:[%s23621_s1 + $0x18] sm:$0xff] }
 0xd89   :  { %v21205_v39 = vadd.f32 %v21199_v30, %v2886_v10 }
 0xd8b   :  { %18683 = vmatmul.mubr.msk.f32.vlgmr.msra.gmra.mrb[34].mxu0 %vm127_vm1, %v21205_v39  ;;  %18705 = vmatmul.mubr.msk.f32.vlgmr.msra.gmra.mrb[34].mxu1 %vm127_vm1, %v21205_v39 }
 0xd8c   :  { %19955 = vmatpush3.bf16.msra.mxu0 %v21202_v27  ;;  %18693 = vmatprep.mubr.msk.f32.mxu0 %vm20568_vm0, %v20569_v8 }
 0xd8d   :  { %19956 = vmatprep.subr.bf16.mxu0 %v20567_v0  ;;  %18720 = vmatprep.mubr.msk.f32.mxu1 %vm20568_vm0, %v20569_v8 }
 0xd90   :  { %19958 = vmatpush3.bf16.msra.mxu0 %v21218_v35 }
 0xd91   :  { %19965 = vmatprep.subr.bf16.mxu0 %v20567_v0 }
 0xd93   :  { %18694 = vmatmul.mubr.msk.f32.vlgmr.msra.gmra.mrb[36].mxu0 %vm127_vm1, %v21205_v39 }
 0xd94   :  { %19967 = vmatpush3.bf16.msra.mxu0 %v21232_v41  ;;  %18715 = vmatprep.mubr.msk.f32.mxu0 %vm20568_vm0, %v20569_v8 }
 0xd95   :  { %19968 = vmatprep.subr.bf16.mxu0 %v20567_v0 }
 0xd98   :  { %19970 = vmatpush3.bf16.msra.mxu0 %v21244_v18 }
 0xd99   :  { %18728 = vmatprep.subr.mxu0 %v20569_v8 }
 0xd9b   :  { %18716 = vmatmul.mubr.msk.f32.vlgmr.msra.gmra.mrb[38].mxu0 %vm127_vm1, %v21205_v39 }
 0xd9c   :  { %18730 = vmatprep.mubr.msk.f32.mxu0 %vm20568_vm0, %v20569_v8 }
 0xe5e   :  { %v3044_v36 = vpop.f32.mrb[34].mxu0  ;;  %v3184_v44 = vpop.f32.mrb[34].mxu1 }
 0xe5f   :  { %v21261_v45 = vadd.f32 %v21258_v16, %v3044_v36  ;;  %v18684_v46 = vpop.f32.mrb[35].mxu0  ;;  %v18706_v47 = vpop.f32.mrb[35].mxu1  ;;  %v21271_v50 = vadd.f32 %v21266_v49, %v3184_v44 }
 0xe61   :  { %3267 = vrot.lane.b32.xlu1 %v21261_v45, %s20570_s21  ;;  %v3258_v55 = vmul.f32 0.35355338, %v21261_v45  ;;  %v3260_v60 = vmul.f32 0.35355338, %v21271_v50 }
 0xe65   :  { %3423 = vrot.lane.b32.xlu1 %v21271_v50, %s20570_s21 }
 0xe66   :  { %v3114_v58 = vpop.f32.mrb[36].mxu0 }
 0xe67   :  { %v21281_v52 = vadd.f32 %v21276_v51, %v3114_v58  ;;  %v18695_v38 = vpop.f32.mrb[37].mxu0 }
 0xe69   :  { %3345 = vrot.lane.b32.xlu0 %v21281_v52, %s20570_s21  ;;  %v3259_v62 = vmul.f32 0.35355338, %v21281_v52 }
 0xe6e   :  { %v3254_v34 = vpop.f32.mrb[38].mxu0 }
 0xe6f   :  { %v21291_v53 = vadd.f32 %v21288_v42, %v3254_v34  ;;  %v18717_v59 = vpop.f32.mrb[39].mxu0 }
 0xe71   :  { %3501 = vrot.lane.b32.xlu1 %v21291_v53, %s20570_s21  ;;  %v3261_v63 = vmul.f32 0.35355338, %v21291_v53 }
 0xed3   :  { %v3268_v54 = vpop.permute.xlu1 %3267 }
 0xed4   :  { %18719 = vmatpush3.xpose.msk.msra.mxu1 %vm422_vm2, %v3268_v54 }
 0xed5   :  { %18723 = vmatprep.subr.mxu1 %v20569_v8 }
 0xed7   :  { %v3424_v57 = vpop.permute.xlu1 %3423  ;;  %18721 = vmatmul.mubr.msk.f32.vlgmr.msra.gmra.mrb[36].mxu1 %vm422_vm2, %v3258_v55 }
 0xed8   :  { %18729 = vmatpush3.xpose.msk.msra.mxu0 %vm422_vm2, %v3424_v57  ;;  %18725 = vmatprep.mubr.msk.f32.mxu1 %vm20568_vm0, %v20569_v8 }
 0xed9   :  { %18738 = vmatprep.subr.mxu0 %v20569_v8 }
 0xedb   :  { %v3346_v61 = vpop.permute.xlu0 %3345  ;;  %18731 = vmatmul.mubr.msk.f32.vlgmr.msra.gmra.mrb[40].mxu0 %vm422_vm2, %v3260_v60 }
 0xedc   :  { %18724 = vmatpush3.xpose.msk.msra.mxu1 %vm422_vm2, %v3346_v61  ;;  %18740 = vmatprep.mubr.msk.f32.mxu0 %vm20568_vm0, %v20569_v8 }
 0xedd   :  { %18733 = vmatprep.subr.mxu1 %v20569_v8 }
 0xedf   :  { %18726 = vmatmul.mubr.msk.f32.vlgmr.msra.gmra.mrb[38].mxu1 %vm422_vm2, %v3259_v62 }
 0xee0   :  { %18735 = vmatprep.mubr.msk.f32.mxu1 %vm20568_vm0, %v20569_v8 }
 0xee3   :  { %v3502_v1 = vpop.permute.xlu1 %3501 }
 0xee4   :  { %18734 = vmatpush3.xpose.msk.msra.mxu1 %vm422_vm2, %v3502_v1 }
 0xee5   :  { %18743 = vmatprep.subr.mxu1 %v20569_v8 }
 0xee7   :  { %18736 = vmatmul.mubr.msk.f32.vlgmr.msra.gmra.mrb[40].mxu1 %vm422_vm2, %v3261_v63  ;;  %v2853_v63 = vadd.f32 %v21140_v56, %v21117_v48 }
 0xee8   :  { %18745 = vmatprep.mubr.msk.f32.mxu1 %vm20568_vm0, %v20569_v8 }
 0xfaa   :  { %v3340_v3 = vpop.f32.mrb[36].mxu1 }
 0xfab   :  { %v3341_v6 = vadd.f32 %v20565_v5, %v3340_v3  ;;  %v18722_v7 = vpop.f32.mrb[37].mxu1  ;;  %v2857_v3 = vsel %vm127_vm1, %v2853_v63, 0.0 }
 0xfad   :  { %v3578_v9 = vsel %vm422_vm2, %v3341_v6, -inf }
 0xfae   :  { %3579 = vmax.xlane.f32.xlu0 %v3578_v9  ;;  %v3496_v2 = vpop.f32.mrb[40].mxu0 }
 0xfaf   :  { %v3497_v20 = vadd.f32 %v20566_v13, %v3496_v2  ;;  %v18732_v25 = vpop.f32.mrb[41].mxu0 }
 0xfb1   :  { %v3584_v14 = vsel %vm422_vm2, %v3497_v20, -inf }
 0xfb2   :  { %v3418_v17 = vpop.f32.mrb[38].mxu1  ;;  %3585 = vmax.xlane.f32.xlu0 %v3584_v14 }
 0xfb3   :  { %v3419_v21 = vadd.f32 %v3418_v17, %v3263_v26  ;;  %v18727_v22 = vpop.f32.mrb[39].mxu1 }
 0xfb5   :  { %v3581_v23 = vsel %vm422_vm2, %v3419_v21, -inf }
 0xfb6   :  { %3582 = vmax.xlane.f32.xlu1 %v3581_v23 }
 0xfba   :  { %v3574_v31 = vpop.f32.mrb[40].mxu1 }
 0xfbb   :  { %v3575_v32 = vadd.f32 %v3574_v31, %v3265_v4  ;;  %v18737_v10 = vpop.f32.mrb[41].mxu1  ;;  %v21370_v31 = vld [vmem:[%s23622_s5 + $0x20] sm:$0xff] }
 0xfbd   :  { %v3587_v29 = vsel %vm422_vm2, %v3575_v32, -inf }
 0xfbe   :  { %3588 = vmax.xlane.f32.xlu0 %v3587_v29 }
 0xfc7   :  { %3622 = vrot.lane.b32.xlu1 %v21261_v45, %s20571_s23 }
0x103b   :  { %v3580_v40 = vpop.xlane.xlu0 %3579 }
0x103c   :  { %v3590_v37 = vsub.f32 %v3341_v6, %v3580_v40 }
0x103e   :  { %v3594_v33 = vmul.f32 1.442695, %v3590_v37  ;;  %v21384_v37 = vld [vmem:[%s23622_s5 + $0x30] sm:$0xff] }
0x103f   :  { %v3586_v43 = vpop.xlane.xlu0 %3585 }
0x1040   :  { %20359 = vpow2.f32 %v3594_v33  ;;  %v3592_v28 = vsub.f32 %v3497_v20, %v3586_v43 }
0x1042   :  { %v3598_v36 = vmul.f32 1.442695, %v3592_v28 }
0x1043   :  { %v3583_v44 = vpop.xlane.xlu1 %3582 }
0x1044   :  { %20361 = vpow2.f32 %v3598_v36  ;;  %v3591_v46 = vsub.f32 %v3419_v21, %v3583_v44  ;;  %v21399_v44 = vld [vmem:[%s23622_s5 + $0x38] sm:$0xff] }
0x1046   :  { %v3596_v47 = vmul.f32 1.442695, %v3591_v46 }
0x1047   :  { %v3623_v58 = vpop.permute.xlu1 %3622 }
0x1048   :  { %20363 = vpow2.f32 %v3596_v47  ;;  %18739 = vmatpush3.msra.mxu0 %v3623_v58 }
0x1049   :  { %18748 = vmatprep.subr.mxu0 %v20569_v8 }
0x104a   :  { %v20360_v38 = vpop.eup %20359 }
0x104b   :  { %v3589_v34 = vpop.xlane.xlu0 %3588  ;;  %v3602_v45 = vsel %vm422_vm2, %v20360_v38, 0.0 }
0x104c   :  { %v3593_v59 = vsub.f32 %v3575_v32, %v3589_v34  ;;  %3603 = vadd.xlane.f32.xlu1 %v3602_v45  ;;  %v21377_v32 = vld [vmem:[%s23622_s5 + $0x28] sm:$0xff] }
0x104e   :  { %v20362_v54 = vpop.eup %20361  ;;  %v3600_v55 = vmul.f32 1.442695, %v3593_v59 }
0x104f   :  { %v3608_v57 = vsel %vm422_vm2, %v20362_v54, 0.0 }
0x1050   :  { %20365 = vpow2.f32 %v3600_v55  ;;  %3609 = vadd.xlane.f32.xlu1 %v3608_v57 }
0x1052   :  { %v20364_v60 = vpop.eup %20363 }
0x1053   :  { %v3605_v61 = vsel %vm422_vm2, %v20364_v60, 0.0 }
0x1054   :  { %3606 = vadd.xlane.f32.xlu0 %v3605_v61 }
0x105a   :  { %v20366_v62 = vpop.eup %20365 }
0x105b   :  { %v3611_v1 = vsel %vm422_vm2, %v20366_v62, 0.0 }
0x105c   :  { %3612 = vadd.xlane.f32.xlu0 %v3611_v1 }
0x1061   :  { %3774 = vrot.lane.b32.xlu1 %v21271_v50, %s20571_s23 }
0x1065   :  { %3850 = vrot.lane.b32.xlu1 %v21291_v53, %s20571_s23 }
0x1072   :  { %3698 = vrot.lane.b32.xlu0 %v21281_v52, %s20571_s23 }
0x1091   :  { %2858 = vadd.xlane.f32.xlu0 %v2857_v3 }
0x10d9   :  { %v3604_v5 = vpop.xlane.xlu1 %3603 }
0x10da   :  { %20367 = vrcp.f32 %v3604_v5 }
0x10dd   :  { %v3610_v6 = vpop.xlane.xlu1 %3609 }
0x10de   :  { %20369 = vrcp.f32 %v3610_v6 }
0x10e1   :  { %v3607_v7 = vpop.xlane.xlu0 %3606  ;;  %v3775_v2 = vpop.permute.xlu1 %3774 }
0x10e2   :  { %20371 = vrcp.f32 %v3607_v7 }
0x10e4   :  { %v20368_v9 = vpop.eup %20367 }
0x10e5   :  { %v3618_v50 = vmul.f32 %v20368_v9, %v20360_v38  ;;  %v3851_v25 = vpop.permute.xlu1 %3850 }
0x10e7   :  { %18741 = vmatmul.mubr.msk.f32.vlgmr.msra.gmra.mrb[42].mxu0 %vm422_vm2, %v3618_v50 }
0x10e8   :  { %v20370_v53 = vpop.eup %20369  ;;  %18749 = vmatpush3.msra.mxu0 %v3775_v2  ;;  %18750 = vmatprep.mubr.msk.f32.mxu0 %vm20568_vm0, %v20569_v8 }
0x10e9   :  { %v3613_v48 = vpop.xlane.xlu0 %3612  ;;  %v3620_v56 = vmul.f32 %v20370_v53, %v20362_v54  ;;  %18758 = vmatprep.subr.mxu0 %v20569_v8 }
0x10ea   :  { %20373 = vrcp.f32 %v3613_v48 }
0x10eb   :  { %18751 = vmatmul.mubr.msk.f32.vlgmr.msra.gmra.mrb[44].mxu0 %vm422_vm2, %v3620_v56 }
0x10ec   :  { %v20372_v52 = vpop.eup %20371  ;;  %18760 = vmatprep.mubr.msk.f32.mxu0 %vm20568_vm0, %v20569_v8  ;;  %18759 = vmatpush3.msra.mxu0 %v21370_v31 }
0x10ed   :  { %v3699_v13 = vpop.permute.xlu0 %3698  ;;  %v3619_v20 = vmul.f32 %v20372_v52, %v20364_v60  ;;  %18768 = vmatprep.subr.mxu0 %v20569_v8 }
0x10ee   :  { %18744 = vmatpush3.msra.mxu1 %v3699_v13 }
0x10ef   :  { %18746 = vmatmul.mubr.msk.f32.vlgmr.msra.gmra.mrb[42].mxu1 %vm422_vm2, %v3619_v20  ;;  %18753 = vmatprep.subr.mxu1 %v20569_v8  ;;  %v17367_v20 = vld [vmem:[%s23621_s1 + $0x20] sm:$0xff] }
0x10f0   :  { %18754 = vmatpush3.msra.mxu1 %v3851_v25  ;;  %18755 = vmatprep.mubr.msk.f32.mxu1 %vm20568_vm0, %v20569_v8 }
0x10f1   :  { %18763 = vmatprep.subr.mxu1 %v20569_v8 }
0x10f4   :  { %v20374_v26 = vpop.eup %20373 }
0x10f5   :  { %v3621_v14 = vmul.f32 %v20374_v26, %v20366_v62 }
0x10f7   :  { %18756 = vmatmul.mubr.msk.f32.vlgmr.msra.gmra.mrb[44].mxu1 %vm422_vm2, %v3621_v14 }
0x10f8   :  { %18765 = vmatprep.mubr.msk.f32.mxu1 %vm20568_vm0, %v20569_v8  ;;  %18764 = vmatpush3.msra.mxu1 %v21377_v32 }
0x10f9   :  { %18773 = vmatprep.subr.mxu1 %v20569_v8 }
0x111e   :  { %v2859_v17 = vpop.xlane.xlu0 %2858 }
0x111f   :  { %v2861_v21 = vmul.f32 0.03125, %v2859_v17 }
0x1121   :  { %v2863_v22 = vsub.f32 %v2853_v63, %v2861_v21  ;;  %v17369_v21 = vld [vmem:[%s23621_s1 + $0x30] sm:$0xff] }
0x1123   :  { %v2865_v23 = vmul.f32 %v2863_v22, %v2863_v22 }
0x1125   :  { %v2869_v4 = vsel %vm127_vm1, %v2865_v23, 0.0  ;;  %v17368_v23 = vld [vmem:[%s23621_s1 + $0x28] sm:$0xff] }
0x1126   :  { %2870 = vadd.xlane.f32.xlu1 %v2869_v4 }
0x11b3   :  { %v2871_v10 = vpop.xlane.xlu1 %2870 }
0x11b4   :  { %v2873_v29 = vmul.f32 0.03125, %v2871_v10 }
0x11b6   :  { %v2875_v40 = vadd.f32 1e-05, %v2873_v29 }
0x11b8   :  { %20375 = vrsqrt.f32 %v2875_v40 }
0x11ba   :  { %v3694_v33 = vpop.f32.mrb[42].mxu0 }
0x11bb   :  { %v18742_v43 = vpop.f32.mrb[43].mxu0  ;;  %18761 = vmatmul.mubr.msk.f32.vlgmr.msra.gmra.mrb[46].mxu0 %vm422_vm2, %v3694_v33 }
0x11bc   :  { %18769 = vmatpush3.msra.mxu0 %v21384_v37  ;;  %18770 = vmatprep.mubr.msk.f32.mxu0 %vm20568_vm0, %v20569_v8 }
0x11bd   :  { %19971 = vmatprep.subr.bf16.mxu0 %v20567_v0 }
0x11be   :  { %v3846_v28 = vpop.f32.mrb[44].mxu0 }
0x11bf   :  { %v18752_v36 = vpop.f32.mrb[45].mxu0  ;;  %18771 = vmatmul.mubr.msk.f32.vlgmr.msra.gmra.mrb[48].mxu0 %vm422_vm2, %v3846_v28 }
0x11c0   :  { %19973 = vmatpush3.bf16.msra.mxu0 %v21151_v12  ;;  %18786 = vmatprep.mubr.msk.f32.mxu0 %vm20568_vm0, %v20569_v8  ;;  %v17370_v36 = vld [vmem:[%s23621_s1 + $0x38] sm:$0xff] }
0x11c1   :  { %19974 = vmatprep.subr.bf16.mxu0 %v20567_v0 }
0x11c2   :  { %v20376_v46 = vpop.eup %20375  ;;  %v3770_v47 = vpop.f32.mrb[42].mxu1 }
0x11c3   :  { %v2879_v58 = vmul.f32 %v20376_v46, %v2863_v22  ;;  %v18747_v38 = vpop.f32.mrb[43].mxu1  ;;  %18766 = vmatmul.mubr.msk.f32.vlgmr.msra.gmra.mrb[46].mxu1 %vm422_vm2, %v3770_v47 }
0x11c4   :  { %19976 = vmatpush3.bf16.msra.mxu0 %v21173_v11  ;;  %18774 = vmatpush3.msra.mxu1 %v21399_v44 }
0x11c5   :  { %19983 = vmatprep.subr.bf16.mxu0 %v20567_v0  ;;  %v2887_v12 = vmul.f32 %v21188_v24, %v2879_v58  ;;  %18775 = vmatprep.mubr.msk.f32.mxu1 %vm20568_vm0, %v20569_v8  ;;  %v21446_v24 = vld [vmem:[%s23623_s6 + $0x1] ss:$0 sm:$0xff] }
0x11c6   :  { %19977 = vmatprep.subr.bf16.mxu1 %v20567_v0 }
0x11c7   :  { %v21410_v34 = vadd.f32 %v21199_v30, %v2887_v12 }
0x11c9   :  { %18787 = vmatmul.mubr.msk.f32.vlgmr.msra.gmra.mrb[50].mxu0 %vm127_vm1, %v21410_v34 }
0x11ca   :  { %19985 = vmatpush3.bf16.msra.mxu0 %v21159_v19  ;;  %v3922_v11 = vpop.f32.mrb[44].mxu1  ;;  %18808 = vmatprep.mubr.msk.f32.mxu0 %vm20568_vm0, %v20569_v8 }
0x11cb   :  { %v18757_v45 = vpop.f32.mrb[45].mxu1  ;;  %18776 = vmatmul.mubr.msk.f32.vlgmr.msra.gmra.mrb[48].mxu1 %vm422_vm2, %v3922_v11  ;;  %19986 = vmatprep.subr.bf16.mxu0 %v20567_v0 }
0x11cc   :  { %19979 = vmatpush3.bf16.msra.mxu1 %v21202_v27  ;;  %18797 = vmatprep.mubr.msk.f32.mxu1 %vm20568_vm0, %v20569_v8 }
0x11cd   :  { %19980 = vmatprep.subr.bf16.mxu1 %v20567_v0 }
0x11ce   :  { %19988 = vmatpush3.bf16.msra.mxu0 %v21179_v15 }
0x11cf   :  { %18822 = vmatprep.subr.mxu0 %v20569_v8 }
0x11d0   :  { %19982 = vmatpush3.bf16.msra.mxu1 %v21218_v35 }
0x11d1   :  { %18809 = vmatmul.mubr.msk.f32.vlgmr.msra.gmra.mrb[52].mxu0 %vm127_vm1, %v21410_v34  ;;  %19989 = vmatprep.subr.bf16.mxu1 %v20567_v0 }
0x11d2   :  { %18824 = vmatprep.mubr.msk.f32.mxu0 %vm20568_vm0, %v20569_v8 }
0x11d3   :  { %18798 = vmatmul.mubr.msk.f32.vlgmr.msra.gmra.mrb[50].mxu1 %vm127_vm1, %v21410_v34 }
0x11d4   :  { %19991 = vmatpush3.bf16.msra.mxu1 %v21232_v41  ;;  %18819 = vmatprep.mubr.msk.f32.mxu1 %vm20568_vm0, %v20569_v8 }
0x11d5   :  { %19992 = vmatprep.subr.bf16.mxu1 %v20567_v0 }
0x11d8   :  { %19994 = vmatpush3.bf16.msra.mxu1 %v21244_v18 }
0x11d9   :  { %18827 = vmatprep.subr.mxu1 %v20569_v8 }
0x11db   :  { %18820 = vmatmul.mubr.msk.f32.vlgmr.msra.gmra.mrb[52].mxu1 %vm127_vm1, %v21410_v34 }
0x11dc   :  { %18829 = vmatprep.mubr.msk.f32.mxu1 %vm20568_vm0, %v20569_v8 }
0x128e   :  { %v3995_v19 = vpop.f32.mrb[46].mxu0 }
0x128f   :  { %v18762_v15 = vpop.f32.mrb[47].mxu0  ;;  %v4005_v35 = vadd.f32 %v21446_v24, %v3995_v19 }
0x1292   :  { %v4149_v30 = vpop.f32.mrb[48].mxu0 }
0x1293   :  { %v18772_v27 = vpop.f32.mrb[49].mxu0 }
0x1296   :  { %v4075_v41 = vpop.f32.mrb[46].mxu1 }
0x1297   :  { %v4079_v18 = vadd.f32 %v4075_v41, %v4005_v35  ;;  %v18767_v59 = vpop.f32.mrb[47].mxu1 }
0x1299   :  { %v4153_v54 = vadd.f32 %v4149_v30, %v4079_v18 }
0x129c   :  { %v4297_v55 = vpop.f32.mrb[50].mxu0 }
0x129d   :  { %v21450_v57 = vadd.f32 %v21258_v16, %v4297_v55  ;;  %v18788_v60 = vpop.f32.mrb[51].mxu0 }
0x129e   :  { %v4223_v61 = vpop.f32.mrb[48].mxu1 }
0x129f   :  { %v21452_v62 = vadd.f32 %v4223_v61, %v4153_v54  ;;  %v18777_v1 = vpop.f32.mrb[49].mxu1  ;;  %4520 = vrot.lane.b32.xlu0 %v21450_v57, %s20570_s21 }
0x12a4   :  { %v4437_v63 = vpop.f32.mrb[52].mxu0 }
0x12a5   :  { %v21457_v3 = vadd.f32 %v21266_v49, %v4437_v63  ;;  %v18810_v5 = vpop.f32.mrb[53].mxu0 }
0x12a6   :  { %v4367_v6 = vpop.f32.mrb[50].mxu1 }
0x12a7   :  { %v21460_v7 = vadd.f32 %v21276_v51, %v4367_v6  ;;  %v18799_v9 = vpop.f32.mrb[51].mxu1  ;;  %4676 = vrot.lane.b32.xlu0 %v21457_v3, %s20570_s21  ;;  %v4511_v51 = vmul.f32 0.35355338, %v21450_v57 }
0x12a9   :  { %4598 = vrot.lane.b32.xlu1 %v21460_v7, %s20570_s21  ;;  %v4512_v56 = vmul.f32 0.35355338, %v21460_v7 }
0x12ae   :  { %v4507_v16 = vpop.f32.mrb[52].mxu1 }
0x12af   :  { %v21467_v50 = vadd.f32 %v21288_v42, %v4507_v16  ;;  %v18821_v2 = vpop.f32.mrb[53].mxu1  ;;  %v4513_v42 = vmul.f32 0.35355338, %v21457_v3  ;;  %v5475_v16 = vadd.f32 %v21452_v62, %v21205_v39 }
0x12b1   :  { %4754 = vrot.lane.b32.xlu1 %v21467_v50, %s20570_s21  ;;  %v4514_v13 = vmul.f32 0.35355338, %v21467_v50  ;;  %v5477_v2 = vsel %vm127_vm1, %v5475_v16, 0.0 }
0x1311   :  { %v4521_v49 = vpop.permute.xlu0 %4520 }
0x1312   :  { %18823 = vmatpush3.xpose.msk.msra.mxu0 %vm422_vm2, %v4521_v49 }
0x1313   :  { %18832 = vmatprep.subr.mxu0 %v20569_v8 }
0x1315   :  { %18825 = vmatmul.mubr.msk.f32.vlgmr.msra.gmra.mrb[54].mxu0 %vm422_vm2, %v4511_v51 }
0x1316   :  { %18834 = vmatprep.mubr.msk.f32.mxu0 %vm20568_vm0, %v20569_v8 }
0x1319   :  { %v4677_v53 = vpop.permute.xlu0 %4676 }
0x131a   :  { %18833 = vmatpush3.xpose.msk.msra.mxu0 %vm422_vm2, %v4677_v53 }
0x131b   :  { %v4599_v48 = vpop.permute.xlu1 %4598  ;;  %18842 = vmatprep.subr.mxu0 %v20569_v8 }
0x131c   :  { %18828 = vmatpush3.xpose.msk.msra.mxu1 %vm422_vm2, %v4599_v48 }
0x131d   :  { %18835 = vmatmul.mubr.msk.f32.vlgmr.msra.gmra.mrb[56].mxu0 %vm422_vm2, %v4513_v42  ;;  %18837 = vmatprep.subr.mxu1 %v20569_v8 }
0x131e   :  { %18844 = vmatprep.mubr.msk.f32.mxu0 %vm20568_vm0, %v20569_v8 }
0x131f   :  { %18830 = vmatmul.mubr.msk.f32.vlgmr.msra.gmra.mrb[54].mxu1 %vm422_vm2, %v4512_v56 }
0x1320   :  { %18839 = vmatprep.mubr.msk.f32.mxu1 %vm20568_vm0, %v20569_v8 }
0x1323   :  { %v4755_v52 = vpop.permute.xlu1 %4754 }
0x1324   :  { %18838 = vmatpush3.xpose.msk.msra.mxu1 %vm422_vm2, %v4755_v52 }
0x1325   :  { %18847 = vmatprep.subr.mxu1 %v20569_v8 }
0x1327   :  { %18840 = vmatmul.mubr.msk.f32.vlgmr.msra.gmra.mrb[56].mxu1 %vm422_vm2, %v4514_v13 }
0x1328   :  { %18849 = vmatprep.mubr.msk.f32.mxu1 %vm20568_vm0, %v20569_v8 }
0x13e8   :  { %v4593_v25 = vpop.f32.mrb[54].mxu0 }
0x13e9   :  { %v4594_v26 = vadd.f32 %v17367_v20, %v4593_v25  ;;  %v18826_v14 = vpop.f32.mrb[55].mxu0 }
0x13eb   :  { %v4831_v17 = vsel %vm422_vm2, %v4594_v26, -inf }
0x13ec   :  { %4832 = vmax.xlane.f32.xlu0 %v4831_v17 }
0x13f0   :  { %v4749_v22 = vpop.f32.mrb[56].mxu0 }
0x13f1   :  { %v4750_v4 = vadd.f32 %v17369_v21, %v4749_v22  ;;  %v18836_v10 = vpop.f32.mrb[57].mxu0 }
0x13f2   :  { %v4671_v29 = vpop.f32.mrb[54].mxu1 }
0x13f3   :  { %v4672_v40 = vadd.f32 %v17368_v23, %v4671_v29  ;;  %v18831_v33 = vpop.f32.mrb[55].mxu1  ;;  %v4837_v43 = vsel %vm422_vm2, %v4750_v4, -inf }
0x13f4   :  { %4838 = vmax.xlane.f32.xlu0 %v4837_v43 }
0x13f5   :  { %v4834_v28 = vsel %vm422_vm2, %v4672_v40, -inf }
0x13f6   :  { %4835 = vmax.xlane.f32.xlu1 %v4834_v28  ;;  %v21555_v28 = vld [vmem:[%s23624_s11 + $0x1] ss:$0 sm:$0xff] }
0x13fa   :  { %v4827_v46 = vpop.f32.mrb[56].mxu1 }
0x13fb   :  { %v4828_v47 = vadd.f32 %v17370_v36, %v4827_v46  ;;  %v18841_v58 = vpop.f32.mrb[57].mxu1 }
0x13fd   :  { %v4840_v38 = vsel %vm422_vm2, %v4828_v47, -inf }
0x13fe   :  { %4841 = vmax.xlane.f32.xlu0 %v4840_v38 }
0x1407   :  { %4875 = vrot.lane.b32.xlu1 %v21450_v57, %s20571_s23 }
0x1479   :  { %v4833_v12 = vpop.xlane.xlu0 %4832 }
0x147a   :  { %v4843_v11 = vsub.f32 %v4594_v26, %v4833_v12 }
0x147c   :  { %v4847_v45 = vmul.f32 1.442695, %v4843_v11 }
0x147e   :  { %20377 = vpow2.f32 %v4847_v45 }
0x1481   :  { %v4839_v19 = vpop.xlane.xlu0 %4838 }
0x1482   :  { %v4845_v15 = vsub.f32 %v4750_v4, %v4839_v19 }
0x1483   :  { %v4836_v30 = vpop.xlane.xlu1 %4835 }
0x1484   :  { %v4851_v27 = vmul.f32 1.442695, %v4845_v15  ;;  %v4844_v35 = vsub.f32 %v4672_v40, %v4836_v30 }
0x1486   :  { %20379 = vpow2.f32 %v4851_v27  ;;  %v4849_v41 = vmul.f32 1.442695, %v4844_v35 }
0x1487   :  { %v4876_v18 = vpop.permute.xlu1 %4875 }
0x1488   :  { %v20378_v59 = vpop.eup %20377  ;;  %20381 = vpow2.f32 %v4849_v41  ;;  %18843 = vmatpush3.msra.mxu0 %v4876_v18 }
0x1489   :  { %v4855_v54 = vsel %vm422_vm2, %v20378_v59, 0.0  ;;  %18852 = vmatprep.subr.mxu0 %v20569_v8 }
0x148a   :  { %4856 = vadd.xlane.f32.xlu1 %v4855_v54 }
0x148b   :  { %v4842_v55 = vpop.xlane.xlu0 %4841 }
0x148c   :  { %v4846_v57 = vsub.f32 %v4828_v47, %v4842_v55 }
0x148e   :  { %v4853_v60 = vmul.f32 1.442695, %v4846_v57 }
0x1490   :  { %v20380_v61 = vpop.eup %20379  ;;  %20383 = vpow2.f32 %v4853_v60 }
0x1491   :  { %v4861_v1 = vsel %vm422_vm2, %v20380_v61, 0.0 }
0x1492   :  { %v20382_v63 = vpop.eup %20381  ;;  %4862 = vadd.xlane.f32.xlu1 %v4861_v1 }
0x1493   :  { %v4858_v5 = vsel %vm422_vm2, %v20382_v63, 0.0 }
0x1494   :  { %4859 = vadd.xlane.f32.xlu0 %v4858_v5 }
0x149a   :  { %v20384_v6 = vpop.eup %20383 }
0x149b   :  { %v4864_v9 = vsel %vm422_vm2, %v20384_v6, 0.0 }
0x149c   :  { %4865 = vadd.xlane.f32.xlu0 %v4864_v9 }
0x14a3   :  { %5027 = vrot.lane.b32.xlu1 %v21457_v3, %s20571_s23 }
0x14a7   :  { %5103 = vrot.lane.b32.xlu1 %v21467_v50, %s20571_s23 }
0x14b2   :  { %4951 = vrot.lane.b32.xlu0 %v21460_v7, %s20571_s23 }
0x14d1   :  { %5478 = vadd.xlane.f32.xlu0 %v5477_v2 }
0x1517   :  { %v4857_v49 = vpop.xlane.xlu1 %4856 }
0x1518   :  { %20385 = vrcp.f32 %v4857_v49  ;;  %v17325_v49 = vld [vmem:[%s23627_s9 + $0x40] sm:$0xff] }
0x151f   :  { %v4863_v51 = vpop.xlane.xlu1 %4862 }
0x1520   :  { %20387 = vrcp.f32 %v4863_v51  ;;  %v17326_v51 = vld [vmem:[%s23627_s9 + $0x48] sm:$0xff] }
0x1521   :  { %v4860_v53 = vpop.xlane.xlu0 %4859 }
0x1522   :  { %v20386_v42 = vpop.eup %20385  ;;  %20389 = vrcp.f32 %v4860_v53  ;;  %v17327_v53 = vld [vmem:[%s23627_s9 + $0x50] sm:$0xff] }
0x1523   :  { %v4871_v3 = vmul.f32 %v20386_v42, %v20378_v59  ;;  %v5028_v48 = vpop.permute.xlu1 %5027  ;;  %v20003_v42 = vpack.c.bf16 %v17326_v51, %v17325_v49  ;;  %v17403_v49 = vld [vmem:[%s23640_s26 + $0x130] sm:$0xff]  ;;  %v17404_v51 = vld [vmem:[%s23640_s26 + $0x138] sm:$0xff] }
0x1525   :  { %18845 = vmatmul.mubr.msk.f32.vlgmr.msra.gmra.mrb[58].mxu0 %vm422_vm2, %v4871_v3  ;;  %v17328_v3 = vld [vmem:[%s23627_s9 + $0x58] sm:$0xff] }
0x1526   :  { %18853 = vmatpush3.msra.mxu0 %v5028_v48  ;;  %18854 = vmatprep.mubr.msk.f32.mxu0 %vm20568_vm0, %v20569_v8  ;;  %v20007_v48 = vpack.c.bf16 %v17328_v3, %v17327_v53  ;;  %v21707_v53 = vpack.c.bf16 %v17404_v51, %v17403_v49  ;;  %v17410_v3 = vld [vmem:[%s23640_s26 + $0x168] sm:$0xff] }
0x1527   :  { %18862 = vmatprep.subr.mxu0 %v20569_v8  ;;  %v5104_v13 = vpop.permute.xlu1 %5103 }
0x1529   :  { %v4866_v39 = vpop.xlane.xlu0 %4865 }
0x152a   :  { %v20388_v62 = vpop.eup %20387  ;;  %20391 = vrcp.f32 %v4866_v39  ;;  %v17329_v39 = vld [vmem:[%s23627_s9 + $0x60] sm:$0xff] }
0x152b   :  { %v4873_v7 = vmul.f32 %v20388_v62, %v20380_v61  ;;  %v17330_v62 = vld [vmem:[%s23627_s9 + $0x68] sm:$0xff] }
0x152c   :  { %v20390_v50 = vpop.eup %20389 }
0x152d   :  { %18855 = vmatmul.mubr.msk.f32.vlgmr.msra.gmra.mrb[60].mxu0 %vm422_vm2, %v4873_v7  ;;  %v4952_v56 = vpop.permute.xlu0 %4951  ;;  %v4872_v52 = vmul.f32 %v20390_v50, %v20382_v63  ;;  %v20011_v7 = vpack.c.bf16 %v17330_v62, %v17329_v39  ;;  %v17411_v39 = vld [vmem:[%s23640_s26 + $0x170] sm:$0xff]  ;;  %v17412_v62 = vld [vmem:[%s23640_s26 + $0x178] sm:$0xff] }
0x152e   :  { %18848 = vmatpush3.msra.mxu1 %v4952_v56  ;;  %18863 = vmatpush3.msra.mxu0 %v21370_v31 }
0x152f   :  { %18850 = vmatmul.mubr.msk.f32.vlgmr.msra.gmra.mrb[58].mxu1 %vm422_vm2, %v4872_v52  ;;  %18857 = vmatprep.subr.mxu1 %v20569_v8 }
0x1530   :  { %18858 = vmatpush3.msra.mxu1 %v5104_v13  ;;  %18859 = vmatprep.mubr.msk.f32.mxu1 %vm20568_vm0, %v20569_v8 }
0x1531   :  { %18864 = vmatprep.mubr.msk.f32.mxu0 %vm20568_vm0, %v20569_v8  ;;  %18872 = vmatprep.subr.mxu0 %v20569_v8 }
0x1532   :  { %18867 = vmatprep.subr.mxu1 %v20569_v8 }
0x1534   :  { %v20392_v20 = vpop.eup %20391 }
0x1535   :  { %v4874_v25 = vmul.f32 %v20392_v20, %v20384_v6  ;;  %v17321_v6 = vld [vmem:[%s23626_s7 + $0x28] sm:$0xff] }
0x1537   :  { %18860 = vmatmul.mubr.msk.f32.vlgmr.msra.gmra.mrb[60].mxu1 %vm422_vm2, %v4874_v25 }
0x1538   :  { %18868 = vmatpush3.msra.mxu1 %v21377_v32  ;;  %18869 = vmatprep.mubr.msk.f32.mxu1 %vm20568_vm0, %v20569_v8 }
0x1539   :  { %18877 = vmatprep.subr.mxu1 %v20569_v8 }
0x155e   :  { %v5479_v31 = vpop.xlane.xlu0 %5478 }
0x155f   :  { %v5483_v26 = vmul.f32 0.03125, %v5479_v31 }
0x1561   :  { %v5485_v14 = vsub.f32 %v5475_v16, %v5483_v26  ;;  %v17323_v16 = vld [vmem:[%s23626_s7 + $0x38] sm:$0xff]  ;;  %v17331_v26 = vld [vmem:[%s23627_s9 + $0x70] sm:$0xff] }
0x1563   :  { %v5487_v17 = vmul.f32 %v5485_v14, %v5485_v14 }
0x1565   :  { %v5489_v21 = vsel %vm127_vm1, %v5487_v17, 0.0 }
0x1566   :  { %5490 = vadd.xlane.f32.xlu0 %v5489_v21  ;;  %v17389_v21 = vld [vmem:[%s23628_s8 + $0x1] ss:$0 sm:$0xff] }
0x15f3   :  { %v5491_v22 = vpop.xlane.xlu0 %5490 }
0x15f4   :  { %v5495_v23 = vmul.f32 0.03125, %v5491_v22 }
0x15f6   :  { %v5497_v4 = vadd.f32 1e-05, %v5495_v23 }
0x15f8   :  { %20393 = vrsqrt.f32 %v5497_v4  ;;  %v4947_v10 = vpop.f32.mrb[58].mxu0 }
0x15f9   :  { %v18846_v29 = vpop.f32.mrb[59].mxu0  ;;  %18865 = vmatmul.mubr.msk.f32.vlgmr.msra.gmra.mrb[62].mxu0 %vm422_vm2, %v4947_v10 }
0x15fa   :  { %18873 = vmatpush3.msra.mxu0 %v21384_v37  ;;  %18874 = vmatprep.mubr.msk.f32.mxu0 %vm20568_vm0, %v20569_v8  ;;  %v17388_v37 = vld [vmem:[%s23625_s12 + $0x1] ss:$0 sm:$0xff] }
0x1600   :  { %v5099_v32 = vpop.f32.mrb[60].mxu0 }
0x1601   :  { %v18856_v40 = vpop.f32.mrb[61].mxu0  ;;  %18875 = vmatmul.mubr.msk.f32.vlgmr.msra.gmra.mrb[64].mxu0 %vm422_vm2, %v5099_v32 }
0x1602   :  { %v20394_v33 = vpop.eup %20393  ;;  %v5023_v43 = vpop.f32.mrb[58].mxu1  ;;  %v17392_v40 = vld [vmem:[%s23629_s10 + $0x1] ss:$0 sm:$0xff] }
0x1603   :  { %v18851_v36 = vpop.f32.mrb[59].mxu1  ;;  %18870 = vmatmul.mubr.msk.f32.vlgmr.msra.gmra.mrb[62].mxu1 %vm422_vm2, %v5023_v43  ;;  %v5501_v46 = vmul.f32 %v20394_v33, %v5485_v14  ;;  %v17332_v14 = vld [vmem:[%s23627_s9 + $0x78] sm:$0xff] }
0x1604   :  { %18878 = vmatpush3.msra.mxu1 %v21399_v44  ;;  %18879 = vmatprep.mubr.msk.f32.mxu1 %vm20568_vm0, %v20569_v8  ;;  %v20015_v17 = vpack.c.bf16 %v17332_v14, %v17331_v26  ;;  %v21755_v26 = vld [vmem:[%s23620_s4 + $0xa] ss:$0 sm:$0xff] }
0x1605   :  { %v5509_v47 = vmul.f32 %v21555_v28, %v5501_v46  ;;  %20004 = vmatprep.subr.bf16.mxu1 %v20003_v42 }
0x1607   :  { %v21565_v58 = vadd.f32 %v17388_v37, %v5509_v47 }
0x1609   :  { %18890 = vmatprep.mubr.msk.f32.mxu0 %vm127_vm1, %v21565_v58 }
0x160a   :  { %v5175_v38 = vpop.f32.mrb[60].mxu1 }
0x160b   :  { %v18861_v12 = vpop.f32.mrb[61].mxu1  ;;  %18880 = vmatmul.mubr.msk.f32.vlgmr.msra.gmra.mrb[64].mxu1 %vm422_vm2, %v5175_v38 }
0x160c   :  { %20006 = vmatpush3.bf16.msra.mxu1 %v20003_v42  ;;  %v17409_v42 = vld [vmem:[%s23640_s26 + $0x160] sm:$0xff] }
0x160d   :  { %20008 = vmatprep.subr.bf16.mxu1 %v20007_v48 }
0x1610   :  { %20010 = vmatpush3.bf16.msra.mxu1 %v20007_v48  ;;  %v21721_v48 = vpack.c.bf16 %v17410_v3, %v17409_v42 }
0x1611   :  { %20012 = vmatprep.subr.bf16.mxu1 %v20011_v7 }
0x1614   :  { %20014 = vmatpush3.bf16.msra.mxu1 %v20011_v7  ;;  %v21733_v7 = vpack.c.bf16 %v17412_v62, %v17411_v39 }
0x1615   :  { %20016 = vmatprep.subr.bf16.mxu1 %v20015_v17 }
0x1618   :  { %20018 = vmatpush3.bf16.msra.mxu1 %v20015_v17  ;;  %v21765_v17 = vld [vmem:[%s23620_s4 + $0x9] ss:$0 sm:$0xff] }
0x1619   :  { %20031 = vmatprep.subr.bf16.mxu1 %v20567_v0 }
0x16cc   :  { %v5248_v11 = vpop.f32.mrb[62].mxu0 }
0x16cd   :  { %v18866_v44 = vpop.f32.mrb[63].mxu0  ;;  %v5252_v19 = vadd.f32 %v21446_v24, %v5248_v11  ;;  %v17320_v24 = vld [vmem:[%s23626_s7 + $0x20] sm:$0xff] }
0x16ce   :  { %v19995_v9 = vpack.c.bf16 %v17321_v6, %v17320_v24  ;;  %v17401_v24 = vld [vmem:[%s23640_s26 + $0x120] sm:$0xff]  ;;  %v17402_v6 = vld [vmem:[%s23640_s26 + $0x128] sm:$0xff] }
0x16d0   :  { %19996 = vmatprep.subr.bf16.mxu0 %v19995_v9 }
0x16d1   :  { %19998 = vmatpush3.bf16.msra.mxu0 %v19995_v9  ;;  %v21688_v9 = vld [vmem:[%s23631_s14 + $0x1] ss:$0 sm:$0xff] }
0x16d4   :  { %v5396_v45 = vpop.f32.mrb[64].mxu0 }
0x16d5   :  { %v18876_v15 = vpop.f32.mrb[65].mxu0 }
0x16d6   :  { %v5322_v30 = vpop.f32.mrb[62].mxu1 }
0x16d7   :  { %v5326_v27 = vadd.f32 %v5322_v30, %v5252_v19  ;;  %v18871_v35 = vpop.f32.mrb[63].mxu1  ;;  %v17398_v19 = vld [vmem:[%s23640_s26 + $0x108] sm:$0xff] }
0x16d8   :  { %v17406_v30 = vld [vmem:[%s23640_s26 + $0x148] sm:$0xff]  ;;  %v17399_v35 = vld [vmem:[%s23640_s26 + $0x110] sm:$0xff] }
0x16d9   :  { %v5400_v41 = vadd.f32 %v5396_v45, %v5326_v27  ;;  %v17397_v45 = vld [vmem:[%s23640_s26 + $0x100] sm:$0xff] }
0x16da   :  { %v21640_v15 = vpack.c.bf16 %v17398_v19, %v17397_v45  ;;  %v6107_v19 = vld [vmem:[%s23621_s1 + $0x10] sm:$0xff] }
0x16de   :  { %v5470_v18 = vpop.f32.mrb[64].mxu1 }
0x16df   :  { %v5474_v59 = vadd.f32 %v5470_v18, %v5400_v41  ;;  %v18881_v54 = vpop.f32.mrb[65].mxu1  ;;  %v17400_v41 = vld [vmem:[%s23640_s26 + $0x118] sm:$0xff] }
0x16e0   :  { %v21659_v18 = vpack.c.bf16 %v17400_v41, %v17399_v35  ;;  %v17408_v54 = vld [vmem:[%s23640_s26 + $0x158] sm:$0xff] }
0x16e1   :  { %v5476_v55 = vadd.f32 %v5474_v59, %v21410_v34  ;;  %v17322_v34 = vld [vmem:[%s23626_s7 + $0x30] sm:$0xff] }
0x16e2   :  { %v19999_v2 = vpack.c.bf16 %v17323_v16, %v17322_v34  ;;  %v17407_v59 = vld [vmem:[%s23640_s26 + $0x150] sm:$0xff]  ;;  %v21691_v16 = vpack.c.bf16 %v17402_v6, %v17401_v24 }
0x16e3   :  { %v5480_v57 = vsel %vm127_vm1, %v5476_v55, 0.0 }
0x16e4   :  { %5481 = vadd.xlane.f32.xlu1 %v5480_v57  ;;  %20000 = vmatprep.subr.bf16.mxu0 %v19999_v2 }
0x16e5   :  { %20002 = vmatpush3.bf16.msra.mxu0 %v19999_v2 }
0x16e6   :  { %20019 = vmatprep.subr.bf16.mxu0 %v20567_v0 }
0x1771   :  { %v5482_v60 = vpop.xlane.xlu1 %5481 }
0x1772   :  { %v5484_v61 = vmul.f32 0.03125, %v5482_v60 }
0x1774   :  { %v5486_v1 = vsub.f32 %v5476_v55, %v5484_v61  ;;  %v21668_v55 = vpack.c.bf16 %v17408_v54, %v17407_v59  ;;  %v6106_v59 = vld [vmem:[%s23621_s1 + $0x8] sm:$0xff] }
0x1776   :  { %v5488_v63 = vmul.f32 %v5486_v1, %v5486_v1 }
0x1778   :  { %v5492_v5 = vsel %vm127_vm1, %v5488_v63, 0.0  ;;  %v21677_v63 = vld [vmem:[%s23630_s13 + $0x1] ss:$0 sm:$0xff] }
0x1779   :  { %5493 = vadd.xlane.f32.xlu0 %v5492_v5 }
0x1806   :  { %v5494_v50 = vpop.xlane.xlu0 %5493 }
0x1807   :  { %v5496_v56 = vmul.f32 0.03125, %v5494_v50  ;;  %v21747_v50 = vld [vmem:[%s23620_s4 + $0x8] ss:$0 sm:$0xff] }
0x1809   :  { %v5498_v52 = vadd.f32 1e-05, %v5496_v56 }
0x180b   :  { %20395 = vrsqrt.f32 %v5498_v52 }
0x1815   :  { %v20396_v13 = vpop.eup %20395 }
0x1816   :  { %v5502_v20 = vmul.f32 %v20396_v13, %v5486_v1 }
0x1818   :  { %v5510_v25 = vmul.f32 %v21555_v28, %v5502_v20 }
0x181a   :  { %v21606_v31 = vadd.f32 %v17388_v37, %v5510_v25 }
0x181c   :  { %18891 = vmatmul.mubr.msk.f32.vlgmr.msra.gmra.mrb[66].mxu0 %vm127_vm1, %v21606_v31 }
0x181d   :  { %18920 = vmatprep.mubr.msk.f32.mxu0 %vm20568_vm0, %v20569_v8  ;;  %20021 = vmatpush3.bf16.msra.mxu0 %v21640_v15 }
0x181e   :  { %20022 = vmatprep.subr.bf16.mxu0 %v20567_v0 }
0x1821   :  { %20024 = vmatpush3.bf16.msra.mxu0 %v21659_v18 }
0x1822   :  { %20025 = vmatprep.subr.bf16.mxu0 %v20567_v0 }
0x18ef   :  { %v18892_v22 = vpop.f32.mrb[66].mxu0 }
0x18f0   :  { %v5603_v23 = vadd.f32 %v18892_v22, %v17389_v21  ;;  %v5597_v4 = vpop.f32.mrb[67].mxu0 }
0x18f1   :  { %v5598_v10 = vadd.f32 %v17389_v21, %v5597_v4  ;;  %v21777_v4 = vld [vmem:[%s23620_s4 + $0xb] ss:$0 sm:$0xff] }
0x18f2   :  { %v5607_v32 = vmax.f32 %v5603_v23, 0.0 }
0x18f3   :  { %v5606_v29 = vmax.f32 %v5598_v10, 0.0 }
0x18f5   :  { %18909 = vmatprep.mubr.msk.f32.mxu1 %vm2770_vm3, %v5606_v29 }
0x18f6   :  { %18910 = vmatmul.mubr.msk.f32.vlgmr.msra.gmra.mrb[66].mxu1 %vm2770_vm3, %v5607_v32 }
0x18f7   :  { %18942 = vmatprep.mubr.msk.f32.mxu1 %vm20568_vm0, %v20569_v8 }
0x19c9   :  { %v18911_v33 = vpop.f32.mrb[66].mxu1 }
0x19ca   :  { %v21629_v43 = vadd.f32 %v18911_v33, %v17392_v40  ;;  %v5686_v28 = vpop.f32.mrb[67].mxu1 }
0x19cb   :  { %v5687_v36 = vadd.f32 %v17392_v40, %v5686_v28 }
0x19cd   :  { %v5695_v46 = vadd.f32 %v5687_v36, %v21565_v58  ;;  %v17405_v58 = vld [vmem:[%s23640_s26 + $0x140] sm:$0xff] }
0x19ce   :  { %v21648_v27 = vpack.c.bf16 %v17406_v30, %v17405_v58 }
0x19cf   :  { %v5697_v37 = vsel %vm127_vm1, %v5695_v46, 0.0 }
0x19d0   :  { %5698 = vadd.xlane.f32.xlu1 %v5697_v37  ;;  %20033 = vmatpush3.bf16.msra.mxu1 %v21648_v27 }
0x19d1   :  { %20034 = vmatprep.subr.bf16.mxu1 %v20567_v0 }
0x19d4   :  { %20036 = vmatpush3.bf16.msra.mxu1 %v21668_v55 }
0x19d5   :  { %18956 = vmatprep.subr.mxu1 %v20569_v8 }
0x1a5d   :  { %v5699_v47 = vpop.xlane.xlu1 %5698 }
0x1a5e   :  { %v5703_v38 = vmul.f32 0.03125, %v5699_v47 }
0x1a60   :  { %v5705_v12 = vsub.f32 %v5695_v46, %v5703_v38 }
0x1a62   :  { %v5707_v11 = vmul.f32 %v5705_v12, %v5705_v12 }
0x1a64   :  { %v5709_v44 = vsel %vm127_vm1, %v5707_v11, 0.0 }
0x1a65   :  { %5710 = vadd.xlane.f32.xlu0 %v5709_v44 }
0x1af2   :  { %v5711_v57 = vpop.xlane.xlu0 %5710 }
0x1af3   :  { %v5715_v60 = vmul.f32 0.03125, %v5711_v57 }
0x1af5   :  { %v5717_v61 = vadd.f32 1e-05, %v5715_v60 }
0x1af7   :  { %20397 = vrsqrt.f32 %v5717_v61 }
0x1b01   :  { %v20398_v1 = vpop.eup %20397 }
0x1b02   :  { %v5721_v5 = vmul.f32 %v20398_v1, %v5705_v12  ;;  %v6105_v12 = vld [vmem:[%s23621_s1] sm:$0xff] }
0x1b04   :  { %v5729_v34 = vmul.f32 %v21677_v63, %v5721_v5  ;;  %v6108_v5 = vld [vmem:[%s23621_s1 + $0x18] sm:$0xff] }
0x1b06   :  { %v21694_v2 = vadd.f32 %v21688_v9, %v5729_v34 }
0x1b08   :  { %18921 = vmatmul.mubr.msk.f32.vlgmr.msra.gmra.mrb[68].mxu0 %vm127_vm1, %v21694_v2  ;;  %18943 = vmatmul.mubr.msk.f32.vlgmr.msra.gmra.mrb[68].mxu1 %vm127_vm1, %v21694_v2 }
0x1b09   :  { %20027 = vmatpush3.bf16.msra.mxu0 %v21691_v16  ;;  %18931 = vmatprep.mubr.msk.f32.mxu0 %vm20568_vm0, %v20569_v8 }
0x1b0a   :  { %20028 = vmatprep.subr.bf16.mxu0 %v20567_v0  ;;  %18958 = vmatprep.mubr.msk.f32.mxu1 %vm20568_vm0, %v20569_v8 }
0x1b0d   :  { %20030 = vmatpush3.bf16.msra.mxu0 %v21707_v53 }
0x1b0e   :  { %20037 = vmatprep.subr.bf16.mxu0 %v20567_v0 }
0x1b10   :  { %18932 = vmatmul.mubr.msk.f32.vlgmr.msra.gmra.mrb[70].mxu0 %vm127_vm1, %v21694_v2 }
0x1b11   :  { %20039 = vmatpush3.bf16.msra.mxu0 %v21721_v48  ;;  %18953 = vmatprep.mubr.msk.f32.mxu0 %vm20568_vm0, %v20569_v8 }
0x1b12   :  { %20040 = vmatprep.subr.bf16.mxu0 %v20567_v0 }
0x1b15   :  { %20042 = vmatpush3.bf16.msra.mxu0 %v21733_v7 }
0x1b16   :  { %18966 = vmatprep.subr.mxu0 %v20569_v8 }
0x1b18   :  { %18954 = vmatmul.mubr.msk.f32.vlgmr.msra.gmra.mrb[72].mxu0 %vm127_vm1, %v21694_v2 }
0x1b19   :  { %18968 = vmatprep.mubr.msk.f32.mxu0 %vm20568_vm0, %v20569_v8 }
0x1bdb   :  { %v5887_v56 = vpop.f32.mrb[68].mxu0  ;;  %v6027_v52 = vpop.f32.mrb[68].mxu1 }
0x1bdc   :  { %v21750_v13 = vadd.f32 %v21747_v50, %v5887_v56  ;;  %v18922_v20 = vpop.f32.mrb[69].mxu0  ;;  %v18944_v25 = vpop.f32.mrb[69].mxu1  ;;  %v21760_v14 = vadd.f32 %v21755_v26, %v6027_v52 }
0x1bde   :  { %6110 = vrot.lane.b32.xlu1 %v21750_v13, %s20570_s21  ;;  %v6101_v33 = vmul.f32 0.35355338, %v21750_v13  ;;  %v6103_v36 = vmul.f32 0.35355338, %v21760_v14 }
0x1be2   :  { %6266 = vrot.lane.b32.xlu1 %v21760_v14, %s20570_s21 }
0x1be3   :  { %v5957_v21 = vpop.f32.mrb[70].mxu0 }
0x1be4   :  { %v21770_v22 = vadd.f32 %v21765_v17, %v5957_v21  ;;  %v18933_v23 = vpop.f32.mrb[71].mxu0 }
0x1be6   :  { %6188 = vrot.lane.b32.xlu0 %v21770_v22, %s20570_s21  ;;  %v6102_v37 = vmul.f32 0.35355338, %v21770_v22 }
0x1beb   :  { %v6097_v10 = vpop.f32.mrb[72].mxu0 }
0x1bec   :  { %v21780_v29 = vadd.f32 %v21777_v4, %v6097_v10  ;;  %v18955_v32 = vpop.f32.mrb[73].mxu0 }
0x1bee   :  { %6344 = vrot.lane.b32.xlu1 %v21780_v29, %s20570_s21  ;;  %v6104_v38 = vmul.f32 0.35355338, %v21780_v29 }
0x1c50   :  { %v6111_v40 = vpop.permute.xlu1 %6110 }
0x1c51   :  { %18957 = vmatpush3.xpose.msk.msra.mxu1 %vm422_vm2, %v6111_v40 }
0x1c52   :  { %18961 = vmatprep.subr.mxu1 %v20569_v8 }
0x1c54   :  { %v6267_v28 = vpop.permute.xlu1 %6266  ;;  %18959 = vmatmul.mubr.msk.f32.vlgmr.msra.gmra.mrb[70].mxu1 %vm422_vm2, %v6101_v33 }
0x1c55   :  { %18967 = vmatpush3.xpose.msk.msra.mxu0 %vm422_vm2, %v6267_v28  ;;  %18963 = vmatprep.mubr.msk.f32.mxu1 %vm20568_vm0, %v20569_v8 }
0x1c56   :  { %18976 = vmatprep.subr.mxu0 %v20569_v8 }
0x1c58   :  { %v6189_v46 = vpop.permute.xlu0 %6188  ;;  %18969 = vmatmul.mubr.msk.f32.vlgmr.msra.gmra.mrb[74].mxu0 %vm422_vm2, %v6103_v36 }
0x1c59   :  { %18962 = vmatpush3.xpose.msk.msra.mxu1 %vm422_vm2, %v6189_v46  ;;  %18978 = vmatprep.mubr.msk.f32.mxu0 %vm20568_vm0, %v20569_v8 }
0x1c5a   :  { %18971 = vmatprep.subr.mxu1 %v20569_v8 }
0x1c5c   :  { %18964 = vmatmul.mubr.msk.f32.vlgmr.msra.gmra.mrb[72].mxu1 %vm422_vm2, %v6102_v37 }
0x1c5d   :  { %18973 = vmatprep.mubr.msk.f32.mxu1 %vm20568_vm0, %v20569_v8 }
0x1c60   :  { %v6345_v47 = vpop.permute.xlu1 %6344 }
0x1c61   :  { %18972 = vmatpush3.xpose.msk.msra.mxu1 %vm422_vm2, %v6345_v47 }
0x1c62   :  { %18981 = vmatprep.subr.mxu1 %v20569_v8 }
0x1c64   :  { %18974 = vmatmul.mubr.msk.f32.vlgmr.msra.gmra.mrb[74].mxu1 %vm422_vm2, %v6104_v38  ;;  %v5696_v38 = vadd.f32 %v21629_v43, %v21606_v31 }
0x1c65   :  { %18983 = vmatprep.mubr.msk.f32.mxu1 %vm20568_vm0, %v20569_v8 }
0x1d27   :  { %v6183_v11 = vpop.f32.mrb[70].mxu1 }
0x1d28   :  { %v6184_v44 = vadd.f32 %v6183_v11, %v6105_v12  ;;  %v18960_v45 = vpop.f32.mrb[71].mxu1  ;;  %v5700_v12 = vsel %vm127_vm1, %v5696_v38, 0.0 }
0x1d2a   :  { %v6421_v58 = vsel %vm422_vm2, %v6184_v44, -inf }
0x1d2b   :  { %6422 = vmax.xlane.f32.xlu0 %v6421_v58  ;;  %v6339_v30 = vpop.f32.mrb[74].mxu0 }
0x1d2c   :  { %v6340_v35 = vadd.f32 %v6339_v30, %v6107_v19  ;;  %v18970_v41 = vpop.f32.mrb[75].mxu0 }
0x1d2e   :  { %v6427_v54 = vsel %vm422_vm2, %v6340_v35, -inf }
0x1d2f   :  { %v6261_v57 = vpop.f32.mrb[72].mxu1  ;;  %6428 = vmax.xlane.f32.xlu0 %v6427_v54 }
0x1d30   :  { %v6262_v60 = vadd.f32 %v6261_v57, %v6106_v59  ;;  %v18965_v61 = vpop.f32.mrb[73].mxu1 }
0x1d32   :  { %v6424_v1 = vsel %vm422_vm2, %v6262_v60, -inf }
0x1d33   :  { %6425 = vmax.xlane.f32.xlu1 %v6424_v1 }
0x1d37   :  { %v6417_v24 = vpop.f32.mrb[74].mxu1 }
0x1d38   :  { %v6418_v6 = vadd.f32 %v6417_v24, %v6108_v5  ;;  %v18975_v34 = vpop.f32.mrb[75].mxu1  ;;  %v21859_v24 = vld [vmem:[%s23622_s5 + $0x40] sm:$0xff] }
0x1d3a   :  { %v6430_v49 = vsel %vm422_vm2, %v6418_v6, -inf }
0x1d3b   :  { %6431 = vmax.xlane.f32.xlu0 %v6430_v49 }
0x1d44   :  { %6465 = vrot.lane.b32.xlu1 %v21750_v13, %s20571_s23 }
0x1db8   :  { %v6423_v51 = vpop.xlane.xlu0 %6422 }
0x1db9   :  { %v6433_v42 = vsub.f32 %v6184_v44, %v6423_v51 }
0x1dbb   :  { %v6437_v3 = vmul.f32 1.442695, %v6433_v42  ;;  %v21873_v42 = vld [vmem:[%s23622_s5 + $0x50] sm:$0xff] }
0x1dbc   :  { %v6429_v39 = vpop.xlane.xlu0 %6428 }
0x1dbd   :  { %20399 = vpow2.f32 %v6437_v3  ;;  %v6435_v62 = vsub.f32 %v6340_v35, %v6429_v39 }
0x1dbf   :  { %v6441_v56 = vmul.f32 1.442695, %v6435_v62 }
0x1dc0   :  { %v6426_v52 = vpop.xlane.xlu1 %6425 }
0x1dc1   :  { %20401 = vpow2.f32 %v6441_v56  ;;  %v6434_v20 = vsub.f32 %v6262_v60, %v6426_v52  ;;  %v21888_v52 = vld [vmem:[%s23622_s5 + $0x58] sm:$0xff] }
0x1dc3   :  { %v6439_v25 = vmul.f32 1.442695, %v6434_v20 }
0x1dc4   :  { %v6466_v21 = vpop.permute.xlu1 %6465 }
0x1dc5   :  { %20403 = vpow2.f32 %v6439_v25  ;;  %18977 = vmatpush3.msra.mxu0 %v6466_v21 }
0x1dc6   :  { %18986 = vmatprep.subr.mxu0 %v20569_v8 }
0x1dc7   :  { %v20400_v23 = vpop.eup %20399 }
0x1dc8   :  { %v6432_v10 = vpop.xlane.xlu0 %6431  ;;  %v6445_v13 = vsel %vm422_vm2, %v20400_v23, 0.0 }
0x1dc9   :  { %v6436_v32 = vsub.f32 %v6418_v6, %v6432_v10  ;;  %6446 = vadd.xlane.f32.xlu1 %v6445_v13  ;;  %v21866_v6 = vld [vmem:[%s23622_s5 + $0x48] sm:$0xff] }
0x1dcb   :  { %v20402_v40 = vpop.eup %20401  ;;  %v6443_v33 = vmul.f32 1.442695, %v6436_v32 }
0x1dcc   :  { %v6451_v28 = vsel %vm422_vm2, %v20402_v40, 0.0 }
0x1dcd   :  { %20405 = vpow2.f32 %v6443_v33  ;;  %6452 = vadd.xlane.f32.xlu1 %v6451_v28 }
0x1dcf   :  { %v20404_v36 = vpop.eup %20403 }
0x1dd0   :  { %v6448_v46 = vsel %vm422_vm2, %v20404_v36, 0.0 }
0x1dd1   :  { %6449 = vadd.xlane.f32.xlu0 %v6448_v46 }
0x1dd7   :  { %v20406_v37 = vpop.eup %20405 }
0x1dd8   :  { %v6454_v47 = vsel %vm422_vm2, %v20406_v37, 0.0 }
0x1dd9   :  { %6455 = vadd.xlane.f32.xlu0 %v6454_v47 }
0x1dde   :  { %6617 = vrot.lane.b32.xlu1 %v21760_v14, %s20571_s23 }
0x1de2   :  { %6693 = vrot.lane.b32.xlu1 %v21780_v29, %s20571_s23 }
0x1def   :  { %6541 = vrot.lane.b32.xlu0 %v21770_v22, %s20571_s23 }
0x1e0e   :  { %5701 = vadd.xlane.f32.xlu0 %v5700_v12 }
0x1e56   :  { %v6447_v11 = vpop.xlane.xlu1 %6446 }
0x1e57   :  { %20407 = vrcp.f32 %v6447_v11 }
0x1e5a   :  { %v6453_v44 = vpop.xlane.xlu1 %6452 }
0x1e5b   :  { %20409 = vrcp.f32 %v6453_v44 }
0x1e5e   :  { %v6450_v45 = vpop.xlane.xlu0 %6449  ;;  %v6618_v58 = vpop.permute.xlu1 %6617 }
0x1e5f   :  { %20411 = vrcp.f32 %v6450_v45 }
0x1e61   :  { %v20408_v19 = vpop.eup %20407 }
0x1e62   :  { %v6461_v14 = vmul.f32 %v20408_v19, %v20400_v23  ;;  %v6694_v41 = vpop.permute.xlu1 %6693 }
0x1e64   :  { %18979 = vmatmul.mubr.msk.f32.vlgmr.msra.gmra.mrb[76].mxu0 %vm422_vm2, %v6461_v14 }
0x1e65   :  { %v20410_v29 = vpop.eup %20409  ;;  %18987 = vmatpush3.msra.mxu0 %v6618_v58  ;;  %18988 = vmatprep.mubr.msk.f32.mxu0 %vm20568_vm0, %v20569_v8 }
0x1e66   :  { %v6456_v31 = vpop.xlane.xlu0 %6455  ;;  %v6463_v43 = vmul.f32 %v20410_v29, %v20402_v40  ;;  %18996 = vmatprep.subr.mxu0 %v20569_v8 }
0x1e67   :  { %20413 = vrcp.f32 %v6456_v31 }
0x1e68   :  { %18989 = vmatmul.mubr.msk.f32.vlgmr.msra.gmra.mrb[78].mxu0 %vm422_vm2, %v6463_v43 }
0x1e69   :  { %v20412_v22 = vpop.eup %20411  ;;  %18998 = vmatprep.mubr.msk.f32.mxu0 %vm20568_vm0, %v20569_v8  ;;  %18997 = vmatpush3.msra.mxu0 %v21859_v24 }
0x1e6a   :  { %v6542_v30 = vpop.permute.xlu0 %6541  ;;  %v6462_v35 = vmul.f32 %v20412_v22, %v20404_v36  ;;  %19006 = vmatprep.subr.mxu0 %v20569_v8 }
0x1e6b   :  { %18982 = vmatpush3.msra.mxu1 %v6542_v30 }
0x1e6c   :  { %18984 = vmatmul.mubr.msk.f32.vlgmr.msra.gmra.mrb[76].mxu1 %vm422_vm2, %v6462_v35  ;;  %18991 = vmatprep.subr.mxu1 %v20569_v8  ;;  %v17469_v35 = vld [vmem:[%s23621_s1 + $0x20] sm:$0xff] }
0x1e6d   :  { %18992 = vmatpush3.msra.mxu1 %v6694_v41  ;;  %18993 = vmatprep.mubr.msk.f32.mxu1 %vm20568_vm0, %v20569_v8 }
0x1e6e   :  { %19001 = vmatprep.subr.mxu1 %v20569_v8 }
0x1e71   :  { %v20414_v59 = vpop.eup %20413 }
0x1e72   :  { %v6464_v54 = vmul.f32 %v20414_v59, %v20406_v37 }
0x1e74   :  { %18994 = vmatmul.mubr.msk.f32.vlgmr.msra.gmra.mrb[78].mxu1 %vm422_vm2, %v6464_v54 }
0x1e75   :  { %19003 = vmatprep.mubr.msk.f32.mxu1 %vm20568_vm0, %v20569_v8  ;;  %19002 = vmatpush3.msra.mxu1 %v21866_v6 }
0x1e76   :  { %19011 = vmatprep.subr.mxu1 %v20569_v8 }
0x1e9b   :  { %v5702_v57 = vpop.xlane.xlu0 %5701 }
0x1e9c   :  { %v5704_v60 = vmul.f32 0.03125, %v5702_v57 }
0x1e9e   :  { %v5706_v61 = vsub.f32 %v5696_v38, %v5704_v60  ;;  %v17471_v60 = vld [vmem:[%s23621_s1 + $0x30] sm:$0xff] }
0x1ea0   :  { %v5708_v1 = vmul.f32 %v5706_v61, %v5706_v61 }
0x1ea2   :  { %v5712_v5 = vsel %vm127_vm1, %v5708_v1, 0.0  ;;  %v17470_v1 = vld [vmem:[%s23621_s1 + $0x28] sm:$0xff] }
0x1ea3   :  { %5713 = vadd.xlane.f32.xlu1 %v5712_v5 }
0x1f30   :  { %v5714_v34 = vpop.xlane.xlu1 %5713 }
0x1f31   :  { %v5716_v49 = vmul.f32 0.03125, %v5714_v34 }
0x1f33   :  { %v5718_v51 = vadd.f32 1e-05, %v5716_v49 }
0x1f35   :  { %20415 = vrsqrt.f32 %v5718_v51 }
0x1f37   :  { %v6537_v3 = vpop.f32.mrb[76].mxu0 }
0x1f38   :  { %v18980_v39 = vpop.f32.mrb[77].mxu0  ;;  %18999 = vmatmul.mubr.msk.f32.vlgmr.msra.gmra.mrb[80].mxu0 %vm422_vm2, %v6537_v3 }
0x1f39   :  { %19007 = vmatpush3.msra.mxu0 %v21873_v42  ;;  %19008 = vmatprep.mubr.msk.f32.mxu0 %vm20568_vm0, %v20569_v8 }
0x1f3a   :  { %20043 = vmatprep.subr.bf16.mxu0 %v20567_v0 }
0x1f3b   :  { %v6689_v62 = vpop.f32.mrb[78].mxu0 }
0x1f3c   :  { %v18990_v56 = vpop.f32.mrb[79].mxu0  ;;  %19009 = vmatmul.mubr.msk.f32.vlgmr.msra.gmra.mrb[82].mxu0 %vm422_vm2, %v6689_v62 }
0x1f3d   :  { %20045 = vmatpush3.bf16.msra.mxu0 %v21640_v15  ;;  %19024 = vmatprep.mubr.msk.f32.mxu0 %vm20568_vm0, %v20569_v8  ;;  %v17472_v56 = vld [vmem:[%s23621_s1 + $0x38] sm:$0xff] }
0x1f3e   :  { %20046 = vmatprep.subr.bf16.mxu0 %v20567_v0 }
0x1f3f   :  { %v20416_v20 = vpop.eup %20415  ;;  %v6613_v25 = vpop.f32.mrb[76].mxu1 }
0x1f40   :  { %v5722_v21 = vmul.f32 %v20416_v20, %v5706_v61  ;;  %v18985_v23 = vpop.f32.mrb[77].mxu1  ;;  %19004 = vmatmul.mubr.msk.f32.vlgmr.msra.gmra.mrb[80].mxu1 %vm422_vm2, %v6613_v25 }
0x1f41   :  { %20048 = vmatpush3.bf16.msra.mxu0 %v21659_v18  ;;  %19012 = vmatpush3.msra.mxu1 %v21888_v52 }
0x1f42   :  { %20055 = vmatprep.subr.bf16.mxu0 %v20567_v0  ;;  %v5730_v15 = vmul.f32 %v21677_v63, %v5722_v21  ;;  %19013 = vmatprep.mubr.msk.f32.mxu1 %vm20568_vm0, %v20569_v8  ;;  %v21935_v63 = vld [vmem:[%s23623_s6 + $0x2] ss:$0 sm:$0xff] }
0x1f43   :  { %20049 = vmatprep.subr.bf16.mxu1 %v20567_v0 }
0x1f44   :  { %v21899_v10 = vadd.f32 %v21688_v9, %v5730_v15 }
0x1f46   :  { %19025 = vmatmul.mubr.msk.f32.vlgmr.msra.gmra.mrb[84].mxu0 %vm127_vm1, %v21899_v10 }
0x1f47   :  { %20057 = vmatpush3.bf16.msra.mxu0 %v21648_v27  ;;  %v6765_v18 = vpop.f32.mrb[78].mxu1  ;;  %19046 = vmatprep.mubr.msk.f32.mxu0 %vm20568_vm0, %v20569_v8 }
0x1f48   :  { %v18995_v13 = vpop.f32.mrb[79].mxu1  ;;  %19014 = vmatmul.mubr.msk.f32.vlgmr.msra.gmra.mrb[82].mxu1 %vm422_vm2, %v6765_v18  ;;  %20058 = vmatprep.subr.bf16.mxu0 %v20567_v0 }
0x1f49   :  { %20051 = vmatpush3.bf16.msra.mxu1 %v21691_v16  ;;  %19035 = vmatprep.mubr.msk.f32.mxu1 %vm20568_vm0, %v20569_v8 }
0x1f4a   :  { %20052 = vmatprep.subr.bf16.mxu1 %v20567_v0 }
0x1f4b   :  { %20060 = vmatpush3.bf16.msra.mxu0 %v21668_v55 }
0x1f4c   :  { %19060 = vmatprep.subr.mxu0 %v20569_v8 }
0x1f4d   :  { %20054 = vmatpush3.bf16.msra.mxu1 %v21707_v53 }
0x1f4e   :  { %19047 = vmatmul.mubr.msk.f32.vlgmr.msra.gmra.mrb[86].mxu0 %vm127_vm1, %v21899_v10  ;;  %20061 = vmatprep.subr.bf16.mxu1 %v20567_v0 }
0x1f4f   :  { %19062 = vmatprep.mubr.msk.f32.mxu0 %vm20568_vm0, %v20569_v8 }
0x1f50   :  { %19036 = vmatmul.mubr.msk.f32.vlgmr.msra.gmra.mrb[84].mxu1 %vm127_vm1, %v21899_v10 }
0x1f51   :  { %20063 = vmatpush3.bf16.msra.mxu1 %v21721_v48  ;;  %19057 = vmatprep.mubr.msk.f32.mxu1 %vm20568_vm0, %v20569_v8 }
0x1f52   :  { %20064 = vmatprep.subr.bf16.mxu1 %v20567_v0 }
0x1f55   :  { %20066 = vmatpush3.bf16.msra.mxu1 %v21733_v7 }
0x1f56   :  { %19065 = vmatprep.subr.mxu1 %v20569_v8 }
0x1f58   :  { %19058 = vmatmul.mubr.msk.f32.vlgmr.msra.gmra.mrb[86].mxu1 %vm127_vm1, %v21899_v10 }
0x1f59   :  { %19067 = vmatprep.mubr.msk.f32.mxu1 %vm20568_vm0, %v20569_v8 }
0x200b   :  { %v6838_v27 = vpop.f32.mrb[80].mxu0 }
0x200c   :  { %v19000_v55 = vpop.f32.mrb[81].mxu0  ;;  %v6848_v53 = vadd.f32 %v21935_v63, %v6838_v27 }
0x200f   :  { %v6992_v9 = vpop.f32.mrb[82].mxu0 }
0x2010   :  { %v19010_v16 = vpop.f32.mrb[83].mxu0 }
0x2013   :  { %v6918_v48 = vpop.f32.mrb[80].mxu1 }
0x2014   :  { %v6922_v7 = vadd.f32 %v6918_v48, %v6848_v53  ;;  %v19005_v32 = vpop.f32.mrb[81].mxu1 }
0x2016   :  { %v6996_v40 = vadd.f32 %v6992_v9, %v6922_v7 }
0x2019   :  { %v7140_v33 = vpop.f32.mrb[84].mxu0 }
0x201a   :  { %v21939_v28 = vadd.f32 %v21747_v50, %v7140_v33  ;;  %v19026_v36 = vpop.f32.mrb[85].mxu0 }
0x201b   :  { %v7066_v46 = vpop.f32.mrb[82].mxu1 }
0x201c   :  { %v21941_v37 = vadd.f32 %v7066_v46, %v6996_v40  ;;  %v19015_v47 = vpop.f32.mrb[83].mxu1  ;;  %7363 = vrot.lane.b32.xlu0 %v21939_v28, %s20570_s21 }
0x2021   :  { %v7280_v38 = vpop.f32.mrb[86].mxu0 }
0x2022   :  { %v21946_v12 = vadd.f32 %v21755_v26, %v7280_v38  ;;  %v19048_v11 = vpop.f32.mrb[87].mxu0 }
0x2023   :  { %v7210_v44 = vpop.f32.mrb[84].mxu1 }
0x2024   :  { %v21949_v45 = vadd.f32 %v21765_v17, %v7210_v44  ;;  %v19037_v19 = vpop.f32.mrb[85].mxu1  ;;  %7519 = vrot.lane.b32.xlu0 %v21946_v12, %s20570_s21  ;;  %v7354_v17 = vmul.f32 0.35355338, %v21939_v28 }
0x2026   :  { %7441 = vrot.lane.b32.xlu1 %v21949_v45, %s20570_s21  ;;  %v7355_v43 = vmul.f32 0.35355338, %v21949_v45 }
0x202b   :  { %v7350_v50 = vpop.f32.mrb[86].mxu1 }
0x202c   :  { %v21956_v14 = vadd.f32 %v21777_v4, %v7350_v50  ;;  %v19059_v58 = vpop.f32.mrb[87].mxu1  ;;  %v7356_v4 = vmul.f32 0.35355338, %v21946_v12  ;;  %v8318_v50 = vadd.f32 %v21941_v37, %v21694_v2 }
0x202e   :  { %7597 = vrot.lane.b32.xlu1 %v21956_v14, %s20570_s21  ;;  %v7357_v30 = vmul.f32 0.35355338, %v21956_v14  ;;  %v8320_v58 = vsel %vm127_vm1, %v8318_v50, 0.0 }
0x208e   :  { %v7364_v26 = vpop.permute.xlu0 %7363 }
0x208f   :  { %19061 = vmatpush3.xpose.msk.msra.mxu0 %vm422_vm2, %v7364_v26 }
0x2090   :  { %19070 = vmatprep.subr.mxu0 %v20569_v8 }
0x2092   :  { %19063 = vmatmul.mubr.msk.f32.vlgmr.msra.gmra.mrb[88].mxu0 %vm422_vm2, %v7354_v17 }
0x2093   :  { %19072 = vmatprep.mubr.msk.f32.mxu0 %vm20568_vm0, %v20569_v8 }
0x2096   :  { %v7520_v29 = vpop.permute.xlu0 %7519 }
0x2097   :  { %19071 = vmatpush3.xpose.msk.msra.mxu0 %vm422_vm2, %v7520_v29 }
0x2098   :  { %v7442_v31 = vpop.permute.xlu1 %7441  ;;  %19080 = vmatprep.subr.mxu0 %v20569_v8 }
0x2099   :  { %19066 = vmatpush3.xpose.msk.msra.mxu1 %vm422_vm2, %v7442_v31 }
0x209a   :  { %19073 = vmatmul.mubr.msk.f32.vlgmr.msra.gmra.mrb[90].mxu0 %vm422_vm2, %v7356_v4  ;;  %19075 = vmatprep.subr.mxu1 %v20569_v8 }
0x209b   :  { %19082 = vmatprep.mubr.msk.f32.mxu0 %vm20568_vm0, %v20569_v8 }
0x209c   :  { %19068 = vmatmul.mubr.msk.f32.vlgmr.msra.gmra.mrb[88].mxu1 %vm422_vm2, %v7355_v43 }
0x209d   :  { %19077 = vmatprep.mubr.msk.f32.mxu1 %vm20568_vm0, %v20569_v8 }
0x20a0   :  { %v7598_v22 = vpop.permute.xlu1 %7597 }
0x20a1   :  { %19076 = vmatpush3.xpose.msk.msra.mxu1 %vm422_vm2, %v7598_v22 }
0x20a2   :  { %19085 = vmatprep.subr.mxu1 %v20569_v8 }
0x20a4   :  { %19078 = vmatmul.mubr.msk.f32.vlgmr.msra.gmra.mrb[90].mxu1 %vm422_vm2, %v7357_v30 }
0x20a5   :  { %19087 = vmatprep.mubr.msk.f32.mxu1 %vm20568_vm0, %v20569_v8 }
0x2165   :  { %v7436_v41 = vpop.f32.mrb[88].mxu0 }
0x2166   :  { %v7437_v59 = vadd.f32 %v17469_v35, %v7436_v41  ;;  %v19064_v54 = vpop.f32.mrb[89].mxu0 }
0x2168   :  { %v7674_v57 = vsel %vm422_vm2, %v7437_v59, -inf }
0x2169   :  { %7675 = vmax.xlane.f32.xlu0 %v7674_v57 }
0x216d   :  { %v7592_v61 = vpop.f32.mrb[90].mxu0 }
0x216e   :  { %v7593_v5 = vadd.f32 %v17471_v60, %v7592_v61  ;;  %v19074_v34 = vpop.f32.mrb[91].mxu0 }
0x216f   :  { %v7514_v49 = vpop.f32.mrb[88].mxu1 }
0x2170   :  { %v7515_v51 = vadd.f32 %v17470_v1, %v7514_v49  ;;  %v19069_v3 = vpop.f32.mrb[89].mxu1  ;;  %v7680_v39 = vsel %vm422_vm2, %v7593_v5, -inf }
0x2171   :  { %7681 = vmax.xlane.f32.xlu0 %v7680_v39 }
0x2172   :  { %v7677_v62 = vsel %vm422_vm2, %v7515_v51, -inf }
0x2173   :  { %7678 = vmax.xlane.f32.xlu1 %v7677_v62  ;;  %v22044_v62 = vld [vmem:[%s23624_s11 + $0x2] ss:$0 sm:$0xff] }
0x2177   :  { %v7670_v20 = vpop.f32.mrb[90].mxu1 }
0x2178   :  { %v7671_v25 = vadd.f32 %v17472_v56, %v7670_v20  ;;  %v19079_v21 = vpop.f32.mrb[91].mxu1 }
0x217a   :  { %v7683_v23 = vsel %vm422_vm2, %v7671_v25, -inf }
0x217b   :  { %7684 = vmax.xlane.f32.xlu0 %v7683_v23 }
0x2184   :  { %7718 = vrot.lane.b32.xlu1 %v21939_v28, %s20571_s23 }
0x21f6   :  { %v7676_v15 = vpop.xlane.xlu0 %7675 }
0x21f7   :  { %v7686_v18 = vsub.f32 %v7437_v59, %v7676_v15 }
0x21f9   :  { %v7690_v13 = vmul.f32 1.442695, %v7686_v18 }
0x21fb   :  { %20417 = vpow2.f32 %v7690_v13 }
0x21fe   :  { %v7682_v27 = vpop.xlane.xlu0 %7681 }
0x21ff   :  { %v7688_v55 = vsub.f32 %v7593_v5, %v7682_v27 }
0x2200   :  { %v7679_v9 = vpop.xlane.xlu1 %7678 }
0x2201   :  { %v7694_v16 = vmul.f32 1.442695, %v7688_v55  ;;  %v7687_v53 = vsub.f32 %v7515_v51, %v7679_v9 }
0x2203   :  { %20419 = vpow2.f32 %v7694_v16  ;;  %v7692_v48 = vmul.f32 1.442695, %v7687_v53 }
0x2204   :  { %v7719_v7 = vpop.permute.xlu1 %7718 }
0x2205   :  { %v20418_v32 = vpop.eup %20417  ;;  %20421 = vpow2.f32 %v7692_v48  ;;  %19081 = vmatpush3.msra.mxu0 %v7719_v7 }
0x2206   :  { %v7698_v40 = vsel %vm422_vm2, %v20418_v32, 0.0  ;;  %19090 = vmatprep.subr.mxu0 %v20569_v8 }
0x2207   :  { %7699 = vadd.xlane.f32.xlu1 %v7698_v40 }
0x2208   :  { %v7685_v33 = vpop.xlane.xlu0 %7684 }
0x2209   :  { %v7689_v28 = vsub.f32 %v7671_v25, %v7685_v33 }
0x220b   :  { %v7696_v36 = vmul.f32 1.442695, %v7689_v28 }
0x220d   :  { %v20420_v46 = vpop.eup %20419  ;;  %20423 = vpow2.f32 %v7696_v36 }
0x220e   :  { %v7704_v47 = vsel %vm422_vm2, %v20420_v46, 0.0 }
0x220f   :  { %v20422_v38 = vpop.eup %20421  ;;  %7705 = vadd.xlane.f32.xlu1 %v7704_v47 }
0x2210   :  { %v7701_v11 = vsel %vm422_vm2, %v20422_v38, 0.0 }
0x2211   :  { %7702 = vadd.xlane.f32.xlu0 %v7701_v11 }
0x2217   :  { %v20424_v44 = vpop.eup %20423 }
0x2218   :  { %v7707_v19 = vsel %vm422_vm2, %v20424_v44, 0.0 }
0x2219   :  { %7708 = vadd.xlane.f32.xlu0 %v7707_v19 }
0x2220   :  { %7870 = vrot.lane.b32.xlu1 %v21946_v12, %s20571_s23 }
0x2224   :  { %7946 = vrot.lane.b32.xlu1 %v21956_v14, %s20571_s23 }
0x222f   :  { %7794 = vrot.lane.b32.xlu0 %v21949_v45, %s20571_s23 }
0x224e   :  { %8321 = vadd.xlane.f32.xlu0 %v8320_v58 }
0x2294   :  { %v7700_v26 = vpop.xlane.xlu1 %7699 }
0x2295   :  { %20425 = vrcp.f32 %v7700_v26  ;;  %v17427_v26 = vld [vmem:[%s23627_s9 + $0x80] sm:$0xff] }
0x229c   :  { %v7706_v17 = vpop.xlane.xlu1 %7705 }
0x229d   :  { %20427 = vrcp.f32 %v7706_v17  ;;  %v17428_v17 = vld [vmem:[%s23627_s9 + $0x88] sm:$0xff] }
0x229e   :  { %v7703_v29 = vpop.xlane.xlu0 %7702 }
0x229f   :  { %v20426_v4 = vpop.eup %20425  ;;  %20429 = vrcp.f32 %v7703_v29  ;;  %v17429_v29 = vld [vmem:[%s23627_s9 + $0x90] sm:$0xff] }
0x22a0   :  { %v7714_v12 = vmul.f32 %v20426_v4, %v20418_v32  ;;  %v7871_v31 = vpop.permute.xlu1 %7870  ;;  %v20075_v4 = vpack.c.bf16 %v17428_v17, %v17427_v26  ;;  %v17505_v26 = vld [vmem:[%s23640_s26 + $0x1b0] sm:$0xff]  ;;  %v17506_v17 = vld [vmem:[%s23640_s26 + $0x1b8] sm:$0xff] }
0x22a2   :  { %19083 = vmatmul.mubr.msk.f32.vlgmr.msra.gmra.mrb[92].mxu0 %vm422_vm2, %v7714_v12  ;;  %v17430_v12 = vld [vmem:[%s23627_s9 + $0x98] sm:$0xff] }
0x22a3   :  { %19091 = vmatpush3.msra.mxu0 %v7871_v31  ;;  %19092 = vmatprep.mubr.msk.f32.mxu0 %vm20568_vm0, %v20569_v8  ;;  %v20079_v31 = vpack.c.bf16 %v17430_v12, %v17429_v29  ;;  %v22196_v29 = vpack.c.bf16 %v17506_v17, %v17505_v26  ;;  %v17512_v12 = vld [vmem:[%s23640_s26 + $0x1e8] sm:$0xff] }
0x22a4   :  { %19100 = vmatprep.subr.mxu0 %v20569_v8  ;;  %v7947_v30 = vpop.permute.xlu1 %7946 }
0x22a6   :  { %v7709_v2 = vpop.xlane.xlu0 %7708 }
0x22a7   :  { %v20428_v37 = vpop.eup %20427  ;;  %20431 = vrcp.f32 %v7709_v2  ;;  %v17431_v2 = vld [vmem:[%s23627_s9 + $0xa0] sm:$0xff] }
0x22a8   :  { %v7716_v45 = vmul.f32 %v20428_v37, %v20420_v46  ;;  %v17432_v37 = vld [vmem:[%s23627_s9 + $0xa8] sm:$0xff] }
0x22a9   :  { %v20430_v14 = vpop.eup %20429 }
0x22aa   :  { %19093 = vmatmul.mubr.msk.f32.vlgmr.msra.gmra.mrb[94].mxu0 %vm422_vm2, %v7716_v45  ;;  %v7795_v43 = vpop.permute.xlu0 %7794  ;;  %v7715_v22 = vmul.f32 %v20430_v14, %v20422_v38  ;;  %v20083_v45 = vpack.c.bf16 %v17432_v37, %v17431_v2  ;;  %v17513_v2 = vld [vmem:[%s23640_s26 + $0x1f0] sm:$0xff]  ;;  %v17514_v37 = vld [vmem:[%s23640_s26 + $0x1f8] sm:$0xff] }
0x22ab   :  { %19086 = vmatpush3.msra.mxu1 %v7795_v43  ;;  %19101 = vmatpush3.msra.mxu0 %v21859_v24 }
0x22ac   :  { %19088 = vmatmul.mubr.msk.f32.vlgmr.msra.gmra.mrb[92].mxu1 %vm422_vm2, %v7715_v22  ;;  %19095 = vmatprep.subr.mxu1 %v20569_v8 }
0x22ad   :  { %19096 = vmatpush3.msra.mxu1 %v7947_v30  ;;  %19097 = vmatprep.mubr.msk.f32.mxu1 %vm20568_vm0, %v20569_v8 }
0x22ae   :  { %19102 = vmatprep.mubr.msk.f32.mxu0 %vm20568_vm0, %v20569_v8  ;;  %19110 = vmatprep.subr.mxu0 %v20569_v8 }
0x22af   :  { %19105 = vmatprep.subr.mxu1 %v20569_v8 }
0x22b1   :  { %v20432_v35 = vpop.eup %20431 }
0x22b2   :  { %v7717_v41 = vmul.f32 %v20432_v35, %v20424_v44  ;;  %v17423_v44 = vld [vmem:[%s23626_s7 + $0x48] sm:$0xff] }
0x22b4   :  { %19098 = vmatmul.mubr.msk.f32.vlgmr.msra.gmra.mrb[94].mxu1 %vm422_vm2, %v7717_v41 }
0x22b5   :  { %19106 = vmatpush3.msra.mxu1 %v21866_v6  ;;  %19107 = vmatprep.mubr.msk.f32.mxu1 %vm20568_vm0, %v20569_v8 }
0x22b6   :  { %19115 = vmatprep.subr.mxu1 %v20569_v8 }
0x22db   :  { %v8322_v24 = vpop.xlane.xlu0 %8321 }
0x22dc   :  { %v8326_v59 = vmul.f32 0.03125, %v8322_v24 }
0x22de   :  { %v8328_v54 = vsub.f32 %v8318_v50, %v8326_v59  ;;  %v17425_v50 = vld [vmem:[%s23626_s7 + $0x58] sm:$0xff]  ;;  %v17433_v59 = vld [vmem:[%s23627_s9 + $0xb0] sm:$0xff] }
0x22e0   :  { %v8330_v57 = vmul.f32 %v8328_v54, %v8328_v54 }
0x22e2   :  { %v8332_v60 = vsel %vm127_vm1, %v8330_v57, 0.0 }
0x22e3   :  { %8333 = vadd.xlane.f32.xlu0 %v8332_v60  ;;  %v17491_v60 = vld [vmem:[%s23628_s8 + $0x2] ss:$0 sm:$0xff] }
0x2370   :  { %v8334_v61 = vpop.xlane.xlu0 %8333 }
0x2371   :  { %v8338_v1 = vmul.f32 0.03125, %v8334_v61 }
0x2373   :  { %v8340_v5 = vadd.f32 1e-05, %v8338_v1 }
0x2375   :  { %20433 = vrsqrt.f32 %v8340_v5  ;;  %v7790_v34 = vpop.f32.mrb[92].mxu0 }
0x2376   :  { %v19084_v49 = vpop.f32.mrb[93].mxu0  ;;  %19103 = vmatmul.mubr.msk.f32.vlgmr.msra.gmra.mrb[96].mxu0 %vm422_vm2, %v7790_v34 }
0x2377   :  { %19111 = vmatpush3.msra.mxu0 %v21873_v42  ;;  %19112 = vmatprep.mubr.msk.f32.mxu0 %vm20568_vm0, %v20569_v8  ;;  %v17490_v42 = vld [vmem:[%s23625_s12 + $0x2] ss:$0 sm:$0xff] }
0x237d   :  { %v7942_v6 = vpop.f32.mrb[94].mxu0 }
0x237e   :  { %v19094_v51 = vpop.f32.mrb[95].mxu0  ;;  %19113 = vmatmul.mubr.msk.f32.vlgmr.msra.gmra.mrb[98].mxu0 %vm422_vm2, %v7942_v6 }
0x237f   :  { %v20434_v3 = vpop.eup %20433  ;;  %v7866_v39 = vpop.f32.mrb[92].mxu1  ;;  %v17494_v51 = vld [vmem:[%s23629_s10 + $0x2] ss:$0 sm:$0xff] }
0x2380   :  { %v19089_v56 = vpop.f32.mrb[93].mxu1  ;;  %19108 = vmatmul.mubr.msk.f32.vlgmr.msra.gmra.mrb[96].mxu1 %vm422_vm2, %v7866_v39  ;;  %v8344_v20 = vmul.f32 %v20434_v3, %v8328_v54  ;;  %v17434_v54 = vld [vmem:[%s23627_s9 + $0xb8] sm:$0xff] }
0x2381   :  { %19116 = vmatpush3.msra.mxu1 %v21888_v52  ;;  %19117 = vmatprep.mubr.msk.f32.mxu1 %vm20568_vm0, %v20569_v8  ;;  %v20087_v57 = vpack.c.bf16 %v17434_v54, %v17433_v59  ;;  %v22244_v59 = vld [vmem:[%s23620_s4 + $0xe] ss:$0 sm:$0xff] }
0x2382   :  { %v8352_v25 = vmul.f32 %v22044_v62, %v8344_v20  ;;  %20076 = vmatprep.subr.bf16.mxu1 %v20075_v4 }
0x2384   :  { %v22054_v21 = vadd.f32 %v17490_v42, %v8352_v25 }
0x2386   :  { %19128 = vmatprep.mubr.msk.f32.mxu0 %vm127_vm1, %v22054_v21 }
0x2387   :  { %v8018_v23 = vpop.f32.mrb[94].mxu1 }
0x2388   :  { %v19099_v15 = vpop.f32.mrb[95].mxu1  ;;  %19118 = vmatmul.mubr.msk.f32.vlgmr.msra.gmra.mrb[98].mxu1 %vm422_vm2, %v8018_v23 }
0x2389   :  { %20078 = vmatpush3.bf16.msra.mxu1 %v20075_v4  ;;  %v17511_v4 = vld [vmem:[%s23640_s26 + $0x1e0] sm:$0xff] }
0x238a   :  { %20080 = vmatprep.subr.bf16.mxu1 %v20079_v31 }
0x238d   :  { %20082 = vmatpush3.bf16.msra.mxu1 %v20079_v31  ;;  %v22210_v31 = vpack.c.bf16 %v17512_v12, %v17511_v4 }
0x238e   :  { %20084 = vmatprep.subr.bf16.mxu1 %v20083_v45 }
0x2391   :  { %20086 = vmatpush3.bf16.msra.mxu1 %v20083_v45  ;;  %v22222_v45 = vpack.c.bf16 %v17514_v37, %v17513_v2 }
0x2392   :  { %20088 = vmatprep.subr.bf16.mxu1 %v20087_v57 }
0x2395   :  { %20090 = vmatpush3.bf16.msra.mxu1 %v20087_v57  ;;  %v22254_v57 = vld [vmem:[%s23620_s4 + $0xd] ss:$0 sm:$0xff] }
0x2396   :  { %20103 = vmatprep.subr.bf16.mxu1 %v20567_v0 }
0x2449   :  { %v8091_v18 = vpop.f32.mrb[96].mxu0 }
0x244a   :  { %v19104_v52 = vpop.f32.mrb[97].mxu0  ;;  %v8095_v27 = vadd.f32 %v21935_v63, %v8091_v18  ;;  %v17422_v63 = vld [vmem:[%s23626_s7 + $0x40] sm:$0xff] }
0x244b   :  { %v20067_v19 = vpack.c.bf16 %v17423_v44, %v17422_v63  ;;  %v17503_v63 = vld [vmem:[%s23640_s26 + $0x1a0] sm:$0xff]  ;;  %v17504_v44 = vld [vmem:[%s23640_s26 + $0x1a8] sm:$0xff] }
0x244d   :  { %20068 = vmatprep.subr.bf16.mxu0 %v20067_v19 }
0x244e   :  { %20070 = vmatpush3.bf16.msra.mxu0 %v20067_v19  ;;  %v22177_v19 = vld [vmem:[%s23631_s14 + $0x2] ss:$0 sm:$0xff] }
0x2451   :  { %v8239_v13 = vpop.f32.mrb[98].mxu0 }
0x2452   :  { %v19114_v55 = vpop.f32.mrb[99].mxu0 }
0x2453   :  { %v8165_v9 = vpop.f32.mrb[96].mxu1 }
0x2454   :  { %v8169_v16 = vadd.f32 %v8165_v9, %v8095_v27  ;;  %v19109_v53 = vpop.f32.mrb[97].mxu1  ;;  %v17500_v27 = vld [vmem:[%s23640_s26 + $0x188] sm:$0xff] }
0x2455   :  { %v17508_v9 = vld [vmem:[%s23640_s26 + $0x1c8] sm:$0xff]  ;;  %v17501_v53 = vld [vmem:[%s23640_s26 + $0x190] sm:$0xff] }
0x2456   :  { %v8243_v48 = vadd.f32 %v8239_v13, %v8169_v16  ;;  %v17499_v13 = vld [vmem:[%s23640_s26 + $0x180] sm:$0xff] }
0x2457   :  { %v22129_v55 = vpack.c.bf16 %v17500_v27, %v17499_v13  ;;  %v8950_v27 = vld [vmem:[%s23621_s1 + $0x10] sm:$0xff] }
0x245b   :  { %v8313_v7 = vpop.f32.mrb[98].mxu1 }
0x245c   :  { %v8317_v32 = vadd.f32 %v8313_v7, %v8243_v48  ;;  %v19119_v40 = vpop.f32.mrb[99].mxu1  ;;  %v17502_v48 = vld [vmem:[%s23640_s26 + $0x198] sm:$0xff] }
0x245d   :  { %v22148_v7 = vpack.c.bf16 %v17502_v48, %v17501_v53  ;;  %v17510_v40 = vld [vmem:[%s23640_s26 + $0x1d8] sm:$0xff] }
0x245e   :  { %v8319_v33 = vadd.f32 %v8317_v32, %v21899_v10  ;;  %v17424_v10 = vld [vmem:[%s23626_s7 + $0x50] sm:$0xff] }
0x245f   :  { %v20071_v58 = vpack.c.bf16 %v17425_v50, %v17424_v10  ;;  %v17509_v32 = vld [vmem:[%s23640_s26 + $0x1d0] sm:$0xff]  ;;  %v22180_v50 = vpack.c.bf16 %v17504_v44, %v17503_v63 }
0x2460   :  { %v8323_v28 = vsel %vm127_vm1, %v8319_v33, 0.0 }
0x2461   :  { %8324 = vadd.xlane.f32.xlu1 %v8323_v28  ;;  %20072 = vmatprep.subr.bf16.mxu0 %v20071_v58 }
0x2462   :  { %20074 = vmatpush3.bf16.msra.mxu0 %v20071_v58 }
0x2463   :  { %20091 = vmatprep.subr.bf16.mxu0 %v20567_v0 }
0x24ee   :  { %v8325_v36 = vpop.xlane.xlu1 %8324 }
0x24ef   :  { %v8327_v46 = vmul.f32 0.03125, %v8325_v36 }
0x24f1   :  { %v8329_v47 = vsub.f32 %v8319_v33, %v8327_v46  ;;  %v22157_v33 = vpack.c.bf16 %v17510_v40, %v17509_v32  ;;  %v8949_v32 = vld [vmem:[%s23621_s1 + $0x8] sm:$0xff] }
0x24f3   :  { %v8331_v38 = vmul.f32 %v8329_v47, %v8329_v47 }
0x24f5   :  { %v8335_v11 = vsel %vm127_vm1, %v8331_v38, 0.0  ;;  %v22166_v38 = vld [vmem:[%s23630_s13 + $0x2] ss:$0 sm:$0xff] }
0x24f6   :  { %8336 = vadd.xlane.f32.xlu0 %v8335_v11 }
0x2583   :  { %v8337_v14 = vpop.xlane.xlu0 %8336 }
0x2584   :  { %v8339_v43 = vmul.f32 0.03125, %v8337_v14  ;;  %v22236_v14 = vld [vmem:[%s23620_s4 + $0xc] ss:$0 sm:$0xff] }
0x2586   :  { %v8341_v22 = vadd.f32 1e-05, %v8339_v43 }
0x2588   :  { %20435 = vrsqrt.f32 %v8341_v22 }
0x2592   :  { %v20436_v30 = vpop.eup %20435 }
0x2593   :  { %v8345_v35 = vmul.f32 %v20436_v30, %v8329_v47 }
0x2595   :  { %v8353_v41 = vmul.f32 %v22044_v62, %v8345_v35 }
0x2597   :  { %v22095_v24 = vadd.f32 %v17490_v42, %v8353_v41 }
0x2599   :  { %19129 = vmatmul.mubr.msk.f32.vlgmr.msra.gmra.mrb[100].mxu0 %vm127_vm1, %v22095_v24 }
0x259a   :  { %19158 = vmatprep.mubr.msk.f32.mxu0 %vm20568_vm0, %v20569_v8  ;;  %20093 = vmatpush3.bf16.msra.mxu0 %v22129_v55 }
0x259b   :  { %20094 = vmatprep.subr.bf16.mxu0 %v20567_v0 }
0x259e   :  { %20096 = vmatpush3.bf16.msra.mxu0 %v22148_v7 }
0x259f   :  { %20097 = vmatprep.subr.bf16.mxu0 %v20567_v0 }
0x266c   :  { %v19130_v61 = vpop.f32.mrb[100].mxu0 }
0x266d   :  { %v8446_v1 = vadd.f32 %v19130_v61, %v17491_v60  ;;  %v8440_v5 = vpop.f32.mrb[101].mxu0 }
0x266e   :  { %v8441_v34 = vadd.f32 %v17491_v60, %v8440_v5  ;;  %v22266_v5 = vld [vmem:[%s23620_s4 + $0xf] ss:$0 sm:$0xff] }
0x266f   :  { %v8450_v6 = vmax.f32 %v8446_v1, 0.0 }
0x2670   :  { %v8449_v49 = vmax.f32 %v8441_v34, 0.0 }
0x2672   :  { %19147 = vmatprep.mubr.msk.f32.mxu1 %vm2770_vm3, %v8449_v49 }
0x2673   :  { %19148 = vmatmul.mubr.msk.f32.vlgmr.msra.gmra.mrb[100].mxu1 %vm2770_vm3, %v8450_v6 }
0x2674   :  { %19180 = vmatprep.mubr.msk.f32.mxu1 %vm20568_vm0, %v20569_v8 }
0x2746   :  { %v19149_v3 = vpop.f32.mrb[100].mxu1 }
0x2747   :  { %v22118_v39 = vadd.f32 %v19149_v3, %v17494_v51  ;;  %v8529_v62 = vpop.f32.mrb[101].mxu1 }
0x2748   :  { %v8530_v56 = vadd.f32 %v17494_v51, %v8529_v62 }
0x274a   :  { %v8538_v20 = vadd.f32 %v8530_v56, %v22054_v21  ;;  %v17507_v21 = vld [vmem:[%s23640_s26 + $0x1c0] sm:$0xff] }
0x274b   :  { %v22137_v16 = vpack.c.bf16 %v17508_v9, %v17507_v21 }
0x274c   :  { %v8540_v42 = vsel %vm127_vm1, %v8538_v20, 0.0 }
0x274d   :  { %8541 = vadd.xlane.f32.xlu1 %v8540_v42  ;;  %20105 = vmatpush3.bf16.msra.mxu1 %v22137_v16 }
0x274e   :  { %20106 = vmatprep.subr.bf16.mxu1 %v20567_v0 }
0x2751   :  { %20108 = vmatpush3.bf16.msra.mxu1 %v22157_v33 }
0x2752   :  { %19194 = vmatprep.subr.mxu1 %v20569_v8 }
0x27da   :  { %v8542_v25 = vpop.xlane.xlu1 %8541 }
0x27db   :  { %v8546_v23 = vmul.f32 0.03125, %v8542_v25 }
0x27dd   :  { %v8548_v15 = vsub.f32 %v8538_v20, %v8546_v23 }
0x27df   :  { %v8550_v18 = vmul.f32 %v8548_v15, %v8548_v15 }
0x27e1   :  { %v8552_v52 = vsel %vm127_vm1, %v8550_v18, 0.0 }
0x27e2   :  { %8553 = vadd.xlane.f32.xlu0 %v8552_v52 }
0x286f   :  { %v8554_v28 = vpop.xlane.xlu0 %8553 }
0x2870   :  { %v8558_v36 = vmul.f32 0.03125, %v8554_v28 }
0x2872   :  { %v8560_v46 = vadd.f32 1e-05, %v8558_v36 }
0x2874   :  { %20437 = vrsqrt.f32 %v8560_v46 }
0x287e   :  { %v20438_v47 = vpop.eup %20437 }
0x287f   :  { %v8564_v11 = vmul.f32 %v20438_v47, %v8548_v15  ;;  %v8948_v15 = vld [vmem:[%s23621_s1] sm:$0xff] }
0x2881   :  { %v8572_v10 = vmul.f32 %v22166_v38, %v8564_v11  ;;  %v8951_v11 = vld [vmem:[%s23621_s1 + $0x18] sm:$0xff] }
0x2883   :  { %v22183_v58 = vadd.f32 %v22177_v19, %v8572_v10 }
0x2885   :  { %19159 = vmatmul.mubr.msk.f32.vlgmr.msra.gmra.mrb[102].mxu0 %vm127_vm1, %v22183_v58  ;;  %19181 = vmatmul.mubr.msk.f32.vlgmr.msra.gmra.mrb[102].mxu1 %vm127_vm1, %v22183_v58 }
0x2886   :  { %20099 = vmatpush3.bf16.msra.mxu0 %v22180_v50  ;;  %19169 = vmatprep.mubr.msk.f32.mxu0 %vm20568_vm0, %v20569_v8 }
0x2887   :  { %20100 = vmatprep.subr.bf16.mxu0 %v20567_v0  ;;  %19196 = vmatprep.mubr.msk.f32.mxu1 %vm20568_vm0, %v20569_v8 }
0x288a   :  { %20102 = vmatpush3.bf16.msra.mxu0 %v22196_v29 }
0x288b   :  { %20109 = vmatprep.subr.bf16.mxu0 %v20567_v0 }
0x288d   :  { %19170 = vmatmul.mubr.msk.f32.vlgmr.msra.gmra.mrb[104].mxu0 %vm127_vm1, %v22183_v58 }
0x288e   :  { %20111 = vmatpush3.bf16.msra.mxu0 %v22210_v31  ;;  %19191 = vmatprep.mubr.msk.f32.mxu0 %vm20568_vm0, %v20569_v8 }
0x288f   :  { %20112 = vmatprep.subr.bf16.mxu0 %v20567_v0 }
0x2892   :  { %20114 = vmatpush3.bf16.msra.mxu0 %v22222_v45 }
0x2893   :  { %19204 = vmatprep.subr.mxu0 %v20569_v8 }
0x2895   :  { %19192 = vmatmul.mubr.msk.f32.vlgmr.msra.gmra.mrb[106].mxu0 %vm127_vm1, %v22183_v58 }
0x2896   :  { %19206 = vmatprep.mubr.msk.f32.mxu0 %vm20568_vm0, %v20569_v8 }
0x2958   :  { %v8730_v43 = vpop.f32.mrb[102].mxu0  ;;  %v8870_v22 = vpop.f32.mrb[102].mxu1 }
0x2959   :  { %v22239_v30 = vadd.f32 %v22236_v14, %v8730_v43  ;;  %v19160_v35 = vpop.f32.mrb[103].mxu0  ;;  %v19182_v41 = vpop.f32.mrb[103].mxu1  ;;  %v22249_v54 = vadd.f32 %v22244_v59, %v8870_v22 }
0x295b   :  { %8953 = vrot.lane.b32.xlu1 %v22239_v30, %s20570_s21  ;;  %v8944_v3 = vmul.f32 0.35355338, %v22239_v30  ;;  %v8946_v56 = vmul.f32 0.35355338, %v22249_v54 }
0x295f   :  { %9109 = vrot.lane.b32.xlu1 %v22249_v54, %s20570_s21 }
0x2960   :  { %v8800_v60 = vpop.f32.mrb[104].mxu0 }
0x2961   :  { %v22259_v61 = vadd.f32 %v22254_v57, %v8800_v60  ;;  %v19171_v1 = vpop.f32.mrb[105].mxu0 }
0x2963   :  { %9031 = vrot.lane.b32.xlu0 %v22259_v61, %s20570_s21  ;;  %v8945_v42 = vmul.f32 0.35355338, %v22259_v61 }
0x2968   :  { %v8940_v34 = vpop.f32.mrb[106].mxu0 }
0x2969   :  { %v22269_v49 = vadd.f32 %v22266_v5, %v8940_v34  ;;  %v19193_v6 = vpop.f32.mrb[107].mxu0 }
0x296b   :  { %9187 = vrot.lane.b32.xlu1 %v22269_v49, %s20570_s21  ;;  %v8947_v23 = vmul.f32 0.35355338, %v22269_v49 }
0x29cd   :  { %v8954_v51 = vpop.permute.xlu1 %8953 }
0x29ce   :  { %19195 = vmatpush3.xpose.msk.msra.mxu1 %vm422_vm2, %v8954_v51 }
0x29cf   :  { %19199 = vmatprep.subr.mxu1 %v20569_v8 }
0x29d1   :  { %v9110_v62 = vpop.permute.xlu1 %9109  ;;  %19197 = vmatmul.mubr.msk.f32.vlgmr.msra.gmra.mrb[104].mxu1 %vm422_vm2, %v8944_v3 }
0x29d2   :  { %19205 = vmatpush3.xpose.msk.msra.mxu0 %vm422_vm2, %v9110_v62  ;;  %19201 = vmatprep.mubr.msk.f32.mxu1 %vm20568_vm0, %v20569_v8 }
0x29d3   :  { %19214 = vmatprep.subr.mxu0 %v20569_v8 }
0x29d5   :  { %v9032_v20 = vpop.permute.xlu0 %9031  ;;  %19207 = vmatmul.mubr.msk.f32.vlgmr.msra.gmra.mrb[108].mxu0 %vm422_vm2, %v8946_v56 }
0x29d6   :  { %19200 = vmatpush3.xpose.msk.msra.mxu1 %vm422_vm2, %v9032_v20  ;;  %19216 = vmatprep.mubr.msk.f32.mxu0 %vm20568_vm0, %v20569_v8 }
0x29d7   :  { %19209 = vmatprep.subr.mxu1 %v20569_v8 }
0x29d9   :  { %19202 = vmatmul.mubr.msk.f32.vlgmr.msra.gmra.mrb[106].mxu1 %vm422_vm2, %v8945_v42 }
0x29da   :  { %19211 = vmatprep.mubr.msk.f32.mxu1 %vm20568_vm0, %v20569_v8 }
0x29dd   :  { %v9188_v25 = vpop.permute.xlu1 %9187 }
0x29de   :  { %19210 = vmatpush3.xpose.msk.msra.mxu1 %vm422_vm2, %v9188_v25 }
0x29df   :  { %19219 = vmatprep.subr.mxu1 %v20569_v8 }
0x29e1   :  { %19212 = vmatmul.mubr.msk.f32.vlgmr.msra.gmra.mrb[108].mxu1 %vm422_vm2, %v8947_v23  ;;  %v8539_v23 = vadd.f32 %v22118_v39, %v22095_v24 }
0x29e2   :  { %19221 = vmatprep.mubr.msk.f32.mxu1 %vm20568_vm0, %v20569_v8 }
0x2aa4   :  { %v9026_v18 = vpop.f32.mrb[104].mxu1 }
0x2aa5   :  { %v9027_v52 = vadd.f32 %v9026_v18, %v8948_v15  ;;  %v19198_v13 = vpop.f32.mrb[105].mxu1  ;;  %v8543_v15 = vsel %vm127_vm1, %v8539_v23, 0.0 }
0x2aa7   :  { %v9264_v21 = vsel %vm422_vm2, %v9027_v52, -inf }
0x2aa8   :  { %9265 = vmax.xlane.f32.xlu0 %v9264_v21  ;;  %v9182_v9 = vpop.f32.mrb[108].mxu0 }
0x2aa9   :  { %v9183_v53 = vadd.f32 %v9182_v9, %v8950_v27  ;;  %v19208_v48 = vpop.f32.mrb[109].mxu0 }
0x2aab   :  { %v9270_v40 = vsel %vm422_vm2, %v9183_v53, -inf }
0x2aac   :  { %v9104_v28 = vpop.f32.mrb[106].mxu1  ;;  %9271 = vmax.xlane.f32.xlu0 %v9270_v40 }
0x2aad   :  { %v9105_v36 = vadd.f32 %v9104_v28, %v8949_v32  ;;  %v19203_v46 = vpop.f32.mrb[107].mxu1 }
0x2aaf   :  { %v9267_v47 = vsel %vm422_vm2, %v9105_v36, -inf }
0x2ab0   :  { %9268 = vmax.xlane.f32.xlu1 %v9267_v47 }
0x2ab4   :  { %v9260_v63 = vpop.f32.mrb[108].mxu1 }
0x2ab5   :  { %v9261_v44 = vadd.f32 %v9260_v63, %v8951_v11  ;;  %v19213_v10 = vpop.f32.mrb[109].mxu1  ;;  %v22348_v63 = vld [vmem:[%s23622_s5 + $0x60] sm:$0xff] }
0x2ab7   :  { %v9273_v26 = vsel %vm422_vm2, %v9261_v44, -inf }
0x2ab8   :  { %9274 = vmax.xlane.f32.xlu0 %v9273_v26 }
0x2ac1   :  { %9308 = vrot.lane.b32.xlu1 %v22239_v30, %s20571_s23 }
0x2b35   :  { %v9266_v17 = vpop.xlane.xlu0 %9265 }
0x2b36   :  { %v9276_v4 = vsub.f32 %v9027_v52, %v9266_v17 }
0x2b38   :  { %v9280_v12 = vmul.f32 1.442695, %v9276_v4  ;;  %v22362_v4 = vld [vmem:[%s23622_s5 + $0x70] sm:$0xff] }
0x2b39   :  { %v9272_v2 = vpop.xlane.xlu0 %9271 }
0x2b3a   :  { %20439 = vpow2.f32 %v9280_v12  ;;  %v9278_v37 = vsub.f32 %v9183_v53, %v9272_v2 }
0x2b3c   :  { %v9284_v43 = vmul.f32 1.442695, %v9278_v37 }
0x2b3d   :  { %v9269_v22 = vpop.xlane.xlu1 %9268 }
0x2b3e   :  { %20441 = vpow2.f32 %v9284_v43  ;;  %v9277_v35 = vsub.f32 %v9105_v36, %v9269_v22  ;;  %v22377_v22 = vld [vmem:[%s23622_s5 + $0x78] sm:$0xff] }
0x2b40   :  { %v9282_v41 = vmul.f32 1.442695, %v9277_v35 }
0x2b41   :  { %v9309_v60 = vpop.permute.xlu1 %9308 }
0x2b42   :  { %20443 = vpow2.f32 %v9282_v41  ;;  %19215 = vmatpush3.msra.mxu0 %v9309_v60 }
0x2b43   :  { %19224 = vmatprep.subr.mxu0 %v20569_v8 }
0x2b44   :  { %v20440_v1 = vpop.eup %20439 }
0x2b45   :  { %v9275_v34 = vpop.xlane.xlu0 %9274  ;;  %v9288_v30 = vsel %vm422_vm2, %v20440_v1, 0.0 }
0x2b46   :  { %v9279_v6 = vsub.f32 %v9261_v44, %v9275_v34  ;;  %9289 = vadd.xlane.f32.xlu1 %v9288_v30  ;;  %v22355_v44 = vld [vmem:[%s23622_s5 + $0x68] sm:$0xff] }
0x2b48   :  { %v20442_v51 = vpop.eup %20441  ;;  %v9286_v3 = vmul.f32 1.442695, %v9279_v6 }
0x2b49   :  { %v9294_v62 = vsel %vm422_vm2, %v20442_v51, 0.0 }
0x2b4a   :  { %20445 = vpow2.f32 %v9286_v3  ;;  %9295 = vadd.xlane.f32.xlu1 %v9294_v62 }
0x2b4c   :  { %v20444_v56 = vpop.eup %20443 }
0x2b4d   :  { %v9291_v20 = vsel %vm422_vm2, %v20444_v56, 0.0 }
0x2b4e   :  { %9292 = vadd.xlane.f32.xlu0 %v9291_v20 }
0x2b54   :  { %v20446_v42 = vpop.eup %20445 }
0x2b55   :  { %v9297_v25 = vsel %vm422_vm2, %v20446_v42, 0.0 }
0x2b56   :  { %9298 = vadd.xlane.f32.xlu0 %v9297_v25 }
0x2b5b   :  { %9460 = vrot.lane.b32.xlu1 %v22249_v54, %s20571_s23 }
0x2b5f   :  { %9536 = vrot.lane.b32.xlu1 %v22269_v49, %s20571_s23 }
0x2b6c   :  { %9384 = vrot.lane.b32.xlu0 %v22259_v61, %s20571_s23 }
0x2b8b   :  { %8544 = vadd.xlane.f32.xlu0 %v8543_v15 }
0x2bd3   :  { %v9290_v18 = vpop.xlane.xlu1 %9289 }
0x2bd4   :  { %20447 = vrcp.f32 %v9290_v18 }
0x2bd7   :  { %v9296_v52 = vpop.xlane.xlu1 %9295 }
0x2bd8   :  { %20449 = vrcp.f32 %v9296_v52 }
0x2bdb   :  { %v9293_v13 = vpop.xlane.xlu0 %9292  ;;  %v9461_v21 = vpop.permute.xlu1 %9460 }
0x2bdc   :  { %20451 = vrcp.f32 %v9293_v13 }
0x2bde   :  { %v20448_v27 = vpop.eup %20447 }
0x2bdf   :  { %v9304_v54 = vmul.f32 %v20448_v27, %v20440_v1  ;;  %v9537_v48 = vpop.permute.xlu1 %9536 }
0x2be1   :  { %19217 = vmatmul.mubr.msk.f32.vlgmr.msra.gmra.mrb[110].mxu0 %vm422_vm2, %v9304_v54 }
0x2be2   :  { %v20450_v49 = vpop.eup %20449  ;;  %19225 = vmatpush3.msra.mxu0 %v9461_v21  ;;  %19226 = vmatprep.mubr.msk.f32.mxu0 %vm20568_vm0, %v20569_v8 }
0x2be3   :  { %v9299_v24 = vpop.xlane.xlu0 %9298  ;;  %v9306_v39 = vmul.f32 %v20450_v49, %v20442_v51  ;;  %19234 = vmatprep.subr.mxu0 %v20569_v8 }
0x2be4   :  { %20453 = vrcp.f32 %v9299_v24 }
0x2be5   :  { %19227 = vmatmul.mubr.msk.f32.vlgmr.msra.gmra.mrb[112].mxu0 %vm422_vm2, %v9306_v39 }
0x2be6   :  { %v20452_v61 = vpop.eup %20451  ;;  %19236 = vmatprep.mubr.msk.f32.mxu0 %vm20568_vm0, %v20569_v8  ;;  %19235 = vmatpush3.msra.mxu0 %v22348_v63 }
0x2be7   :  { %v9385_v9 = vpop.permute.xlu0 %9384  ;;  %v9305_v53 = vmul.f32 %v20452_v61, %v20444_v56  ;;  %19244 = vmatprep.subr.mxu0 %v20569_v8 }
0x2be8   :  { %19220 = vmatpush3.msra.mxu1 %v9385_v9 }
0x2be9   :  { %19222 = vmatmul.mubr.msk.f32.vlgmr.msra.gmra.mrb[110].mxu1 %vm422_vm2, %v9305_v53  ;;  %19229 = vmatprep.subr.mxu1 %v20569_v8  ;;  %v17571_v53 = vld [vmem:[%s23621_s1 + $0x20] sm:$0xff] }
0x2bea   :  { %19230 = vmatpush3.msra.mxu1 %v9537_v48  ;;  %19231 = vmatprep.mubr.msk.f32.mxu1 %vm20568_vm0, %v20569_v8 }
0x2beb   :  { %19239 = vmatprep.subr.mxu1 %v20569_v8 }
0x2bee   :  { %v20454_v32 = vpop.eup %20453 }
0x2bef   :  { %v9307_v40 = vmul.f32 %v20454_v32, %v20446_v42 }
0x2bf1   :  { %19232 = vmatmul.mubr.msk.f32.vlgmr.msra.gmra.mrb[112].mxu1 %vm422_vm2, %v9307_v40 }
0x2bf2   :  { %19241 = vmatprep.mubr.msk.f32.mxu1 %vm20568_vm0, %v20569_v8  ;;  %19240 = vmatpush3.msra.mxu1 %v22355_v44 }
0x2bf3   :  { %19249 = vmatprep.subr.mxu1 %v20569_v8 }
0x2c18   :  { %v8545_v28 = vpop.xlane.xlu0 %8544 }
0x2c19   :  { %v8547_v36 = vmul.f32 0.03125, %v8545_v28 }
0x2c1b   :  { %v8549_v46 = vsub.f32 %v8539_v23, %v8547_v36  ;;  %v17573_v36 = vld [vmem:[%s23621_s1 + $0x30] sm:$0xff] }
0x2c1d   :  { %v8551_v47 = vmul.f32 %v8549_v46, %v8549_v46 }
0x2c1f   :  { %v8555_v11 = vsel %vm127_vm1, %v8551_v47, 0.0  ;;  %v17572_v47 = vld [vmem:[%s23621_s1 + $0x28] sm:$0xff] }
0x2c20   :  { %8556 = vadd.xlane.f32.xlu1 %v8555_v11 }
0x2cad   :  { %v8557_v10 = vpop.xlane.xlu1 %8556 }
0x2cae   :  { %v8559_v26 = vmul.f32 0.03125, %v8557_v10 }
0x2cb0   :  { %v8561_v17 = vadd.f32 1e-05, %v8559_v26 }
0x2cb2   :  { %20455 = vrsqrt.f32 %v8561_v17 }
0x2cb4   :  { %v9380_v12 = vpop.f32.mrb[110].mxu0 }
0x2cb5   :  { %v19218_v2 = vpop.f32.mrb[111].mxu0  ;;  %19237 = vmatmul.mubr.msk.f32.vlgmr.msra.gmra.mrb[114].mxu0 %vm422_vm2, %v9380_v12 }
0x2cb6   :  { %19245 = vmatpush3.msra.mxu0 %v22362_v4  ;;  %19246 = vmatprep.mubr.msk.f32.mxu0 %vm20568_vm0, %v20569_v8 }
0x2cb7   :  { %20115 = vmatprep.subr.bf16.mxu0 %v20567_v0 }
0x2cb8   :  { %v9532_v37 = vpop.f32.mrb[112].mxu0 }
0x2cb9   :  { %v19228_v43 = vpop.f32.mrb[113].mxu0  ;;  %19247 = vmatmul.mubr.msk.f32.vlgmr.msra.gmra.mrb[116].mxu0 %vm422_vm2, %v9532_v37 }
0x2cba   :  { %20117 = vmatpush3.bf16.msra.mxu0 %v22129_v55  ;;  %19262 = vmatprep.mubr.msk.f32.mxu0 %vm20568_vm0, %v20569_v8  ;;  %v17574_v43 = vld [vmem:[%s23621_s1 + $0x38] sm:$0xff] }
0x2cbb   :  { %20118 = vmatprep.subr.bf16.mxu0 %v20567_v0 }
0x2cbc   :  { %v20456_v35 = vpop.eup %20455  ;;  %v9456_v41 = vpop.f32.mrb[110].mxu1 }
0x2cbd   :  { %v8565_v60 = vmul.f32 %v20456_v35, %v8549_v46  ;;  %v19223_v1 = vpop.f32.mrb[111].mxu1  ;;  %19242 = vmatmul.mubr.msk.f32.vlgmr.msra.gmra.mrb[114].mxu1 %vm422_vm2, %v9456_v41 }
0x2cbe   :  { %20120 = vmatpush3.bf16.msra.mxu0 %v22148_v7  ;;  %19250 = vmatpush3.msra.mxu1 %v22377_v22 }
0x2cbf   :  { %20127 = vmatprep.subr.bf16.mxu0 %v20567_v0  ;;  %v8573_v55 = vmul.f32 %v22166_v38, %v8565_v60  ;;  %19251 = vmatprep.mubr.msk.f32.mxu1 %vm20568_vm0, %v20569_v8  ;;  %v22424_v38 = vld [vmem:[%s23623_s6 + $0x3] ss:$0 sm:$0xff] }
0x2cc0   :  { %20121 = vmatprep.subr.bf16.mxu1 %v20567_v0 }
0x2cc1   :  { %v22388_v34 = vadd.f32 %v22177_v19, %v8573_v55 }
0x2cc3   :  { %19263 = vmatmul.mubr.msk.f32.vlgmr.msra.gmra.mrb[118].mxu0 %vm127_vm1, %v22388_v34 }
0x2cc4   :  { %20129 = vmatpush3.bf16.msra.mxu0 %v22137_v16  ;;  %v9608_v7 = vpop.f32.mrb[112].mxu1  ;;  %19284 = vmatprep.mubr.msk.f32.mxu0 %vm20568_vm0, %v20569_v8 }
0x2cc5   :  { %v19233_v30 = vpop.f32.mrb[113].mxu1  ;;  %19252 = vmatmul.mubr.msk.f32.vlgmr.msra.gmra.mrb[116].mxu1 %vm422_vm2, %v9608_v7  ;;  %20130 = vmatprep.subr.bf16.mxu0 %v20567_v0 }
0x2cc6   :  { %20123 = vmatpush3.bf16.msra.mxu1 %v22180_v50  ;;  %19273 = vmatprep.mubr.msk.f32.mxu1 %vm20568_vm0, %v20569_v8 }
0x2cc7   :  { %20124 = vmatprep.subr.bf16.mxu1 %v20567_v0 }
0x2cc8   :  { %20132 = vmatpush3.bf16.msra.mxu0 %v22157_v33 }
0x2cc9   :  { %19298 = vmatprep.subr.mxu0 %v20569_v8 }
0x2cca   :  { %20126 = vmatpush3.bf16.msra.mxu1 %v22196_v29 }
0x2ccb   :  { %19285 = vmatmul.mubr.msk.f32.vlgmr.msra.gmra.mrb[120].mxu0 %vm127_vm1, %v22388_v34  ;;  %20133 = vmatprep.subr.bf16.mxu1 %v20567_v0 }
0x2ccc   :  { %19300 = vmatprep.mubr.msk.f32.mxu0 %vm20568_vm0, %v20569_v8 }
0x2ccd   :  { %19274 = vmatmul.mubr.msk.f32.vlgmr.msra.gmra.mrb[118].mxu1 %vm127_vm1, %v22388_v34 }
0x2cce   :  { %20135 = vmatpush3.bf16.msra.mxu1 %v22210_v31  ;;  %19295 = vmatprep.mubr.msk.f32.mxu1 %vm20568_vm0, %v20569_v8 }
0x2ccf   :  { %20136 = vmatprep.subr.bf16.mxu1 %v20567_v0 }
0x2cd2   :  { %20138 = vmatpush3.bf16.msra.mxu1 %v22222_v45 }
0x2cd3   :  { %19303 = vmatprep.subr.mxu1 %v20569_v8 }
0x2cd5   :  { %19296 = vmatmul.mubr.msk.f32.vlgmr.msra.gmra.mrb[120].mxu1 %vm127_vm1, %v22388_v34 }
0x2cd6   :  { %19305 = vmatprep.mubr.msk.f32.mxu1 %vm20568_vm0, %v20569_v8 }
0x2d88   :  { %v9681_v16 = vpop.f32.mrb[114].mxu0 }
0x2d89   :  { %v19238_v33 = vpop.f32.mrb[115].mxu0  ;;  %v9691_v29 = vadd.f32 %v22424_v38, %v9681_v16 }
0x2d8c   :  { %v9835_v19 = vpop.f32.mrb[116].mxu0 }
0x2d8d   :  { %v19248_v50 = vpop.f32.mrb[117].mxu0 }
0x2d90   :  { %v9761_v31 = vpop.f32.mrb[114].mxu1 }
0x2d91   :  { %v9765_v45 = vadd.f32 %v9761_v31, %v9691_v29  ;;  %v19243_v6 = vpop.f32.mrb[115].mxu1 }
0x2d93   :  { %v9839_v51 = vadd.f32 %v9835_v19, %v9765_v45 }
0x2d96   :  { %v9983_v3 = vpop.f32.mrb[118].mxu0 }
0x2d97   :  { %v22428_v62 = vadd.f32 %v22236_v14, %v9983_v3  ;;  %v19264_v56 = vpop.f32.mrb[119].mxu0 }
0x2d98   :  { %v9909_v20 = vpop.f32.mrb[116].mxu1 }
0x2d99   :  { %v22430_v42 = vadd.f32 %v9909_v20, %v9839_v51  ;;  %v19253_v25 = vpop.f32.mrb[117].mxu1  ;;  %10206 = vrot.lane.b32.xlu0 %v22428_v62, %s20570_s21 }
0x2d9e   :  { %v10123_v23 = vpop.f32.mrb[120].mxu0 }
0x2d9f   :  { %v22435_v15 = vadd.f32 %v22244_v59, %v10123_v23  ;;  %v19286_v18 = vpop.f32.mrb[121].mxu0 }
0x2da0   :  { %v10053_v52 = vpop.f32.mrb[118].mxu1 }
0x2da1   :  { %v22438_v13 = vadd.f32 %v22254_v57, %v10053_v52  ;;  %v19275_v27 = vpop.f32.mrb[119].mxu1  ;;  %10362 = vrot.lane.b32.xlu0 %v22435_v15, %s20570_s21  ;;  %v10197_v57 = vmul.f32 0.35355338, %v22428_v62 }
0x2da3   :  { %10284 = vrot.lane.b32.xlu1 %v22438_v13, %s20570_s21  ;;  %v10198_v39 = vmul.f32 0.35355338, %v22438_v13 }
0x2da8   :  { %v10193_v14 = vpop.f32.mrb[120].mxu1 }
0x2da9   :  { %v22445_v54 = vadd.f32 %v22266_v5, %v10193_v14  ;;  %v19297_v21 = vpop.f32.mrb[121].mxu1  ;;  %v10199_v5 = vmul.f32 0.35355338, %v22435_v15  ;;  %v11161_v14 = vadd.f32 %v22430_v42, %v22183_v58 }
0x2dab   :  { %10440 = vrot.lane.b32.xlu1 %v22445_v54, %s20570_s21  ;;  %v10200_v9 = vmul.f32 0.35355338, %v22445_v54  ;;  %v11163_v21 = vsel %vm127_vm1, %v11161_v14, 0.0 }
0x2e0b   :  { %v10207_v59 = vpop.permute.xlu0 %10206 }
0x2e0c   :  { %19299 = vmatpush3.xpose.msk.msra.mxu0 %vm422_vm2, %v10207_v59 }
0x2e0d   :  { %19308 = vmatprep.subr.mxu0 %v20569_v8 }
0x2e0f   :  { %19301 = vmatmul.mubr.msk.f32.vlgmr.msra.gmra.mrb[122].mxu0 %vm422_vm2, %v10197_v57 }
0x2e10   :  { %19310 = vmatprep.mubr.msk.f32.mxu0 %vm20568_vm0, %v20569_v8 }
0x2e13   :  { %v10363_v49 = vpop.permute.xlu0 %10362 }
0x2e14   :  { %19309 = vmatpush3.xpose.msk.msra.mxu0 %vm422_vm2, %v10363_v49 }
0x2e15   :  { %v10285_v24 = vpop.permute.xlu1 %10284  ;;  %19318 = vmatprep.subr.mxu0 %v20569_v8 }
0x2e16   :  { %19304 = vmatpush3.xpose.msk.msra.mxu1 %vm422_vm2, %v10285_v24 }
0x2e17   :  { %19311 = vmatmul.mubr.msk.f32.vlgmr.msra.gmra.mrb[124].mxu0 %vm422_vm2, %v10199_v5  ;;  %19313 = vmatprep.subr.mxu1 %v20569_v8 }
0x2e18   :  { %19320 = vmatprep.mubr.msk.f32.mxu0 %vm20568_vm0, %v20569_v8 }
0x2e19   :  { %19306 = vmatmul.mubr.msk.f32.vlgmr.msra.gmra.mrb[122].mxu1 %vm422_vm2, %v10198_v39 }
0x2e1a   :  { %19315 = vmatprep.mubr.msk.f32.mxu1 %vm20568_vm0, %v20569_v8 }
0x2e1d   :  { %v10441_v61 = vpop.permute.xlu1 %10440 }
0x2e1e   :  { %19314 = vmatpush3.xpose.msk.msra.mxu1 %vm422_vm2, %v10441_v61 }
0x2e1f   :  { %19323 = vmatprep.subr.mxu1 %v20569_v8 }
0x2e21   :  { %19316 = vmatmul.mubr.msk.f32.vlgmr.msra.gmra.mrb[124].mxu1 %vm422_vm2, %v10200_v9 }
0x2e22   :  { %19325 = vmatprep.mubr.msk.f32.mxu1 %vm20568_vm0, %v20569_v8 }
0x2ee2   :  { %v10279_v48 = vpop.f32.mrb[122].mxu0 }
0x2ee3   :  { %v10280_v32 = vadd.f32 %v17571_v53, %v10279_v48  ;;  %v19302_v40 = vpop.f32.mrb[123].mxu0 }
0x2ee5   :  { %v10517_v28 = vsel %vm422_vm2, %v10280_v32, -inf }
0x2ee6   :  { %10518 = vmax.xlane.f32.xlu0 %v10517_v28 }
0x2eea   :  { %v10435_v46 = vpop.f32.mrb[124].mxu0 }
0x2eeb   :  { %v10436_v11 = vadd.f32 %v17573_v36, %v10435_v46  ;;  %v19312_v10 = vpop.f32.mrb[125].mxu0 }
0x2eec   :  { %v10357_v26 = vpop.f32.mrb[122].mxu1 }
0x2eed   :  { %v10358_v17 = vadd.f32 %v17572_v47, %v10357_v26  ;;  %v19307_v12 = vpop.f32.mrb[123].mxu1  ;;  %v10523_v2 = vsel %vm422_vm2, %v10436_v11, -inf }
0x2eee   :  { %10524 = vmax.xlane.f32.xlu0 %v10523_v2 }
0x2eef   :  { %v10520_v37 = vsel %vm422_vm2, %v10358_v17, -inf }
0x2ef0   :  { %10521 = vmax.xlane.f32.xlu1 %v10520_v37  ;;  %v22533_v37 = vld [vmem:[%s23624_s11 + $0x3] ss:$0 sm:$0xff] }
0x2ef4   :  { %v10513_v35 = vpop.f32.mrb[124].mxu1 }
0x2ef5   :  { %v10514_v41 = vadd.f32 %v17574_v43, %v10513_v35  ;;  %v19317_v60 = vpop.f32.mrb[125].mxu1 }
0x2ef7   :  { %v10526_v1 = vsel %vm422_vm2, %v10514_v41, -inf }
0x2ef8   :  { %10527 = vmax.xlane.f32.xlu0 %v10526_v1 }
0x2f01   :  { %10561 = vrot.lane.b32.xlu1 %v22428_v62, %s20571_s23 }
0x2f73   :  { %v10519_v55 = vpop.xlane.xlu0 %10518 }
0x2f74   :  { %v10529_v7 = vsub.f32 %v10280_v32, %v10519_v55 }
0x2f76   :  { %v10533_v30 = vmul.f32 1.442695, %v10529_v7 }
0x2f78   :  { %20457 = vpow2.f32 %v10533_v30 }
0x2f7b   :  { %v10525_v16 = vpop.xlane.xlu0 %10524 }
0x2f7c   :  { %v10531_v33 = vsub.f32 %v10436_v11, %v10525_v16 }
0x2f7d   :  { %v10522_v19 = vpop.xlane.xlu1 %10521 }
0x2f7e   :  { %v10537_v50 = vmul.f32 1.442695, %v10531_v33  ;;  %v10530_v29 = vsub.f32 %v10358_v17, %v10522_v19 }
0x2f80   :  { %20459 = vpow2.f32 %v10537_v50  ;;  %v10535_v31 = vmul.f32 1.442695, %v10530_v29 }
0x2f81   :  { %v10562_v45 = vpop.permute.xlu1 %10561 }
0x2f82   :  { %v20458_v6 = vpop.eup %20457  ;;  %20461 = vpow2.f32 %v10535_v31  ;;  %19319 = vmatpush3.msra.mxu0 %v10562_v45 }
0x2f83   :  { %v10541_v51 = vsel %vm422_vm2, %v20458_v6, 0.0  ;;  %19328 = vmatprep.subr.mxu0 %v20569_v8 }
0x2f84   :  { %10542 = vadd.xlane.f32.xlu1 %v10541_v51 }
0x2f85   :  { %v10528_v3 = vpop.xlane.xlu0 %10527 }
0x2f86   :  { %v10532_v62 = vsub.f32 %v10514_v41, %v10528_v3 }
0x2f88   :  { %v10539_v56 = vmul.f32 1.442695, %v10532_v62 }
0x2f8a   :  { %v20460_v20 = vpop.eup %20459  ;;  %20463 = vpow2.f32 %v10539_v56 }
0x2f8b   :  { %v10547_v25 = vsel %vm422_vm2, %v20460_v20, 0.0 }
0x2f8c   :  { %v20462_v23 = vpop.eup %20461  ;;  %10548 = vadd.xlane.f32.xlu1 %v10547_v25 }
0x2f8d   :  { %v10544_v18 = vsel %vm422_vm2, %v20462_v23, 0.0 }
0x2f8e   :  { %10545 = vadd.xlane.f32.xlu0 %v10544_v18 }
0x2f94   :  { %v20464_v52 = vpop.eup %20463 }
0x2f95   :  { %v10550_v27 = vsel %vm422_vm2, %v20464_v52, 0.0 }
0x2f96   :  { %10551 = vadd.xlane.f32.xlu0 %v10550_v27 }
0x2f9d   :  { %10713 = vrot.lane.b32.xlu1 %v22435_v15, %s20571_s23 }
0x2fa1   :  { %10789 = vrot.lane.b32.xlu1 %v22445_v54, %s20571_s23 }
0x2fac   :  { %10637 = vrot.lane.b32.xlu0 %v22438_v13, %s20571_s23 }
0x2fcb   :  { %11164 = vadd.xlane.f32.xlu0 %v11163_v21 }
0x3011   :  { %v10543_v59 = vpop.xlane.xlu1 %10542 }
0x3012   :  { %20465 = vrcp.f32 %v10543_v59  ;;  %v17529_v59 = vld [vmem:[%s23627_s9 + $0xc0] sm:$0xff] }
0x3019   :  { %v10549_v57 = vpop.xlane.xlu1 %10548 }
0x301a   :  { %20467 = vrcp.f32 %v10549_v57  ;;  %v17530_v57 = vld [vmem:[%s23627_s9 + $0xc8] sm:$0xff] }
0x301b   :  { %v10546_v49 = vpop.xlane.xlu0 %10545 }
0x301c   :  { %v20466_v5 = vpop.eup %20465  ;;  %20469 = vrcp.f32 %v10546_v49  ;;  %v17531_v49 = vld [vmem:[%s23627_s9 + $0xd0] sm:$0xff] }
0x301d   :  { %v10557_v15 = vmul.f32 %v20466_v5, %v20458_v6  ;;  %v10714_v24 = vpop.permute.xlu1 %10713  ;;  %v20147_v5 = vpack.c.bf16 %v17530_v57, %v17529_v59  ;;  %v17607_v59 = vld [vmem:[%s23640_s26 + $0x230] sm:$0xff]  ;;  %v17608_v57 = vld [vmem:[%s23640_s26 + $0x238] sm:$0xff] }
0x301f   :  { %19321 = vmatmul.mubr.msk.f32.vlgmr.msra.gmra.mrb[126].mxu0 %vm422_vm2, %v10557_v15  ;;  %v17532_v15 = vld [vmem:[%s23627_s9 + $0xd8] sm:$0xff] }
0x3020   :  { %19329 = vmatpush3.msra.mxu0 %v10714_v24  ;;  %19330 = vmatprep.mubr.msk.f32.mxu0 %vm20568_vm0, %v20569_v8  ;;  %v20151_v24 = vpack.c.bf16 %v17532_v15, %v17531_v49  ;;  %v22685_v49 = vpack.c.bf16 %v17608_v57, %v17607_v59  ;;  %v17614_v15 = vld [vmem:[%s23640_s26 + $0x268] sm:$0xff] }
0x3021   :  { %19338 = vmatprep.subr.mxu0 %v20569_v8  ;;  %v10790_v9 = vpop.permute.xlu1 %10789 }
0x3023   :  { %v10552_v58 = vpop.xlane.xlu0 %10551 }
0x3024   :  { %v20468_v42 = vpop.eup %20467  ;;  %20471 = vrcp.f32 %v10552_v58  ;;  %v17533_v58 = vld [vmem:[%s23627_s9 + $0xe0] sm:$0xff] }
0x3025   :  { %v10559_v13 = vmul.f32 %v20468_v42, %v20460_v20  ;;  %v17534_v42 = vld [vmem:[%s23627_s9 + $0xe8] sm:$0xff] }
0x3026   :  { %v20470_v54 = vpop.eup %20469 }
0x3027   :  { %v10558_v39 = vmul.f32 %v20470_v54, %v20462_v23  ;;  %19331 = vmatmul.mubr.msk.f32.vlgmr.msra.gmra.mrb[128].mxu0 %vm422_vm2, %v10559_v13  ;;  %v10638_v61 = vpop.permute.xlu0 %10637  ;;  %v20155_v13 = vpack.c.bf16 %v17534_v42, %v17533_v58  ;;  %v17615_v58 = vld [vmem:[%s23640_s26 + $0x270] sm:$0xff]  ;;  %v17616_v42 = vld [vmem:[%s23640_s26 + $0x278] sm:$0xff] }
0x3028   :  { %19324 = vmatpush3.msra.mxu1 %v10638_v61  ;;  %19339 = vmatpush3.msra.mxu0 %v22348_v63 }
0x3029   :  { %19326 = vmatmul.mubr.msk.f32.vlgmr.msra.gmra.mrb[126].mxu1 %vm422_vm2, %v10558_v39  ;;  %19333 = vmatprep.subr.mxu1 %v20569_v8 }
0x302a   :  { %19334 = vmatpush3.msra.mxu1 %v10790_v9  ;;  %19335 = vmatprep.mubr.msk.f32.mxu1 %vm20568_vm0, %v20569_v8 }
0x302b   :  { %19340 = vmatprep.mubr.msk.f32.mxu0 %vm20568_vm0, %v20569_v8  ;;  %19348 = vmatprep.subr.mxu0 %v20569_v8 }
0x302c   :  { %19343 = vmatprep.subr.mxu1 %v20569_v8 }
0x302e   :  { %v20472_v53 = vpop.eup %20471 }
0x302f   :  { %v10560_v48 = vmul.f32 %v20472_v53, %v20464_v52  ;;  %v17525_v52 = vld [vmem:[%s23626_s7 + $0x68] sm:$0xff] }
0x3031   :  { %19336 = vmatmul.mubr.msk.f32.vlgmr.msra.gmra.mrb[128].mxu1 %vm422_vm2, %v10560_v48 }
0x3032   :  { %19344 = vmatpush3.msra.mxu1 %v22355_v44  ;;  %19345 = vmatprep.mubr.msk.f32.mxu1 %vm20568_vm0, %v20569_v8 }
0x3033   :  { %19353 = vmatprep.subr.mxu1 %v20569_v8 }
0x3058   :  { %v11165_v63 = vpop.xlane.xlu0 %11164 }
0x3059   :  { %v11169_v32 = vmul.f32 0.03125, %v11165_v63 }
0x305b   :  { %v11171_v40 = vsub.f32 %v11161_v14, %v11169_v32  ;;  %v17527_v14 = vld [vmem:[%s23626_s7 + $0x78] sm:$0xff]  ;;  %v17535_v32 = vld [vmem:[%s23627_s9 + $0xf0] sm:$0xff] }
0x305d   :  { %v11173_v28 = vmul.f32 %v11171_v40, %v11171_v40 }
0x305f   :  { %v11175_v36 = vsel %vm127_vm1, %v11173_v28, 0.0 }
0x3060   :  { %11176 = vadd.xlane.f32.xlu0 %v11175_v36  ;;  %v17593_v36 = vld [vmem:[%s23628_s8 + $0x3] ss:$0 sm:$0xff] }
0x30ed   :  { %v11177_v46 = vpop.xlane.xlu0 %11176 }
0x30ee   :  { %v11181_v47 = vmul.f32 0.03125, %v11177_v46 }
0x30f0   :  { %v11183_v11 = vadd.f32 1e-05, %v11181_v47 }
0x30f2   :  { %20473 = vrsqrt.f32 %v11183_v11  ;;  %v10633_v10 = vpop.f32.mrb[126].mxu0 }
0x30f3   :  { %v19322_v26 = vpop.f32.mrb[127].mxu0  ;;  %19341 = vmatmul.mubr.msk.f32.vlgmr.msra.gmra.mrb[130].mxu0 %vm422_vm2, %v10633_v10 }
0x30f4   :  { %19349 = vmatpush3.msra.mxu0 %v22362_v4  ;;  %19350 = vmatprep.mubr.msk.f32.mxu0 %vm20568_vm0, %v20569_v8  ;;  %v17592_v4 = vld [vmem:[%s23625_s12 + $0x3] ss:$0 sm:$0xff] }
0x30fa   :  { %v10785_v44 = vpop.f32.mrb[128].mxu0 }
0x30fb   :  { %v19332_v17 = vpop.f32.mrb[129].mxu0  ;;  %19351 = vmatmul.mubr.msk.f32.vlgmr.msra.gmra.mrb[132].mxu0 %vm422_vm2, %v10785_v44 }
0x30fc   :  { %v20474_v12 = vpop.eup %20473  ;;  %v10709_v2 = vpop.f32.mrb[126].mxu1  ;;  %v17596_v17 = vld [vmem:[%s23629_s10 + $0x3] ss:$0 sm:$0xff] }
0x30fd   :  { %v19327_v43 = vpop.f32.mrb[127].mxu1  ;;  %19346 = vmatmul.mubr.msk.f32.vlgmr.msra.gmra.mrb[130].mxu1 %vm422_vm2, %v10709_v2  ;;  %v11187_v35 = vmul.f32 %v20474_v12, %v11171_v40  ;;  %v17536_v40 = vld [vmem:[%s23627_s9 + $0xf8] sm:$0xff] }
0x30fe   :  { %19354 = vmatpush3.msra.mxu1 %v22377_v22  ;;  %19355 = vmatprep.mubr.msk.f32.mxu1 %vm20568_vm0, %v20569_v8  ;;  %v20159_v28 = vpack.c.bf16 %v17536_v40, %v17535_v32  ;;  %v22733_v32 = vld [vmem:[%s23620_s4 + $0x12] ss:$0 sm:$0xff] }
0x30ff   :  { %v11195_v41 = vmul.f32 %v22533_v37, %v11187_v35  ;;  %20148 = vmatprep.subr.bf16.mxu1 %v20147_v5 }
0x3101   :  { %v22543_v60 = vadd.f32 %v17592_v4, %v11195_v41 }
0x3103   :  { %19366 = vmatprep.mubr.msk.f32.mxu0 %vm127_vm1, %v22543_v60 }
0x3104   :  { %v10861_v1 = vpop.f32.mrb[128].mxu1 }
0x3105   :  { %v19337_v55 = vpop.f32.mrb[129].mxu1  ;;  %19356 = vmatmul.mubr.msk.f32.vlgmr.msra.gmra.mrb[132].mxu1 %vm422_vm2, %v10861_v1 }
0x3106   :  { %20150 = vmatpush3.bf16.msra.mxu1 %v20147_v5  ;;  %v17613_v5 = vld [vmem:[%s23640_s26 + $0x260] sm:$0xff] }
0x3107   :  { %20152 = vmatprep.subr.bf16.mxu1 %v20151_v24 }
0x310a   :  { %20154 = vmatpush3.bf16.msra.mxu1 %v20151_v24  ;;  %v22699_v24 = vpack.c.bf16 %v17614_v15, %v17613_v5 }
0x310b   :  { %20156 = vmatprep.subr.bf16.mxu1 %v20155_v13 }
0x310e   :  { %20158 = vmatpush3.bf16.msra.mxu1 %v20155_v13  ;;  %v22711_v13 = vpack.c.bf16 %v17616_v42, %v17615_v58 }
0x310f   :  { %20160 = vmatprep.subr.bf16.mxu1 %v20159_v28 }
0x3112   :  { %20162 = vmatpush3.bf16.msra.mxu1 %v20159_v28  ;;  %v22743_v28 = vld [vmem:[%s23620_s4 + $0x11] ss:$0 sm:$0xff] }
0x3113   :  { %20175 = vmatprep.subr.bf16.mxu1 %v20567_v0 }
0x31c6   :  { %v10934_v7 = vpop.f32.mrb[130].mxu0 }
0x31c7   :  { %v19342_v22 = vpop.f32.mrb[131].mxu0  ;;  %v10938_v16 = vadd.f32 %v22424_v38, %v10934_v7  ;;  %v17524_v38 = vld [vmem:[%s23626_s7 + $0x60] sm:$0xff] }
0x31c8   :  { %v20139_v27 = vpack.c.bf16 %v17525_v52, %v17524_v38  ;;  %v17605_v38 = vld [vmem:[%s23640_s26 + $0x220] sm:$0xff]  ;;  %v17606_v52 = vld [vmem:[%s23640_s26 + $0x228] sm:$0xff] }
0x31ca   :  { %20140 = vmatprep.subr.bf16.mxu0 %v20139_v27 }
0x31cb   :  { %20142 = vmatpush3.bf16.msra.mxu0 %v20139_v27  ;;  %v22666_v27 = vld [vmem:[%s23631_s14 + $0x3] ss:$0 sm:$0xff] }
0x31ce   :  { %v11082_v30 = vpop.f32.mrb[132].mxu0 }
0x31cf   :  { %v19352_v33 = vpop.f32.mrb[133].mxu0 }
0x31d0   :  { %v11008_v19 = vpop.f32.mrb[130].mxu1 }
0x31d1   :  { %v11012_v50 = vadd.f32 %v11008_v19, %v10938_v16  ;;  %v19347_v29 = vpop.f32.mrb[131].mxu1  ;;  %v17602_v16 = vld [vmem:[%s23640_s26 + $0x208] sm:$0xff] }
0x31d2   :  { %v17610_v19 = vld [vmem:[%s23640_s26 + $0x248] sm:$0xff]  ;;  %v17603_v29 = vld [vmem:[%s23640_s26 + $0x210] sm:$0xff] }
0x31d3   :  { %v11086_v31 = vadd.f32 %v11082_v30, %v11012_v50  ;;  %v17601_v30 = vld [vmem:[%s23640_s26 + $0x200] sm:$0xff] }
0x31d4   :  { %v22618_v33 = vpack.c.bf16 %v17602_v16, %v17601_v30  ;;  %v11793_v16 = vld [vmem:[%s23621_s1 + $0x10] sm:$0xff] }
0x31d8   :  { %v11156_v45 = vpop.f32.mrb[132].mxu1 }
0x31d9   :  { %v11160_v6 = vadd.f32 %v11156_v45, %v11086_v31  ;;  %v19357_v51 = vpop.f32.mrb[133].mxu1  ;;  %v17604_v31 = vld [vmem:[%s23640_s26 + $0x218] sm:$0xff] }
0x31da   :  { %v22637_v45 = vpack.c.bf16 %v17604_v31, %v17603_v29  ;;  %v17612_v51 = vld [vmem:[%s23640_s26 + $0x258] sm:$0xff] }
0x31db   :  { %v11162_v3 = vadd.f32 %v11160_v6, %v22388_v34  ;;  %v17526_v34 = vld [vmem:[%s23626_s7 + $0x70] sm:$0xff] }
0x31dc   :  { %v20143_v21 = vpack.c.bf16 %v17527_v14, %v17526_v34  ;;  %v17611_v6 = vld [vmem:[%s23640_s26 + $0x250] sm:$0xff]  ;;  %v22669_v14 = vpack.c.bf16 %v17606_v52, %v17605_v38 }
0x31dd   :  { %v11166_v62 = vsel %vm127_vm1, %v11162_v3, 0.0 }
0x31de   :  { %11167 = vadd.xlane.f32.xlu1 %v11166_v62  ;;  %20144 = vmatprep.subr.bf16.mxu0 %v20143_v21 }
0x31df   :  { %20146 = vmatpush3.bf16.msra.mxu0 %v20143_v21 }
0x31e0   :  { %20163 = vmatprep.subr.bf16.mxu0 %v20567_v0 }
0x326b   :  { %v11168_v56 = vpop.xlane.xlu1 %11167 }
0x326c   :  { %v11170_v20 = vmul.f32 0.03125, %v11168_v56 }
0x326e   :  { %v11172_v25 = vsub.f32 %v11162_v3, %v11170_v20  ;;  %v22646_v3 = vpack.c.bf16 %v17612_v51, %v17611_v6  ;;  %v11792_v6 = vld [vmem:[%s23621_s1 + $0x8] sm:$0xff] }
0x3270   :  { %v11174_v23 = vmul.f32 %v11172_v25, %v11172_v25 }
0x3272   :  { %v11178_v18 = vsel %vm127_vm1, %v11174_v23, 0.0  ;;  %v22655_v23 = vld [vmem:[%s23630_s13 + $0x3] ss:$0 sm:$0xff] }
0x3273   :  { %11179 = vadd.xlane.f32.xlu0 %v11178_v18 }
0x3300   :  { %v11180_v54 = vpop.xlane.xlu0 %11179 }
0x3301   :  { %v11182_v39 = vmul.f32 0.03125, %v11180_v54  ;;  %v22725_v54 = vld [vmem:[%s23620_s4 + $0x10] ss:$0 sm:$0xff] }
0x3303   :  { %v11184_v61 = vadd.f32 1e-05, %v11182_v39 }
0x3305   :  { %20475 = vrsqrt.f32 %v11184_v61 }
0x330f   :  { %v20476_v9 = vpop.eup %20475 }
0x3310   :  { %v11188_v53 = vmul.f32 %v20476_v9, %v11172_v25 }
0x3312   :  { %v11196_v48 = vmul.f32 %v22533_v37, %v11188_v53 }
0x3314   :  { %v22584_v63 = vadd.f32 %v17592_v4, %v11196_v48 }
0x3316   :  { %19367 = vmatmul.mubr.msk.f32.vlgmr.msra.gmra.mrb[134].mxu0 %vm127_vm1, %v22584_v63 }
0x3317   :  { %19396 = vmatprep.mubr.msk.f32.mxu0 %vm20568_vm0, %v20569_v8  ;;  %20165 = vmatpush3.bf16.msra.mxu0 %v22618_v33 }
0x3318   :  { %20166 = vmatprep.subr.bf16.mxu0 %v20567_v0 }
0x331b   :  { %20168 = vmatpush3.bf16.msra.mxu0 %v22637_v45 }
0x331c   :  { %20169 = vmatprep.subr.bf16.mxu0 %v20567_v0 }
0x33e9   :  { %v19368_v46 = vpop.f32.mrb[134].mxu0 }
0x33ea   :  { %v11289_v47 = vadd.f32 %v19368_v46, %v17593_v36  ;;  %v11283_v11 = vpop.f32.mrb[135].mxu0 }
0x33eb   :  { %v11284_v10 = vadd.f32 %v17593_v36, %v11283_v11  ;;  %v22755_v11 = vld [vmem:[%s23620_s4 + $0x13] ss:$0 sm:$0xff] }
0x33ec   :  { %v11293_v44 = vmax.f32 %v11289_v47, 0.0 }
0x33ed   :  { %v11292_v26 = vmax.f32 %v11284_v10, 0.0 }
0x33ef   :  { %19385 = vmatprep.mubr.msk.f32.mxu1 %vm2770_vm3, %v11292_v26 }
0x33f0   :  { %19386 = vmatmul.mubr.msk.f32.vlgmr.msra.gmra.mrb[134].mxu1 %vm2770_vm3, %v11293_v44 }
0x33f1   :  { %19418 = vmatprep.mubr.msk.f32.mxu1 %vm20568_vm0, %v20569_v8 }
0x34c3   :  { %v19387_v12 = vpop.f32.mrb[134].mxu1 }
0x34c4   :  { %v22607_v2 = vadd.f32 %v19387_v12, %v17596_v17  ;;  %v11372_v37 = vpop.f32.mrb[135].mxu1 }
0x34c5   :  { %v11373_v43 = vadd.f32 %v17596_v17, %v11372_v37 }
0x34c7   :  { %v11381_v35 = vadd.f32 %v11373_v43, %v22543_v60  ;;  %v17609_v60 = vld [vmem:[%s23640_s26 + $0x240] sm:$0xff] }
0x34c8   :  { %v22626_v50 = vpack.c.bf16 %v17610_v19, %v17609_v60 }
0x34c9   :  { %v11383_v4 = vsel %vm127_vm1, %v11381_v35, 0.0 }
0x34ca   :  { %11384 = vadd.xlane.f32.xlu1 %v11383_v4  ;;  %20177 = vmatpush3.bf16.msra.mxu1 %v22626_v50 }
0x34cb   :  { %20178 = vmatprep.subr.bf16.mxu1 %v20567_v0 }
0x34ce   :  { %20180 = vmatpush3.bf16.msra.mxu1 %v22646_v3 }
0x34cf   :  { %19432 = vmatprep.subr.mxu1 %v20569_v8 }
0x3557   :  { %v11385_v41 = vpop.xlane.xlu1 %11384 }
0x3558   :  { %v11389_v1 = vmul.f32 0.03125, %v11385_v41 }
0x355a   :  { %v11391_v55 = vsub.f32 %v11381_v35, %v11389_v1 }
0x355c   :  { %v11393_v7 = vmul.f32 %v11391_v55, %v11391_v55 }
0x355e   :  { %v11395_v22 = vsel %vm127_vm1, %v11393_v7, 0.0 }
0x355f   :  { %11396 = vadd.xlane.f32.xlu0 %v11395_v22 }
0x35ec   :  { %v11397_v62 = vpop.xlane.xlu0 %11396 }
0x35ed   :  { %v11401_v56 = vmul.f32 0.03125, %v11397_v62 }
0x35ef   :  { %v11403_v20 = vadd.f32 1e-05, %v11401_v56 }
0x35f1   :  { %20477 = vrsqrt.f32 %v11403_v20 }
0x35fb   :  { %v20478_v25 = vpop.eup %20477 }
0x35fc   :  { %v11407_v18 = vmul.f32 %v20478_v25, %v11391_v55  ;;  %v11791_v55 = vld [vmem:[%s23621_s1] sm:$0xff] }
0x35fe   :  { %v11415_v34 = vmul.f32 %v22655_v23, %v11407_v18  ;;  %v11794_v18 = vld [vmem:[%s23621_s1 + $0x18] sm:$0xff] }
0x3600   :  { %v22672_v21 = vadd.f32 %v22666_v27, %v11415_v34 }
0x3602   :  { %19397 = vmatmul.mubr.msk.f32.vlgmr.msra.gmra.mrb[136].mxu0 %vm127_vm1, %v22672_v21  ;;  %19419 = vmatmul.mubr.msk.f32.vlgmr.msra.gmra.mrb[136].mxu1 %vm127_vm1, %v22672_v21 }
0x3603   :  { %20171 = vmatpush3.bf16.msra.mxu0 %v22669_v14  ;;  %19407 = vmatprep.mubr.msk.f32.mxu0 %vm20568_vm0, %v20569_v8 }
0x3604   :  { %20172 = vmatprep.subr.bf16.mxu0 %v20567_v0  ;;  %19434 = vmatprep.mubr.msk.f32.mxu1 %vm20568_vm0, %v20569_v8 }
0x3607   :  { %20174 = vmatpush3.bf16.msra.mxu0 %v22685_v49 }
0x3608   :  { %20181 = vmatprep.subr.bf16.mxu0 %v20567_v0 }
0x360a   :  { %19408 = vmatmul.mubr.msk.f32.vlgmr.msra.gmra.mrb[138].mxu0 %vm127_vm1, %v22672_v21 }
0x360b   :  { %20183 = vmatpush3.bf16.msra.mxu0 %v22699_v24  ;;  %19429 = vmatprep.mubr.msk.f32.mxu0 %vm20568_vm0, %v20569_v8 }
0x360c   :  { %20184 = vmatprep.subr.bf16.mxu0 %v20567_v0 }
0x360f   :  { %20186 = vmatpush3.bf16.msra.mxu0 %v22711_v13 }
0x3610   :  { %19442 = vmatprep.subr.mxu0 %v20569_v8 }
0x3612   :  { %19430 = vmatmul.mubr.msk.f32.vlgmr.msra.gmra.mrb[140].mxu0 %vm127_vm1, %v22672_v21 }
0x3613   :  { %19444 = vmatprep.mubr.msk.f32.mxu0 %vm20568_vm0, %v20569_v8 }
0x36d5   :  { %v11573_v39 = vpop.f32.mrb[136].mxu0  ;;  %v11713_v61 = vpop.f32.mrb[136].mxu1 }
0x36d6   :  { %v22728_v9 = vadd.f32 %v22725_v54, %v11573_v39  ;;  %v19398_v53 = vpop.f32.mrb[137].mxu0  ;;  %v19420_v48 = vpop.f32.mrb[137].mxu1  ;;  %v22738_v40 = vadd.f32 %v22733_v32, %v11713_v61 }
0x36d8   :  { %11796 = vrot.lane.b32.xlu1 %v22728_v9, %s20570_s21  ;;  %v11787_v12 = vmul.f32 0.35355338, %v22728_v9  ;;  %v11789_v43 = vmul.f32 0.35355338, %v22738_v40 }
0x36dc   :  { %11952 = vrot.lane.b32.xlu1 %v22738_v40, %s20570_s21 }
0x36dd   :  { %v11643_v36 = vpop.f32.mrb[138].mxu0 }
0x36de   :  { %v22748_v46 = vadd.f32 %v22743_v28, %v11643_v36  ;;  %v19409_v47 = vpop.f32.mrb[139].mxu0 }
0x36e0   :  { %11874 = vrot.lane.b32.xlu0 %v22748_v46, %s20570_s21  ;;  %v11788_v4 = vmul.f32 0.35355338, %v22748_v46 }
0x36e5   :  { %v11783_v10 = vpop.f32.mrb[140].mxu0 }
0x36e6   :  { %v22758_v26 = vadd.f32 %v22755_v11, %v11783_v10  ;;  %v19431_v44 = vpop.f32.mrb[141].mxu0 }
0x36e8   :  { %12030 = vrot.lane.b32.xlu1 %v22758_v26, %s20570_s21  ;;  %v11790_v1 = vmul.f32 0.35355338, %v22758_v26 }
0x374a   :  { %v11797_v17 = vpop.permute.xlu1 %11796 }
0x374b   :  { %19433 = vmatpush3.xpose.msk.msra.mxu1 %vm422_vm2, %v11797_v17 }
0x374c   :  { %19437 = vmatprep.subr.mxu1 %v20569_v8 }
0x374e   :  { %v11953_v37 = vpop.permute.xlu1 %11952  ;;  %19435 = vmatmul.mubr.msk.f32.vlgmr.msra.gmra.mrb[138].mxu1 %vm422_vm2, %v11787_v12 }
0x374f   :  { %19443 = vmatpush3.xpose.msk.msra.mxu0 %vm422_vm2, %v11953_v37  ;;  %19439 = vmatprep.mubr.msk.f32.mxu1 %vm20568_vm0, %v20569_v8 }
0x3750   :  { %19452 = vmatprep.subr.mxu0 %v20569_v8 }
0x3752   :  { %v11875_v35 = vpop.permute.xlu0 %11874  ;;  %19445 = vmatmul.mubr.msk.f32.vlgmr.msra.gmra.mrb[142].mxu0 %vm422_vm2, %v11789_v43 }
0x3753   :  { %19438 = vmatpush3.xpose.msk.msra.mxu1 %vm422_vm2, %v11875_v35  ;;  %19454 = vmatprep.mubr.msk.f32.mxu0 %vm20568_vm0, %v20569_v8 }
0x3754   :  { %19447 = vmatprep.subr.mxu1 %v20569_v8 }
0x3756   :  { %19440 = vmatmul.mubr.msk.f32.vlgmr.msra.gmra.mrb[140].mxu1 %vm422_vm2, %v11788_v4 }
0x3757   :  { %19449 = vmatprep.mubr.msk.f32.mxu1 %vm20568_vm0, %v20569_v8 }
0x375a   :  { %v12031_v41 = vpop.permute.xlu1 %12030 }
0x375b   :  { %19448 = vmatpush3.xpose.msk.msra.mxu1 %vm422_vm2, %v12031_v41 }
0x375c   :  { %19457 = vmatprep.subr.mxu1 %v20569_v8 }
0x375e   :  { %19450 = vmatmul.mubr.msk.f32.vlgmr.msra.gmra.mrb[142].mxu1 %vm422_vm2, %v11790_v1  ;;  %v11382_v1 = vadd.f32 %v22607_v2, %v22584_v63 }
0x375f   :  { %19459 = vmatprep.mubr.msk.f32.mxu1 %vm20568_vm0, %v20569_v8 }
0x3821   :  { %v11869_v7 = vpop.f32.mrb[138].mxu1 }
0x3822   :  { %v11870_v22 = vadd.f32 %v11869_v7, %v11791_v55  ;;  %v19436_v30 = vpop.f32.mrb[139].mxu1  ;;  %v11386_v55 = vsel %vm127_vm1, %v11382_v1, 0.0 }
0x3824   :  { %v12107_v60 = vsel %vm422_vm2, %v11870_v22, -inf }
0x3825   :  { %12108 = vmax.xlane.f32.xlu0 %v12107_v60  ;;  %v12025_v19 = vpop.f32.mrb[142].mxu0 }
0x3826   :  { %v12026_v29 = vadd.f32 %v12025_v19, %v11793_v16  ;;  %v19446_v31 = vpop.f32.mrb[143].mxu0 }
0x3828   :  { %v12113_v51 = vsel %vm422_vm2, %v12026_v29, -inf }
0x3829   :  { %v11947_v62 = vpop.f32.mrb[140].mxu1  ;;  %12114 = vmax.xlane.f32.xlu0 %v12113_v51 }
0x382a   :  { %v11948_v56 = vadd.f32 %v11947_v62, %v11792_v6  ;;  %v19441_v20 = vpop.f32.mrb[141].mxu1 }
0x382c   :  { %v12110_v25 = vsel %vm422_vm2, %v11948_v56, -inf }
0x382d   :  { %12111 = vmax.xlane.f32.xlu1 %v12110_v25 }
0x3831   :  { %v12103_v38 = vpop.f32.mrb[142].mxu1 }
0x3832   :  { %v12104_v52 = vadd.f32 %v12103_v38, %v11794_v18  ;;  %v19451_v34 = vpop.f32.mrb[143].mxu1  ;;  %v22837_v38 = vld [vmem:[%s23622_s5 + $0x80] sm:$0xff] }
0x3834   :  { %v12116_v59 = vsel %vm422_vm2, %v12104_v52, -inf }
0x3835   :  { %12117 = vmax.xlane.f32.xlu0 %v12116_v59 }
0x383e   :  { %12151 = vrot.lane.b32.xlu1 %v22728_v9, %s20571_s23 }
0x38b2   :  { %v12109_v57 = vpop.xlane.xlu0 %12108 }
0x38b3   :  { %v12119_v5 = vsub.f32 %v11870_v22, %v12109_v57 }
0x38b5   :  { %v12123_v15 = vmul.f32 1.442695, %v12119_v5  ;;  %v22851_v5 = vld [vmem:[%s23622_s5 + $0x90] sm:$0xff] }
0x38b6   :  { %v12115_v58 = vpop.xlane.xlu0 %12114 }
0x38b7   :  { %20479 = vpow2.f32 %v12123_v15  ;;  %v12121_v42 = vsub.f32 %v12026_v29, %v12115_v58 }
0x38b9   :  { %v12127_v39 = vmul.f32 1.442695, %v12121_v42 }
0x38ba   :  { %v12112_v61 = vpop.xlane.xlu1 %12111 }
0x38bb   :  { %20481 = vpow2.f32 %v12127_v39  ;;  %v12120_v53 = vsub.f32 %v11948_v56, %v12112_v61  ;;  %v22866_v61 = vld [vmem:[%s23622_s5 + $0x98] sm:$0xff] }
0x38bd   :  { %v12125_v48 = vmul.f32 1.442695, %v12120_v53 }
0x38be   :  { %v12152_v36 = vpop.permute.xlu1 %12151 }
0x38bf   :  { %20483 = vpow2.f32 %v12125_v48  ;;  %19453 = vmatpush3.msra.mxu0 %v12152_v36 }
0x38c0   :  { %19462 = vmatprep.subr.mxu0 %v20569_v8 }
0x38c1   :  { %v20480_v47 = vpop.eup %20479 }
0x38c2   :  { %v12118_v10 = vpop.xlane.xlu0 %12117  ;;  %v12131_v9 = vsel %vm422_vm2, %v20480_v47, 0.0 }
0x38c3   :  { %v12122_v44 = vsub.f32 %v12104_v52, %v12118_v10  ;;  %12132 = vadd.xlane.f32.xlu1 %v12131_v9  ;;  %v22844_v52 = vld [vmem:[%s23622_s5 + $0x88] sm:$0xff] }
0x38c5   :  { %v20482_v17 = vpop.eup %20481  ;;  %v12129_v12 = vmul.f32 1.442695, %v12122_v44 }
0x38c6   :  { %v12137_v37 = vsel %vm422_vm2, %v20482_v17, 0.0 }
0x38c7   :  { %20485 = vpow2.f32 %v12129_v12  ;;  %12138 = vadd.xlane.f32.xlu1 %v12137_v37 }
0x38c9   :  { %v20484_v43 = vpop.eup %20483 }
0x38ca   :  { %v12134_v35 = vsel %vm422_vm2, %v20484_v43, 0.0 }
0x38cb   :  { %12135 = vadd.xlane.f32.xlu0 %v12134_v35 }
0x38d1   :  { %v20486_v4 = vpop.eup %20485 }
0x38d2   :  { %v12140_v41 = vsel %vm422_vm2, %v20486_v4, 0.0 }
0x38d3   :  { %12141 = vadd.xlane.f32.xlu0 %v12140_v41 }
0x38d8   :  { %12303 = vrot.lane.b32.xlu1 %v22738_v40, %s20571_s23 }
0x38dc   :  { %12379 = vrot.lane.b32.xlu1 %v22758_v26, %s20571_s23 }
0x38e9   :  { %12227 = vrot.lane.b32.xlu0 %v22748_v46, %s20571_s23 }
0x3908   :  { %11387 = vadd.xlane.f32.xlu0 %v11386_v55 }
0x3950   :  { %v12133_v7 = vpop.xlane.xlu1 %12132 }
0x3951   :  { %20487 = vrcp.f32 %v12133_v7 }
0x3954   :  { %v12139_v22 = vpop.xlane.xlu1 %12138 }
0x3955   :  { %20489 = vrcp.f32 %v12139_v22 }
0x3958   :  { %v12136_v30 = vpop.xlane.xlu0 %12135  ;;  %v12304_v60 = vpop.permute.xlu1 %12303 }
0x3959   :  { %20491 = vrcp.f32 %v12136_v30 }
0x395b   :  { %v20488_v16 = vpop.eup %20487 }
0x395c   :  { %v12147_v40 = vmul.f32 %v20488_v16, %v20480_v47  ;;  %v12380_v31 = vpop.permute.xlu1 %12379 }
0x395e   :  { %19455 = vmatmul.mubr.msk.f32.vlgmr.msra.gmra.mrb[144].mxu0 %vm422_vm2, %v12147_v40 }
0x395f   :  { %v20490_v26 = vpop.eup %20489  ;;  %19463 = vmatpush3.msra.mxu0 %v12304_v60  ;;  %19464 = vmatprep.mubr.msk.f32.mxu0 %vm20568_vm0, %v20569_v8 }
0x3960   :  { %v12149_v63 = vmul.f32 %v20490_v26, %v20482_v17  ;;  %v12142_v2 = vpop.xlane.xlu0 %12141  ;;  %19472 = vmatprep.subr.mxu0 %v20569_v8 }
0x3961   :  { %20493 = vrcp.f32 %v12142_v2 }
0x3962   :  { %19465 = vmatmul.mubr.msk.f32.vlgmr.msra.gmra.mrb[146].mxu0 %vm422_vm2, %v12149_v63 }
0x3963   :  { %v20492_v46 = vpop.eup %20491  ;;  %19474 = vmatprep.mubr.msk.f32.mxu0 %vm20568_vm0, %v20569_v8  ;;  %19473 = vmatpush3.msra.mxu0 %v22837_v38 }
0x3964   :  { %v12148_v19 = vmul.f32 %v20492_v46, %v20484_v43  ;;  %v12228_v29 = vpop.permute.xlu0 %12227  ;;  %19482 = vmatprep.subr.mxu0 %v20569_v8 }
0x3965   :  { %19458 = vmatpush3.msra.mxu1 %v12228_v29  ;;  %v17673_v29 = vld [vmem:[%s23621_s1 + $0x20] sm:$0xff] }
0x3966   :  { %19460 = vmatmul.mubr.msk.f32.vlgmr.msra.gmra.mrb[144].mxu1 %vm422_vm2, %v12148_v19  ;;  %19467 = vmatprep.subr.mxu1 %v20569_v8 }
0x3967   :  { %19468 = vmatpush3.msra.mxu1 %v12380_v31  ;;  %19469 = vmatprep.mubr.msk.f32.mxu1 %vm20568_vm0, %v20569_v8 }
0x3968   :  { %19477 = vmatprep.subr.mxu1 %v20569_v8 }
0x396b   :  { %v20494_v6 = vpop.eup %20493 }
0x396c   :  { %v12150_v51 = vmul.f32 %v20494_v6, %v20486_v4 }
0x396e   :  { %19470 = vmatmul.mubr.msk.f32.vlgmr.msra.gmra.mrb[146].mxu1 %vm422_vm2, %v12150_v51 }
0x396f   :  { %19479 = vmatprep.mubr.msk.f32.mxu1 %vm20568_vm0, %v20569_v8  ;;  %19478 = vmatpush3.msra.mxu1 %v22844_v52 }
0x3970   :  { %19487 = vmatprep.subr.mxu1 %v20569_v8 }
0x3995   :  { %v11388_v62 = vpop.xlane.xlu0 %11387 }
0x3996   :  { %v11390_v56 = vmul.f32 0.03125, %v11388_v62 }
0x3998   :  { %v11392_v20 = vsub.f32 %v11382_v1, %v11390_v56  ;;  %v17675_v56 = vld [vmem:[%s23621_s1 + $0x30] sm:$0xff] }
0x399a   :  { %v11394_v25 = vmul.f32 %v11392_v20, %v11392_v20 }
0x399c   :  { %v11398_v18 = vsel %vm127_vm1, %v11394_v25, 0.0  ;;  %v17674_v25 = vld [vmem:[%s23621_s1 + $0x28] sm:$0xff] }
0x399d   :  { %11399 = vadd.xlane.f32.xlu1 %v11398_v18 }
0x3a2a   :  { %v11400_v34 = vpop.xlane.xlu1 %11399 }
0x3a2b   :  { %v11402_v59 = vmul.f32 0.03125, %v11400_v34 }
0x3a2d   :  { %v11404_v57 = vadd.f32 1e-05, %v11402_v59 }
0x3a2f   :  { %20495 = vrsqrt.f32 %v11404_v57 }
0x3a31   :  { %v12223_v15 = vpop.f32.mrb[144].mxu0 }
0x3a32   :  { %v19456_v58 = vpop.f32.mrb[145].mxu0  ;;  %19475 = vmatmul.mubr.msk.f32.vlgmr.msra.gmra.mrb[148].mxu0 %vm422_vm2, %v12223_v15 }
0x3a33   :  { %19483 = vmatpush3.msra.mxu0 %v22851_v5  ;;  %19484 = vmatprep.mubr.msk.f32.mxu0 %vm20568_vm0, %v20569_v8 }
0x3a34   :  { %20187 = vmatprep.subr.bf16.mxu0 %v20567_v0 }
0x3a35   :  { %v12375_v42 = vpop.f32.mrb[146].mxu0 }
0x3a36   :  { %v19466_v39 = vpop.f32.mrb[147].mxu0  ;;  %19485 = vmatmul.mubr.msk.f32.vlgmr.msra.gmra.mrb[150].mxu0 %vm422_vm2, %v12375_v42 }
0x3a37   :  { %20189 = vmatpush3.bf16.msra.mxu0 %v22618_v33  ;;  %19500 = vmatprep.mubr.msk.f32.mxu0 %vm20568_vm0, %v20569_v8  ;;  %v17676_v39 = vld [vmem:[%s23621_s1 + $0x38] sm:$0xff] }
0x3a38   :  { %20190 = vmatprep.subr.bf16.mxu0 %v20567_v0 }
0x3a39   :  { %v20496_v53 = vpop.eup %20495  ;;  %v12299_v48 = vpop.f32.mrb[144].mxu1 }
0x3a3a   :  { %v11408_v36 = vmul.f32 %v20496_v53, %v11392_v20  ;;  %v19461_v47 = vpop.f32.mrb[145].mxu1  ;;  %19480 = vmatmul.mubr.msk.f32.vlgmr.msra.gmra.mrb[148].mxu1 %vm422_vm2, %v12299_v48 }
0x3a3b   :  { %20192 = vmatpush3.bf16.msra.mxu0 %v22637_v45  ;;  %19488 = vmatpush3.msra.mxu1 %v22866_v61 }
0x3a3c   :  { %20199 = vmatprep.subr.bf16.mxu0 %v20567_v0  ;;  %v11416_v33 = vmul.f32 %v22655_v23, %v11408_v36  ;;  %19489 = vmatprep.mubr.msk.f32.mxu1 %vm20568_vm0, %v20569_v8  ;;  %v22913_v23 = vld [vmem:[%s23623_s6 + $0x4] ss:$0 sm:$0xff] }
0x3a3d   :  { %20193 = vmatprep.subr.bf16.mxu1 %v20567_v0 }
0x3a3e   :  { %v22877_v10 = vadd.f32 %v22666_v27, %v11416_v33 }
0x3a40   :  { %19501 = vmatmul.mubr.msk.f32.vlgmr.msra.gmra.mrb[152].mxu0 %vm127_vm1, %v22877_v10 }
0x3a41   :  { %20201 = vmatpush3.bf16.msra.mxu0 %v22626_v50  ;;  %v12451_v45 = vpop.f32.mrb[146].mxu1  ;;  %19522 = vmatprep.mubr.msk.f32.mxu0 %vm20568_vm0, %v20569_v8 }
0x3a42   :  { %v19471_v9 = vpop.f32.mrb[147].mxu1  ;;  %19490 = vmatmul.mubr.msk.f32.vlgmr.msra.gmra.mrb[150].mxu1 %vm422_vm2, %v12451_v45  ;;  %20202 = vmatprep.subr.bf16.mxu0 %v20567_v0 }
0x3a43   :  { %20195 = vmatpush3.bf16.msra.mxu1 %v22669_v14  ;;  %19511 = vmatprep.mubr.msk.f32.mxu1 %vm20568_vm0, %v20569_v8 }
0x3a44   :  { %20196 = vmatprep.subr.bf16.mxu1 %v20567_v0 }
0x3a45   :  { %20204 = vmatpush3.bf16.msra.mxu0 %v22646_v3 }
0x3a46   :  { %19536 = vmatprep.subr.mxu0 %v20569_v8 }
0x3a47   :  { %20198 = vmatpush3.bf16.msra.mxu1 %v22685_v49 }
0x3a48   :  { %19523 = vmatmul.mubr.msk.f32.vlgmr.msra.gmra.mrb[154].mxu0 %vm127_vm1, %v22877_v10  ;;  %20205 = vmatprep.subr.bf16.mxu1 %v20567_v0 }
0x3a49   :  { %19538 = vmatprep.mubr.msk.f32.mxu0 %vm20568_vm0, %v20569_v8 }
0x3a4a   :  { %19512 = vmatmul.mubr.msk.f32.vlgmr.msra.gmra.mrb[152].mxu1 %vm127_vm1, %v22877_v10 }
0x3a4b   :  { %20207 = vmatpush3.bf16.msra.mxu1 %v22699_v24  ;;  %19533 = vmatprep.mubr.msk.f32.mxu1 %vm20568_vm0, %v20569_v8 }
0x3a4c   :  { %20208 = vmatprep.subr.bf16.mxu1 %v20567_v0 }
0x3a4f   :  { %20210 = vmatpush3.bf16.msra.mxu1 %v22711_v13 }
0x3a50   :  { %19541 = vmatprep.subr.mxu1 %v20569_v8 }
0x3a52   :  { %19534 = vmatmul.mubr.msk.f32.vlgmr.msra.gmra.mrb[154].mxu1 %vm127_vm1, %v22877_v10 }
0x3a53   :  { %19543 = vmatprep.mubr.msk.f32.mxu1 %vm20568_vm0, %v20569_v8 }
0x3b05   :  { %v12524_v50 = vpop.f32.mrb[148].mxu0 }
0x3b06   :  { %v19476_v3 = vpop.f32.mrb[149].mxu0  ;;  %v12534_v49 = vadd.f32 %v22913_v23, %v12524_v50 }
0x3b09   :  { %v12678_v27 = vpop.f32.mrb[150].mxu0 }
0x3b0a   :  { %v19486_v14 = vpop.f32.mrb[151].mxu0 }
0x3b0d   :  { %v12604_v24 = vpop.f32.mrb[148].mxu1 }
0x3b0e   :  { %v12608_v13 = vadd.f32 %v12604_v24, %v12534_v49  ;;  %v19481_v44 = vpop.f32.mrb[149].mxu1 }
0x3b10   :  { %v12682_v17 = vadd.f32 %v12678_v27, %v12608_v13 }
0x3b13   :  { %v12826_v12 = vpop.f32.mrb[152].mxu0 }
0x3b14   :  { %v22917_v37 = vadd.f32 %v22725_v54, %v12826_v12  ;;  %v19502_v43 = vpop.f32.mrb[153].mxu0 }
0x3b15   :  { %v12752_v35 = vpop.f32.mrb[150].mxu1 }
0x3b16   :  { %v22919_v4 = vadd.f32 %v12752_v35, %v12682_v17  ;;  %v19491_v41 = vpop.f32.mrb[151].mxu1  ;;  %13049 = vrot.lane.b32.xlu0 %v22917_v37, %s20570_s21 }
0x3b1b   :  { %v12966_v1 = vpop.f32.mrb[154].mxu0 }
0x3b1c   :  { %v22924_v55 = vadd.f32 %v22733_v32, %v12966_v1  ;;  %v19524_v7 = vpop.f32.mrb[155].mxu0 }
0x3b1d   :  { %v12896_v22 = vpop.f32.mrb[152].mxu1 }
0x3b1e   :  { %v22927_v30 = vadd.f32 %v22743_v28, %v12896_v22  ;;  %v19513_v16 = vpop.f32.mrb[153].mxu1  ;;  %13205 = vrot.lane.b32.xlu0 %v22924_v55, %s20570_s21  ;;  %v13040_v28 = vmul.f32 0.35355338, %v22917_v37 }
0x3b20   :  { %13127 = vrot.lane.b32.xlu1 %v22927_v30, %s20570_s21  ;;  %v13041_v2 = vmul.f32 0.35355338, %v22927_v30 }
0x3b25   :  { %v13036_v54 = vpop.f32.mrb[154].mxu1 }
0x3b26   :  { %v22934_v40 = vadd.f32 %v22755_v11, %v13036_v54  ;;  %v19535_v60 = vpop.f32.mrb[155].mxu1  ;;  %v13042_v11 = vmul.f32 0.35355338, %v22924_v55  ;;  %v14004_v54 = vadd.f32 %v22919_v4, %v22672_v21 }
0x3b28   :  { %13283 = vrot.lane.b32.xlu1 %v22934_v40, %s20570_s21  ;;  %v13043_v19 = vmul.f32 0.35355338, %v22934_v40  ;;  %v14006_v60 = vsel %vm127_vm1, %v14004_v54, 0.0 }
0x3b88   :  { %v13050_v32 = vpop.permute.xlu0 %13049 }
0x3b89   :  { %19537 = vmatpush3.xpose.msk.msra.mxu0 %vm422_vm2, %v13050_v32 }
0x3b8a   :  { %19546 = vmatprep.subr.mxu0 %v20569_v8 }
0x3b8c   :  { %19539 = vmatmul.mubr.msk.f32.vlgmr.msra.gmra.mrb[156].mxu0 %vm422_vm2, %v13040_v28 }
0x3b8d   :  { %19548 = vmatprep.mubr.msk.f32.mxu0 %vm20568_vm0, %v20569_v8 }
0x3b90   :  { %v13206_v26 = vpop.permute.xlu0 %13205 }
0x3b91   :  { %19547 = vmatpush3.xpose.msk.msra.mxu0 %vm422_vm2, %v13206_v26 }
0x3b92   :  { %v13128_v63 = vpop.permute.xlu1 %13127  ;;  %19556 = vmatprep.subr.mxu0 %v20569_v8 }
0x3b93   :  { %19542 = vmatpush3.xpose.msk.msra.mxu1 %vm422_vm2, %v13128_v63 }
0x3b94   :  { %19549 = vmatmul.mubr.msk.f32.vlgmr.msra.gmra.mrb[158].mxu0 %vm422_vm2, %v13042_v11  ;;  %19551 = vmatprep.subr.mxu1 %v20569_v8 }
0x3b95   :  { %19558 = vmatprep.mubr.msk.f32.mxu0 %vm20568_vm0, %v20569_v8 }
0x3b96   :  { %19544 = vmatmul.mubr.msk.f32.vlgmr.msra.gmra.mrb[156].mxu1 %vm422_vm2, %v13041_v2 }
0x3b97   :  { %19553 = vmatprep.mubr.msk.f32.mxu1 %vm20568_vm0, %v20569_v8 }
0x3b9a   :  { %v13284_v46 = vpop.permute.xlu1 %13283 }
0x3b9b   :  { %19552 = vmatpush3.xpose.msk.msra.mxu1 %vm422_vm2, %v13284_v46 }
0x3b9c   :  { %19561 = vmatprep.subr.mxu1 %v20569_v8 }
0x3b9e   :  { %19554 = vmatmul.mubr.msk.f32.vlgmr.msra.gmra.mrb[158].mxu1 %vm422_vm2, %v13043_v19 }
0x3b9f   :  { %19563 = vmatprep.mubr.msk.f32.mxu1 %vm20568_vm0, %v20569_v8 }
0x3c5f   :  { %v13122_v31 = vpop.f32.mrb[156].mxu0 }
0x3c60   :  { %v13123_v6 = vadd.f32 %v17673_v29, %v13122_v31  ;;  %v19540_v51 = vpop.f32.mrb[157].mxu0 }
0x3c62   :  { %v13360_v62 = vsel %vm422_vm2, %v13123_v6, -inf }
0x3c63   :  { %13361 = vmax.xlane.f32.xlu0 %v13360_v62 }
0x3c67   :  { %v13278_v20 = vpop.f32.mrb[158].mxu0 }
0x3c68   :  { %v13279_v18 = vadd.f32 %v17675_v56, %v13278_v20  ;;  %v19550_v34 = vpop.f32.mrb[159].mxu0 }
0x3c69   :  { %v13200_v59 = vpop.f32.mrb[156].mxu1 }
0x3c6a   :  { %v13201_v57 = vadd.f32 %v17674_v25, %v13200_v59  ;;  %v19545_v15 = vpop.f32.mrb[157].mxu1  ;;  %v13366_v58 = vsel %vm422_vm2, %v13279_v18, -inf }
0x3c6b   :  { %13367 = vmax.xlane.f32.xlu0 %v13366_v58 }
0x3c6c   :  { %v13363_v42 = vsel %vm422_vm2, %v13201_v57, -inf }
0x3c6d   :  { %13364 = vmax.xlane.f32.xlu1 %v13363_v42  ;;  %v23022_v42 = vld [vmem:[%s23624_s11 + $0x4] ss:$0 sm:$0xff] }
0x3c71   :  { %v13356_v53 = vpop.f32.mrb[158].mxu1 }
0x3c72   :  { %v13357_v48 = vadd.f32 %v17676_v39, %v13356_v53  ;;  %v19555_v36 = vpop.f32.mrb[159].mxu1 }
0x3c74   :  { %v13369_v47 = vsel %vm422_vm2, %v13357_v48, -inf }
0x3c75   :  { %13370 = vmax.xlane.f32.xlu0 %v13369_v47 }
0x3c7e   :  { %13404 = vrot.lane.b32.xlu1 %v22917_v37, %s20571_s23 }
0x3cf0   :  { %v13362_v33 = vpop.xlane.xlu0 %13361 }
0x3cf1   :  { %v13372_v45 = vsub.f32 %v13123_v6, %v13362_v33 }
0x3cf3   :  { %v13376_v9 = vmul.f32 1.442695, %v13372_v45 }
0x3cf5   :  { %20497 = vpow2.f32 %v13376_v9 }
0x3cf8   :  { %v13368_v50 = vpop.xlane.xlu0 %13367 }
0x3cf9   :  { %v13374_v3 = vsub.f32 %v13279_v18, %v13368_v50 }
0x3cfa   :  { %v13365_v27 = vpop.xlane.xlu1 %13364 }
0x3cfb   :  { %v13380_v14 = vmul.f32 1.442695, %v13374_v3  ;;  %v13373_v49 = vsub.f32 %v13201_v57, %v13365_v27 }
0x3cfd   :  { %20499 = vpow2.f32 %v13380_v14  ;;  %v13378_v24 = vmul.f32 1.442695, %v13373_v49 }
0x3cfe   :  { %v13405_v13 = vpop.permute.xlu1 %13404 }
0x3cff   :  { %v20498_v44 = vpop.eup %20497  ;;  %20501 = vpow2.f32 %v13378_v24  ;;  %19557 = vmatpush3.msra.mxu0 %v13405_v13 }
0x3d00   :  { %v13384_v17 = vsel %vm422_vm2, %v20498_v44, 0.0  ;;  %19566 = vmatprep.subr.mxu0 %v20569_v8 }
0x3d01   :  { %13385 = vadd.xlane.f32.xlu1 %v13384_v17 }
0x3d02   :  { %v13371_v12 = vpop.xlane.xlu0 %13370 }
0x3d03   :  { %v13375_v37 = vsub.f32 %v13357_v48, %v13371_v12 }
0x3d05   :  { %v13382_v43 = vmul.f32 1.442695, %v13375_v37 }
0x3d07   :  { %v20500_v35 = vpop.eup %20499  ;;  %20503 = vpow2.f32 %v13382_v43 }
0x3d08   :  { %v13390_v41 = vsel %vm422_vm2, %v20500_v35, 0.0 }
0x3d09   :  { %v20502_v1 = vpop.eup %20501  ;;  %13391 = vadd.xlane.f32.xlu1 %v13390_v41 }
0x3d0a   :  { %v13387_v7 = vsel %vm422_vm2, %v20502_v1, 0.0 }
0x3d0b   :  { %13388 = vadd.xlane.f32.xlu0 %v13387_v7 }
0x3d11   :  { %v20504_v22 = vpop.eup %20503 }
0x3d12   :  { %v13393_v16 = vsel %vm422_vm2, %v20504_v22, 0.0 }
0x3d13   :  { %13394 = vadd.xlane.f32.xlu0 %v13393_v16 }
0x3d1a   :  { %13556 = vrot.lane.b32.xlu1 %v22924_v55, %s20571_s23 }
0x3d1e   :  { %13632 = vrot.lane.b32.xlu1 %v22934_v40, %s20571_s23 }
0x3d29   :  { %13480 = vrot.lane.b32.xlu0 %v22927_v30, %s20571_s23 }
0x3d48   :  { %14007 = vadd.xlane.f32.xlu0 %v14006_v60 }
0x3d8e   :  { %v13386_v32 = vpop.xlane.xlu1 %13385 }
0x3d8f   :  { %20505 = vrcp.f32 %v13386_v32  ;;  %v17631_v32 = vld [vmem:[%s23627_s9 + $0x100] sm:$0xff] }
0x3d96   :  { %v13392_v28 = vpop.xlane.xlu1 %13391 }
0x3d97   :  { %20507 = vrcp.f32 %v13392_v28  ;;  %v17632_v28 = vld [vmem:[%s23627_s9 + $0x108] sm:$0xff] }
0x3d98   :  { %v13389_v26 = vpop.xlane.xlu0 %13388 }
0x3d99   :  { %v20506_v11 = vpop.eup %20505  ;;  %20509 = vrcp.f32 %v13389_v26  ;;  %v17633_v26 = vld [vmem:[%s23627_s9 + $0x110] sm:$0xff] }
0x3d9a   :  { %v13400_v55 = vmul.f32 %v20506_v11, %v20498_v44  ;;  %v13557_v63 = vpop.permute.xlu1 %13556  ;;  %v20219_v11 = vpack.c.bf16 %v17632_v28, %v17631_v32  ;;  %v17709_v32 = vld [vmem:[%s23640_s26 + $0x2b0] sm:$0xff]  ;;  %v17710_v28 = vld [vmem:[%s23640_s26 + $0x2b8] sm:$0xff] }
0x3d9c   :  { %19559 = vmatmul.mubr.msk.f32.vlgmr.msra.gmra.mrb[160].mxu0 %vm422_vm2, %v13400_v55  ;;  %v17634_v55 = vld [vmem:[%s23627_s9 + $0x118] sm:$0xff] }
0x3d9d   :  { %19567 = vmatpush3.msra.mxu0 %v13557_v63  ;;  %19568 = vmatprep.mubr.msk.f32.mxu0 %vm20568_vm0, %v20569_v8  ;;  %v20223_v63 = vpack.c.bf16 %v17634_v55, %v17633_v26  ;;  %v23174_v26 = vpack.c.bf16 %v17710_v28, %v17709_v32  ;;  %v17716_v55 = vld [vmem:[%s23640_s26 + $0x2e8] sm:$0xff] }
0x3d9e   :  { %19576 = vmatprep.subr.mxu0 %v20569_v8  ;;  %v13633_v19 = vpop.permute.xlu1 %13632 }
0x3da0   :  { %v13395_v21 = vpop.xlane.xlu0 %13394 }
0x3da1   :  { %v20508_v4 = vpop.eup %20507  ;;  %20511 = vrcp.f32 %v13395_v21  ;;  %v17635_v21 = vld [vmem:[%s23627_s9 + $0x120] sm:$0xff] }
0x3da2   :  { %v13402_v30 = vmul.f32 %v20508_v4, %v20500_v35  ;;  %v17636_v4 = vld [vmem:[%s23627_s9 + $0x128] sm:$0xff] }
0x3da3   :  { %v20510_v40 = vpop.eup %20509 }
0x3da4   :  { %v13401_v2 = vmul.f32 %v20510_v40, %v20502_v1  ;;  %19569 = vmatmul.mubr.msk.f32.vlgmr.msra.gmra.mrb[162].mxu0 %vm422_vm2, %v13402_v30  ;;  %v13481_v46 = vpop.permute.xlu0 %13480  ;;  %v20227_v30 = vpack.c.bf16 %v17636_v4, %v17635_v21  ;;  %v17717_v21 = vld [vmem:[%s23640_s26 + $0x2f0] sm:$0xff]  ;;  %v17718_v4 = vld [vmem:[%s23640_s26 + $0x2f8] sm:$0xff] }
0x3da5   :  { %19562 = vmatpush3.msra.mxu1 %v13481_v46  ;;  %19577 = vmatpush3.msra.mxu0 %v22837_v38 }
0x3da6   :  { %19564 = vmatmul.mubr.msk.f32.vlgmr.msra.gmra.mrb[160].mxu1 %vm422_vm2, %v13401_v2  ;;  %19571 = vmatprep.subr.mxu1 %v20569_v8 }
0x3da7   :  { %19572 = vmatpush3.msra.mxu1 %v13633_v19  ;;  %19573 = vmatprep.mubr.msk.f32.mxu1 %vm20568_vm0, %v20569_v8 }
0x3da8   :  { %19578 = vmatprep.mubr.msk.f32.mxu0 %vm20568_vm0, %v20569_v8  ;;  %19586 = vmatprep.subr.mxu0 %v20569_v8 }
0x3da9   :  { %19581 = vmatprep.subr.mxu1 %v20569_v8 }
0x3dab   :  { %v20512_v29 = vpop.eup %20511 }
0x3dac   :  { %v13403_v31 = vmul.f32 %v20512_v29, %v20504_v22  ;;  %v17627_v22 = vld [vmem:[%s23626_s7 + $0x88] sm:$0xff] }
0x3dae   :  { %19574 = vmatmul.mubr.msk.f32.vlgmr.msra.gmra.mrb[162].mxu1 %vm422_vm2, %v13403_v31 }
0x3daf   :  { %19582 = vmatpush3.msra.mxu1 %v22844_v52  ;;  %19583 = vmatprep.mubr.msk.f32.mxu1 %vm20568_vm0, %v20569_v8 }
0x3db0   :  { %19591 = vmatprep.subr.mxu1 %v20569_v8 }
0x3dd5   :  { %v14008_v38 = vpop.xlane.xlu0 %14007 }
0x3dd6   :  { %v14012_v6 = vmul.f32 0.03125, %v14008_v38 }
0x3dd8   :  { %v14014_v51 = vsub.f32 %v14004_v54, %v14012_v6  ;;  %v17629_v54 = vld [vmem:[%s23626_s7 + $0x98] sm:$0xff]  ;;  %v17637_v6 = vld [vmem:[%s23627_s9 + $0x130] sm:$0xff] }
0x3dda   :  { %v14016_v62 = vmul.f32 %v14014_v51, %v14014_v51 }
0x3ddc   :  { %v14018_v56 = vsel %vm127_vm1, %v14016_v62, 0.0 }
0x3ddd   :  { %14019 = vadd.xlane.f32.xlu0 %v14018_v56  ;;  %v17695_v56 = vld [vmem:[%s23628_s8 + $0x4] ss:$0 sm:$0xff] }
0x3e6a   :  { %v14020_v20 = vpop.xlane.xlu0 %14019 }
0x3e6b   :  { %v14024_v25 = vmul.f32 0.03125, %v14020_v20 }
0x3e6d   :  { %v14026_v18 = vadd.f32 1e-05, %v14024_v25 }
0x3e6f   :  { %20513 = vrsqrt.f32 %v14026_v18  ;;  %v13476_v34 = vpop.f32.mrb[160].mxu0 }
0x3e70   :  { %v19560_v59 = vpop.f32.mrb[161].mxu0  ;;  %19579 = vmatmul.mubr.msk.f32.vlgmr.msra.gmra.mrb[164].mxu0 %vm422_vm2, %v13476_v34 }
0x3e71   :  { %19587 = vmatpush3.msra.mxu0 %v22851_v5  ;;  %19588 = vmatprep.mubr.msk.f32.mxu0 %vm20568_vm0, %v20569_v8  ;;  %v17694_v5 = vld [vmem:[%s23625_s12 + $0x4] ss:$0 sm:$0xff] }
0x3e77   :  { %v13628_v52 = vpop.f32.mrb[162].mxu0 }
0x3e78   :  { %v19570_v57 = vpop.f32.mrb[163].mxu0  ;;  %19589 = vmatmul.mubr.msk.f32.vlgmr.msra.gmra.mrb[166].mxu0 %vm422_vm2, %v13628_v52 }
0x3e79   :  { %v20514_v15 = vpop.eup %20513  ;;  %v13552_v58 = vpop.f32.mrb[160].mxu1  ;;  %v17698_v57 = vld [vmem:[%s23629_s10 + $0x4] ss:$0 sm:$0xff] }
0x3e7a   :  { %v19565_v39 = vpop.f32.mrb[161].mxu1  ;;  %19584 = vmatmul.mubr.msk.f32.vlgmr.msra.gmra.mrb[164].mxu1 %vm422_vm2, %v13552_v58  ;;  %v14030_v53 = vmul.f32 %v20514_v15, %v14014_v51  ;;  %v17638_v51 = vld [vmem:[%s23627_s9 + $0x138] sm:$0xff] }
0x3e7b   :  { %19592 = vmatpush3.msra.mxu1 %v22866_v61  ;;  %19593 = vmatprep.mubr.msk.f32.mxu1 %vm20568_vm0, %v20569_v8  ;;  %v20231_v62 = vpack.c.bf16 %v17638_v51, %v17637_v6  ;;  %v23222_v6 = vld [vmem:[%s23620_s4 + $0x16] ss:$0 sm:$0xff] }
0x3e7c   :  { %v14038_v48 = vmul.f32 %v23022_v42, %v14030_v53  ;;  %20220 = vmatprep.subr.bf16.mxu1 %v20219_v11 }
0x3e7e   :  { %v23032_v36 = vadd.f32 %v17694_v5, %v14038_v48 }
0x3e80   :  { %19604 = vmatprep.mubr.msk.f32.mxu0 %vm127_vm1, %v23032_v36 }
0x3e81   :  { %v13704_v47 = vpop.f32.mrb[162].mxu1 }
0x3e82   :  { %v19575_v33 = vpop.f32.mrb[163].mxu1  ;;  %19594 = vmatmul.mubr.msk.f32.vlgmr.msra.gmra.mrb[166].mxu1 %vm422_vm2, %v13704_v47 }
0x3e83   :  { %20222 = vmatpush3.bf16.msra.mxu1 %v20219_v11  ;;  %v17715_v11 = vld [vmem:[%s23640_s26 + $0x2e0] sm:$0xff] }
0x3e84   :  { %20224 = vmatprep.subr.bf16.mxu1 %v20223_v63 }
0x3e87   :  { %20226 = vmatpush3.bf16.msra.mxu1 %v20223_v63  ;;  %v23188_v63 = vpack.c.bf16 %v17716_v55, %v17715_v11 }
0x3e88   :  { %20228 = vmatprep.subr.bf16.mxu1 %v20227_v30 }
0x3e8b   :  { %20230 = vmatpush3.bf16.msra.mxu1 %v20227_v30  ;;  %v23200_v30 = vpack.c.bf16 %v17718_v4, %v17717_v21 }
0x3e8c   :  { %20232 = vmatprep.subr.bf16.mxu1 %v20231_v62 }
0x3e8f   :  { %20234 = vmatpush3.bf16.msra.mxu1 %v20231_v62  ;;  %v23232_v62 = vld [vmem:[%s23620_s4 + $0x15] ss:$0 sm:$0xff] }
0x3e90   :  { %20247 = vmatprep.subr.bf16.mxu1 %v20567_v0 }
0x3f43   :  { %v13777_v45 = vpop.f32.mrb[164].mxu0 }
0x3f44   :  { %v19580_v61 = vpop.f32.mrb[165].mxu0  ;;  %v13781_v50 = vadd.f32 %v22913_v23, %v13777_v45  ;;  %v17626_v23 = vld [vmem:[%s23626_s7 + $0x80] sm:$0xff] }
0x3f45   :  { %v20211_v16 = vpack.c.bf16 %v17627_v22, %v17626_v23  ;;  %v17707_v23 = vld [vmem:[%s23640_s26 + $0x2a0] sm:$0xff]  ;;  %v17708_v22 = vld [vmem:[%s23640_s26 + $0x2a8] sm:$0xff] }
0x3f47   :  { %20212 = vmatprep.subr.bf16.mxu0 %v20211_v16 }
0x3f48   :  { %20214 = vmatpush3.bf16.msra.mxu0 %v20211_v16  ;;  %v23155_v16 = vld [vmem:[%s23631_s14 + $0x4] ss:$0 sm:$0xff] }
0x3f4b   :  { %v13925_v9 = vpop.f32.mrb[166].mxu0 }
0x3f4c   :  { %v19590_v3 = vpop.f32.mrb[167].mxu0 }
0x3f4d   :  { %v13851_v27 = vpop.f32.mrb[164].mxu1 }
0x3f4e   :  { %v13855_v14 = vadd.f32 %v13851_v27, %v13781_v50  ;;  %v19585_v49 = vpop.f32.mrb[165].mxu1  ;;  %v17704_v50 = vld [vmem:[%s23640_s26 + $0x288] sm:$0xff] }
0x3f4f   :  { %v17712_v27 = vld [vmem:[%s23640_s26 + $0x2c8] sm:$0xff]  ;;  %v17705_v49 = vld [vmem:[%s23640_s26 + $0x290] sm:$0xff] }
0x3f50   :  { %v13929_v24 = vadd.f32 %v13925_v9, %v13855_v14  ;;  %v17703_v9 = vld [vmem:[%s23640_s26 + $0x280] sm:$0xff] }
0x3f51   :  { %v23107_v3 = vpack.c.bf16 %v17704_v50, %v17703_v9  ;;  %v14636_v50 = vld [vmem:[%s23621_s1 + $0x10] sm:$0xff] }
0x3f55   :  { %v13999_v13 = vpop.f32.mrb[166].mxu1 }
0x3f56   :  { %v14003_v44 = vadd.f32 %v13999_v13, %v13929_v24  ;;  %v19595_v17 = vpop.f32.mrb[167].mxu1  ;;  %v17706_v24 = vld [vmem:[%s23640_s26 + $0x298] sm:$0xff] }
0x3f57   :  { %v23126_v13 = vpack.c.bf16 %v17706_v24, %v17705_v49  ;;  %v17714_v17 = vld [vmem:[%s23640_s26 + $0x2d8] sm:$0xff] }
0x3f58   :  { %v14005_v12 = vadd.f32 %v14003_v44, %v22877_v10  ;;  %v17628_v10 = vld [vmem:[%s23626_s7 + $0x90] sm:$0xff] }
0x3f59   :  { %v20215_v60 = vpack.c.bf16 %v17629_v54, %v17628_v10  ;;  %v17713_v44 = vld [vmem:[%s23640_s26 + $0x2d0] sm:$0xff]  ;;  %v23158_v54 = vpack.c.bf16 %v17708_v22, %v17707_v23 }
0x3f5a   :  { %v14009_v37 = vsel %vm127_vm1, %v14005_v12, 0.0 }
0x3f5b   :  { %14010 = vadd.xlane.f32.xlu1 %v14009_v37  ;;  %20216 = vmatprep.subr.bf16.mxu0 %v20215_v60 }
0x3f5c   :  { %20218 = vmatpush3.bf16.msra.mxu0 %v20215_v60 }
0x3f5d   :  { %20235 = vmatprep.subr.bf16.mxu0 %v20567_v0 }
0x3fe8   :  { %v14011_v43 = vpop.xlane.xlu1 %14010 }
0x3fe9   :  { %v14013_v35 = vmul.f32 0.03125, %v14011_v43 }
0x3feb   :  { %v14015_v41 = vsub.f32 %v14005_v12, %v14013_v35  ;;  %v23135_v12 = vpack.c.bf16 %v17714_v17, %v17713_v44  ;;  %v14635_v44 = vld [vmem:[%s23621_s1 + $0x8] sm:$0xff] }
0x3fed   :  { %v14017_v1 = vmul.f32 %v14015_v41, %v14015_v41 }
0x3fef   :  { %v14021_v7 = vsel %vm127_vm1, %v14017_v1, 0.0  ;;  %v23144_v1 = vld [vmem:[%s23630_s13 + $0x4] ss:$0 sm:$0xff] }
0x3ff0   :  { %14022 = vadd.xlane.f32.xlu0 %v14021_v7 }
0x407d   :  { %v14023_v40 = vpop.xlane.xlu0 %14022 }
0x407e   :  { %v14025_v2 = vmul.f32 0.03125, %v14023_v40  ;;  %v23214_v40 = vld [vmem:[%s23620_s4 + $0x14] ss:$0 sm:$0xff] }
0x4080   :  { %v14027_v46 = vadd.f32 1e-05, %v14025_v2 }
0x4082   :  { %20515 = vrsqrt.f32 %v14027_v46 }
0x408c   :  { %v20516_v19 = vpop.eup %20515 }
0x408d   :  { %v14031_v29 = vmul.f32 %v20516_v19, %v14015_v41 }
0x408f   :  { %v14039_v31 = vmul.f32 %v23022_v42, %v14031_v29 }
0x4091   :  { %v23073_v38 = vadd.f32 %v17694_v5, %v14039_v31 }
0x4093   :  { %19605 = vmatmul.mubr.msk.f32.vlgmr.msra.gmra.mrb[168].mxu0 %vm127_vm1, %v23073_v38 }
0x4094   :  { %19634 = vmatprep.mubr.msk.f32.mxu0 %vm20568_vm0, %v20569_v8  ;;  %20237 = vmatpush3.bf16.msra.mxu0 %v23107_v3 }
0x4095   :  { %20238 = vmatprep.subr.bf16.mxu0 %v20567_v0 }
0x4098   :  { %20240 = vmatpush3.bf16.msra.mxu0 %v23126_v13 }
0x4099   :  { %20241 = vmatprep.subr.bf16.mxu0 %v20567_v0 }
0x4166   :  { %v19606_v20 = vpop.f32.mrb[168].mxu0 }
0x4167   :  { %v14132_v25 = vadd.f32 %v19606_v20, %v17695_v56  ;;  %v14126_v18 = vpop.f32.mrb[169].mxu0 }
0x4168   :  { %v14127_v34 = vadd.f32 %v17695_v56, %v14126_v18  ;;  %v23244_v18 = vld [vmem:[%s23620_s4 + $0x17] ss:$0 sm:$0xff] }
0x4169   :  { %v14136_v52 = vmax.f32 %v14132_v25, 0.0 }
0x416a   :  { %v14135_v59 = vmax.f32 %v14127_v34, 0.0 }
0x416c   :  { %19623 = vmatprep.mubr.msk.f32.mxu1 %vm2770_vm3, %v14135_v59 }
0x416d   :  { %19624 = vmatmul.mubr.msk.f32.vlgmr.msra.gmra.mrb[168].mxu1 %vm2770_vm3, %v14136_v52 }
0x416e   :  { %19656 = vmatprep.mubr.msk.f32.mxu1 %vm20568_vm0, %v20569_v8 }
0x4240   :  { %v19625_v15 = vpop.f32.mrb[168].mxu1 }
0x4241   :  { %v23096_v58 = vadd.f32 %v19625_v15, %v17698_v57  ;;  %v14215_v42 = vpop.f32.mrb[169].mxu1 }
0x4242   :  { %v14216_v39 = vadd.f32 %v17698_v57, %v14215_v42 }
0x4244   :  { %v14224_v53 = vadd.f32 %v14216_v39, %v23032_v36  ;;  %v17711_v36 = vld [vmem:[%s23640_s26 + $0x2c0] sm:$0xff] }
0x4245   :  { %v23115_v14 = vpack.c.bf16 %v17712_v27, %v17711_v36 }
0x4246   :  { %v14226_v5 = vsel %vm127_vm1, %v14224_v53, 0.0 }
0x4247   :  { %14227 = vadd.xlane.f32.xlu1 %v14226_v5  ;;  %20249 = vmatpush3.bf16.msra.mxu1 %v23115_v14 }
0x4248   :  { %20250 = vmatprep.subr.bf16.mxu1 %v20567_v0 }
0x424b   :  { %20252 = vmatpush3.bf16.msra.mxu1 %v23135_v12 }
0x424c   :  { %19670 = vmatprep.subr.mxu1 %v20569_v8 }
0x42d4   :  { %v14228_v48 = vpop.xlane.xlu1 %14227 }
0x42d5   :  { %v14232_v47 = vmul.f32 0.03125, %v14228_v48 }
0x42d7   :  { %v14234_v33 = vsub.f32 %v14224_v53, %v14232_v47 }
0x42d9   :  { %v14236_v45 = vmul.f32 %v14234_v33, %v14234_v33 }
0x42db   :  { %v14238_v61 = vsel %vm127_vm1, %v14236_v45, 0.0 }
0x42dc   :  { %14239 = vadd.xlane.f32.xlu0 %v14238_v61 }
0x4369   :  { %v14240_v37 = vpop.xlane.xlu0 %14239 }
0x436a   :  { %v14244_v43 = vmul.f32 0.03125, %v14240_v37 }
0x436c   :  { %v14246_v35 = vadd.f32 1e-05, %v14244_v43 }
0x436e   :  { %20517 = vrsqrt.f32 %v14246_v35 }
0x4378   :  { %v20518_v41 = vpop.eup %20517 }
0x4379   :  { %v14250_v7 = vmul.f32 %v20518_v41, %v14234_v33  ;;  %v14634_v33 = vld [vmem:[%s23621_s1] sm:$0xff] }
0x437b   :  { %v14258_v10 = vmul.f32 %v23144_v1, %v14250_v7  ;;  %v14637_v7 = vld [vmem:[%s23621_s1 + $0x18] sm:$0xff] }
0x437d   :  { %v23161_v60 = vadd.f32 %v23155_v16, %v14258_v10 }
0x437f   :  { %19635 = vmatmul.mubr.msk.f32.vlgmr.msra.gmra.mrb[170].mxu0 %vm127_vm1, %v23161_v60  ;;  %19657 = vmatmul.mubr.msk.f32.vlgmr.msra.gmra.mrb[170].mxu1 %vm127_vm1, %v23161_v60 }
0x4380   :  { %20243 = vmatpush3.bf16.msra.mxu0 %v23158_v54  ;;  %19645 = vmatprep.mubr.msk.f32.mxu0 %vm20568_vm0, %v20569_v8 }
0x4381   :  { %20244 = vmatprep.subr.bf16.mxu0 %v20567_v0  ;;  %19672 = vmatprep.mubr.msk.f32.mxu1 %vm20568_vm0, %v20569_v8 }
0x4384   :  { %20246 = vmatpush3.bf16.msra.mxu0 %v23174_v26 }
0x4385   :  { %20253 = vmatprep.subr.bf16.mxu0 %v20567_v0 }
0x4387   :  { %19646 = vmatmul.mubr.msk.f32.vlgmr.msra.gmra.mrb[172].mxu0 %vm127_vm1, %v23161_v60 }
0x4388   :  { %20255 = vmatpush3.bf16.msra.mxu0 %v23188_v63  ;;  %19667 = vmatprep.mubr.msk.f32.mxu0 %vm20568_vm0, %v20569_v8 }
0x4389   :  { %20256 = vmatprep.subr.bf16.mxu0 %v20567_v0 }
0x438c   :  { %20258 = vmatpush3.bf16.msra.mxu0 %v23200_v30 }
0x438d   :  { %19680 = vmatprep.subr.mxu0 %v20569_v8 }
0x438f   :  { %19668 = vmatmul.mubr.msk.f32.vlgmr.msra.gmra.mrb[174].mxu0 %vm127_vm1, %v23161_v60 }
0x4390   :  { %19682 = vmatprep.mubr.msk.f32.mxu0 %vm20568_vm0, %v20569_v8 }
0x4452   :  { %v14416_v2 = vpop.f32.mrb[170].mxu0  ;;  %v14556_v46 = vpop.f32.mrb[170].mxu1 }
0x4453   :  { %v23217_v19 = vadd.f32 %v23214_v40, %v14416_v2  ;;  %v19636_v29 = vpop.f32.mrb[171].mxu0  ;;  %v19658_v31 = vpop.f32.mrb[171].mxu1  ;;  %v23227_v51 = vadd.f32 %v23222_v6, %v14556_v46 }
0x4455   :  { %14639 = vrot.lane.b32.xlu1 %v23217_v19, %s20570_s21  ;;  %v14630_v15 = vmul.f32 0.35355338, %v23217_v19  ;;  %v14632_v39 = vmul.f32 0.35355338, %v23227_v51 }
0x4459   :  { %14795 = vrot.lane.b32.xlu1 %v23227_v51, %s20570_s21 }
0x445a   :  { %v14486_v56 = vpop.f32.mrb[172].mxu0 }
0x445b   :  { %v23237_v20 = vadd.f32 %v23232_v62, %v14486_v56  ;;  %v19647_v25 = vpop.f32.mrb[173].mxu0 }
0x445d   :  { %14717 = vrot.lane.b32.xlu0 %v23237_v20, %s20570_s21  ;;  %v14631_v5 = vmul.f32 0.35355338, %v23237_v20 }
0x4462   :  { %v14626_v34 = vpop.f32.mrb[174].mxu0 }
0x4463   :  { %v23247_v59 = vadd.f32 %v23244_v18, %v14626_v34  ;;  %v19669_v52 = vpop.f32.mrb[175].mxu0 }
0x4465   :  { %14873 = vrot.lane.b32.xlu1 %v23247_v59, %s20570_s21  ;;  %v14633_v47 = vmul.f32 0.35355338, %v23247_v59 }
0x44c7   :  { %v14640_v57 = vpop.permute.xlu1 %14639 }
0x44c8   :  { %19671 = vmatpush3.xpose.msk.msra.mxu1 %vm422_vm2, %v14640_v57 }
0x44c9   :  { %19675 = vmatprep.subr.mxu1 %v20569_v8 }
0x44cb   :  { %v14796_v42 = vpop.permute.xlu1 %14795  ;;  %19673 = vmatmul.mubr.msk.f32.vlgmr.msra.gmra.mrb[172].mxu1 %vm422_vm2, %v14630_v15 }
0x44cc   :  { %19681 = vmatpush3.xpose.msk.msra.mxu0 %vm422_vm2, %v14796_v42  ;;  %19677 = vmatprep.mubr.msk.f32.mxu1 %vm20568_vm0, %v20569_v8 }
0x44cd   :  { %19690 = vmatprep.subr.mxu0 %v20569_v8 }
0x44cf   :  { %v14718_v53 = vpop.permute.xlu0 %14717  ;;  %19683 = vmatmul.mubr.msk.f32.vlgmr.msra.gmra.mrb[176].mxu0 %vm422_vm2, %v14632_v39 }
0x44d0   :  { %19676 = vmatpush3.xpose.msk.msra.mxu1 %vm422_vm2, %v14718_v53  ;;  %19692 = vmatprep.mubr.msk.f32.mxu0 %vm20568_vm0, %v20569_v8 }
0x44d1   :  { %19685 = vmatprep.subr.mxu1 %v20569_v8 }
0x44d3   :  { %19678 = vmatmul.mubr.msk.f32.vlgmr.msra.gmra.mrb[174].mxu1 %vm422_vm2, %v14631_v5 }
0x44d4   :  { %19687 = vmatprep.mubr.msk.f32.mxu1 %vm20568_vm0, %v20569_v8 }
0x44d7   :  { %v14874_v48 = vpop.permute.xlu1 %14873 }
0x44d8   :  { %19686 = vmatpush3.xpose.msk.msra.mxu1 %vm422_vm2, %v14874_v48 }
0x44d9   :  { %19695 = vmatprep.subr.mxu1 %v20569_v8 }
0x44db   :  { %19688 = vmatmul.mubr.msk.f32.vlgmr.msra.gmra.mrb[176].mxu1 %vm422_vm2, %v14633_v47  ;;  %v14225_v47 = vadd.f32 %v23096_v58, %v23073_v38 }
0x44dc   :  { %19697 = vmatprep.mubr.msk.f32.mxu1 %vm20568_vm0, %v20569_v8 }
0x459e   :  { %v14712_v45 = vpop.f32.mrb[172].mxu1 }
0x459f   :  { %v14713_v61 = vadd.f32 %v14712_v45, %v14634_v33  ;;  %v19674_v9 = vpop.f32.mrb[173].mxu1  ;;  %v14229_v33 = vsel %vm127_vm1, %v14225_v47, 0.0 }
0x45a1   :  { %v14950_v36 = vsel %vm422_vm2, %v14713_v61, -inf }
0x45a2   :  { %14951 = vmax.xlane.f32.xlu0 %v14950_v36  ;;  %v14868_v27 = vpop.f32.mrb[176].mxu0 }
0x45a3   :  { %v14869_v49 = vadd.f32 %v14868_v27, %v14636_v50  ;;  %v19684_v24 = vpop.f32.mrb[177].mxu0 }
0x45a5   :  { %v14956_v17 = vsel %vm422_vm2, %v14869_v49, -inf }
0x45a6   :  { %v14790_v37 = vpop.f32.mrb[174].mxu1  ;;  %14957 = vmax.xlane.f32.xlu0 %v14956_v17 }
0x45a7   :  { %v14791_v43 = vadd.f32 %v14790_v37, %v14635_v44  ;;  %v19679_v35 = vpop.f32.mrb[175].mxu1 }
0x45a9   :  { %v14953_v41 = vsel %vm422_vm2, %v14791_v43, -inf }
0x45aa   :  { %14954 = vmax.xlane.f32.xlu1 %v14953_v41 }
0x45ae   :  { %v14946_v23 = vpop.f32.mrb[176].mxu1 }
0x45af   :  { %v14947_v22 = vadd.f32 %v14946_v23, %v14637_v7  ;;  %v19689_v10 = vpop.f32.mrb[177].mxu1  ;;  %v23326_v23 = vld [vmem:[%s23622_s5 + $0xa0] sm:$0xff] }
0x45b1   :  { %v14959_v32 = vsel %vm422_vm2, %v14947_v22, -inf }
0x45b2   :  { %14960 = vmax.xlane.f32.xlu0 %v14959_v32 }
0x45bb   :  { %14994 = vrot.lane.b32.xlu1 %v23217_v19, %s20571_s23 }
0x462f   :  { %v14952_v28 = vpop.xlane.xlu0 %14951 }
0x4630   :  { %v14962_v11 = vsub.f32 %v14713_v61, %v14952_v28 }
0x4632   :  { %v14966_v55 = vmul.f32 1.442695, %v14962_v11  ;;  %v23340_v11 = vld [vmem:[%s23622_s5 + $0xb0] sm:$0xff] }
0x4633   :  { %v14958_v21 = vpop.xlane.xlu0 %14957 }
0x4634   :  { %20519 = vpow2.f32 %v14966_v55  ;;  %v14964_v4 = vsub.f32 %v14869_v49, %v14958_v21 }
0x4636   :  { %v14970_v2 = vmul.f32 1.442695, %v14964_v4 }
0x4637   :  { %v14955_v46 = vpop.xlane.xlu1 %14954 }
0x4638   :  { %20521 = vpow2.f32 %v14970_v2  ;;  %v14963_v29 = vsub.f32 %v14791_v43, %v14955_v46  ;;  %v23355_v46 = vld [vmem:[%s23622_s5 + $0xb8] sm:$0xff] }
0x463a   :  { %v14968_v31 = vmul.f32 1.442695, %v14963_v29 }
0x463b   :  { %v14995_v56 = vpop.permute.xlu1 %14994 }
0x463c   :  { %20523 = vpow2.f32 %v14968_v31  ;;  %19691 = vmatpush3.msra.mxu0 %v14995_v56 }
0x463d   :  { %19700 = vmatprep.subr.mxu0 %v20569_v8 }
0x463e   :  { %v20520_v25 = vpop.eup %20519 }
0x463f   :  { %v14961_v34 = vpop.xlane.xlu0 %14960  ;;  %v14974_v19 = vsel %vm422_vm2, %v20520_v25, 0.0 }
0x4640   :  { %v14965_v52 = vsub.f32 %v14947_v22, %v14961_v34  ;;  %14975 = vadd.xlane.f32.xlu1 %v14974_v19  ;;  %v23333_v22 = vld [vmem:[%s23622_s5 + $0xa8] sm:$0xff] }
0x4642   :  { %v20522_v57 = vpop.eup %20521  ;;  %v14972_v15 = vmul.f32 1.442695, %v14965_v52 }
0x4643   :  { %v14980_v42 = vsel %vm422_vm2, %v20522_v57, 0.0 }
0x4644   :  { %20525 = vpow2.f32 %v14972_v15  ;;  %14981 = vadd.xlane.f32.xlu1 %v14980_v42 }
0x4646   :  { %v20524_v39 = vpop.eup %20523 }
0x4647   :  { %v14977_v53 = vsel %vm422_vm2, %v20524_v39, 0.0 }
0x4648   :  { %14978 = vadd.xlane.f32.xlu0 %v14977_v53 }
0x464e   :  { %v20526_v5 = vpop.eup %20525 }
0x464f   :  { %v14983_v48 = vsel %vm422_vm2, %v20526_v5, 0.0 }
0x4650   :  { %14984 = vadd.xlane.f32.xlu0 %v14983_v48 }
0x4655   :  { %15146 = vrot.lane.b32.xlu1 %v23227_v51, %s20571_s23 }
0x4659   :  { %15222 = vrot.lane.b32.xlu1 %v23247_v59, %s20571_s23 }
0x4666   :  { %15070 = vrot.lane.b32.xlu0 %v23237_v20, %s20571_s23 }
0x4685   :  { %14230 = vadd.xlane.f32.xlu0 %v14229_v33 }
0x46cd   :  { %v14976_v45 = vpop.xlane.xlu1 %14975 }
0x46ce   :  { %20527 = vrcp.f32 %v14976_v45 }
0x46d1   :  { %v14982_v61 = vpop.xlane.xlu1 %14981 }
0x46d2   :  { %20529 = vrcp.f32 %v14982_v61 }
0x46d5   :  { %v14979_v9 = vpop.xlane.xlu0 %14978  ;;  %v15147_v36 = vpop.permute.xlu1 %15146 }
0x46d6   :  { %20531 = vrcp.f32 %v14979_v9 }
0x46d8   :  { %v20528_v50 = vpop.eup %20527 }
0x46d9   :  { %v14990_v51 = vmul.f32 %v20528_v50, %v20520_v25  ;;  %v15223_v24 = vpop.permute.xlu1 %15222 }
0x46db   :  { %19693 = vmatmul.mubr.msk.f32.vlgmr.msra.gmra.mrb[178].mxu0 %vm422_vm2, %v14990_v51 }
0x46dc   :  { %v20530_v59 = vpop.eup %20529  ;;  %19701 = vmatpush3.msra.mxu0 %v15147_v36  ;;  %19702 = vmatprep.mubr.msk.f32.mxu0 %vm20568_vm0, %v20569_v8 }
0x46dd   :  { %v14992_v38 = vmul.f32 %v20530_v59, %v20522_v57  ;;  %v14985_v58 = vpop.xlane.xlu0 %14984  ;;  %19710 = vmatprep.subr.mxu0 %v20569_v8 }
0x46de   :  { %20533 = vrcp.f32 %v14985_v58 }
0x46df   :  { %19703 = vmatmul.mubr.msk.f32.vlgmr.msra.gmra.mrb[180].mxu0 %vm422_vm2, %v14992_v38 }
0x46e0   :  { %v20532_v20 = vpop.eup %20531  ;;  %19712 = vmatprep.mubr.msk.f32.mxu0 %vm20568_vm0, %v20569_v8  ;;  %19711 = vmatpush3.msra.mxu0 %v23326_v23 }
0x46e1   :  { %v14991_v27 = vmul.f32 %v20532_v20, %v20524_v39  ;;  %v15071_v49 = vpop.permute.xlu0 %15070  ;;  %19720 = vmatprep.subr.mxu0 %v20569_v8 }
0x46e2   :  { %19696 = vmatpush3.msra.mxu1 %v15071_v49  ;;  %v17775_v49 = vld [vmem:[%s23621_s1 + $0x20] sm:$0xff] }
0x46e3   :  { %19698 = vmatmul.mubr.msk.f32.vlgmr.msra.gmra.mrb[178].mxu1 %vm422_vm2, %v14991_v27  ;;  %19705 = vmatprep.subr.mxu1 %v20569_v8 }
0x46e4   :  { %19706 = vmatpush3.msra.mxu1 %v15223_v24  ;;  %19707 = vmatprep.mubr.msk.f32.mxu1 %vm20568_vm0, %v20569_v8 }
0x46e5   :  { %19715 = vmatprep.subr.mxu1 %v20569_v8 }
0x46e8   :  { %v20534_v44 = vpop.eup %20533 }
0x46e9   :  { %v14993_v17 = vmul.f32 %v20534_v44, %v20526_v5 }
0x46eb   :  { %19708 = vmatmul.mubr.msk.f32.vlgmr.msra.gmra.mrb[180].mxu1 %vm422_vm2, %v14993_v17 }
0x46ec   :  { %19717 = vmatprep.mubr.msk.f32.mxu1 %vm20568_vm0, %v20569_v8  ;;  %19716 = vmatpush3.msra.mxu1 %v23333_v22 }
0x46ed   :  { %19725 = vmatprep.subr.mxu1 %v20569_v8 }
0x4712   :  { %v14231_v37 = vpop.xlane.xlu0 %14230 }
0x4713   :  { %v14233_v43 = vmul.f32 0.03125, %v14231_v37 }
0x4715   :  { %v14235_v35 = vsub.f32 %v14225_v47, %v14233_v43  ;;  %v17777_v43 = vld [vmem:[%s23621_s1 + $0x30] sm:$0xff] }
0x4717   :  { %v14237_v41 = vmul.f32 %v14235_v35, %v14235_v35 }
0x4719   :  { %v14241_v7 = vsel %vm127_vm1, %v14237_v41, 0.0  ;;  %v17776_v41 = vld [vmem:[%s23621_s1 + $0x28] sm:$0xff] }
0x471a   :  { %14242 = vadd.xlane.f32.xlu1 %v14241_v7 }
0x47a7   :  { %v14243_v10 = vpop.xlane.xlu1 %14242 }
0x47a8   :  { %v14245_v32 = vmul.f32 0.03125, %v14243_v10 }
0x47aa   :  { %v14247_v28 = vadd.f32 1e-05, %v14245_v32 }
0x47ac   :  { %20535 = vrsqrt.f32 %v14247_v28 }
0x47ae   :  { %v15066_v55 = vpop.f32.mrb[178].mxu0 }
0x47af   :  { %v19694_v21 = vpop.f32.mrb[179].mxu0  ;;  %19713 = vmatmul.mubr.msk.f32.vlgmr.msra.gmra.mrb[182].mxu0 %vm422_vm2, %v15066_v55 }
0x47b0   :  { %19721 = vmatpush3.msra.mxu0 %v23340_v11  ;;  %19722 = vmatprep.mubr.msk.f32.mxu0 %vm20568_vm0, %v20569_v8 }
0x47b1   :  { %20259 = vmatprep.subr.bf16.mxu0 %v20567_v0 }
0x47b2   :  { %v15218_v4 = vpop.f32.mrb[180].mxu0 }
0x47b3   :  { %v19704_v2 = vpop.f32.mrb[181].mxu0  ;;  %19723 = vmatmul.mubr.msk.f32.vlgmr.msra.gmra.mrb[184].mxu0 %vm422_vm2, %v15218_v4 }
0x47b4   :  { %20261 = vmatpush3.bf16.msra.mxu0 %v23107_v3  ;;  %19738 = vmatprep.mubr.msk.f32.mxu0 %vm20568_vm0, %v20569_v8  ;;  %v17778_v2 = vld [vmem:[%s23621_s1 + $0x38] sm:$0xff] }
0x47b5   :  { %20262 = vmatprep.subr.bf16.mxu0 %v20567_v0 }
0x47b6   :  { %v20536_v29 = vpop.eup %20535  ;;  %v15142_v31 = vpop.f32.mrb[178].mxu1 }
0x47b7   :  { %v14251_v56 = vmul.f32 %v20536_v29, %v14235_v35  ;;  %v19699_v25 = vpop.f32.mrb[179].mxu1  ;;  %19718 = vmatmul.mubr.msk.f32.vlgmr.msra.gmra.mrb[182].mxu1 %vm422_vm2, %v15142_v31 }
0x47b8   :  { %20264 = vmatpush3.bf16.msra.mxu0 %v23126_v13  ;;  %19726 = vmatpush3.msra.mxu1 %v23355_v46 }
0x47b9   :  { %20271 = vmatprep.subr.bf16.mxu0 %v20567_v0  ;;  %v14259_v3 = vmul.f32 %v23144_v1, %v14251_v56  ;;  %19727 = vmatprep.mubr.msk.f32.mxu1 %vm20568_vm0, %v20569_v8  ;;  %v23402_v1 = vld [vmem:[%s23623_s6 + $0x5] ss:$0 sm:$0xff] }
0x47ba   :  { %20265 = vmatprep.subr.bf16.mxu1 %v20567_v0 }
0x47bb   :  { %v23366_v34 = vadd.f32 %v23155_v16, %v14259_v3 }
0x47bd   :  { %19739 = vmatmul.mubr.msk.f32.vlgmr.msra.gmra.mrb[186].mxu0 %vm127_vm1, %v23366_v34 }
0x47be   :  { %20273 = vmatpush3.bf16.msra.mxu0 %v23115_v14  ;;  %v15294_v13 = vpop.f32.mrb[180].mxu1  ;;  %19760 = vmatprep.mubr.msk.f32.mxu0 %vm20568_vm0, %v20569_v8 }
0x47bf   :  { %v19709_v19 = vpop.f32.mrb[181].mxu1  ;;  %19728 = vmatmul.mubr.msk.f32.vlgmr.msra.gmra.mrb[184].mxu1 %vm422_vm2, %v15294_v13  ;;  %20274 = vmatprep.subr.bf16.mxu0 %v20567_v0 }
0x47c0   :  { %20267 = vmatpush3.bf16.msra.mxu1 %v23158_v54  ;;  %19749 = vmatprep.mubr.msk.f32.mxu1 %vm20568_vm0, %v20569_v8 }
0x47c1   :  { %20268 = vmatprep.subr.bf16.mxu1 %v20567_v0 }
0x47c2   :  { %20276 = vmatpush3.bf16.msra.mxu0 %v23135_v12 }
0x47c3   :  { %19774 = vmatprep.subr.mxu0 %v20569_v8 }
0x47c4   :  { %20270 = vmatpush3.bf16.msra.mxu1 %v23174_v26 }
0x47c5   :  { %19761 = vmatmul.mubr.msk.f32.vlgmr.msra.gmra.mrb[188].mxu0 %vm127_vm1, %v23366_v34  ;;  %20277 = vmatprep.subr.bf16.mxu1 %v20567_v0 }
0x47c6   :  { %19776 = vmatprep.mubr.msk.f32.mxu0 %vm20568_vm0, %v20569_v8 }
0x47c7   :  { %19750 = vmatmul.mubr.msk.f32.vlgmr.msra.gmra.mrb[186].mxu1 %vm127_vm1, %v23366_v34 }
0x47c8   :  { %20279 = vmatpush3.bf16.msra.mxu1 %v23188_v63  ;;  %19771 = vmatprep.mubr.msk.f32.mxu1 %vm20568_vm0, %v20569_v8 }
0x47c9   :  { %20280 = vmatprep.subr.bf16.mxu1 %v20567_v0 }
0x47cc   :  { %20282 = vmatpush3.bf16.msra.mxu1 %v23200_v30 }
0x47cd   :  { %19779 = vmatprep.subr.mxu1 %v20569_v8 }
0x47cf   :  { %19772 = vmatmul.mubr.msk.f32.vlgmr.msra.gmra.mrb[188].mxu1 %vm127_vm1, %v23366_v34 }
0x47d0   :  { %19781 = vmatprep.mubr.msk.f32.mxu1 %vm20568_vm0, %v20569_v8 }
0x4882   :  { %v15367_v14 = vpop.f32.mrb[182].mxu0 }
0x4883   :  { %v19714_v12 = vpop.f32.mrb[183].mxu0  ;;  %v15377_v26 = vadd.f32 %v23402_v1, %v15367_v14 }
0x4886   :  { %v15521_v16 = vpop.f32.mrb[184].mxu0 }
0x4887   :  { %v19724_v54 = vpop.f32.mrb[185].mxu0 }
0x488a   :  { %v15447_v63 = vpop.f32.mrb[182].mxu1 }
0x488b   :  { %v15451_v30 = vadd.f32 %v15447_v63, %v15377_v26  ;;  %v19719_v52 = vpop.f32.mrb[183].mxu1 }
0x488d   :  { %v15525_v57 = vadd.f32 %v15521_v16, %v15451_v30 }
0x4890   :  { %v15669_v15 = vpop.f32.mrb[186].mxu0 }
0x4891   :  { %v23406_v42 = vadd.f32 %v23214_v40, %v15669_v15  ;;  %v19740_v39 = vpop.f32.mrb[187].mxu0 }
0x4892   :  { %v15595_v53 = vpop.f32.mrb[184].mxu1 }
0x4893   :  { %v23408_v5 = vadd.f32 %v15595_v53, %v15525_v57  ;;  %v19729_v48 = vpop.f32.mrb[185].mxu1  ;;  %15892 = vrot.lane.b32.xlu0 %v23406_v42, %s20570_s21 }
0x4898   :  { %v15809_v47 = vpop.f32.mrb[188].mxu0 }
0x4899   :  { %v23413_v33 = vadd.f32 %v23222_v6, %v15809_v47  ;;  %v19762_v45 = vpop.f32.mrb[189].mxu0 }
0x489a   :  { %v15739_v61 = vpop.f32.mrb[186].mxu1 }
0x489b   :  { %v23416_v9 = vadd.f32 %v23232_v62, %v15739_v61  ;;  %v19751_v50 = vpop.f32.mrb[187].mxu1  ;;  %16048 = vrot.lane.b32.xlu0 %v23413_v33, %s20570_s21  ;;  %v15883_v62 = vmul.f32 0.35355338, %v23406_v42 }
0x489d   :  { %15970 = vrot.lane.b32.xlu1 %v23416_v9, %s20570_s21  ;;  %v15884_v58 = vmul.f32 0.35355338, %v23416_v9 }
0x48a2   :  { %v15879_v40 = vpop.f32.mrb[188].mxu1 }
0x48a3   :  { %v23423_v51 = vadd.f32 %v23244_v18, %v15879_v40  ;;  %v19773_v36 = vpop.f32.mrb[189].mxu1  ;;  %v15885_v18 = vmul.f32 0.35355338, %v23413_v33  ;;  %v16847_v40 = vadd.f32 %v23408_v5, %v23161_v60 }
0x48a5   :  { %16126 = vrot.lane.b32.xlu1 %v23423_v51, %s20570_s21  ;;  %v15886_v27 = vmul.f32 0.35355338, %v23423_v51  ;;  %v16849_v36 = vsel %vm127_vm1, %v16847_v40, 0.0 }
0x4905   :  { %v15893_v6 = vpop.permute.xlu0 %15892 }
0x4906   :  { %19775 = vmatpush3.xpose.msk.msra.mxu0 %vm422_vm2, %v15893_v6 }
0x4907   :  { %19784 = vmatprep.subr.mxu0 %v20569_v8 }
0x4909   :  { %19777 = vmatmul.mubr.msk.f32.vlgmr.msra.gmra.mrb[190].mxu0 %vm422_vm2, %v15883_v62 }
0x490a   :  { %19786 = vmatprep.mubr.msk.f32.mxu0 %vm20568_vm0, %v20569_v8 }
0x490d   :  { %v16049_v59 = vpop.permute.xlu0 %16048 }
0x490e   :  { %19785 = vmatpush3.xpose.msk.msra.mxu0 %vm422_vm2, %v16049_v59 }
0x490f   :  { %v15971_v38 = vpop.permute.xlu1 %15970  ;;  %19794 = vmatprep.subr.mxu0 %v20569_v8 }
0x4910   :  { %19780 = vmatpush3.xpose.msk.msra.mxu1 %vm422_vm2, %v15971_v38 }
0x4911   :  { %19787 = vmatmul.mubr.msk.f32.vlgmr.msra.gmra.mrb[192].mxu0 %vm422_vm2, %v15885_v18  ;;  %19789 = vmatprep.subr.mxu1 %v20569_v8 }
0x4912   :  { %19796 = vmatprep.mubr.msk.f32.mxu0 %vm20568_vm0, %v20569_v8 }
0x4913   :  { %19782 = vmatmul.mubr.msk.f32.vlgmr.msra.gmra.mrb[190].mxu1 %vm422_vm2, %v15884_v58 }
0x4914   :  { %19791 = vmatprep.mubr.msk.f32.mxu1 %vm20568_vm0, %v20569_v8 }
0x4917   :  { %v16127_v20 = vpop.permute.xlu1 %16126 }
0x4918   :  { %19790 = vmatpush3.xpose.msk.msra.mxu1 %vm422_vm2, %v16127_v20 }
0x4919   :  { %19799 = vmatprep.subr.mxu1 %v20569_v8 }
0x491b   :  { %19792 = vmatmul.mubr.msk.f32.vlgmr.msra.gmra.mrb[192].mxu1 %vm422_vm2, %v15886_v27 }
0x491c   :  { %19801 = vmatprep.mubr.msk.f32.mxu1 %vm20568_vm0, %v20569_v8 }
0x49dc   :  { %v15965_v24 = vpop.f32.mrb[190].mxu0 }
0x49dd   :  { %v15966_v44 = vadd.f32 %v17775_v49, %v15965_v24  ;;  %v19778_v17 = vpop.f32.mrb[191].mxu0 }
0x49df   :  { %v16203_v37 = vsel %vm422_vm2, %v15966_v44, -inf }
0x49e0   :  { %16204 = vmax.xlane.f32.xlu0 %v16203_v37 }
0x49e4   :  { %v16121_v35 = vpop.f32.mrb[192].mxu0 }
0x49e5   :  { %v16122_v7 = vadd.f32 %v17777_v43, %v16121_v35  ;;  %v19788_v10 = vpop.f32.mrb[193].mxu0 }
0x49e6   :  { %v16043_v32 = vpop.f32.mrb[190].mxu1 }
0x49e7   :  { %v16044_v28 = vadd.f32 %v17776_v41, %v16043_v32  ;;  %v19783_v55 = vpop.f32.mrb[191].mxu1  ;;  %v16209_v21 = vsel %vm422_vm2, %v16122_v7, -inf }
0x49e8   :  { %16210 = vmax.xlane.f32.xlu0 %v16209_v21 }
0x49e9   :  { %v16206_v4 = vsel %vm422_vm2, %v16044_v28, -inf }
0x49ea   :  { %16207 = vmax.xlane.f32.xlu1 %v16206_v4  ;;  %v23511_v4 = vld [vmem:[%s23624_s11 + $0x5] ss:$0 sm:$0xff] }
0x49ee   :  { %v16199_v29 = vpop.f32.mrb[192].mxu1 }
0x49ef   :  { %v16200_v31 = vadd.f32 %v17778_v2, %v16199_v29  ;;  %v19793_v56 = vpop.f32.mrb[193].mxu1 }
0x49f1   :  { %v16212_v25 = vsel %vm422_vm2, %v16200_v31, -inf }
0x49f2   :  { %16213 = vmax.xlane.f32.xlu0 %v16212_v25 }
0x49fb   :  { %16247 = vrot.lane.b32.xlu1 %v23406_v42, %s20571_s23 }
0x4a6d   :  { %v16205_v3 = vpop.xlane.xlu0 %16204 }
0x4a6e   :  { %v16215_v13 = vsub.f32 %v15966_v44, %v16205_v3 }
0x4a70   :  { %v16219_v19 = vmul.f32 1.442695, %v16215_v13 }
0x4a72   :  { %20537 = vpow2.f32 %v16219_v19 }
0x4a75   :  { %v16211_v14 = vpop.xlane.xlu0 %16210 }
0x4a76   :  { %v16217_v12 = vsub.f32 %v16122_v7, %v16211_v14 }
0x4a77   :  { %v16208_v16 = vpop.xlane.xlu1 %16207 }
0x4a78   :  { %v16223_v54 = vmul.f32 1.442695, %v16217_v12  ;;  %v16216_v26 = vsub.f32 %v16044_v28, %v16208_v16 }
0x4a7a   :  { %20539 = vpow2.f32 %v16223_v54  ;;  %v16221_v63 = vmul.f32 1.442695, %v16216_v26 }
0x4a7b   :  { %v16248_v30 = vpop.permute.xlu1 %16247 }
0x4a7c   :  { %v20538_v52 = vpop.eup %20537  ;;  %20541 = vpow2.f32 %v16221_v63  ;;  %19795 = vmatpush3.msra.mxu0 %v16248_v30 }
0x4a7d   :  { %v16227_v57 = vsel %vm422_vm2, %v20538_v52, 0.0  ;;  %19804 = vmatprep.subr.mxu0 %v20569_v8 }
0x4a7e   :  { %16228 = vadd.xlane.f32.xlu1 %v16227_v57 }
0x4a7f   :  { %v16214_v15 = vpop.xlane.xlu0 %16213 }
0x4a80   :  { %v16218_v42 = vsub.f32 %v16200_v31, %v16214_v15 }
0x4a82   :  { %v16225_v39 = vmul.f32 1.442695, %v16218_v42 }
0x4a84   :  { %v20540_v53 = vpop.eup %20539  ;;  %20543 = vpow2.f32 %v16225_v39 }
0x4a85   :  { %v16233_v48 = vsel %vm422_vm2, %v20540_v53, 0.0 }
0x4a86   :  { %v20542_v47 = vpop.eup %20541  ;;  %16234 = vadd.xlane.f32.xlu1 %v16233_v48 }
0x4a87   :  { %v16230_v45 = vsel %vm422_vm2, %v20542_v47, 0.0 }
0x4a88   :  { %16231 = vadd.xlane.f32.xlu0 %v16230_v45 }
0x4a8e   :  { %v20544_v61 = vpop.eup %20543 }
0x4a8f   :  { %v16236_v50 = vsel %vm422_vm2, %v20544_v61, 0.0 }
0x4a90   :  { %16237 = vadd.xlane.f32.xlu0 %v16236_v50 }
0x4a97   :  { %16399 = vrot.lane.b32.xlu1 %v23413_v33, %s20571_s23 }
0x4a9b   :  { %16475 = vrot.lane.b32.xlu1 %v23423_v51, %s20571_s23 }
0x4aa6   :  { %16323 = vrot.lane.b32.xlu0 %v23416_v9, %s20571_s23 }
0x4ac5   :  { %16850 = vadd.xlane.f32.xlu0 %v16849_v36 }
0x4b0b   :  { %v16229_v6 = vpop.xlane.xlu1 %16228 }
0x4b0c   :  { %20545 = vrcp.f32 %v16229_v6  ;;  %v17733_v6 = vld [vmem:[%s23627_s9 + $0x140] sm:$0xff] }
0x4b13   :  { %v16235_v62 = vpop.xlane.xlu1 %16234 }
0x4b14   :  { %20547 = vrcp.f32 %v16235_v62  ;;  %v17734_v62 = vld [vmem:[%s23627_s9 + $0x148] sm:$0xff] }
0x4b15   :  { %v16232_v59 = vpop.xlane.xlu0 %16231 }
0x4b16   :  { %v20546_v18 = vpop.eup %20545  ;;  %20549 = vrcp.f32 %v16232_v59  ;;  %v17735_v59 = vld [vmem:[%s23627_s9 + $0x150] sm:$0xff] }
0x4b17   :  { %v16243_v33 = vmul.f32 %v20546_v18, %v20538_v52  ;;  %v16400_v38 = vpop.permute.xlu1 %16399  ;;  %v20291_v18 = vpack.c.bf16 %v17734_v62, %v17733_v6  ;;  %v17804_v62 = vld [vmem:[%s23631_s14 + $0x5] ss:$0 sm:$0xff] }
0x4b19   :  { %19797 = vmatmul.mubr.msk.f32.vlgmr.msra.gmra.mrb[194].mxu0 %vm422_vm2, %v16243_v33  ;;  %v17736_v33 = vld [vmem:[%s23627_s9 + $0x158] sm:$0xff] }
0x4b1a   :  { %19805 = vmatpush3.msra.mxu0 %v16400_v38  ;;  %19806 = vmatprep.mubr.msk.f32.mxu0 %vm20568_vm0, %v20569_v8  ;;  %v20295_v38 = vpack.c.bf16 %v17736_v33, %v17735_v59 }
0x4b1b   :  { %19814 = vmatprep.subr.mxu0 %v20569_v8  ;;  %v16476_v27 = vpop.permute.xlu1 %16475 }
0x4b1d   :  { %v16238_v60 = vpop.xlane.xlu0 %16237 }
0x4b1e   :  { %v20548_v5 = vpop.eup %20547  ;;  %20551 = vrcp.f32 %v16238_v60  ;;  %v17737_v60 = vld [vmem:[%s23627_s9 + $0x160] sm:$0xff] }
0x4b1f   :  { %v16245_v9 = vmul.f32 %v20548_v5, %v20540_v53  ;;  %v17738_v5 = vld [vmem:[%s23627_s9 + $0x168] sm:$0xff] }
0x4b20   :  { %v20550_v51 = vpop.eup %20549 }
0x4b21   :  { %v16244_v58 = vmul.f32 %v20550_v51, %v20542_v47  ;;  %19807 = vmatmul.mubr.msk.f32.vlgmr.msra.gmra.mrb[196].mxu0 %vm422_vm2, %v16245_v9  ;;  %v16324_v20 = vpop.permute.xlu0 %16323  ;;  %v20299_v9 = vpack.c.bf16 %v17738_v5, %v17737_v60 }
0x4b22   :  { %19800 = vmatpush3.msra.mxu1 %v16324_v20  ;;  %19815 = vmatpush3.msra.mxu0 %v23326_v23 }
0x4b23   :  { %19802 = vmatmul.mubr.msk.f32.vlgmr.msra.gmra.mrb[194].mxu1 %vm422_vm2, %v16244_v58  ;;  %19809 = vmatprep.subr.mxu1 %v20569_v8 }
0x4b24   :  { %19810 = vmatpush3.msra.mxu1 %v16476_v27  ;;  %19811 = vmatprep.mubr.msk.f32.mxu1 %vm20568_vm0, %v20569_v8 }
0x4b25   :  { %19816 = vmatprep.mubr.msk.f32.mxu0 %vm20568_vm0, %v20569_v8  ;;  %19824 = vmatprep.subr.mxu0 %v20569_v8 }
0x4b26   :  { %19819 = vmatprep.subr.mxu1 %v20569_v8 }
0x4b28   :  { %v20552_v49 = vpop.eup %20551 }
0x4b29   :  { %v16246_v24 = vmul.f32 %v20552_v49, %v20544_v61  ;;  %v17729_v61 = vld [vmem:[%s23626_s7 + $0xa8] sm:$0xff] }
0x4b2b   :  { %19812 = vmatmul.mubr.msk.f32.vlgmr.msra.gmra.mrb[196].mxu1 %vm422_vm2, %v16246_v24 }
0x4b2c   :  { %19820 = vmatpush3.msra.mxu1 %v23333_v22  ;;  %19821 = vmatprep.mubr.msk.f32.mxu1 %vm20568_vm0, %v20569_v8 }
0x4b2d   :  { %19829 = vmatprep.subr.mxu1 %v20569_v8 }
0x4b52   :  { %v16851_v23 = vpop.xlane.xlu0 %16850 }
0x4b53   :  { %v16855_v44 = vmul.f32 0.03125, %v16851_v23 }
0x4b55   :  { %v16857_v17 = vsub.f32 %v16847_v40, %v16855_v44  ;;  %v17731_v40 = vld [vmem:[%s23626_s7 + $0xb8] sm:$0xff]  ;;  %v17739_v44 = vld [vmem:[%s23627_s9 + $0x170] sm:$0xff] }
0x4b57   :  { %v16859_v37 = vmul.f32 %v16857_v17, %v16857_v17 }
0x4b59   :  { %v16861_v43 = vsel %vm127_vm1, %v16859_v37, 0.0 }
0x4b5a   :  { %16862 = vadd.xlane.f32.xlu0 %v16861_v43  ;;  %v17797_v43 = vld [vmem:[%s23628_s8 + $0x5] ss:$0 sm:$0xff] }
0x4be7   :  { %v16863_v35 = vpop.xlane.xlu0 %16862 }
0x4be8   :  { %v16867_v41 = vmul.f32 0.03125, %v16863_v35 }
0x4bea   :  { %v16869_v7 = vadd.f32 1e-05, %v16867_v41 }
0x4bec   :  { %20553 = vrsqrt.f32 %v16869_v7  ;;  %v16319_v10 = vpop.f32.mrb[194].mxu0 }
0x4bed   :  { %v19798_v32 = vpop.f32.mrb[195].mxu0  ;;  %19817 = vmatmul.mubr.msk.f32.vlgmr.msra.gmra.mrb[198].mxu0 %vm422_vm2, %v16319_v10 }
0x4bee   :  { %19825 = vmatpush3.msra.mxu0 %v23340_v11  ;;  %19826 = vmatprep.mubr.msk.f32.mxu0 %vm20568_vm0, %v20569_v8  ;;  %v17796_v11 = vld [vmem:[%s23625_s12 + $0x5] ss:$0 sm:$0xff] }
0x4bf4   :  { %v16471_v22 = vpop.f32.mrb[196].mxu0 }
0x4bf5   :  { %v19808_v28 = vpop.f32.mrb[197].mxu0  ;;  %19827 = vmatmul.mubr.msk.f32.vlgmr.msra.gmra.mrb[200].mxu0 %vm422_vm2, %v16471_v22  ;;  %v17800_v22 = vld [vmem:[%s23629_s10 + $0x5] ss:$0 sm:$0xff] }
0x4bf6   :  { %v20554_v55 = vpop.eup %20553  ;;  %v16395_v21 = vpop.f32.mrb[194].mxu1 }
0x4bf7   :  { %v19803_v2 = vpop.f32.mrb[195].mxu1  ;;  %19822 = vmatmul.mubr.msk.f32.vlgmr.msra.gmra.mrb[198].mxu1 %vm422_vm2, %v16395_v21  ;;  %v16873_v29 = vmul.f32 %v20554_v55, %v16857_v17  ;;  %v17740_v17 = vld [vmem:[%s23627_s9 + $0x178] sm:$0xff] }
0x4bf8   :  { %19830 = vmatpush3.msra.mxu1 %v23355_v46  ;;  %19831 = vmatprep.mubr.msk.f32.mxu1 %vm20568_vm0, %v20569_v8  ;;  %v20303_v37 = vpack.c.bf16 %v17740_v17, %v17739_v44 }
0x4bf9   :  { %v16881_v31 = vmul.f32 %v23511_v4, %v16873_v29  ;;  %20292 = vmatprep.subr.bf16.mxu1 %v20291_v18 }
0x4bfb   :  { %v23521_v56 = vadd.f32 %v17796_v11, %v16881_v31 }
0x4bfd   :  { %19842 = vmatprep.mubr.msk.f32.mxu0 %vm127_vm1, %v23521_v56 }
0x4bfe   :  { %v16547_v25 = vpop.f32.mrb[196].mxu1 }
0x4bff   :  { %v19813_v3 = vpop.f32.mrb[197].mxu1  ;;  %19832 = vmatmul.mubr.msk.f32.vlgmr.msra.gmra.mrb[200].mxu1 %vm422_vm2, %v16547_v25  ;;  %v20572_v25 = vmov 0  }
0x4c00   :  { %20294 = vmatpush3.bf16.msra.mxu1 %v20291_v18  ;;  %20320 = vset.pattern.permute.xlu0 %v20572_v25 }
0x4c01   :  { %20296 = vmatprep.subr.bf16.mxu1 %v20295_v38  ;;  %20319 = vset.pattern.permute.xlu1 %v20572_v25 }
0x4c04   :  { %20298 = vmatpush3.bf16.msra.mxu1 %v20295_v38 }
0x4c05   :  { %20300 = vmatprep.subr.bf16.mxu1 %v20299_v9 }
0x4c08   :  { %20302 = vmatpush3.bf16.msra.mxu1 %v20299_v9 }
0x4c09   :  { %20304 = vmatprep.subr.bf16.mxu1 %v20303_v37 }
0x4c0c   :  { %20306 = vmatpush3.bf16.msra.mxu1 %v20303_v37 }
0x4cc0   :  { %v16620_v13 = vpop.f32.mrb[198].mxu0 }
0x4cc1   :  { %v19818_v46 = vpop.f32.mrb[199].mxu0  ;;  %v16624_v14 = vadd.f32 %v23402_v1, %v16620_v13  ;;  %v17728_v1 = vld [vmem:[%s23626_s7 + $0xa0] sm:$0xff] }
0x4cc2   :  { %v20283_v50 = vpack.c.bf16 %v17729_v61, %v17728_v1 }
0x4cc4   :  { %20284 = vmatprep.subr.bf16.mxu0 %v20283_v50 }
0x4cc5   :  { %20286 = vmatpush3.bf16.msra.mxu0 %v20283_v50 }
0x4cc8   :  { %v16768_v19 = vpop.f32.mrb[200].mxu0 }
0x4cc9   :  { %v19828_v12 = vpop.f32.mrb[201].mxu0 }
0x4cca   :  { %v16694_v16 = vpop.f32.mrb[198].mxu1 }
0x4ccb   :  { %v16698_v54 = vadd.f32 %v16694_v16, %v16624_v14  ;;  %v19823_v26 = vpop.f32.mrb[199].mxu1 }
0x4ccd   :  { %v16772_v63 = vadd.f32 %v16768_v19, %v16698_v54 }
0x4cd2   :  { %v16842_v30 = vpop.f32.mrb[200].mxu1 }
0x4cd3   :  { %v16846_v52 = vadd.f32 %v16842_v30, %v16772_v63  ;;  %v19833_v57 = vpop.f32.mrb[201].mxu1  ;;  %v17111_v63 = vld [vmem:[%s23632_s2] sm:$0xff]  ;;  %v17112_v30 = vld [vmem:[%s23632_s2 + $0x8] sm:$0xff] }
0x4cd4   :  { %v17142_v57 = vld [vmem:[%s23633_s15 + $0x8] sm:$0xff] }
0x4cd5   :  { %v16848_v15 = vadd.f32 %v16846_v52, %v23366_v34  ;;  %v17730_v34 = vld [vmem:[%s23626_s7 + $0xb0] sm:$0xff]  ;;  %v17141_v52 = vld [vmem:[%s23633_s15] sm:$0xff] }
0x4cd6   :  { %v20287_v36 = vpack.c.bf16 %v17731_v40, %v17730_v34  ;;  %v17803_v40 = vld [vmem:[%s23630_s13 + $0x5] ss:$0 sm:$0xff] }
0x4cd7   :  { %v16852_v42 = vsel %vm127_vm1, %v16848_v15, 0.0 }
0x4cd8   :  { %16853 = vadd.xlane.f32.xlu1 %v16852_v42  ;;  %20288 = vmatprep.subr.bf16.mxu0 %v20287_v36  ;;  %v17143_v42 = vld [vmem:[%s23633_s15 + $0x10] sm:$0xff] }
0x4cd9   :  { %20290 = vmatpush3.bf16.msra.mxu0 %v20287_v36 }
0x4cda   :  { %20307 = vmatprep.subr.bf16.mxu0 %v20567_v0 }
0x4d65   :  { %v16854_v39 = vpop.xlane.xlu1 %16853 }
0x4d66   :  { %v16856_v53 = vmul.f32 0.03125, %v16854_v39  ;;  %v17144_v39 = vld [vmem:[%s23633_s15 + $0x18] sm:$0xff] }
0x4d68   :  { %v16858_v48 = vsub.f32 %v16848_v15, %v16856_v53  ;;  %v20308_v15 = vpack.c.bf16 %v17142_v57, %v17141_v52  ;;  %v20311_v53 = vpack.c.bf16 %v17144_v39, %v17143_v42 }
0x4d6a   :  { %v16860_v47 = vmul.f32 %v16858_v48, %v16858_v48 }
0x4d6c   :  { %v16864_v45 = vsel %vm127_vm1, %v16860_v47, 0.0 }
0x4d6d   :  { %16865 = vadd.xlane.f32.xlu0 %v16864_v45 }
0x4dfa   :  { %v16866_v51 = vpop.xlane.xlu0 %16865 }
0x4dfb   :  { %v16868_v58 = vmul.f32 0.03125, %v16866_v51 }
0x4dfd   :  { %v16870_v20 = vadd.f32 1e-05, %v16868_v58 }
0x4dff   :  { %20555 = vrsqrt.f32 %v16870_v20 }
0x4e09   :  { %v20556_v27 = vpop.eup %20555 }
0x4e0a   :  { %v16874_v49 = vmul.f32 %v20556_v27, %v16858_v48  ;;  %v22_v48 = vstv %s23634_s16 }
0x4e0b   :  { %23 = vst [vmem:[#allocation2] sm:$0x1] %v22_v48 }
0x4e0c   :  { %v16882_v24 = vmul.f32 %v23511_v4, %v16874_v49 }
0x4e0e   :  { %v16890_v23 = vadd.f32 %v17796_v11, %v16882_v24 }
0x4e10   :  { %19843 = vmatmul.mubr.msk.f32.vlgmr.msra.gmra.mrb[202].mxu0 %vm127_vm1, %v16890_v23 }
0x4e11   :  { %19872 = vmatprep.mubr.msk.f32.mxu0 %vm20568_vm0, %v20569_v8  ;;  %20309 = vmatpush3.bf16.msra.mxu0 %v20308_v15 }
0x4e12   :  { %20310 = vmatprep.subr.bf16.mxu0 %v20567_v0 }
0x4e15   :  { %20312 = vmatpush3.bf16.msra.mxu0 %v20311_v53 }
0x4ee3   :  { %v19844_v35 = vpop.f32.mrb[202].mxu0 }
0x4ee4   :  { %v16975_v41 = vadd.f32 %v19844_v35, %v17797_v43  ;;  %v16969_v7 = vpop.f32.mrb[203].mxu0 }
0x4ee5   :  { %v16970_v10 = vadd.f32 %v17797_v43, %v16969_v7 }
0x4ee6   :  { %v16979_v32 = vmax.f32 %v16975_v41, 0.0 }
0x4ee7   :  { %v16978_v8 = vmax.f32 %v16970_v10, 0.0 }
0x4ee9   :  { %19861 = vmatprep.mubr.msk.f32.mxu1 %vm2770_vm3, %v16978_v8 }
0x4eea   :  { %19862 = vmatmul.mubr.msk.f32.vlgmr.msra.gmra.mrb[202].mxu1 %vm2770_vm3, %v16979_v32 }
0x4fbd   :  { %v19863_v28 = vpop.f32.mrb[202].mxu1 }
0x4fbe   :  { %v17064_v55 = vadd.f32 %v19863_v28, %v17800_v22  ;;  %v17058_v21 = vpop.f32.mrb[203].mxu1 }
0x4fbf   :  { %v17059_v4 = vadd.f32 %v17800_v22, %v17058_v21  ;;  %v17805_v22 = vld [vmem:[#allocation2] ss:$0 sm:$0xff] }
0x4fc0   :  { %v17068_v2 = vadd.f32 %v17064_v55, %v16890_v23 }
0x4fc1   :  { %v17067_v29 = vadd.f32 %v17059_v4, %v23521_v56 }
0x4fc2   :  { %v17072_v11 = vsel %vm127_vm1, %v17068_v2, 0.0 }
0x4fc3   :  { %17073 = vadd.xlane.f32.xlu0 %v17072_v11  ;;  %v17069_v31 = vsel %vm127_vm1, %v17067_v29, 0.0 }
0x4fc4   :  { %17070 = vadd.xlane.f32.xlu1 %v17069_v31 }
0x5050   :  { %v17074_v3 = vpop.xlane.xlu0 %17073 }
0x5051   :  { %v17076_v13 = vmul.f32 0.03125, %v17074_v3  ;;  %v17071_v46 = vpop.xlane.xlu1 %17070 }
0x5052   :  { %v17075_v19 = vmul.f32 0.03125, %v17071_v46 }
0x5053   :  { %v17078_v14 = vsub.f32 %v17068_v2, %v17076_v13 }
0x5054   :  { %v17077_v12 = vsub.f32 %v17067_v29, %v17075_v19 }
0x5055   :  { %v17080_v16 = vmul.f32 %v17078_v14, %v17078_v14 }
0x5056   :  { %v17079_v54 = vmul.f32 %v17077_v12, %v17077_v12 }
0x5057   :  { %v17084_v26 = vsel %vm127_vm1, %v17080_v16, 0.0 }
0x5058   :  { %17085 = vadd.xlane.f32.xlu0 %v17084_v26  ;;  %v17081_v56 = vsel %vm127_vm1, %v17079_v54, 0.0 }
0x5059   :  { %17082 = vadd.xlane.f32.xlu1 %v17081_v56 }
0x506a   :  { %17115 = vperm.xlu1 %20319, %v17111_v63  }
0x506e   :  { %17120 = vperm.xlu0 %20320, %v17112_v30  }
0x50e5   :  { %v17086_v47 = vpop.xlane.xlu0 %17085 }
0x50e6   :  { %v17088_v45 = vmul.f32 0.03125, %v17086_v47  ;;  %v17083_v1 = vpop.xlane.xlu1 %17082 }
0x50e7   :  { %v17087_v61 = vmul.f32 0.03125, %v17083_v1 }
0x50e8   :  { %v17090_v0 = vadd.f32 1e-05, %v17088_v45 }
0x50e9   :  { %v17089_v50 = vadd.f32 1e-05, %v17087_v61 }
0x50ea   :  { %20557 = vrsqrt.f32 %v17090_v0  ;;  %v17116_v5 = vpop.permute.xlu1 %17115 }
0x50eb   :  { %20559 = vrsqrt.f32 %v17089_v50 }
0x50ed   :  { %v17121_v33 = vpop.permute.xlu0 %17120 }
0x50f4   :  { %v20558_v34 = vpop.eup %20557 }
0x50f5   :  { %v20560_v36 = vpop.eup %20559  ;;  %v17094_v6 = vmul.f32 %v20558_v34, %v17078_v14 }
0x50f6   :  { %v17093_v59 = vmul.f32 %v20560_v36, %v17077_v12 }
0x50f7   :  { %v17102_v18 = vmul.f32 %v17803_v40, %v17094_v6 }
0x50f8   :  { %v17101_v38 = vmul.f32 %v17803_v40, %v17093_v59 }
0x50f9   :  { %v17110_v60 = vadd.f32 %v17804_v62, %v17102_v18 }
0x50fa   :  { %v17109_v9 = vadd.f32 %v17804_v62, %v17101_v38 }
0x50fb   :  { %v17124_v51 = vmul.f32 %v17121_v33, %v17110_v60 }
0x50fc   :  { %v17123_v58 = vmul.f32 %v17116_v5, %v17109_v9 }
0x50fd   :  { %v17132_v20 = vsel %vm127_vm1, %v17124_v51, 0.0 }
0x50fe   :  { %v17133_v27 = vrot.slane %v17132_v20, 4  ;;  %v17125_v49 = vsel %vm127_vm1, %v17123_v58, 0.0 }
0x50ff   :  { %v17126_v24 = vrot.slane %v17125_v49, 4 }
0x5100   :  { %v17134_v23 = vadd.f32 %v17133_v27, %v17132_v20 }
0x5101   :  { %v17127_v44 = vadd.f32 %v17126_v24, %v17125_v49 }
0x5102   :  { %v17135_v17 = vrot.slane %v17134_v23, 2 }
0x5103   :  { %v17128_v37 = vrot.slane %v17127_v44, 2 }
0x5104   :  { %v17136_v43 = vadd.f32 %v17135_v17, %v17134_v23 }
0x5105   :  { %v17129_v35 = vadd.f32 %v17128_v37, %v17127_v44 }
0x5106   :  { %v17137_v41 = vrot.slane %v17136_v43, 1 }
0x5107   :  { %v17130_v7 = vrot.slane %v17129_v35, 1 }
0x5108   :  { %v17138_v10 = vadd.f32 %v17137_v41, %v17136_v43 }
0x5109   :  { %v17131_v8 = vadd.f32 %v17130_v7, %v17129_v35 }
0x510b   :  { %v17140_v32 = vsel %vm17139_vm4, %v17131_v8, %v17138_v10 }
0x510c   :  { %19873 = vmatmul.mubr.msk.f32.vlgmr.msra.gmra.mrb[204].mxu0 %vm127_vm1, %v17140_v32 }
0x51df   :  { %v17221_v28 = vpop.f32.mrb[204].mxu0 }
0x51e0   :  { %v17222_v55 = vadd.f32 %v17805_v22, %v17221_v28  ;;  %v19874_v21 = vpop.f32.mrb[205].mxu0 }
0x51e2   :  { %v17225_v4 = vsub.f32 0.0, %v17222_v55 }
0x51e4   :  { %v17226_v2 = vmul.f32 1.442695, %v17225_v4 }
0x51e6   :  { %20561 = vpow2.f32 %v17226_v2 }
0x51f0   :  { %v20562_v29 = vpop.eup %20561 }
0x51f1   :  { %v17228_v11 = vadd.f32 1.0, %v20562_v29 }
0x51f3   :  { %20563 = vrcp.f32 %v17228_v11 }
0x51fd   :  { %v20564_v31 = vpop.eup %20563 }
0x51fe   :  { %17231 = vst.msk [vmem:[%s23635_s17] sm:$0x3] %vm17230_vm5, %v20564_v31 }

</bundles_post_ra>
